<compile_context>
chip_gen: v7x
topology: tpu7x:2x2x1
jax: 0.10.0
libtpu: 0.0.40
codegen_flags: <defaults>
</compile_context>

<pallas_src>
import jax
import jax.numpy as jnp
from jax.experimental import pallas as pl
from jax.experimental.pallas import tpu as pltpu

_S = 16  # bf16-tile aligned offset of the x staging region inside the scratch


def basic_block_kernel(xt_ref, xm_ref, xb_ref, w1_ref, b1_ref, w2_ref, b2_ref,
                       out_ref, xf_ref, mid_ref):
    # xt_ref  : (1, 2, Wp, Cp)   two rows above the tile (zeroed at top edge)
    # xm_ref  : (1, TH, Wp, Cp)  the tile rows (also the residual)
    # xb_ref  : (1, 2, Wp, Cp)   two rows below the tile (zeroed at bottom edge)
    # w*_ref  : (9, Cp, Cp)      bf16 conv weights, BN scale folded in, tap-major
    # b*_ref  : (1, Cp)          f32 folded BN bias
    # out_ref : (1, TH, W, Cp)
    # xf_ref  : (S + (TH+5)*Wp, Cp) bf16 flat x staging (row-major, padded W)
    # mid_ref : ((TH+3)*Wp, Cp)     bf16 flat h1 staging
    TH, W, Cp = out_ref.shape[1], out_ref.shape[2], out_ref.shape[3]
    Wp = xm_ref.shape[2]
    S = _S
    r = pl.program_id(1)
    last_r = pl.num_programs(1) - 1
    M1 = (TH + 2) * Wp                      # conv1 positions (incl. pad cols)
    M2 = TH * Wp                            # conv2 positions

    # ---- assemble the (TH + 4)-row input window in the flat staging buffer --
    xf_ref[pl.ds(S, 2 * Wp), :] = xt_ref[0].reshape(2 * Wp, Cp)
    xf_ref[pl.ds(S + 2 * Wp, TH * Wp), :] = xm_ref[0].reshape(TH * Wp, Cp)
    xf_ref[pl.ds(S + (TH + 2) * Wp, 2 * Wp), :] = xb_ref[0].reshape(2 * Wp, Cp)

    @pl.when(r == 0)                        # rows above the image: zero padding
    def _():
        xf_ref[pl.ds(S, 2 * Wp), :] = jnp.zeros((2 * Wp, Cp), xf_ref.dtype)

    @pl.when(r == last_r)                   # rows below the image: zero padding
    def _():
        xf_ref[pl.ds(S + (TH + 2) * Wp, 2 * Wp), :] = jnp.zeros(
            (2 * Wp, Cp), xf_ref.dtype)

    # ---- conv1: 9 full-lane (K = Cp) MXU matmuls at static flat offsets -----
    acc1 = jnp.zeros((M1, Cp), jnp.float32)
    for ky in range(3):
        for kx in range(3):
            acc1 = acc1 + jnp.dot(
                xf_ref[pl.ds(S - 1 + ky * Wp + kx, M1), :],
                w1_ref[3 * ky + kx],
                preferred_element_type=jnp.float32)

    # bn1 (scale already folded into w1) + relu on the f32 accumulator
    h1 = jnp.maximum(acc1 + b1_ref[0], 0.0).reshape(TH + 2, Wp, Cp)
    # zero the pad / wrap-around columns: they are conv2's zero padding
    col = jax.lax.broadcasted_iota(jnp.int32, (1, Wp, Cp), 1)
    h1 = jnp.where((col >= 1) & (col <= W), h1, 0.0)
    mid_ref[pl.ds(0, M1), :] = h1.reshape(M1, Cp).astype(mid_ref.dtype)

    @pl.when(r == 0)                        # h1 row above the image: conv2 pad
    def _():
        mid_ref[pl.ds(0, Wp), :] = jnp.zeros((Wp, Cp), mid_ref.dtype)

    @pl.when(r == last_r)                   # h1 row below the image: conv2 pad
    def _():
        mid_ref[pl.ds((TH + 1) * Wp, Wp), :] = jnp.zeros((Wp, Cp), mid_ref.dtype)

    # ---- conv2: same 9-offset-matmul structure over the h1 staging buffer ---
    acc2 = jnp.zeros((M2, Cp), jnp.float32)
    for ky in range(3):
        for kx in range(3):
            acc2 = acc2 + jnp.dot(
                mid_ref[pl.ds(ky * Wp + kx, M2), :],
                w2_ref[3 * ky + kx],
                preferred_element_type=jnp.float32)

    # ---- bn2 + residual + relu; drop pad columns; lane-dense store ----------
    h2 = (acc2 + b2_ref[0]).reshape(TH, Wp, Cp)[:, :W, :]
    res = xm_ref[0, :, 1:1 + W, :].astype(jnp.float32)
    out_ref[0] = jnp.maximum(h2 + res, 0.0).astype(out_ref.dtype)


def basic_block(x_nchw, w1, gamma1, beta1, mean1, var1,
                w2, gamma2, beta2, mean2, var2, eps=1e-5, tile_h=8):
    """x_nchw: (N, C, H, W) f32; w1/w2: (C, C, 3, 3) PyTorch OIHW layout."""
    N, C, H, W = x_nchw.shape
    assert w1.shape == (C, C, 3, 3) and w2.shape == (C, C, 3, 3), (
        "stride=1, atrous=1, downsample=None => inplanes == planes")
    LANE, SUB = 128, 8
    Cp = ((C + LANE - 1) // LANE) * LANE          # lane-dense channel width
    Wp = ((W + 2 + SUB - 1) // SUB) * SUB         # sublane-aligned padded width
    TH = tile_h
    assert TH % 2 == 0 and H % TH == 0, "tile_h must be even and divide H"
    R = H // TH
    S = _S

    # Fold eval-mode BN: scale goes into the conv weights, shift stays a bias.
    inv1 = gamma1 / jnp.sqrt(var1 + eps)
    inv2 = gamma2 / jnp.sqrt(var2 + eps)

    def prep_w(w, inv):                            # OIHW -> HWIO, fold, pad, bf16
        w = jnp.transpose(w, (2, 3, 1, 0)) * inv[None, None, None, :]
        w = jnp.pad(w, ((0, 0), (0, 0), (0, Cp - C), (0, Cp - C)))
        return w.reshape(9, Cp, Cp).astype(jnp.bfloat16)

    w1p = prep_w(w1, inv1)
    w2p = prep_w(w2, inv2)
    b1p = jnp.pad(beta1 - mean1 * inv1, (0, Cp - C)).reshape(1, Cp).astype(jnp.float32)
    b2p = jnp.pad(beta2 - mean2 * inv2, (0, Cp - C)).reshape(1, Cp).astype(jnp.float32)

    # Single layout conversion of the activation: NCHW -> NHWC, one zero column
    # left of W (the conv's left padding), sublane-align W, lane-align C, bf16.
    # No H padding: the row halo is assembled inside the kernel.
    xp = jnp.transpose(x_nchw, (0, 2, 3, 1))
    xp = jnp.pad(xp, ((0, 0), (0, 0), (1, Wp - W - 1), (0, Cp - C)))
    xp = xp.astype(jnp.bfloat16)

    TH2 = TH // 2
    HB2 = H // 2 - 1

    out = pl.pallas_call(
        basic_block_kernel,
        out_shape=jax.ShapeDtypeStruct((N, H, W, Cp), jnp.float32),
        grid_spec=pltpu.PrefetchScalarGridSpec(
            num_scalar_prefetch=0,
            grid=(N, R),
            in_specs=[
                # 2-row halo above the tile (clamped at the top image edge)
                pl.BlockSpec((1, 2, Wp, Cp),
                             lambda n, r: (n, jnp.maximum(r * TH2 - 1, 0), 0, 0)),
                # the TH tile rows themselves (also used as the residual)
                pl.BlockSpec((1, TH, Wp, Cp), lambda n, r: (n, r, 0, 0)),
                # 2-row halo below the tile (clamped at the bottom image edge)
                pl.BlockSpec((1, 2, Wp, Cp),
                             lambda n, r: (n, jnp.minimum((r + 1) * TH2, HB2), 0, 0)),
                pl.BlockSpec((9, Cp, Cp), lambda n, r: (0, 0, 0)),
                pl.BlockSpec((1, Cp), lambda n, r: (0, 0)),
                pl.BlockSpec((9, Cp, Cp), lambda n, r: (0, 0, 0)),
                pl.BlockSpec((1, Cp), lambda n, r: (0, 0)),
            ],
            out_specs=pl.BlockSpec((1, TH, W, Cp), lambda n, r: (n, r, 0, 0)),
            scratch_shapes=[
                pltpu.VMEM((S + (TH + 5) * Wp, Cp), jnp.bfloat16),   # x staging
                pltpu.VMEM(((TH + 3) * Wp, Cp), jnp.bfloat16),       # h1 staging
            ],
        ),
        compiler_params=pltpu.CompilerParams(
            dimension_semantics=("parallel", "parallel"),
            vmem_limit_bytes=64 * 1024 * 1024),
    )(xp, xp, xp, w1p, b1p, w2p, b2p)

    out = out[..., :C]                             # drop channel padding
    return jnp.transpose(out, (0, 3, 1, 2))        # back to NCHW


def reference(x, w1, gamma1, beta1, mean1, var1,
              w2, gamma2, beta2, mean2, var2, eps=1e-5):
    dn = ('NCHW', 'OIHW', 'NCHW')

    def bn(y, g, b, m, v):
        sh = (1, -1, 1, 1)
        return ((y - m.reshape(sh)) / jnp.sqrt(v.reshape(sh) + eps)
                * g.reshape(sh) + b.reshape(sh))

    out = jax.lax.conv_general_dilated(x, w1, (1, 1), 'SAME', dimension_numbers=dn)
    out = jnp.maximum(bn(out, gamma1, beta1, mean1, var1), 0.0)
    out = jax.lax.conv_general_dilated(out, w2, (1, 1), 'SAME', dimension_numbers=dn)
    out = bn(out, gamma2, beta2, mean2, var2)
    return jnp.maximum(out + x, 0.0)


if __name__ == "__main__":
    N, C, H, W = 2, 4, 16, 16      # inplanes = planes = 4, stride = 1, atrous = 1
    key = jax.random.PRNGKey(0)
    ks = jax.random.split(key, 11)

    x = jax.random.normal(ks[0], (N, C, H, W), jnp.float32)
    w1 = jax.random.normal(ks[1], (C, C, 3, 3), jnp.float32) * 0.2
    w2 = jax.random.normal(ks[2], (C, C, 3, 3), jnp.float32) * 0.2
    gamma1 = 1.0 + 0.1 * jax.random.normal(ks[3], (C,), jnp.float32)
    beta1 = 0.1 * jax.random.normal(ks[4], (C,), jnp.float32)
    mean1 = 0.1 * jax.random.normal(ks[5], (C,), jnp.float32)
    var1 = 1.0 + 0.1 * jnp.abs(jax.random.normal(ks[6], (C,), jnp.float32))
    gamma2 = 1.0 + 0.1 * jax.random.normal(ks[7], (C,), jnp.float32)
    beta2 = 0.1 * jax.random.normal(ks[8], (C,), jnp.float32)
    mean2 = 0.1 * jax.random.normal(ks[9], (C,), jnp.float32)
    var2 = 1.0 + 0.1 * jnp.abs(jax.random.normal(ks[10], (C,), jnp.float32))

    out = basic_block(x, w1, gamma1, beta1, mean1, var1,
                      w2, gamma2, beta2, mean2, var2)
    out = jax.block_until_ready(out)

    ref = reference(x, w1, gamma1, beta1, mean1, var1,
                    w2, gamma2, beta2, mean2, var2)
    assert out.shape == (N, C, H, W)
    # bf16 matmul operands (f32 accumulation) => bf16-level tolerance vs f32 ref
    assert jnp.allclose(out, ref, atol=5e-2, rtol=5e-2), (
        "mismatch vs JAX reference, max abs err = %s"
        % float(jnp.max(jnp.abs(out - ref))))

    print("KERNEL_OK")
</pallas_src>

<mosaic_0001>
module attributes {stable_mosaic.version = 11 : i64} {
  func.func @basic_block_kernel(%arg0: i32, %arg1: i32, %arg2: memref<1x2x24x128xbf16, #tpu.memory_space<vmem>>, %arg3: memref<1x8x24x128xbf16, #tpu.memory_space<vmem>>, %arg4: memref<1x2x24x128xbf16, #tpu.memory_space<vmem>>, %arg5: memref<9x128x128xbf16, #tpu.memory_space<vmem>>, %arg6: memref<1x128xf32, #tpu.memory_space<vmem>>, %arg7: memref<9x128x128xbf16, #tpu.memory_space<vmem>>, %arg8: memref<1x128xf32, #tpu.memory_space<vmem>>, %arg9: memref<1x8x16x128xf32, #tpu.memory_space<vmem>>, %arg10: memref<328x128xbf16, #tpu.memory_space<vmem>>, %arg11: memref<264x128xbf16, #tpu.memory_space<vmem>>) attributes {dimension_semantics = [#tpu.dimension_semantics<parallel>, #tpu.dimension_semantics<parallel>], iteration_bounds = array<i64: 2, 2>, scalar_prefetch = 0 : i64, scratch_operands = 2 : i64, tpu.core_type = #tpu.core_type<tc>, window_params = [{transform_indices = @transform_0, window_bounds = array<i64: 1, 2, 24, 128>}, {transform_indices = @transform_1, window_bounds = array<i64: 1, 8, 24, 128>}, {transform_indices = @transform_2, window_bounds = array<i64: 1, 2, 24, 128>}, {pipeline_mode = #tpu.pipeline_mode<synchronous>, transform_indices = @transform_3, window_bounds = array<i64: 9, 128, 128>}, {pipeline_mode = #tpu.pipeline_mode<synchronous>, transform_indices = @transform_4, window_bounds = array<i64: 1, 128>}, {pipeline_mode = #tpu.pipeline_mode<synchronous>, transform_indices = @transform_5, window_bounds = array<i64: 9, 128, 128>}, {pipeline_mode = #tpu.pipeline_mode<synchronous>, transform_indices = @transform_6, window_bounds = array<i64: 1, 128>}, {transform_indices = @transform_7, window_bounds = array<i64: 1, 8, 16, 128>}]} {
    %c0 = arith.constant 0 : index
    %c0_0 = arith.constant 0 : index
    %c0_1 = arith.constant 0 : index
    %c0_2 = arith.constant 0 : index
    %0 = vector.load %arg2[%c0, %c0_0, %c0_1, %c0_2] : memref<1x2x24x128xbf16, #tpu.memory_space<vmem>>, vector<1x2x24x128xbf16>
    %1 = vector.shape_cast %0 : vector<1x2x24x128xbf16> to vector<2x24x128xbf16>
    %2 = vector.shape_cast %1 : vector<2x24x128xbf16> to vector<48x128xbf16>
    %c16 = arith.constant 16 : index
    %c0_3 = arith.constant 0 : index
    %3 = vector.load %arg10[%c16, %c0_3] : memref<328x128xbf16, #tpu.memory_space<vmem>>, vector<48x128xbf16>
    tpu.vector_store %arg10[%c16, %c0_3], %2 {strides = array<i32>} : memref<328x128xbf16, #tpu.memory_space<vmem>>, vector<48x128xbf16>,
    %c0_4 = arith.constant 0 : index
    %c0_5 = arith.constant 0 : index
    %c0_6 = arith.constant 0 : index
    %c0_7 = arith.constant 0 : index
    %4 = vector.load %arg3[%c0_4, %c0_5, %c0_6, %c0_7] : memref<1x8x24x128xbf16, #tpu.memory_space<vmem>>, vector<1x8x24x128xbf16>
    %5 = vector.shape_cast %4 : vector<1x8x24x128xbf16> to vector<8x24x128xbf16>
    %6 = vector.shape_cast %5 : vector<8x24x128xbf16> to vector<192x128xbf16>
    %c64 = arith.constant 64 : index
    %c0_8 = arith.constant 0 : index
    %7 = vector.load %arg10[%c64, %c0_8] : memref<328x128xbf16, #tpu.memory_space<vmem>>, vector<192x128xbf16>
    tpu.vector_store %arg10[%c64, %c0_8], %6 {strides = array<i32>} : memref<328x128xbf16, #tpu.memory_space<vmem>>, vector<192x128xbf16>,
    %c0_9 = arith.constant 0 : index
    %c0_10 = arith.constant 0 : index
    %c0_11 = arith.constant 0 : index
    %c0_12 = arith.constant 0 : index
    %8 = vector.load %arg4[%c0_9, %c0_10, %c0_11, %c0_12] : memref<1x2x24x128xbf16, #tpu.memory_space<vmem>>, vector<1x2x24x128xbf16>
    %9 = vector.shape_cast %8 : vector<1x2x24x128xbf16> to vector<2x24x128xbf16>
    %10 = vector.shape_cast %9 : vector<2x24x128xbf16> to vector<48x128xbf16>
    %c256 = arith.constant 256 : index
    %c0_13 = arith.constant 0 : index
    %11 = vector.load %arg10[%c256, %c0_13] : memref<328x128xbf16, #tpu.memory_space<vmem>>, vector<48x128xbf16>
    tpu.vector_store %arg10[%c256, %c0_13], %10 {strides = array<i32>} : memref<328x128xbf16, #tpu.memory_space<vmem>>, vector<48x128xbf16>,
    %c0_i32 = arith.constant 0 : i32
    %12 = arith.cmpi eq, %arg1, %c0_i32 : i32
    %13 = arith.extui %12 : i1 to i32
    %c0_i32_14 = arith.constant 0 : i32
    %14 = arith.cmpi ne, %13, %c0_i32_14 : i32
    scf.if %14 {
      %cst_126 = arith.constant 0.000000e+00 : bf16
      %153 = vector.broadcast %cst_126 : bf16 to vector<48x128xbf16>
      %c16_127 = arith.constant 16 : index
      %c0_128 = arith.constant 0 : index
      %154 = vector.load %arg10[%c16_127, %c0_128] : memref<328x128xbf16, #tpu.memory_space<vmem>>, vector<48x128xbf16>
      tpu.vector_store %arg10[%c16_127, %c0_128], %153 {strides = array<i32>} : memref<328x128xbf16, #tpu.memory_space<vmem>>, vector<48x128xbf16>,
    } else {
    }
    %c1_i32 = arith.constant 1 : i32
    %15 = arith.cmpi eq, %arg1, %c1_i32 : i32
    %16 = arith.extui %15 : i1 to i32
    %c0_i32_15 = arith.constant 0 : i32
    %17 = arith.cmpi ne, %16, %c0_i32_15 : i32
    scf.if %17 {
      %cst_126 = arith.constant 0.000000e+00 : bf16
      %153 = vector.broadcast %cst_126 : bf16 to vector<48x128xbf16>
      %c256_127 = arith.constant 256 : index
      %c0_128 = arith.constant 0 : index
      %154 = vector.load %arg10[%c256_127, %c0_128] : memref<328x128xbf16, #tpu.memory_space<vmem>>, vector<48x128xbf16>
      tpu.vector_store %arg10[%c256_127, %c0_128], %153 {strides = array<i32>} : memref<328x128xbf16, #tpu.memory_space<vmem>>, vector<48x128xbf16>,
    } else {
    }
    %cst = arith.constant 0.000000e+00 : f32
    %18 = vector.broadcast %cst : f32 to vector<240x128xf32>
    %c15 = arith.constant 15 : index
    %c0_16 = arith.constant 0 : index
    %19 = vector.load %arg10[%c15, %c0_16] : memref<328x128xbf16, #tpu.memory_space<vmem>>, vector<240x128xbf16>
    %c0_17 = arith.constant 0 : index
    %c0_18 = arith.constant 0 : index
    %c0_19 = arith.constant 0 : index
    %20 = vector.load %arg5[%c0_17, %c0_18, %c0_19] : memref<9x128x128xbf16, #tpu.memory_space<vmem>>, vector<1x128x128xbf16>
    %21 = vector.shape_cast %20 : vector<1x128x128xbf16> to vector<128x128xbf16>
    %cst_20 = arith.constant dense<0.000000e+00> : vector<240x128xf32>
    %22 = tpu.matmul %19, %21, %cst_20 {dimension_numbers = #tpu.dot_dimension_numbers<[1], [0], [0], [1], [0, 0, 1, 1], [], []>} : vector<240x128xbf16>, vector<128x128xbf16>, vector<240x128xf32> -> vector<240x128xf32>
    %23 = arith.addf %18, %22 : vector<240x128xf32>
    %c16_21 = arith.constant 16 : index
    %c0_22 = arith.constant 0 : index
    %24 = vector.load %arg10[%c16_21, %c0_22] : memref<328x128xbf16, #tpu.memory_space<vmem>>, vector<240x128xbf16>
    %c1 = arith.constant 1 : index
    %c0_23 = arith.constant 0 : index
    %c0_24 = arith.constant 0 : index
    %25 = vector.load %arg5[%c1, %c0_23, %c0_24] : memref<9x128x128xbf16, #tpu.memory_space<vmem>>, vector<1x128x128xbf16>
    %26 = vector.shape_cast %25 : vector<1x128x128xbf16> to vector<128x128xbf16>
    %cst_25 = arith.constant dense<0.000000e+00> : vector<240x128xf32>
    %27 = tpu.matmul %24, %26, %cst_25 {dimension_numbers = #tpu.dot_dimension_numbers<[1], [0], [0], [1], [0, 0, 1, 1], [], []>} : vector<240x128xbf16>, vector<128x128xbf16>, vector<240x128xf32> -> vector<240x128xf32>
    %28 = arith.addf %23, %27 : vector<240x128xf32>
    %c17 = arith.constant 17 : index
    %c0_26 = arith.constant 0 : index
    %29 = vector.load %arg10[%c17, %c0_26] : memref<328x128xbf16, #tpu.memory_space<vmem>>, vector<240x128xbf16>
    %c2 = arith.constant 2 : index
    %c0_27 = arith.constant 0 : index
    %c0_28 = arith.constant 0 : index
    %30 = vector.load %arg5[%c2, %c0_27, %c0_28] : memref<9x128x128xbf16, #tpu.memory_space<vmem>>, vector<1x128x128xbf16>
    %31 = vector.shape_cast %30 : vector<1x128x128xbf16> to vector<128x128xbf16>
    %cst_29 = arith.constant dense<0.000000e+00> : vector<240x128xf32>
    %32 = tpu.matmul %29, %31, %cst_29 {dimension_numbers = #tpu.dot_dimension_numbers<[1], [0], [0], [1], [0, 0, 1, 1], [], []>} : vector<240x128xbf16>, vector<128x128xbf16>, vector<240x128xf32> -> vector<240x128xf32>
    %33 = arith.addf %28, %32 : vector<240x128xf32>
    %c39 = arith.constant 39 : index
    %c0_30 = arith.constant 0 : index
    %34 = vector.load %arg10[%c39, %c0_30] : memref<328x128xbf16, #tpu.memory_space<vmem>>, vector<240x128xbf16>
    %c3 = arith.constant 3 : index
    %c0_31 = arith.constant 0 : index
    %c0_32 = arith.constant 0 : index
    %35 = vector.load %arg5[%c3, %c0_31, %c0_32] : memref<9x128x128xbf16, #tpu.memory_space<vmem>>, vector<1x128x128xbf16>
    %36 = vector.shape_cast %35 : vector<1x128x128xbf16> to vector<128x128xbf16>
    %cst_33 = arith.constant dense<0.000000e+00> : vector<240x128xf32>
    %37 = tpu.matmul %34, %36, %cst_33 {dimension_numbers = #tpu.dot_dimension_numbers<[1], [0], [0], [1], [0, 0, 1, 1], [], []>} : vector<240x128xbf16>, vector<128x128xbf16>, vector<240x128xf32> -> vector<240x128xf32>
    %38 = arith.addf %33, %37 : vector<240x128xf32>
    %c40 = arith.constant 40 : index
    %c0_34 = arith.constant 0 : index
    %39 = vector.load %arg10[%c40, %c0_34] : memref<328x128xbf16, #tpu.memory_space<vmem>>, vector<240x128xbf16>
    %c4 = arith.constant 4 : index
    %c0_35 = arith.constant 0 : index
    %c0_36 = arith.constant 0 : index
    %40 = vector.load %arg5[%c4, %c0_35, %c0_36] : memref<9x128x128xbf16, #tpu.memory_space<vmem>>, vector<1x128x128xbf16>
    %41 = vector.shape_cast %40 : vector<1x128x128xbf16> to vector<128x128xbf16>
    %cst_37 = arith.constant dense<0.000000e+00> : vector<240x128xf32>
    %42 = tpu.matmul %39, %41, %cst_37 {dimension_numbers = #tpu.dot_dimension_numbers<[1], [0], [0], [1], [0, 0, 1, 1], [], []>} : vector<240x128xbf16>, vector<128x128xbf16>, vector<240x128xf32> -> vector<240x128xf32>
    %43 = arith.addf %38, %42 : vector<240x128xf32>
    %c41 = arith.constant 41 : index
    %c0_38 = arith.constant 0 : index
    %44 = vector.load %arg10[%c41, %c0_38] : memref<328x128xbf16, #tpu.memory_space<vmem>>, vector<240x128xbf16>
    %c5 = arith.constant 5 : index
    %c0_39 = arith.constant 0 : index
    %c0_40 = arith.constant 0 : index
    %45 = vector.load %arg5[%c5, %c0_39, %c0_40] : memref<9x128x128xbf16, #tpu.memory_space<vmem>>, vector<1x128x128xbf16>
    %46 = vector.shape_cast %45 : vector<1x128x128xbf16> to vector<128x128xbf16>
    %cst_41 = arith.constant dense<0.000000e+00> : vector<240x128xf32>
    %47 = tpu.matmul %44, %46, %cst_41 {dimension_numbers = #tpu.dot_dimension_numbers<[1], [0], [0], [1], [0, 0, 1, 1], [], []>} : vector<240x128xbf16>, vector<128x128xbf16>, vector<240x128xf32> -> vector<240x128xf32>
    %48 = arith.addf %43, %47 : vector<240x128xf32>
    %c63 = arith.constant 63 : index
    %c0_42 = arith.constant 0 : index
    %49 = vector.load %arg10[%c63, %c0_42] : memref<328x128xbf16, #tpu.memory_space<vmem>>, vector<240x128xbf16>
    %c6 = arith.constant 6 : index
    %c0_43 = arith.constant 0 : index
    %c0_44 = arith.constant 0 : index
    %50 = vector.load %arg5[%c6, %c0_43, %c0_44] : memref<9x128x128xbf16, #tpu.memory_space<vmem>>, vector<1x128x128xbf16>
    %51 = vector.shape_cast %50 : vector<1x128x128xbf16> to vector<128x128xbf16>
    %cst_45 = arith.constant dense<0.000000e+00> : vector<240x128xf32>
    %52 = tpu.matmul %49, %51, %cst_45 {dimension_numbers = #tpu.dot_dimension_numbers<[1], [0], [0], [1], [0, 0, 1, 1], [], []>} : vector<240x128xbf16>, vector<128x128xbf16>, vector<240x128xf32> -> vector<240x128xf32>
    %53 = arith.addf %48, %52 : vector<240x128xf32>
    %c64_46 = arith.constant 64 : index
    %c0_47 = arith.constant 0 : index
    %54 = vector.load %arg10[%c64_46, %c0_47] : memref<328x128xbf16, #tpu.memory_space<vmem>>, vector<240x128xbf16>
    %c7 = arith.constant 7 : index
    %c0_48 = arith.constant 0 : index
    %c0_49 = arith.constant 0 : index
    %55 = vector.load %arg5[%c7, %c0_48, %c0_49] : memref<9x128x128xbf16, #tpu.memory_space<vmem>>, vector<1x128x128xbf16>
    %56 = vector.shape_cast %55 : vector<1x128x128xbf16> to vector<128x128xbf16>
    %cst_50 = arith.constant dense<0.000000e+00> : vector<240x128xf32>
    %57 = tpu.matmul %54, %56, %cst_50 {dimension_numbers = #tpu.dot_dimension_numbers<[1], [0], [0], [1], [0, 0, 1, 1], [], []>} : vector<240x128xbf16>, vector<128x128xbf16>, vector<240x128xf32> -> vector<240x128xf32>
    %58 = arith.addf %53, %57 : vector<240x128xf32>
    %c65 = arith.constant 65 : index
    %c0_51 = arith.constant 0 : index
    %59 = vector.load %arg10[%c65, %c0_51] : memref<328x128xbf16, #tpu.memory_space<vmem>>, vector<240x128xbf16>
    %c8 = arith.constant 8 : index
    %c0_52 = arith.constant 0 : index
    %c0_53 = arith.constant 0 : index
    %60 = vector.load %arg5[%c8, %c0_52, %c0_53] : memref<9x128x128xbf16, #tpu.memory_space<vmem>>, vector<1x128x128xbf16>
    %61 = vector.shape_cast %60 : vector<1x128x128xbf16> to vector<128x128xbf16>
    %cst_54 = arith.constant dense<0.000000e+00> : vector<240x128xf32>
    %62 = tpu.matmul %59, %61, %cst_54 {dimension_numbers = #tpu.dot_dimension_numbers<[1], [0], [0], [1], [0, 0, 1, 1], [], []>} : vector<240x128xbf16>, vector<128x128xbf16>, vector<240x128xf32> -> vector<240x128xf32>
    %63 = arith.addf %58, %62 : vector<240x128xf32>
    %c0_55 = arith.constant 0 : index
    %c0_56 = arith.constant 0 : index
    %64 = vector.load %arg6[%c0_55, %c0_56] : memref<1x128xf32, #tpu.memory_space<vmem>>, vector<1x128xf32>
    %65 = vector.shape_cast %64 : vector<1x128xf32> to vector<128xf32>
    %66 = vector.shape_cast %65 : vector<128xf32> to vector<1x128xf32>
    %67 = vector.broadcast %66 : vector<1x128xf32> to vector<240x128xf32>
    %68 = arith.addf %63, %67 : vector<240x128xf32>
    %cst_57 = arith.constant 0.000000e+00 : f32
    %69 = vector.broadcast %cst_57 : f32 to vector<240x128xf32>
    %70 = arith.maximumf %68, %69 : vector<240x128xf32>
    %71 = vector.shape_cast %70 : vector<240x128xf32> to vector<10x24x128xf32>
    %72 = tpu.iota {dimensions = array<i32: 1>} : vector<1x24x128xi32>
    %c1_i32_58 = arith.constant 1 : i32
    %73 = vector.broadcast %c1_i32_58 : i32 to vector<1x24x128xi32>
    %74 = arith.cmpi sge, %72, %73 : vector<1x24x128xi32>
    %c16_i32 = arith.constant 16 : i32
    %75 = vector.broadcast %c16_i32 : i32 to vector<1x24x128xi32>
    %76 = arith.cmpi sle, %72, %75 : vector<1x24x128xi32>
    %77 = arith.andi %74, %76 : vector<1x24x128xi1>
    %cst_59 = arith.constant 0.000000e+00 : f32
    %78 = vector.shape_cast %77 : vector<1x24x128xi1> to vector<1x24x128xi1>
    %79 = vector.broadcast %78 : vector<1x24x128xi1> to vector<10x24x128xi1>
    %80 = vector.broadcast %cst_59 : f32 to vector<10x24x128xf32>
    %81 = arith.select %79, %71, %80 : vector<10x24x128xi1>, vector<10x24x128xf32>
    %82 = vector.shape_cast %81 : vector<10x24x128xf32> to vector<240x128xf32>
    %83 = arith.truncf %82 : vector<240x128xf32> to vector<240x128xbf16>
    %c0_60 = arith.constant 0 : index
    %c0_61 = arith.constant 0 : index
    %84 = vector.load %arg11[%c0_60, %c0_61] : memref<264x128xbf16, #tpu.memory_space<vmem>>, vector<240x128xbf16>
    tpu.vector_store %arg11[%c0_60, %c0_61], %83 {strides = array<i32>} : memref<264x128xbf16, #tpu.memory_space<vmem>>, vector<240x128xbf16>,
    %c0_i32_62 = arith.constant 0 : i32
    %85 = arith.cmpi eq, %arg1, %c0_i32_62 : i32
    %86 = arith.extui %85 : i1 to i32
    %c0_i32_63 = arith.constant 0 : i32
    %87 = arith.cmpi ne, %86, %c0_i32_63 : i32
    scf.if %87 {
      %cst_126 = arith.constant 0.000000e+00 : bf16
      %153 = vector.broadcast %cst_126 : bf16 to vector<24x128xbf16>
      %c0_127 = arith.constant 0 : index
      %c0_128 = arith.constant 0 : index
      %154 = vector.load %arg11[%c0_127, %c0_128] : memref<264x128xbf16, #tpu.memory_space<vmem>>, vector<24x128xbf16>
      tpu.vector_store %arg11[%c0_127, %c0_128], %153 {strides = array<i32>} : memref<264x128xbf16, #tpu.memory_space<vmem>>, vector<24x128xbf16>,
    } else {
    }
    %c1_i32_64 = arith.constant 1 : i32
    %88 = arith.cmpi eq, %arg1, %c1_i32_64 : i32
    %89 = arith.extui %88 : i1 to i32
    %c0_i32_65 = arith.constant 0 : i32
    %90 = arith.cmpi ne, %89, %c0_i32_65 : i32
    scf.if %90 {
      %cst_126 = arith.constant 0.000000e+00 : bf16
      %153 = vector.broadcast %cst_126 : bf16 to vector<24x128xbf16>
      %c216 = arith.constant 216 : index
      %c0_127 = arith.constant 0 : index
      %154 = vector.load %arg11[%c216, %c0_127] : memref<264x128xbf16, #tpu.memory_space<vmem>>, vector<24x128xbf16>
      tpu.vector_store %arg11[%c216, %c0_127], %153 {strides = array<i32>} : memref<264x128xbf16, #tpu.memory_space<vmem>>, vector<24x128xbf16>,
    } else {
    }
    %cst_66 = arith.constant 0.000000e+00 : f32
    %91 = vector.broadcast %cst_66 : f32 to vector<192x128xf32>
    %c0_67 = arith.constant 0 : index
    %c0_68 = arith.constant 0 : index
    %92 = vector.load %arg11[%c0_67, %c0_68] : memref<264x128xbf16, #tpu.memory_space<vmem>>, vector<192x128xbf16>
    %c0_69 = arith.constant 0 : index
    %c0_70 = arith.constant 0 : index
    %c0_71 = arith.constant 0 : index
    %93 = vector.load %arg7[%c0_69, %c0_70, %c0_71] : memref<9x128x128xbf16, #tpu.memory_space<vmem>>, vector<1x128x128xbf16>
    %94 = vector.shape_cast %93 : vector<1x128x128xbf16> to vector<128x128xbf16>
    %cst_72 = arith.constant dense<0.000000e+00> : vector<192x128xf32>
    %95 = tpu.matmul %92, %94, %cst_72 {dimension_numbers = #tpu.dot_dimension_numbers<[1], [0], [0], [1], [0, 0, 1, 1], [], []>} : vector<192x128xbf16>, vector<128x128xbf16>, vector<192x128xf32> -> vector<192x128xf32>
    %96 = arith.addf %91, %95 : vector<192x128xf32>
    %c1_73 = arith.constant 1 : index
    %c0_74 = arith.constant 0 : index
    %97 = vector.load %arg11[%c1_73, %c0_74] : memref<264x128xbf16, #tpu.memory_space<vmem>>, vector<192x128xbf16>
    %c1_75 = arith.constant 1 : index
    %c0_76 = arith.constant 0 : index
    %c0_77 = arith.constant 0 : index
    %98 = vector.load %arg7[%c1_75, %c0_76, %c0_77] : memref<9x128x128xbf16, #tpu.memory_space<vmem>>, vector<1x128x128xbf16>
    %99 = vector.shape_cast %98 : vector<1x128x128xbf16> to vector<128x128xbf16>
    %cst_78 = arith.constant dense<0.000000e+00> : vector<192x128xf32>
    %100 = tpu.matmul %97, %99, %cst_78 {dimension_numbers = #tpu.dot_dimension_numbers<[1], [0], [0], [1], [0, 0, 1, 1], [], []>} : vector<192x128xbf16>, vector<128x128xbf16>, vector<192x128xf32> -> vector<192x128xf32>
    %101 = arith.addf %96, %100 : vector<192x128xf32>
    %c2_79 = arith.constant 2 : index
    %c0_80 = arith.constant 0 : index
    %102 = vector.load %arg11[%c2_79, %c0_80] : memref<264x128xbf16, #tpu.memory_space<vmem>>, vector<192x128xbf16>
    %c2_81 = arith.constant 2 : index
    %c0_82 = arith.constant 0 : index
    %c0_83 = arith.constant 0 : index
    %103 = vector.load %arg7[%c2_81, %c0_82, %c0_83] : memref<9x128x128xbf16, #tpu.memory_space<vmem>>, vector<1x128x128xbf16>
    %104 = vector.shape_cast %103 : vector<1x128x128xbf16> to vector<128x128xbf16>
    %cst_84 = arith.constant dense<0.000000e+00> : vector<192x128xf32>
    %105 = tpu.matmul %102, %104, %cst_84 {dimension_numbers = #tpu.dot_dimension_numbers<[1], [0], [0], [1], [0, 0, 1, 1], [], []>} : vector<192x128xbf16>, vector<128x128xbf16>, vector<192x128xf32> -> vector<192x128xf32>
    %106 = arith.addf %101, %105 : vector<192x128xf32>
    %c24 = arith.constant 24 : index
    %c0_85 = arith.constant 0 : index
    %107 = vector.load %arg11[%c24, %c0_85] : memref<264x128xbf16, #tpu.memory_space<vmem>>, vector<192x128xbf16>
    %c3_86 = arith.constant 3 : index
    %c0_87 = arith.constant 0 : index
    %c0_88 = arith.constant 0 : index
    %108 = vector.load %arg7[%c3_86, %c0_87, %c0_88] : memref<9x128x128xbf16, #tpu.memory_space<vmem>>, vector<1x128x128xbf16>
    %109 = vector.shape_cast %108 : vector<1x128x128xbf16> to vector<128x128xbf16>
    %cst_89 = arith.constant dense<0.000000e+00> : vector<192x128xf32>
    %110 = tpu.matmul %107, %109, %cst_89 {dimension_numbers = #tpu.dot_dimension_numbers<[1], [0], [0], [1], [0, 0, 1, 1], [], []>} : vector<192x128xbf16>, vector<128x128xbf16>, vector<192x128xf32> -> vector<192x128xf32>
    %111 = arith.addf %106, %110 : vector<192x128xf32>
    %c25 = arith.constant 25 : index
    %c0_90 = arith.constant 0 : index
    %112 = vector.load %arg11[%c25, %c0_90] : memref<264x128xbf16, #tpu.memory_space<vmem>>, vector<192x128xbf16>
    %c4_91 = arith.constant 4 : index
    %c0_92 = arith.constant 0 : index
    %c0_93 = arith.constant 0 : index
    %113 = vector.load %arg7[%c4_91, %c0_92, %c0_93] : memref<9x128x128xbf16, #tpu.memory_space<vmem>>, vector<1x128x128xbf16>
    %114 = vector.shape_cast %113 : vector<1x128x128xbf16> to vector<128x128xbf16>
    %cst_94 = arith.constant dense<0.000000e+00> : vector<192x128xf32>
    %115 = tpu.matmul %112, %114, %cst_94 {dimension_numbers = #tpu.dot_dimension_numbers<[1], [0], [0], [1], [0, 0, 1, 1], [], []>} : vector<192x128xbf16>, vector<128x128xbf16>, vector<192x128xf32> -> vector<192x128xf32>
    %116 = arith.addf %111, %115 : vector<192x128xf32>
    %c26 = arith.constant 26 : index
    %c0_95 = arith.constant 0 : index
    %117 = vector.load %arg11[%c26, %c0_95] : memref<264x128xbf16, #tpu.memory_space<vmem>>, vector<192x128xbf16>
    %c5_96 = arith.constant 5 : index
    %c0_97 = arith.constant 0 : index
    %c0_98 = arith.constant 0 : index
    %118 = vector.load %arg7[%c5_96, %c0_97, %c0_98] : memref<9x128x128xbf16, #tpu.memory_space<vmem>>, vector<1x128x128xbf16>
    %119 = vector.shape_cast %118 : vector<1x128x128xbf16> to vector<128x128xbf16>
    %cst_99 = arith.constant dense<0.000000e+00> : vector<192x128xf32>
    %120 = tpu.matmul %117, %119, %cst_99 {dimension_numbers = #tpu.dot_dimension_numbers<[1], [0], [0], [1], [0, 0, 1, 1], [], []>} : vector<192x128xbf16>, vector<128x128xbf16>, vector<192x128xf32> -> vector<192x128xf32>
    %121 = arith.addf %116, %120 : vector<192x128xf32>
    %c48 = arith.constant 48 : index
    %c0_100 = arith.constant 0 : index
    %122 = vector.load %arg11[%c48, %c0_100] : memref<264x128xbf16, #tpu.memory_space<vmem>>, vector<192x128xbf16>
    %c6_101 = arith.constant 6 : index
    %c0_102 = arith.constant 0 : index
    %c0_103 = arith.constant 0 : index
    %123 = vector.load %arg7[%c6_101, %c0_102, %c0_103] : memref<9x128x128xbf16, #tpu.memory_space<vmem>>, vector<1x128x128xbf16>
    %124 = vector.shape_cast %123 : vector<1x128x128xbf16> to vector<128x128xbf16>
    %cst_104 = arith.constant dense<0.000000e+00> : vector<192x128xf32>
    %125 = tpu.matmul %122, %124, %cst_104 {dimension_numbers = #tpu.dot_dimension_numbers<[1], [0], [0], [1], [0, 0, 1, 1], [], []>} : vector<192x128xbf16>, vector<128x128xbf16>, vector<192x128xf32> -> vector<192x128xf32>
    %126 = arith.addf %121, %125 : vector<192x128xf32>
    %c49 = arith.constant 49 : index
    %c0_105 = arith.constant 0 : index
    %127 = vector.load %arg11[%c49, %c0_105] : memref<264x128xbf16, #tpu.memory_space<vmem>>, vector<192x128xbf16>
    %c7_106 = arith.constant 7 : index
    %c0_107 = arith.constant 0 : index
    %c0_108 = arith.constant 0 : index
    %128 = vector.load %arg7[%c7_106, %c0_107, %c0_108] : memref<9x128x128xbf16, #tpu.memory_space<vmem>>, vector<1x128x128xbf16>
    %129 = vector.shape_cast %128 : vector<1x128x128xbf16> to vector<128x128xbf16>
    %cst_109 = arith.constant dense<0.000000e+00> : vector<192x128xf32>
    %130 = tpu.matmul %127, %129, %cst_109 {dimension_numbers = #tpu.dot_dimension_numbers<[1], [0], [0], [1], [0, 0, 1, 1], [], []>} : vector<192x128xbf16>, vector<128x128xbf16>, vector<192x128xf32> -> vector<192x128xf32>
    %131 = arith.addf %126, %130 : vector<192x128xf32>
    %c50 = arith.constant 50 : index
    %c0_110 = arith.constant 0 : index
    %132 = vector.load %arg11[%c50, %c0_110] : memref<264x128xbf16, #tpu.memory_space<vmem>>, vector<192x128xbf16>
    %c8_111 = arith.constant 8 : index
    %c0_112 = arith.constant 0 : index
    %c0_113 = arith.constant 0 : index
    %133 = vector.load %arg7[%c8_111, %c0_112, %c0_113] : memref<9x128x128xbf16, #tpu.memory_space<vmem>>, vector<1x128x128xbf16>
    %134 = vector.shape_cast %133 : vector<1x128x128xbf16> to vector<128x128xbf16>
    %cst_114 = arith.constant dense<0.000000e+00> : vector<192x128xf32>
    %135 = tpu.matmul %132, %134, %cst_114 {dimension_numbers = #tpu.dot_dimension_numbers<[1], [0], [0], [1], [0, 0, 1, 1], [], []>} : vector<192x128xbf16>, vector<128x128xbf16>, vector<192x128xf32> -> vector<192x128xf32>
    %136 = arith.addf %131, %135 : vector<192x128xf32>
    %c0_115 = arith.constant 0 : index
    %c0_116 = arith.constant 0 : index
    %137 = vector.load %arg8[%c0_115, %c0_116] : memref<1x128xf32, #tpu.memory_space<vmem>>, vector<1x128xf32>
    %138 = vector.shape_cast %137 : vector<1x128xf32> to vector<128xf32>
    %139 = vector.shape_cast %138 : vector<128xf32> to vector<1x128xf32>
    %140 = vector.broadcast %139 : vector<1x128xf32> to vector<192x128xf32>
    %141 = arith.addf %136, %140 : vector<192x128xf32>
    %142 = vector.shape_cast %141 : vector<192x128xf32> to vector<8x24x128xf32>
    %143 = vector.extract_strided_slice %142 {offsets = [0, 0, 0], sizes = [8, 16, 128], strides = [1, 1, 1]} : vector<8x24x128xf32> to vector<8x16x128xf32>
    %c0_117 = arith.constant 0 : index
    %c0_118 = arith.constant 0 : index
    %c1_119 = arith.constant 1 : index
    %c0_120 = arith.constant 0 : index
    %144 = vector.load %arg3[%c0_117, %c0_118, %c1_119, %c0_120] : memref<1x8x24x128xbf16, #tpu.memory_space<vmem>>, vector<1x8x16x128xbf16>
    %145 = vector.shape_cast %144 : vector<1x8x16x128xbf16> to vector<8x16x128xbf16>
    %146 = arith.extf %145 : vector<8x16x128xbf16> to vector<8x16x128xf32>
    %147 = arith.addf %143, %146 : vector<8x16x128xf32>
    %cst_121 = arith.constant 0.000000e+00 : f32
    %148 = vector.broadcast %cst_121 : f32 to vector<8x16x128xf32>
    %149 = arith.maximumf %147, %148 : vector<8x16x128xf32>
    %c0_122 = arith.constant 0 : index
    %c0_123 = arith.constant 0 : index
    %c0_124 = arith.constant 0 : index
    %c0_125 = arith.constant 0 : index
    %150 = vector.load %arg9[%c0_122, %c0_123, %c0_124, %c0_125] : memref<1x8x16x128xf32, #tpu.memory_space<vmem>>, vector<1x8x16x128xf32>
    %151 = vector.shape_cast %150 : vector<1x8x16x128xf32> to vector<8x16x128xf32>
    %152 = vector.shape_cast %149 : vector<8x16x128xf32> to vector<1x8x16x128xf32>
    tpu.vector_store %arg9[%c0_122, %c0_123, %c0_124, %c0_125], %152 {strides = array<i32>} : memref<1x8x16x128xf32, #tpu.memory_space<vmem>>, vector<1x8x16x128xf32>,
    return
  }
  func.func @transform_0(%arg0: i32, %arg1: i32) -> (i32, i32, i32, i32) {
    %c4_i32 = arith.constant 4 : i32
    %0 = arith.muli %arg1, %c4_i32 : i32
    %c1_i32 = arith.constant 1 : i32
    %1 = arith.subi %0, %c1_i32 : i32
    %c0_i32 = arith.constant 0 : i32
    %2 = arith.maxsi %1, %c0_i32 : i32
    %c0_i32_0 = arith.constant 0 : i32
    %c0_i32_1 = arith.constant 0 : i32
    %c0_i32_2 = arith.constant 0 : i32
    return %arg0, %2, %c0_i32_0, %c0_i32_1 : i32, i32, i32, i32
  }
  func.func @transform_1(%arg0: i32, %arg1: i32) -> (i32, i32, i32, i32) {
    %c0_i32 = arith.constant 0 : i32
    %c0_i32_0 = arith.constant 0 : i32
    %c0_i32_1 = arith.constant 0 : i32
    return %arg0, %arg1, %c0_i32, %c0_i32_0 : i32, i32, i32, i32
  }
  func.func @transform_2(%arg0: i32, %arg1: i32) -> (i32, i32, i32, i32) {
    %c1_i32 = arith.constant 1 : i32
    %0 = arith.addi %arg1, %c1_i32 : i32
    %c4_i32 = arith.constant 4 : i32
    %1 = arith.muli %0, %c4_i32 : i32
    %c7_i32 = arith.constant 7 : i32
    %2 = arith.minsi %1, %c7_i32 : i32
    %c0_i32 = arith.constant 0 : i32
    %c0_i32_0 = arith.constant 0 : i32
    %c0_i32_1 = arith.constant 0 : i32
    return %arg0, %2, %c0_i32, %c0_i32_0 : i32, i32, i32, i32
  }
  func.func @transform_3(%arg0: i32, %arg1: i32) -> (i32, i32, i32) {
    %c0_i32 = arith.constant 0 : i32
    %c0_i32_0 = arith.constant 0 : i32
    %c0_i32_1 = arith.constant 0 : i32
    %c0_i32_2 = arith.constant 0 : i32
    return %c0_i32, %c0_i32_0, %c0_i32_1 : i32, i32, i32
  }
  func.func @transform_4(%arg0: i32, %arg1: i32) -> (i32, i32) {
    %c0_i32 = arith.constant 0 : i32
    %c0_i32_0 = arith.constant 0 : i32
    %c0_i32_1 = arith.constant 0 : i32
    return %c0_i32, %c0_i32_0 : i32, i32
  }
  func.func @transform_5(%arg0: i32, %arg1: i32) -> (i32, i32, i32) {
    %c0_i32 = arith.constant 0 : i32
    %c0_i32_0 = arith.constant 0 : i32
    %c0_i32_1 = arith.constant 0 : i32
    %c0_i32_2 = arith.constant 0 : i32
    return %c0_i32, %c0_i32_0, %c0_i32_1 : i32, i32, i32
  }
  func.func @transform_6(%arg0: i32, %arg1: i32) -> (i32, i32) {
    %c0_i32 = arith.constant 0 : i32
    %c0_i32_0 = arith.constant 0 : i32
    %c0_i32_1 = arith.constant 0 : i32
    return %c0_i32, %c0_i32_0 : i32, i32
  }
  func.func @transform_7(%arg0: i32, %arg1: i32) -> (i32, i32, i32, i32) {
    %c0_i32 = arith.constant 0 : i32
    %c0_i32_0 = arith.constant 0 : i32
    %c0_i32_1 = arith.constant 0 : i32
    return %arg0, %arg1, %c0_i32, %c0_i32_0 : i32, i32, i32, i32
  }
}

</mosaic_0001>

<bundles_post_ra>
// kernel: tpu_custom_call.1
= control target key start
LH: loop header
LB: loop body
LE: loop exit
PB: predicated region body
PF: predicated region fallthrough
CT: control target
= control target key end

     0   :  { %s13313_s0 = inlined_call_operand.hbm [shape: bf16[2,16,24,128], index: 0, kind: input, shape index: {}]   ;;  %s13314_s1 = inlined_call_operand.hbm [shape: bf16[2,16,24,128], index: 1, kind: input, shape index: {}]   ;;  %s13315_s2 = inlined_call_operand.hbm [shape: bf16[2,16,24,128], index: 2, kind: input, shape index: {}]   ;;  %s13316_s3 = inlined_call_operand.hbm [shape: bf16[9,128,128], index: 3, kind: input, shape index: {}]   ;;  %s13317_s4 = inlined_call_operand.hbm [shape: f32[1,128], index: 4, kind: input, shape index: {}]   ;;  %s13318_s5 = inlined_call_operand.hbm [shape: bf16[9,128,128], index: 5, kind: input, shape index: {}]   ;;  %s13319_s6 = inlined_call_operand.hbm [shape: f32[1,128], index: 6, kind: input, shape index: {}]   ;;  %s13320_s7 = inlined_call_operand.hbm [shape: f32[2,16,16,128], index: 7, kind: output, shape index: {}]  }
   0x1   :  { %13349 = sst [smem:[#allocation37_spill]] %s13314_s1 }
   0x2   :  { %13350 = sst [smem:[#allocation38_spill]] %s13315_s2 }
   0x3   :  { %13351 = sst [smem:[#allocation39_spill]] %s13316_s3 }
   0x4   :  { %13352 = sst [smem:[#allocation40_spill]] %s13317_s4 }
   0x5   :  { %13353 = sst [smem:[#allocation41_spill]] %s13318_s5 }
   0x6   :  { %13354 = sst [smem:[#allocation42_spill]] %s13319_s6 }
   0x7   :  { %13355 = sst [smem:[#allocation43_spill]] %s13320_s7 }
   0x8   :  { %12 = vsyncpa [#allocation5], 0 }
   0x9   :  { %14 = vsyncpa [#allocation5 + $0x1], 0 }
   0xa   :  { %15 = vsyncpa [#allocation8], 0 }
   0xb   :  { %17 = vsyncpa [#allocation8 + $0x1], 0 }
   0xc   :  { %18 = vsyncpa [#allocation11], 0 }
   0xd   :  { %19 = vsyncpa [#allocation14], 0 }
   0xe   :  { %20 = vsyncpa [#allocation6], 0 }
   0xf   :  { %22 = vsyncpa [#allocation6 + $0x1], 0  ;;  %s10783_s24 = smov 0   ;;  %s10785_s25 = smov 0  }
  0x10   :  { %s10787_s26 = smov 0   ;;  %s10789_s27 = smov 0  }
  0x11   :  { %s10791_s28 = smov 0   ;;  %s10793_s29 = smov 0  }
  0x12   :  { %s10795_s30 = smov 0   ;;  %s10797_s8 = smov 0  }
  0x13   :  { %s10799_s9 = smov 0   ;;  %s10801_s10 = smov 0  }
  0x14   :  { %s10803_s11 = smov 0   ;;  %s10805_s12 = smov 0  }
  0x15   :  { %s10807_s13 = smov 0   ;;  %s10809_s14 = smov 0  }
  0x16 LB: > { %13356 = sst [smem:[#allocation23_spill]] %s10671_s24  ;;  %s10854_s15 = sadd.s32 4294967295, %s10723_s14   ;;  %s10723_s14 = sphi %s10809_s14, %s28_s14   ;;  %s10719_s13 = sphi %s10807_s13, %s13433_s13   ;;  %s10715_s12 = sphi %s10805_s12, %s13442_s12   ;;  %s10711_s11 = sphi %s10803_s11, %s13431_s11   ;;  %s10707_s10 = sphi %s10801_s10, %s13441_s10   ;;  %s10703_s9 = sphi %s10799_s9, %s13440_s9   ;;  %s10699_s8 = sphi %s10797_s8, %s13439_s8   ;;  %s10695_s30 = sphi %s10795_s30, %s13438_s30   ;;  %s10691_s29 = sphi %s10793_s29, %s13430_s29   ;;  %s10687_s28 = sphi %s10791_s28, %s13437_s28   ;;  %s10683_s27 = sphi %s10789_s27, %s13436_s27   ;;  %s10679_s26 = sphi %s10787_s26, %s13458_s26   ;;  %s10675_s25 = sphi %s10785_s25, %s13428_s25   ;;  %s10671_s24 = sphi %s10783_s24, %s13435_s24  }
  0x17   : > { %13357 = sst [smem:[#allocation24_spill]] %s10675_s25  ;;  %p7787_p0 = scmp.ge.s32.totalorder %s10723_s14, 1 }
  0x18   : > { %13358 = sst [smem:[#allocation25_spill]] %s10679_s26  ;;  %p13325_p1 = scmp.eq.s32.totalorder %s10854_s15, 0 }
  0x19   : > { %13359 = sst [smem:[#allocation26_spill]] %s10683_s27  ;;  %p257_p2 = scmp.lt.s32.totalorder %s10723_s14, 5 }
  0x1a   : > { %13360 = sst [smem:[#allocation27_spill]] %s10691_s29  ;;  %s10725_s17 = smov [#allocation10]  }
  0x1b   : > { %13361 = sst [smem:[#allocation28_spill]] %s10707_s10  ;;  %p10859_p3 = pnand %p7787_p0, %p257_p2 }
  0x1c   : > { %13362 = sst [smem:[#allocation29_spill]] %s10711_s11  ;;  %s269_s18 = sshll.u32 %s10725_s17, 4  ;;  %s270_s18 = int_to_ptr.vmem [resolvable:$true] %s269_s18 }
  0x1d   : > { %13363 = sst [smem:[#allocation30_spill]] %s10719_s13  ;;  %p9833_p4 = pneg %p10859_p3 }
  0x1e   : > { %s13364_s16 = scalar_select %p10859_p3, 1, 0 }
  0x1f   : > { %p10867_p5 = pnand %p9833_p4, %p13325_p1  ;;  %s10726_s20 = smov [#allocation13]  }
  0x20   : > { %13365 = sst [smem:[#allocation31_spill]] %s13364_s16  ;;  %s293_s21 = sshll.u32 %s10726_s20, 4  ;;  %s10871_s21 = int_to_ptr.vmem [resolvable:$true] %s293_s21 }
  0x21   : > { %s13366_s19 = scalar_select %p10867_p5, 1, 0 }
  0x22   : > { %s13367_s3 = sld [smem:[#allocation39_spill]]  ;;  %p10881_p7 = pneg %p10867_p5 }
  0x28   : > { %s10359_s7 = scalar_lea.hbm %s13367_s3, 9216 }
  0x29   : > { %p10360_p6 = scmp.ne.s32.totalorder %s13367_s3, %s10359_s7  ;;  %p10366_p10 = scmp.lt.u32.totalorder %s10359_s7, %s13367_s3 }
  0x2b   : > { %p10362_p8 = pnand %p10881_p7, %p10360_p6 }
  0x2d   : > { %p10363_p9 = pneg %p10362_p8 }
  0x2f   : > { %p10368_p11 = pnand %p10366_p10, %p10363_p9 }
  0x31   : > { %10371 = shalt.err (!%p10368_p11)
}
  0x32   : > { %s10372_s22 = scalar_lea.vmem %s270_s18, 9216  ;;  %p10380_p2 = scmp.lt.s32.totalorder %s270_s18, %s270_s18 }
  0x33   : > { %p10373_p12 = scmp.ne.s32.totalorder %s270_s18, %s10372_s22  ;;  %p10381_p4 = scmp.lt.s32.totalorder %s10372_s22, %s10372_s22 }
  0x35   : > { %p10375_p13 = pnand %p10373_p12, %p10881_p7  ;;  %p10382_p1 = por %p10381_p4, %p10380_p2 }
  0x37   : > { %p10376_p0 = pneg %p10375_p13 }
  0x39   : > { %p10383_p3 = pnand %p10382_p1, %p10376_p0 }
  0x3b   : > { %10386 = shalt.err (!%p10383_p3)
}
  0x3c   : > { %s13331_s10 = smov 64   ;;  %s13333_s11 = smov 4  }
  0x3d   : > { %9836 = dma.hbm_to_vmem [thread:$0]  (!%p10867_p5), %s13367_s3, 9216, %s270_s18, [#allocation11], %s13331_s10, %s13331_s10, %s13333_s11  }
  0x3e   : > { %s13369_s5 = sld [smem:[#allocation41_spill]] }
  0x44   : > { %s10387_s2 = scalar_lea.hbm %s13369_s5, 9216 }
  0x45   : > { %p10388_p1 = scmp.ne.s32.totalorder %s13369_s5, %s10387_s2  ;;  %p10394_p8 = scmp.lt.u32.totalorder %s10387_s2, %s13369_s5 }
  0x47   : > { %p10390_p3 = pnand %p10388_p1, %p10881_p7 }
  0x49   : > { %p10391_p6 = pneg %p10390_p3 }
  0x4b   : > { %p10396_p9 = pnand %p10394_p8, %p10391_p6 }
  0x4d   : > { %10399 = shalt.err (!%p10396_p9)
}
  0x4e   : > { %s10400_s18 = scalar_lea.vmem %s10871_s21, 9216  ;;  %p10408_p13 = scmp.lt.s32.totalorder %s10871_s21, %s10871_s21 }
  0x4f   : > { %p10401_p10 = scmp.ne.s32.totalorder %s10871_s21, %s10400_s18  ;;  %p10409_p0 = scmp.lt.s32.totalorder %s10400_s18, %s10400_s18 }
  0x51   : > { %p10403_p11 = pnand %p10401_p10, %p10881_p7  ;;  %p10410_p2 = por %p10409_p0, %p10408_p13 }
  0x53   : > { %p10404_p12 = pneg %p10403_p11 }
  0x55   : > { %p10411_p4 = pnand %p10410_p2, %p10404_p12 }
  0x57   : > { %10414 = shalt.err (!%p10411_p4)
}
  0x58   : > { %9842 = dma.hbm_to_vmem [thread:$0]  (!%p10867_p5), %s13369_s5, 9216, %s10871_s21, [#allocation14], %s13331_s10, %s13331_s10, %s13333_s11  }
  0x59   : > { %s7780_s25 = sadd.s32 4294967294, %s10723_s14   ;;  %s37_s26 = sadd.s32 1, %s10715_s12 }
  0x5a   : > { %p38_p1 = scmp.ge.s32.totalorder %s37_s26, 2  ;;  %s40_s7 = sadd.s32 1, %s10719_s13 }
  0x5b   : > { %p13330_p3 = scmp.eq.s32.totalorder %s10723_s14, 0  ;;  %s85_s16 = sadd.s32 1, %s10691_s29 }
  0x5c   : > { %s13444_s26 = smov (%p38_p1, %s37_s26), 0  ;;  %s13446_s7 = smov (!%p38_p1, %s40_s7), %s10719_s13 }
  0x5d   : > { %13370 = sst [smem:[#allocation32_spill]] %s13444_s26  ;;  %s81_s23 = ssub.s32 %s10715_s12, %s13444_s26 }
  0x5e   : > { %p92_p6 = scmp.ne.s32.totalorder %s10691_s29, %s10687_s28  ;;  %p42_p8 = scmp.ge.s32.totalorder %s13446_s7, 2 }
  0x5f   : > { %p98_p9 = scmp.ne.s32.totalorder %s10687_s28, %s10683_s27  ;;  %p244_p11 = scmp.eq.s32.totalorder %s10854_s15, 3 }
  0x60   : > { %p10942_p10 = por %p92_p6, %p13330_p3  ;;  %s13448_s7 = smov (%p42_p8, %s13446_s7), 0 }
  0x61   : > { %13372 = sst [smem:[#allocation33_spill]] %s13448_s7  ;;  %p13373_p12 = scmp.eq.s32.totalorder %s10854_s15, 0 }
  0x62   : > { %p10955_p0 = por %p244_p11, %p92_p6  ;;  %s10961_s18 = ssub.s32 %s10719_s13, %s13448_s7 }
  0x63   : > { %p10951_p13 = por %p98_p9, %p13373_p12  ;;  %p250_p2 = scmp.eq.s32.totalorder %s7780_s25, 3 }
  0x64   : > { %s13375_s22 = scalar_select %p10955_p0, 1, 0 }
  0x65   : > { %s13374_s20 = scalar_select %p10951_p13, 1, 0 }
  0x66   : > { %13376 = sst [smem:[#allocation34_spill]] %s13375_s22  ;;  %s82_s2 = sor.u32 %s81_s23, %s10961_s18 }
  0x67   : > { %p13342_p4 = scmp.lt.s32.totalorder %s10723_s14, 4  ;;  %p83_p1 = scmp.eq.s32.totalorder %s82_s2, 0 }
  0x68   : > { %p10965_p3 = por %p250_p2, %p98_p9  ;;  %s10970_s10 = smul.u32 48, %s10719_s13 }
  0x69   : > { %s346_s11 = sand.u32 1, %s10723_s14   ;;  %s348_s5 = sand.u32 1, %s10691_s29  }
  0x6a   : > { %s13377_s24 = scalar_select %p10965_p3, 1, 0 }
  0x6b   : > { %s10974_s3 = scalar_select %p83_p1, %s10691_s29, %s85_s16  }
  0x6c   : > { %13378 = sst [smem:[#allocation35_spill]] %s13377_s24  ;;  %s9800_s27 = smul.u32 96, %s348_s5 }
  0x6d   : > { %13379 = sst [smem:[#allocation36_spill]] %s10974_s3  ;;  %p10981_p6 = pnand %p13342_p4, %p10942_p10 }
  0x6e   : > { %s9801_s25 = smul.u32 24, %s10715_s12  ;;  %s350_s2 = scalar_lea.vmem [#allocation7], %s9800_s27 }
  0x6f   : > { %s360_s24 = sshll.u32 %s350_s2, 4  ;;  %s13381_s1 = sld [smem:[#allocation37_spill]]  ;;  %s10987_s24 = int_to_ptr.vmem [resolvable:$true] %s360_s24 }
  0x70   : > { %s357_s23 = sadd.s32 %s9801_s25, %s10970_s10  ;;  %s10729_s5 = smov [#allocation12]  }
  0x71   : > { %s7800_s13 = sshll.u32 %s357_s23, 6  ;;  %s10994_s21 = sshll.u32 %s10729_s5, 4  ;;  %s284_s21 = int_to_ptr.vmem [resolvable:$true] %s10994_s21 }
  0x72   : > { %s10996_s29 = scalar_lea.sflag [#allocation8], %s346_s11  ;;  %p10417_p9 = pneg %p10981_p6 }
  0x75   : > { %s10992_s3 = scalar_lea.hbm %s13381_s1, %s7800_s13  ;;  %s10420_s22 = scalar_lea.hbm %s13381_s1, 6144 }
  0x76   : > { %s10415_s25 = scalar_lea.hbm %s10992_s3, 1536  ;;  %p10421_p12 = scmp.lt.u32.totalorder %s10992_s3, %s13381_s1 }
  0x77   : > { %p10416_p8 = scmp.ne.s32.totalorder %s10992_s3, %s10415_s25  ;;  %p10422_p2 = scmp.lt.u32.totalorder %s10420_s22, %s10415_s25 }
  0x78   : > { %p10424_p4 = scmp.lt.u32.totalorder %s10415_s25, %s10992_s3 }
  0x79   : > { %p10418_p10 = pnand %p10417_p9, %p10416_p8  ;;  %p10423_p1 = por %p10422_p2, %p10421_p12 }
  0x7b   : > { %p10419_p11 = pneg %p10418_p10  ;;  %p10425_p3 = por %p10424_p4, %p10423_p1 }
  0x7d   : > { %p10426_p0 = pnand %p10425_p3, %p10419_p11 }
  0x7f   : > { %10429 = shalt.err (!%p10426_p0)
}
  0x80   : > { %s10430_s11 = scalar_lea.vmem %s10987_s24, 1536  ;;  %s10730_s16 = smov [#allocation7]  }
  0x81   : > { %p10431_p8 = scmp.ne.s32.totalorder %s10987_s24, %s10430_s11  ;;  %s10435_s5 = sshll.u32 %s10730_s16, 4  ;;  %s10436_s5 = int_to_ptr.vmem [resolvable:$false] %s10435_s5 }
  0x82   : > { %s10437_s27 = scalar_lea.vmem %s10436_s5, 3072  ;;  %p10438_p5 = scmp.lt.s32.totalorder %s10987_s24, %s10436_s5 }
  0x83   : > { %p10433_p10 = pnand %p10431_p8, %p10417_p9  ;;  %p10439_p12 = scmp.lt.s32.totalorder %s10437_s27, %s10430_s11 }
  0x85   : > { %p10434_p13 = pneg %p10433_p10  ;;  %p10440_p2 = por %p10439_p12, %p10438_p5 }
  0x87   : > { %p10441_p4 = pnand %p10440_p2, %p10434_p13 }
  0x89   : > { %10444 = shalt.err (!%p10441_p4)
}
  0x8a   : > { %s13382_s25 = smov 4   ;;  %s13383_s13 = smov 64  }
  0x8b   : > { %9852 = dma.hbm_to_vmem [thread:$0]  (!%p10981_p6), %s10992_s3, 1536, %s10987_s24, %s10996_s29, %s13383_s13, %s13383_s13, %s13382_s25  }
  0x8c   : > { %s13384_s4 = sld [smem:[#allocation40_spill]] }
  0x92   : > { %s10445_s2 = scalar_lea.hbm %s13384_s4, 16 }
  0x93   : > { %p10446_p5 = scmp.ne.s32.totalorder %s13384_s4, %s10445_s2  ;;  %p10452_p0 = scmp.lt.u32.totalorder %s10445_s2, %s13384_s4 }
  0x95   : > { %p10448_p3 = pnand %p10446_p5, %p10881_p7 }
  0x97   : > { %p10449_p13 = pneg %p10448_p3 }
  0x99   : > { %p10454_p9 = pnand %p10452_p0, %p10449_p13 }
  0x9b   : > { %10457 = shalt.err (!%p10454_p9)
}
  0x9c   : > { %s10458_s27 = scalar_lea.vmem %s284_s21, 16  ;;  %s10465_s3 = scalar_lea.vmem %s284_s21, 32 }
  0x9d   : > { %p10459_p6 = scmp.ne.s32.totalorder %s284_s21, %s10458_s27  ;;  %p10466_p8 = scmp.lt.s32.totalorder %s284_s21, %s284_s21 }
  0x9e   : > { %p10467_p10 = scmp.lt.s32.totalorder %s10465_s3, %s10458_s27 }
  0x9f   : > { %p10461_p11 = pnand %p10459_p6, %p10881_p7 }
  0xa0   : > { %p10468_p12 = por %p10467_p10, %p10466_p8 }
  0xa1   : > { %p10462_p1 = pneg %p10461_p11 }
  0xa3   : > { %p10469_p2 = pnand %p10468_p12, %p10462_p1 }
  0xa5   : > { %10472 = shalt.err (!%p10469_p2)
}
  0xa6   : > { %p13385_p4 = scmp.ne.s32.totalorder %s13366_s19, 0  ;;  %s10731_s23 = smov [#allocation15]  }
  0xa7   : > { %s307_s2 = sshll.u32 %s10731_s23, 4  ;;  %s13386_s6 = sld [smem:[#allocation42_spill]]  ;;  %s308_s2 = int_to_ptr.vmem [resolvable:$true] %s307_s2 }
  0xa8   : > { %9839 = dma.hbm_to_vmem [thread:$0]  (!%p13385_p4), %s13384_s4, 16, %s284_s21, [#allocation11]  }
  0xad   : > { %s10473_s7 = scalar_lea.hbm %s13386_s6, 16 }
  0xae   : > { %p10474_p5 = scmp.ne.s32.totalorder %s13386_s6, %s10473_s7  ;;  %p10480_p0 = scmp.lt.u32.totalorder %s10473_s7, %s13386_s6 }
  0xb0   : > { %p10476_p3 = pnand %p10474_p5, %p10881_p7 }
  0xb2   : > { %p10477_p13 = pneg %p10476_p3 }
  0xb4   : > { %p10482_p9 = pnand %p10480_p0, %p10477_p13 }
  0xb6   : > { %10485 = shalt.err (!%p10482_p9)
}
  0xb7   : > { %s10486_s21 = scalar_lea.vmem %s308_s2, 16  ;;  %s10493_s24 = scalar_lea.vmem %s308_s2, 32 }
  0xb8   : > { %p10487_p6 = scmp.ne.s32.totalorder %s308_s2, %s10486_s21  ;;  %p10494_p8 = scmp.lt.s32.totalorder %s308_s2, %s308_s2 }
  0xb9   : > { %p10495_p10 = scmp.lt.s32.totalorder %s10493_s24, %s10486_s21 }
  0xba   : > { %p10489_p11 = pnand %p10487_p6, %p10881_p7 }
  0xbb   : > { %p10496_p12 = por %p10495_p10, %p10494_p8 }
  0xbc   : > { %p10490_p1 = pneg %p10489_p11 }
  0xbe   : > { %p10497_p2 = pnand %p10496_p12, %p10490_p1 }
  0xc0   : > { %10500 = shalt.err (!%p10497_p2)
}
  0xc1   : > { %9845 = dma.hbm_to_vmem [thread:$0]  (!%p13385_p4), %s13386_s6, 16, %s308_s2, [#allocation14]  }
  0xc2   : > { %s7781_s17 = sshll.u32 %s10715_s12, 2  ;;  %s7783_s23 = sshll.u32 %s13444_s26, 2 }
  0xc3   : > { %s7782_s11 = sadd.s32 4294967295, %s7781_s17  ;;  %s7784_s16 = sadd.s32 4294967295, %s7783_s23 }
  0xc4   : > { %p46_p7 = scmp.gt.s32.totalorder %s7782_s11, 0  ;;  %p50_p5 = scmp.gt.s32.totalorder %s7784_s16, 0 }
  0xc5   : > { %s57_s19 = sadd.s32 1, %s10703_s9  ;;  %p64_p3 = scmp.ne.s32.totalorder %s10703_s9, %s10699_s8 }
  0xc6   : > { %s13450_s11 = smov (!%p46_p7, %s7782_s11), 0  ;;  %s13452_s16 = smov (!%p50_p5, %s7784_s16), 0 }
  0xc7   : > { %p13387_p13 = scmp.eq.s32.totalorder %s10723_s14, 0  ;;  %p70_p4 = scmp.ne.s32.totalorder %s10699_s8, %s10695_s30 }
  0xc8   : > { %s53_s2 = ssub.s32 %s13450_s11, %s13452_s16  ;;  %s11077_s5 = sadd.s32 4, %s7781_s17 }
  0xc9   : > { %p11071_p0 = por %p13387_p13, %p64_p3  ;;  %s54_s27 = sor.u32 %s53_s2, %s10961_s18 }
  0xca   : > { %p13389_p9 = scmp.eq.s32.totalorder %s10854_s15, 0  ;;  %p55_p11 = scmp.eq.s32.totalorder %s54_s27, 0 }
  0xcb   : > { %s11087_s21 = sadd.s32 4, %s7783_s23  ;;  %s318_s24 = sand.u32 1, %s10703_s9  }
  0xcc   : > { %p11082_p6 = por %p13389_p9, %p70_p4  ;;  %s9797_s30 = smul.u32 24, %s318_s24 }
  0xcd   : > { %s11091_s1 = scalar_select %p55_p11, %s10703_s9, %s57_s19  }
  0xce   : > { %p13391_p10 = scmp.lt.s32.totalorder %s10723_s14, 4  ;;  %s9798_s17 = smul.u32 6, %s13450_s11 }
  0xcf   : > { %s322_s2 = scalar_lea.vmem [#allocation4], %s9797_s30  ;;  %s11110_s7 = scalar_lea.sflag [#allocation5], %s318_s24 }
  0xd0   : > { %p11098_p12 = pnand %p13391_p10, %p11071_p0  ;;  %s333_s16 = sadd.s32 %s10970_s10, %s9798_s17 }
  0xd1   : > { %s336_s27 = sshll.u32 %s322_s2, 4  ;;  %s7797_s23 = sshll.u32 %s333_s16, 6  ;;  %s11103_s27 = int_to_ptr.vmem [resolvable:$true] %s336_s27 }
  0xd2   : > { %s11108_s6 = scalar_lea.hbm %s13313_s0, %s7797_s23  ;;  %p10503_p7 = pneg %p11098_p12 }
  0xd3   : > { %s10501_s26 = scalar_lea.hbm %s11108_s6, 384  ;;  %s10506_s4 = scalar_lea.hbm %s13313_s0, 6144 }
  0xd4   : > { %p10502_p2 = scmp.ne.s32.totalorder %s11108_s6, %s10501_s26  ;;  %p10507_p13 = scmp.lt.u32.totalorder %s11108_s6, %s13313_s0 }
  0xd5   : > { %p10508_p0 = scmp.lt.u32.totalorder %s10506_s4, %s10501_s26  ;;  %p10510_p9 = scmp.lt.u32.totalorder %s10501_s26, %s11108_s6 }
  0xd6   : > { %p10504_p5 = pnand %p10503_p7, %p10502_p2 }
  0xd7   : > { %p10509_p4 = por %p10508_p0, %p10507_p13 }
  0xd8   : > { %p10505_p3 = pneg %p10504_p5 }
  0xd9   : > { %p10511_p11 = por %p10510_p9, %p10509_p4 }
  0xdb   : > { %p10512_p10 = pnand %p10511_p11, %p10505_p3 }
  0xdd   : > { %10515 = shalt.err (!%p10512_p10)
}
  0xde   : > { %s10516_s24 = scalar_lea.vmem %s11103_s27, 384  ;;  %s10732_s2 = smov [#allocation4]  }
  0xdf   : > { %p10517_p2 = scmp.ne.s32.totalorder %s11103_s27, %s10516_s24  ;;  %s10521_s23 = sshll.u32 %s10732_s2, 4  ;;  %s10522_s23 = int_to_ptr.vmem [resolvable:$false] %s10521_s23 }
  0xe0   : > { %s10523_s19 = scalar_lea.vmem %s10522_s23, 768  ;;  %p10524_p1 = scmp.lt.s32.totalorder %s11103_s27, %s10522_s23 }
  0xe1   : > { %p10519_p5 = pnand %p10517_p2, %p10503_p7  ;;  %p10525_p13 = scmp.lt.s32.totalorder %s10523_s19, %s10516_s24 }
  0xe3   : > { %p10520_p8 = pneg %p10519_p5  ;;  %p10526_p0 = por %p10525_p13, %p10524_p1 }
  0xe5   : > { %p10527_p4 = pnand %p10526_p0, %p10520_p8 }
  0xe7   : > { %10530 = shalt.err (!%p10527_p4)
}
  0xe8   : > { %s13393_s26 = sld [smem:[#allocation25_spill]]  ;;  %s13394_s11 = sld [smem:[#allocation24_spill]] }
  0xe9   : > { %s13395_s30 = sld [smem:[#allocation23_spill]]  ;;  %p13396_p1 = scmp.lt.s32.totalorder %s11077_s5, 7 }
  0xea   : > { %9849 = dma.hbm_to_vmem [thread:$0]  (!%p11098_p12), %s11108_s6, 384, %s11103_s27, %s11110_s7, %s13383_s13, %s13383_s13, %s13382_s25  }
  0xeb   : > { %s13454_s5 = smov (!%p13396_p1, %s11077_s5), 7  ;;  %p13397_p8 = scmp.lt.s32.totalorder %s11087_s21, 7 }
  0xec   : > { %p13398_p9 = scmp.eq.s32.totalorder %s10723_s14, 0  ;;  %p13399_p2 = scmp.eq.s32.totalorder %s10854_s15, 0 }
  0xed   : > { %s13456_s21 = smov (!%p13397_p8, %s11087_s21), 7  ;;  %s9804_s6 = smul.u32 6, %s13454_s5 }
  0xee   : > { %s121_s22 = sadd.s32 1, %s13393_s26  ;;  %p128_p7 = scmp.ne.s32.totalorder %s13393_s26, %s13394_s11 }
  0xef   : > { %s117_s4 = ssub.s32 %s13454_s5, %s13456_s21  ;;  %p134_p3 = scmp.ne.s32.totalorder %s13394_s11, %s13395_s30 }
  0xf0   : > { %s118_s17 = sor.u32 %s117_s4, %s10961_s18  ;;  %p130_p11 = por %p128_p7, %p13398_p9 }
  0xf1   : > { %p119_p10 = scmp.eq.s32.totalorder %s118_s17, 0  ;;  %p11157_p5 = por %p134_p3, %p13399_p2 }
  0xf2   : > { %s372_s24 = sand.u32 1, %s13393_s26   ;;  %s385_s7 = sadd.s32 %s9804_s6, %s10970_s10 }
  0xf3   : > { %s13400_s16 = scalar_select %p11157_p5, 1, 0 }
  0xf4   : > { %s13458_s26 = smov (!%p119_p10, %s13393_s26), %s121_s22  ;;  %s9803_s27 = smul.u32 24, %s372_s24 }
  0xf5   : > { %s7804_s2 = sshll.u32 %s385_s7, 6  ;;  %p13401_p12 = scmp.lt.s32.totalorder %s10723_s14, 4 }
  0xf6   : > { %s13403_s19 = sld [smem:[#allocation38_spill]]  ;;  %s374_s5 = scalar_lea.vmem [#allocation9], %s9803_s27 }
  0xf7   : > { %p11168_p13 = pnand %p13401_p12, %p130_p11  ;;  %s388_s30 = sshll.u32 %s374_s5, 4  ;;  %s11177_s30 = int_to_ptr.vmem [resolvable:$true] %s388_s30 }
  0xf9   : > { %p10533_p4 = pneg %p11168_p13 }
  0xfc   : > { %s11175_s11 = scalar_lea.hbm %s13403_s19, %s7804_s2  ;;  %s10536_s17 = scalar_lea.hbm %s13403_s19, 6144 }
  0xfd   : > { %s10531_s10 = scalar_lea.hbm %s11175_s11, 384  ;;  %p10537_p7 = scmp.lt.u32.totalorder %s11175_s11, %s13403_s19 }
  0xfe   : > { %p10532_p0 = scmp.ne.s32.totalorder %s11175_s11, %s10531_s10  ;;  %p10538_p3 = scmp.lt.u32.totalorder %s10536_s17, %s10531_s10 }
  0xff   : > { %p10540_p11 = scmp.lt.u32.totalorder %s10531_s10, %s11175_s11 }
 0x100   : > { %p10534_p1 = pnand %p10533_p4, %p10532_p0  ;;  %p10539_p9 = por %p10538_p3, %p10537_p7 }
 0x102   : > { %p10535_p8 = pneg %p10534_p1  ;;  %p10541_p10 = por %p10540_p11, %p10539_p9 }
 0x104   : > { %p10542_p2 = pnand %p10541_p10, %p10535_p8 }
 0x106   : > { %10545 = shalt.err (!%p10542_p2)
}
 0x107   : > { %s10546_s27 = scalar_lea.vmem %s11177_s30, 384  ;;  %s10733_s7 = smov [#allocation9]  }
 0x108   : > { %p10547_p12 = scmp.ne.s32.totalorder %s11177_s30, %s10546_s27  ;;  %s10551_s2 = sshll.u32 %s10733_s7, 4  ;;  %s10552_s2 = int_to_ptr.vmem [resolvable:$false] %s10551_s2 }
 0x109   : > { %s10553_s18 = scalar_lea.vmem %s10552_s2, 768  ;;  %p10554_p5 = scmp.lt.s32.totalorder %s11177_s30, %s10552_s2 }
 0x10a   : > { %p10549_p0 = pnand %p10547_p12, %p10533_p4  ;;  %p10555_p7 = scmp.lt.s32.totalorder %s10553_s18, %s10546_s27 }
 0x10c   : > { %p10550_p1 = pneg %p10549_p0  ;;  %p10556_p3 = por %p10555_p7, %p10554_p5 }
 0x10e   : > { %p10557_p9 = pnand %p10556_p3, %p10550_p1 }
 0x110   : > { %10560 = shalt.err (!%p10557_p9)
}
 0x111   : > { %9855 = dma.hbm_to_vmem [thread:$0]  (!%p11168_p13), %s11175_s11, 384, %s11177_s30, %s10996_s29, %s13383_s13, %s13383_s13, %s13382_s25  }
 0x112   : > { %s13404_s23 = sld [smem:[#allocation31_spill]] }
 0x118   : > { %p13405_p4 = scmp.ne.s32.totalorder %s13404_s23, 0 }
 0x119   : > { %s402_s5 = sand.u32 (!%p13405_p4), 1, %s10699_s8  }
 0x11a   : > { %400 = sbr.rel (%p13405_p4) target bundleno = 1742 (0x6ce), region = 48  ;;  %s403_s22 = scalar_lea.sflag (!%p13405_p4), [#allocation5], %s402_s5 }
 0x11b   : > { %s9806_s10 = smul.u32 (!%p13405_p4), 24, %s402_s5 }
 0x11d   : > { %s406_s4 = scalar_lea.vmem (!%p13405_p4), [#allocation4], %s9806_s10 }
 0x121   : > { %10646 = dma.done.wait (%p11082_p6), %s403_s22, 384  }
 0x122   : > { %10648 = vsyncadd (%p11082_p6), %s403_s22, 4294966912  ;;  %s411_s21 = sand.u32 1, %s10854_s15   ;;  %s11217_s17 = sand.u32 1, %s10687_s28  }
 0x123   : > { %s9807_s29 = smul.u32 96, %s11217_s17  ;;  %s412_s25 = scalar_lea.sflag [#allocation8], %s411_s21 }
 0x124   : > { %p13406_p5 = scmp.ne.s32.totalorder %s13374_s20, 0 }
 0x125   : > { %s11220_s13 = scalar_lea.vmem [#allocation7], %s9807_s29 }
 0x126   : > { %10650 = dma.done.wait (%p13406_p5), %s412_s25, 1536  }
 0x127   : > { %10652 = vsyncadd (%p13406_p5), %s412_s25, 4294965760  ;;  %s13407_s11 = sld [smem:[#allocation24_spill]]  ;;  %p13408_p6 = scmp.ne.s32.totalorder %s13400_s16, 0 }
 0x12d   : > { %s422_s3 = sand.u32 1, %s13407_s11  }
 0x12e   : > { %s9808_s30 = smul.u32 24, %s422_s3 }
 0x130   : > { %s11227_s24 = scalar_lea.vmem [#allocation9], %s9808_s30 }
 0x131   : > { %10654 = dma.done.wait (%p13408_p6), %s412_s25, 384  }
 0x132   : > { %10656 = vsyncadd (%p13408_p6), %s412_s25, 4294966912  ;;  %p13409_p13 = scmp.eq.s32.totalorder %s10854_s15, 0 }
 0x134   : > { %10658 = dma.done.wait (%p13409_p13), [#allocation11], 9232   ;;  %p13410_p8 = pmov %p13409_p13 }
 0x136   : > { %10660 = vsyncadd (%p13410_p8), [#allocation11], 4294958064  ;;  %p13411_p11 = pmov %p13410_p8 }
 0x137   : > { %p13412_p10 = pmov %p13410_p8 }
 0x138   : > { %10662 = dma.done.wait (%p13411_p11), [#allocation14], 9232  }
 0x139   : > { %10664 = vsyncadd (%p13412_p10), [#allocation14], 4294958064  ;;  %s7810_s20 = sshll.u32 %s11217_s17, 7  ;;  %v494_v0 = vld [vmem:[%s406_s4] sm:$0xff]   ;;  %v496_v1 = vld [vmem:[%s406_s4 + $0x8] sm:$0xff]   ;;  %s13413_s16 = sld [smem:[#allocation28_spill]] }
 0x13a   : > { %v498_v2 = vld [vmem:[%s406_s4 + $0x10] sm:$0xff]   ;;  %500 = vst [vmem:[#allocation2 + $0x8] sm:$0xff] %v494_v0   ;;  %502 = vst [vmem:[#allocation2 + $0x10] sm:$0xff] %v496_v1   ;;  %v508_v4 = vld [vmem:[%s11220_s13 + $0x8] sm:$0xff]   ;;  %s11259_s15 = scalar_lea.vmem [#allocation16], %s7810_s20 }
 0x13b   : > { %504 = vst [vmem:[#allocation2 + $0x18] sm:$0xff] %v498_v2   ;;  %v506_v3 = vld [vmem:[%s11220_s13] sm:$0xff]   ;;  %v510_v5 = vld [vmem:[%s11220_s13 + $0x10] sm:$0xff]   ;;  %532 = vst [vmem:[#allocation2 + $0x28] sm:$0xff] %v508_v4  }
 0x13c   : > { %530 = vst [vmem:[#allocation2 + $0x20] sm:$0xff] %v506_v3   ;;  %534 = vst [vmem:[#allocation2 + $0x30] sm:$0xff] %v510_v5   ;;  %v512_v6 = vld [vmem:[%s11220_s13 + $0x18] sm:$0xff]   ;;  %v514_v7 = vld [vmem:[%s11220_s13 + $0x20] sm:$0xff]  }
 0x13d   : > { %v516_v8 = vld [vmem:[%s11220_s13 + $0x28] sm:$0xff]   ;;  %536 = vst [vmem:[#allocation2 + $0x38] sm:$0xff] %v512_v6   ;;  %538 = vst [vmem:[#allocation2 + $0x40] sm:$0xff] %v514_v7   ;;  %v518_v9 = vld [vmem:[%s11220_s13 + $0x30] sm:$0xff]  }
 0x13e   : > { %540 = vst [vmem:[#allocation2 + $0x48] sm:$0xff] %v516_v8   ;;  %v520_v10 = vld [vmem:[%s11220_s13 + $0x38] sm:$0xff]   ;;  %v522_v11 = vld [vmem:[%s11220_s13 + $0x40] sm:$0xff]   ;;  %542 = vst [vmem:[#allocation2 + $0x50] sm:$0xff] %v518_v9  }
 0x13f   : > { %544 = vst [vmem:[#allocation2 + $0x58] sm:$0xff] %v520_v10   ;;  %546 = vst [vmem:[#allocation2 + $0x60] sm:$0xff] %v522_v11   ;;  %v524_v12 = vld [vmem:[%s11220_s13 + $0x48] sm:$0xff]   ;;  %v526_v13 = vld [vmem:[%s11220_s13 + $0x50] sm:$0xff]   ;;  %p7811_p2 = scmp.ne.s32.totalorder %s13413_s16, 0 }
 0x140   : > { %v528_v14 = vld [vmem:[%s11220_s13 + $0x58] sm:$0xff]   ;;  %548 = vst [vmem:[#allocation2 + $0x68] sm:$0xff] %v524_v12   ;;  %550 = vst [vmem:[#allocation2 + $0x70] sm:$0xff] %v526_v13   ;;  %v556_v16 = vld [vmem:[%s11227_s24 + $0x8] sm:$0xff]   ;;  %v10734_v18 = vmov (!%p7811_p2), 0  }
 0x141   : > { %552 = vst [vmem:[#allocation2 + $0x78] sm:$0xff] %v528_v14   ;;  %v554_v15 = vld [vmem:[%s11227_s24] sm:$0xff]   ;;  %v558_v17 = vld [vmem:[%s11227_s24 + $0x10] sm:$0xff]   ;;  %562 = vst [vmem:[#allocation2 + $0x88] sm:$0xff] %v556_v16   ;;  %569 = sbr.rel (%p7811_p2) target bundleno = 328 (0x148), region = 80 }
 0x142   : > { %560 = vst [vmem:[#allocation2 + $0x80] sm:$0xff] %v554_v15   ;;  %564 = vst [vmem:[#allocation2 + $0x90] sm:$0xff] %v558_v17  }
 0x143   : > { %570 = vst [vmem:[#allocation2 + $0x8] sm:$0xf] (!%p7811_p2), %v10734_v18  ;;  %571 = vst [vmem:[#allocation2 + $0xc] sm:$0xf] (!%p7811_p2), %v10734_v18 }
 0x144   : > { %572 = vst [vmem:[#allocation2 + $0x10] sm:$0xf] (!%p7811_p2), %v10734_v18  ;;  %573 = vst [vmem:[#allocation2 + $0x14] sm:$0xf] (!%p7811_p2), %v10734_v18 }
 0x145   : > { %574 = vst [vmem:[#allocation2 + $0x18] sm:$0xf] (!%p7811_p2), %v10734_v18  ;;  %575 = vst [vmem:[#allocation2 + $0x1c] sm:$0xf] (!%p7811_p2), %v10734_v18 }
 0x148 PF: > { %s13414_s6 = sld [smem:[#allocation28_spill]] }
 0x14e   : > { %p7812_p12 = scmp.ne.s32.totalorder %s13414_s6, 1 }
 0x14f   : > { %v10735_v19 = vmov (!%p7812_p12), 0  }
 0x150   : > { %579 = sbr.rel (%p7812_p12) target bundleno = 343 (0x157), region = 84  ;;  %580 = vst [vmem:[#allocation2 + $0x80] sm:$0xf] (!%p7812_p12), %v10735_v19  ;;  %581 = vst [vmem:[#allocation2 + $0x84] sm:$0xf] (!%p7812_p12), %v10735_v19 }
 0x151   : > { %582 = vst [vmem:[#allocation2 + $0x88] sm:$0xf] (!%p7812_p12), %v10735_v19  ;;  %583 = vst [vmem:[#allocation2 + $0x8c] sm:$0xf] (!%p7812_p12), %v10735_v19 }
 0x152   : > { %584 = vst [vmem:[#allocation2 + $0x90] sm:$0xf] (!%p7812_p12), %v10735_v19  ;;  %585 = vst [vmem:[#allocation2 + $0x94] sm:$0xf] (!%p7812_p12), %v10735_v19 }
 0x157 PF: > { %v9996_v20 = vld [vmem:[#allocation10 + $0x40] sm:$0xff]   ;;  %v10736_v21 = vmov 0.0   ;;  %v9998_v23 = vld [vmem:[#allocation10 + $0x48] sm:$0xff]   ;;  %vm10737_vm0 = vmmov 0   ;;  %v10000_v25 = vld [vmem:[#allocation10 + $0x50] sm:$0xff]  }
 0x158   : > { %8737 = vmatprep.subr.bf16.mxu0 %v10736_v21  ;;  %8813 = vmatprep.subr.bf16.mxu1 %v10736_v21  ;;  %v9997_v22 = vld [vmem:[#allocation10] sm:$0xff]   ;;  %v9999_v24 = vld [vmem:[#allocation10 + $0x8] sm:$0xff]   ;;  %v10001_v26 = vld [vmem:[#allocation10 + $0x10] sm:$0xff]   ;;  %vm959_vm1 = vsmask.f32 4352 }
 0x159   : > { %8738 = vmatpush3.bf16.msra.mxu0 %v9996_v20  ;;  %8753 = vmatprep.mubr.msk.bf16.mxu0 %vm10737_vm0, %v10736_v21  ;;  %v10002_v27 = vld [vmem:[#allocation10 + $0x58] sm:$0xff]   ;;  %v10004_v29 = vld [vmem:[#allocation10 + $0x60] sm:$0xff]   ;;  %v11281_v34 = vld [vmem:[#allocation2 + $0x10] sm:$0xf]  ;;  %vm1445_vm2 = vsmask.f32 7424 }
 0x15a   : > { %8814 = vmatpush3.bf16.msra.mxu1 %v9997_v22  ;;  %8739 = vmatprep.subr.bf16.mxu0 %v10736_v21  ;;  %v10003_v28 = vld [vmem:[#allocation10 + $0x18] sm:$0xff]   ;;  %v10005_v30 = vld [vmem:[#allocation10 + $0x20] sm:$0xff]   ;;  %v10006_v36 = vld [vmem:[#allocation10 + $0x68] sm:$0xff]  }
 0x15b   : > { %8815 = vmatprep.subr.bf16.mxu1 %v10736_v21  ;;  %8829 = vmatprep.mubr.msk.bf16.mxu1 %vm10737_vm0, %v10736_v21  ;;  %v586_v31 = vld [vmem:[#allocation2 + $0x4] sm:$0x8]  ;;  %v587_v32 = vld [vmem:[#allocation2 + $0x8] sm:$0xf]  ;;  %v588_v33 = vld [vmem:[#allocation2 + $0xc] sm:$0xf] }
 0x15c   : > { %v7836_v35 = vcombine.low %v586_v31, %v587_v32  ;;  %v10007_v37 = vld [vmem:[#allocation10 + $0x28] sm:$0xff]   ;;  %v7837_v38 = vcombine.low %v588_v33, %v11281_v34  ;;  %v11287_v42 = vld [vmem:[#allocation2 + $0x18] sm:$0xf]  ;;  %v10010_v52 = vld [vmem:[#allocation10 + $0x78] sm:$0xff]   ;;  %v7813_v60 = vcombine.low %v587_v32, %v588_v33 }
 0x15d   : > { %8740 = vmatpush3.bf16.msra.mxu0 %v9998_v23  ;;  %v11285_v41 = vld [vmem:[#allocation2 + $0x14] sm:$0xf]  ;;  %v10008_v45 = vld [vmem:[#allocation10 + $0x70] sm:$0xff]   ;;  %v10011_v53 = vld [vmem:[#allocation10 + $0x38] sm:$0xff]  }
 0x15e   : > { %8816 = vmatpush3.bf16.msra.mxu1 %v9999_v24  ;;  %8741 = vmatprep.subr.bf16.mxu0 %v10736_v21  ;;  %v961_v39 = vshrl.u32 %v7836_v35, 16  ;;  %v964_v40 = vshll.u32 %v7836_v35, 16  ;;  %v969_v43 = vshrl.u32 %v7837_v38, 16  ;;  %v972_v44 = vshll.u32 %v7837_v38, 16  ;;  %v10009_v46 = vld [vmem:[#allocation10 + $0x30] sm:$0xff]   ;;  %v10015_v61 = vld [vmem:[#allocation10 + $0x80] sm:$0xff]  }
 0x15f   : > { %8817 = vmatprep.subr.bf16.mxu1 %v10736_v21  ;;  %v7838_v47 = vcombine.low %v11285_v41, %v11287_v42  ;;  %v11296_v58 = vld [vmem:[#allocation2 + $0x1c] sm:$0xf]  ;;  %v11298_v59 = vld [vmem:[#allocation2 + $0x20] sm:$0xf]  ;;  %v10020_v2 = vld [vmem:[#allocation10 + $0x88] sm:$0xff]   ;;  %v7814_v10 = vcombine.low %v11281_v34, %v11285_v41 }
 0x160   : > { %v963_v48 = vrot.slane %v961_v39, 3  ;;  %v966_v49 = vrot.slane %v964_v40, 4  ;;  %v971_v50 = vrot.slane %v969_v43, 3  ;;  %v974_v51 = vrot.slane %v972_v44, 4  ;;  %v11305_v3 = vld [vmem:[#allocation2 + $0x24] sm:$0xf] }
 0x161   : > { %8742 = vmatpush3.bf16.msra.mxu0 %v10000_v25  ;;  %v978_v56 = vshrl.u32 %v7838_v47, 16  ;;  %v981_v57 = vshll.u32 %v7838_v47, 16  ;;  %v7839_v1 = vcombine.low %v11296_v58, %v11298_v59  ;;  %v10044_v4 = vld [vmem:[#allocation10 + $0xc0] sm:$0xff]   ;;  %v10045_v9 = vld [vmem:[#allocation10 + $0xc8] sm:$0xff]   ;;  %v10023_v12 = vld [vmem:[#allocation10 + $0x90] sm:$0xff]   ;;  %v7815_v25 = vcombine.low %v11287_v42, %v11296_v58 }
 0x162   : > { %8818 = vmatpush3.bf16.msra.mxu1 %v10001_v26  ;;  %8743 = vmatprep.subr.bf16.mxu0 %v10736_v21  ;;  %v967_v54 = vor.u32 %v966_v49, %v963_v48  ;;  %v975_v55 = vor.u32 %v974_v51, %v971_v50  ;;  %v11307_v5 = vld [vmem:[#allocation2 + $0x28] sm:$0xf]  ;;  %v10048_v16 = vld [vmem:[#allocation10 + $0xd0] sm:$0xff]   ;;  %v11324_v18 = vld [vmem:[#allocation2 + $0x2c] sm:$0xf]  ;;  %v7816_v39 = vcombine.low %v11298_v59, %v11305_v3 }
 0x163   : > { %8819 = vmatprep.subr.bf16.mxu1 %v10736_v21  ;;  %v980_v63 = vrot.slane %v978_v56, 3  ;;  %v983_v0 = vrot.slane %v981_v57, 4  ;;  %v987_v7 = vshrl.u32 %v7839_v1, 16  ;;  %v990_v8 = vshll.u32 %v7839_v1, 16  ;;  %v11328_v22 = vld [vmem:[#allocation2 + $0x30] sm:$0xf] }
 0x164   : > { %v976_v62 = vsel %vm959_vm1, %v967_v54, %v975_v55  ;;  %v7840_v11 = vcombine.low %v11305_v3, %v11307_v5  ;;  %v10028_v23 = vld [vmem:[#allocation10 + $0x98] sm:$0xff]   ;;  %v10053_v31 = vld [vmem:[#allocation10 + $0xe0] sm:$0xff]   ;;  %v11338_v32 = vld [vmem:[#allocation2 + $0x34] sm:$0xf] }
 0x165   : > { %8744 = vmatpush3.bf16.msra.mxu0 %v10002_v27  ;;  %v984_v6 = vor.u32 %v983_v0, %v980_v63  ;;  %v989_v14 = vrot.slane %v987_v7, 3  ;;  %v992_v15 = vrot.slane %v990_v8, 4  ;;  %v10049_v24 = vld [vmem:[#allocation10 + $0xd8] sm:$0xff]   ;;  %v7841_v27 = vcombine.low %v11324_v18, %v11328_v22  ;;  %v11343_v35 = vld [vmem:[#allocation2 + $0x38] sm:$0xf]  ;;  %v10054_v38 = vld [vmem:[#allocation10 + $0xe8] sm:$0xff]  }
 0x166   : > { %8820 = vmatpush3.bf16.msra.mxu1 %v10003_v28  ;;  %8745 = vmatprep.subr.bf16.mxu0 %v10736_v21  ;;  %v996_v17 = vshrl.u32 %v7840_v11, 16  ;;  %v999_v20 = vshll.u32 %v7840_v11, 16  ;;  %v7842_v40 = vcombine.low %v11338_v32, %v11343_v35  ;;  %v10043_v44 = vld [vmem:[#allocation10 + $0xb0] sm:$0xff]   ;;  %v10052_v50 = vld [vmem:[#allocation10 + $0xb8] sm:$0xff]   ;;  %v7818_v63 = vcombine.low %v11328_v22, %v11338_v32 }
 0x167   : > { %8821 = vmatprep.subr.bf16.mxu1 %v10736_v21  ;;  %v985_v13 = vsel %vm959_vm1, %v975_v55, %v984_v6  ;;  %v993_v19 = vor.u32 %v992_v15, %v989_v14  ;;  %v1005_v33 = vshrl.u32 %v7841_v27, 16  ;;  %v1008_v34 = vshll.u32 %v7841_v27, 16  ;;  %v600_v47 = vld [vmem:[#allocation2 + $0x3c] sm:$0xf]  ;;  %v601_v51 = vld [vmem:[#allocation2 + $0x40] sm:$0xf] }
 0x168   : > { %v998_v26 = vrot.slane %v996_v17, 3  ;;  %v1017_v49 = vshll.u32 %v7842_v40, 16  ;;  %v7843_v57 = vcombine.low %v600_v47, %v601_v51  ;;  %v606_v17 = vld [vmem:[#allocation2 + $0x54] sm:$0xf]  ;;  %v608_v27 = vld [vmem:[#allocation2 + $0x5c] sm:$0xf] }
 0x169   : > { %8746 = vmatpush3.bf16.msra.mxu0 %v10004_v29  ;;  %v994_v28 = vsel %vm959_vm1, %v984_v6, %v993_v19  ;;  %v1001_v29 = vrot.slane %v999_v20, 4  ;;  %v1007_v42 = vrot.slane %v1005_v33, 3  ;;  %v1010_v43 = vrot.slane %v1008_v34, 4 }
 0x16a   : > { %8822 = vmatpush3.bf16.msra.mxu1 %v10005_v30  ;;  %8747 = vmatprep.subr.bf16.mxu0 %v10736_v21  ;;  %v10033_v30 = vld [vmem:[#allocation10 + $0xa0] sm:$0xff]   ;;  %v1019_v56 = vrot.slane %v1017_v49, 4  ;;  %v1023_v59 = vshrl.u32 %v7843_v57, 16 }
 0x16b   : > { %8823 = vmatprep.subr.bf16.mxu1 %v10736_v21  ;;  %v1011_v48 = vor.u32 %v1010_v43, %v1007_v42 }
 0x16c   : > { %v1025_v1 = vrot.slane %v1023_v59, 3 }
 0x16d   : > { %8748 = vmatpush3.bf16.msra.mxu0 %v10006_v36  ;;  %v10038_v36 = vld [vmem:[#allocation10 + $0xa8] sm:$0xff]  }
 0x16e   : > { %8824 = vmatpush3.bf16.msra.mxu1 %v10007_v37  ;;  %8749 = vmatprep.subr.bf16.mxu0 %v10736_v21  ;;  %v1002_v37 = vor.u32 %v1001_v29, %v998_v26 }
 0x16f   : > { %8825 = vmatprep.subr.bf16.mxu1 %v10736_v21 }
 0x170   : > { %v1003_v41 = vsel %vm959_vm1, %v993_v19, %v1002_v37  ;;  %v1012_v54 = vsel %vm959_vm1, %v1002_v37, %v1011_v48  ;;  %v610_v37 = vld [vmem:[#allocation2 + $0x64] sm:$0xf] }
 0x171   : > { %8750 = vmatpush3.bf16.msra.mxu0 %v10008_v45  ;;  %v10057_v45 = vld [vmem:[#allocation10 + $0xf0] sm:$0xff]  }
 0x172   : > { %8826 = vmatpush3.bf16.msra.mxu1 %v10009_v46  ;;  %8751 = vmatprep.subr.bf16.mxu0 %v10736_v21  ;;  %v1014_v46 = vshrl.u32 %v7842_v40, 16 }
 0x173   : > { %8827 = vmatprep.subr.bf16.mxu1 %v10736_v21 }
 0x174   : > { %v1016_v55 = vrot.slane %v1014_v46, 3 }
 0x175   : > { %8752 = vmatpush3.bf16.msra.mxu0 %v10010_v52  ;;  %v10058_v52 = vld [vmem:[#allocation10 + $0xf8] sm:$0xff]  }
 0x176   : > { %8828 = vmatpush3.bf16.msra.mxu1 %v10011_v53  ;;  %8889 = vmatprep.subr.bf16.mxu0 %v10736_v21  ;;  %v7817_v53 = vcombine.low %v11307_v5, %v11324_v18  ;;  %v1020_v58 = vor.u32 %v1019_v56, %v1016_v55  ;;  %v605_v5 = vld [vmem:[#allocation2 + $0x50] sm:$0xf]  ;;  %v607_v18 = vld [vmem:[#allocation2 + $0x58] sm:$0xf] }
 0x177   : > { %8965 = vmatprep.subr.bf16.mxu1 %v10736_v21  ;;  %v7822_v40 = vcombine.low %v605_v5, %v606_v17 }
 0x178   : > { %8754 = vmatmul.mubr.bf16.vlgmr.msra.gmra.mrb[0].mxu0 %v7813_v60  ;;  %v1026_v60 = vshll.u32 %v7843_v57, 16  ;;  %v1021_v0 = vsel %vm959_vm1, %v1011_v48, %v1020_v58  ;;  %v613_v48 = vld [vmem:[#allocation2 + $0x70] sm:$0xf] }
 0x179   : > { %8830 = vmatmul.mubr.bf16.vlgmr.msra.gmra.mrb[0].mxu1 %v976_v62  ;;  %8890 = vmatpush3.bf16.msra.mxu0 %v10015_v61  ;;  %v602_v61 = vld [vmem:[#allocation2 + $0x44] sm:$0xf]  ;;  %v603_v62 = vld [vmem:[#allocation2 + $0x48] sm:$0xf] }
 0x17a   : > { %8757 = vmatprep.mubr.msk.bf16.mxu0 %vm10737_vm0, %v10736_v21  ;;  %8833 = vmatprep.mubr.msk.bf16.mxu1 %vm10737_vm0, %v10736_v21  ;;  %v7844_v3 = vcombine.low %v602_v61, %v603_v62  ;;  %v7820_v19 = vcombine.low %v601_v51, %v602_v61 }
 0x17b   : > { %8891 = vmatprep.subr.bf16.mxu0 %v10736_v21  ;;  %8966 = vmatpush3.bf16.msra.mxu1 %v10044_v4  ;;  %v604_v4 = vld [vmem:[#allocation2 + $0x4c] sm:$0xf] }
 0x17c   : > { %8967 = vmatprep.subr.bf16.mxu1 %v10736_v21  ;;  %v1032_v7 = vshrl.u32 %v7844_v3, 16  ;;  %v1035_v8 = vshll.u32 %v7844_v3, 16 }
 0x17d   : > { %8892 = vmatpush3.bf16.msra.mxu0 %v10020_v2  ;;  %v1028_v2 = vrot.slane %v1026_v60, 4 }
 0x17e   : > { %8893 = vmatprep.subr.bf16.mxu0 %v10736_v21 }
 0x17f   : > { %8968 = vmatpush3.bf16.msra.mxu1 %v10045_v9  ;;  %v1029_v6 = vor.u32 %v1028_v2, %v1025_v1  ;;  %v7819_v9 = vcombine.low %v11343_v35, %v600_v47  ;;  %v612_v47 = vld [vmem:[#allocation2 + $0x6c] sm:$0xf]  ;;  %v616_v2 = vld [vmem:[#allocation2 + $0x7c] sm:$0xf] }
 0x180   : > { %8758 = vmatmul.mubr.bf16.gmra.mrb[4].mxu0 %v7814_v10  ;;  %8969 = vmatprep.subr.bf16.mxu1 %v10736_v21  ;;  %v7845_v10 = vcombine.low %v604_v4, %v605_v5  ;;  %v7849_v51 = vcombine.low %v612_v47, %v613_v48  ;;  %v7851_v5 = vcombine.low %v616_v2, %v616_v2 }
 0x181   : > { %8834 = vmatmul.mubr.bf16.gmra.mrb[4].mxu1 %v985_v13  ;;  %8761 = vmatprep.mubr.msk.bf16.mxu0 %vm10737_vm0, %v10736_v21  ;;  %v1030_v11 = vsel %vm959_vm1, %v1020_v58, %v1029_v6  ;;  %v1037_v13 = vrot.slane %v1035_v8, 4 }
 0x182   : > { %8837 = vmatprep.mubr.msk.bf16.mxu1 %vm10737_vm0, %v10736_v21  ;;  %8894 = vmatpush3.bf16.msra.mxu0 %v10023_v12  ;;  %v1034_v12 = vrot.slane %v1032_v7, 3  ;;  %v1041_v14 = vshrl.u32 %v7845_v10, 16  ;;  %v1044_v15 = vshll.u32 %v7845_v10, 16  ;;  %v1077_v57 = vshrl.u32 %v7849_v51, 16 }
 0x183   : > { %8895 = vmatprep.subr.bf16.mxu0 %v10736_v21  ;;  %8970 = vmatpush3.bf16.msra.mxu1 %v10048_v16  ;;  %v1080_v59 = vshll.u32 %v7849_v51, 16  ;;  %v1095_v10 = vshrl.u32 %v7851_v5, 16 }
 0x184   : > { %8971 = vmatprep.subr.bf16.mxu1 %v10736_v21  ;;  %v1038_v16 = vor.u32 %v1037_v13, %v1034_v12  ;;  %v1043_v20 = vrot.slane %v1041_v14, 3  ;;  %v1046_v22 = vrot.slane %v1044_v15, 4  ;;  %v10059_v12 = vld [vmem:[#allocation2 + $0x8] sm:$0xff]   ;;  %v11413_v13 = vld [vmem:[#allocation2 + $0x10] sm:$0xff]  }
 0x185   : > { %v1816_v14 = vld [vmem:[#allocation2 + $0x10] sm:$0x8]  ;;  %v11417_v15 = vld [vmem:[#allocation2 + $0x14] sm:$0xf] }
 0x186   : > { %8896 = vmatpush3.bf16.msra.mxu0 %v10028_v23  ;;  %v7846_v23 = vcombine.low %v606_v17, %v607_v18  ;;  %v1047_v29 = vor.u32 %v1046_v22, %v1043_v20  ;;  %v11421_v17 = vld [vmem:[#allocation2 + $0x18] sm:$0xf]  ;;  %v1097_v20 = vrot.slane %v1095_v10, 3 }
 0x187   : > { %8897 = vmatprep.subr.bf16.mxu0 %v10736_v21  ;;  %8972 = vmatpush3.bf16.msra.mxu1 %v10049_v24  ;;  %v1039_v24 = vsel %vm959_vm1, %v1029_v6, %v1038_v16 }
 0x188   : > { %8762 = vmatmul.mubr.bf16.gmra.mrb[8].mxu0 %v7815_v25  ;;  %8973 = vmatprep.subr.bf16.mxu1 %v10736_v21  ;;  %v1050_v25 = vshrl.u32 %v7846_v23, 16  ;;  %v1053_v26 = vshll.u32 %v7846_v23, 16  ;;  %v1048_v32 = vsel %vm959_vm1, %v1038_v16, %v1047_v29  ;;  %v1447_v23 = vshrl.u32 %v10059_v12, 16 }
 0x189   : > { %8838 = vmatmul.mubr.bf16.gmra.mrb[8].mxu1 %v994_v28  ;;  %8765 = vmatprep.mubr.msk.bf16.mxu0 %vm10737_vm0, %v10736_v21  ;;  %v609_v28 = vld [vmem:[#allocation2 + $0x60] sm:$0xf] }
 0x18a   : > { %8841 = vmatprep.mubr.msk.bf16.mxu1 %vm10737_vm0, %v10736_v21  ;;  %8898 = vmatpush3.bf16.msra.mxu0 %v10033_v30  ;;  %v7821_v30 = vcombine.low %v603_v62, %v604_v4  ;;  %v1052_v33 = vrot.slane %v1050_v25, 3  ;;  %v1055_v34 = vrot.slane %v1053_v26, 4  ;;  %v7824_v61 = vcombine.low %v609_v28, %v610_v37 }
 0x18b   : > { %8899 = vmatprep.subr.bf16.mxu0 %v10736_v21  ;;  %8974 = vmatpush3.bf16.msra.mxu1 %v10053_v31  ;;  %v7847_v31 = vcombine.low %v608_v27, %v609_v28  ;;  %v1079_v62 = vrot.slane %v1077_v57, 3  ;;  %v1454_v26 = vshll.u32 %v11413_v13, 16 }
 0x18c   : > { %8975 = vmatprep.subr.bf16.mxu1 %v10736_v21 }
 0x18d   : > { %v1059_v35 = vshrl.u32 %v7847_v31, 16 }
 0x18e   : > { %8900 = vmatpush3.bf16.msra.mxu0 %v10038_v36  ;;  %v1062_v36 = vshll.u32 %v7847_v31, 16 }
 0x18f   : > { %8901 = vmatprep.subr.bf16.mxu0 %v10736_v21  ;;  %8976 = vmatpush3.bf16.msra.mxu1 %v10054_v38  ;;  %v1056_v38 = vor.u32 %v1055_v34, %v1052_v33 }
 0x190   : > { %8766 = vmatmul.mubr.bf16.gmra.mrb[12].mxu0 %v7816_v39  ;;  %8977 = vmatprep.subr.bf16.mxu1 %v10736_v21  ;;  %v611_v39 = vld [vmem:[#allocation2 + $0x68] sm:$0xf]  ;;  %v1064_v42 = vrot.slane %v1062_v36, 4 }
 0x191   : > { %8842 = vmatmul.mubr.bf16.gmra.mrb[12].mxu1 %v1003_v41  ;;  %8769 = vmatprep.mubr.msk.bf16.mxu0 %vm10737_vm0, %v10736_v21  ;;  %v1061_v41 = vrot.slane %v1059_v35, 3  ;;  %v7848_v43 = vcombine.low %v610_v37, %v611_v39  ;;  %v7825_v6 = vcombine.low %v611_v39, %v612_v47 }
 0x192   : > { %8845 = vmatprep.mubr.msk.bf16.mxu1 %vm10737_vm0, %v10736_v21  ;;  %8902 = vmatpush3.bf16.msra.mxu0 %v10043_v44  ;;  %v1057_v44 = vsel %vm959_vm1, %v1047_v29, %v1056_v38  ;;  %v11430_v29 = vld [vmem:[#allocation2 + $0x20] sm:$0xf] }
 0x193   : > { %8903 = vmatprep.subr.bf16.mxu0 %v10736_v21  ;;  %8978 = vmatpush3.bf16.msra.mxu1 %v10057_v45  ;;  %v1068_v45 = vshrl.u32 %v7848_v43, 16  ;;  %v1071_v46 = vshll.u32 %v7848_v43, 16  ;;  %v1065_v49 = vor.u32 %v1064_v42, %v1061_v41 }
 0x194   : > { %8979 = vmatprep.subr.bf16.mxu1 %v10736_v21 }
 0x195   : > { %v1070_v55 = vrot.slane %v1068_v45, 3  ;;  %v1073_v56 = vrot.slane %v1071_v46, 4  ;;  %v10064_v45 = vld [vmem:[#allocation2 + $0x18] sm:$0xff]  }
 0x196   : > { %8904 = vmatpush3.bf16.msra.mxu0 %v10052_v50  ;;  %v7823_v50 = vcombine.low %v607_v18, %v608_v27  ;;  %v11423_v18 = vld [vmem:[#allocation2 + $0x1c] sm:$0xf]  ;;  %v7884_v27 = vcombine.low %v1816_v14, %v11417_v15 }
 0x197   : > { %8980 = vmatpush3.bf16.msra.mxu1 %v10058_v52  ;;  %9041 = vmatprep.subr.bf16.mxu0 %v10736_v21  ;;  %v614_v52 = vld [vmem:[#allocation2 + $0x74] sm:$0xf]  ;;  %v1074_v58 = vor.u32 %v1073_v56, %v1070_v55  ;;  %v7885_v28 = vcombine.low %v11421_v17, %v11423_v18  ;;  %v1458_v55 = vshrl.u32 %v11413_v13, 16  ;;  %v1462_v56 = vshll.u32 %v10064_v45, 16 }
 0x198   : > { %8770 = vmatmul.mubr.bf16.gmra.mrb[16].mxu0 %v7817_v53  ;;  %9117 = vmatprep.subr.bf16.mxu1 %v10736_v21  ;;  %v11399_v53 = vld [vmem:[#allocation2 + $0x78] sm:$0xf]  ;;  %v1946_v33 = vshll.u32 %v7884_v27, 16 }
 0x199   : > { %8846 = vmatmul.mubr.bf16.gmra.mrb[16].mxu1 %v1012_v54  ;;  %8773 = vmatprep.mubr.msk.bf16.mxu0 %vm10737_vm0, %v10736_v21  ;;  %v1066_v54 = vsel %vm959_vm1, %v1056_v38, %v1065_v49  ;;  %v7850_v60 = vcombine.low %v614_v52, %v11399_v53  ;;  %v1951_v34 = vshrl.u32 %v7885_v28, 16  ;;  %v1954_v35 = vshll.u32 %v7885_v28, 16  ;;  %v11475_v28 = vld [vmem:[#allocation2 + $0x38] sm:$0xf] }
 0x19a   : > { %8849 = vmatprep.mubr.msk.bf16.mxu1 %vm10737_vm0, %v10736_v21  ;;  %v7827_v36 = vcombine.low %v11399_v53, %v616_v2  ;;  %v1456_v38 = vrot.slane %v1454_v26, 1  ;;  %v1948_v42 = vrot.slane %v1946_v33, 4 }
 0x19b   : > { %v1086_v1 = vshrl.u32 %v7850_v60, 16  ;;  %v1089_v4 = vshll.u32 %v7850_v60, 16  ;;  %v1953_v43 = vrot.slane %v1951_v34, 3 }
 0x19d   : > { %v1088_v7 = vrot.slane %v1086_v1, 3  ;;  %v10067_v1 = vld [vmem:[#allocation10 + $0x108] sm:$0xff]  }
 0x1a0   : > { %8774 = vmatmul.mubr.bf16.gmra.mrb[20].mxu0 %v7818_v63  ;;  %v1075_v63 = vsel %vm959_vm1, %v1065_v49, %v1074_v58  ;;  %v11444_v49 = vld [vmem:[#allocation2 + $0x28] sm:$0xf] }
 0x1a1   : > { %8850 = vmatmul.mubr.bf16.gmra.mrb[20].mxu1 %v1021_v0  ;;  %8777 = vmatprep.mubr.msk.bf16.mxu0 %vm10737_vm0, %v10736_v21  ;;  %v1082_v0 = vrot.slane %v1080_v59, 4 }
 0x1a2   : > { %8853 = vmatprep.mubr.msk.bf16.mxu1 %vm10737_vm0, %v10736_v21 }
 0x1a3   : > { %v1083_v3 = vor.u32 %v1082_v0, %v1079_v62  ;;  %v1460_v62 = vor.u32 %v1458_v55, %v1456_v38  ;;  %v10066_v0 = vld [vmem:[#allocation2 + $0x20] sm:$0xff]  }
 0x1a4   : > { %v1470_v10 = vshll.u32 %v10066_v0, 16  ;;  %v1474_v34 = vshrl.u32 %v10066_v0, 16 }
 0x1a5   : > { %v1084_v8 = vsel %vm959_vm1, %v1074_v58, %v1083_v3 }
 0x1a8   : > { %8778 = vmatmul.mubr.bf16.gmra.mrb[24].mxu0 %v7819_v9  ;;  %v1091_v9 = vrot.slane %v1089_v4, 4 }
 0x1a9   : > { %8854 = vmatmul.mubr.bf16.gmra.mrb[24].mxu1 %v1030_v11  ;;  %8781 = vmatprep.mubr.msk.bf16.mxu0 %vm10737_vm0, %v10736_v21  ;;  %v1098_v11 = vshll.u32 %v7851_v5, 16  ;;  %v11460_v5 = vld [vmem:[#allocation2 + $0x30] sm:$0xf] }
 0x1aa   : > { %8857 = vmatprep.mubr.msk.bf16.mxu1 %vm10737_vm0, %v10736_v21  ;;  %v1092_v16 = vor.u32 %v1091_v9, %v1088_v7  ;;  %v10093_v7 = vld [vmem:[#allocation10 + $0x148] sm:$0xff]   ;;  %v1466_v9 = vshrl.u32 %v10064_v45, 16 }
 0x1ab   : > { %v1100_v22 = vrot.slane %v1098_v11, 4 }
 0x1ac   : > { %v1093_v25 = vsel %vm959_vm1, %v1083_v3, %v1092_v16 }
 0x1ad   : > { %v1101_v31 = vor.u32 %v1100_v22, %v1097_v20  ;;  %v1472_v22 = vrot.slane %v1470_v10, 1  ;;  %v10106_v10 = vld [vmem:[#allocation10 + $0x178] sm:$0xff]  }
 0x1b0   : > { %8782 = vmatmul.mubr.bf16.gmra.mrb[28].mxu0 %v7820_v19  ;;  %v7826_v19 = vcombine.low %v613_v48, %v614_v52  ;;  %v11448_v52 = vld [vmem:[#allocation2 + $0x2c] sm:$0xf] }
 0x1b1   : > { %8858 = vmatmul.mubr.bf16.gmra.mrb[28].mxu1 %v1039_v24  ;;  %8785 = vmatprep.mubr.msk.bf16.mxu0 %vm10737_vm0, %v10736_v21  ;;  %v1449_v24 = vshll.u32 %v10059_v12, 16  ;;  %v7887_v60 = vcombine.low %v11444_v49, %v11448_v52 }
 0x1b2   : > { %8861 = vmatprep.mubr.msk.bf16.mxu1 %vm10737_vm0, %v10736_v21 }
 0x1b3   : > { %v1451_v37 = vrot.slane %v1449_v24, 1  ;;  %v1969_v3 = vshrl.u32 %v7887_v60, 16  ;;  %v1972_v4 = vshll.u32 %v7887_v60, 16 }
 0x1b5   : > { %v1452_v48 = vor.u32 %v1451_v37, %v1447_v23  ;;  %v1971_v12 = vrot.slane %v1969_v3, 3  ;;  %v1974_v13 = vrot.slane %v1972_v4, 4  ;;  %v10069_v23 = vld [vmem:[#allocation2 + $0x28] sm:$0xff]  }
 0x1b6   : > { %v1482_v55 = vshrl.u32 %v10069_v23, 16 }
 0x1b7   : > { %v1457_v53 = vsel %vm1445_vm2, %v1452_v48, %v1456_v38  ;;  %v1975_v24 = vor.u32 %v1974_v13, %v1971_v12  ;;  %v10086_v48 = vld [vmem:[#allocation10 + $0x128] sm:$0xff]  }
 0x1b8   : > { %8786 = vmatmul.mubr.bf16.gmra.mrb[32].mxu0 %v7821_v30  ;;  %v11432_v30 = vld [vmem:[#allocation2 + $0x24] sm:$0xf] }
 0x1b9   : > { %8862 = vmatmul.mubr.bf16.gmra.mrb[32].mxu1 %v1048_v32  ;;  %8789 = vmatprep.mubr.msk.bf16.mxu0 %vm10737_vm0, %v10736_v21  ;;  %v1943_v32 = vshrl.u32 %v7884_v27, 16  ;;  %v7886_v39 = vcombine.low %v11430_v29, %v11432_v30  ;;  %v10076_v27 = vld [vmem:[#allocation10 + $0x118] sm:$0xff]  }
 0x1ba   : > { %8865 = vmatprep.mubr.msk.bf16.mxu1 %vm10737_vm0, %v10736_v21 }
 0x1bb   : > { %v1945_v41 = vrot.slane %v1943_v32, 3  ;;  %v1960_v46 = vshrl.u32 %v7886_v39, 16  ;;  %v1963_v47 = vshll.u32 %v7886_v39, 16  ;;  %v10097_v32 = vld [vmem:[#allocation10 + $0x158] sm:$0xff]  }
 0x1bd   : > { %v1962_v58 = vrot.slane %v1960_v46, 3  ;;  %v1965_v59 = vrot.slane %v1963_v47, 4 }
 0x1bf   : > { %v1966_v2 = vor.u32 %v1965_v59, %v1962_v58 }
 0x1c0   : > { %8790 = vmatmul.mubr.bf16.gmra.mrb[36].mxu0 %v7822_v40  ;;  %v1102_v40 = vsel %vm959_vm1, %v1092_v16, %v1101_v31  ;;  %v10071_v16 = vld [vmem:[#allocation10 + $0x110] sm:$0xff]  }
 0x1c1   : > { %8866 = vmatmul.mubr.bf16.gmra.mrb[36].mxu1 %v1057_v44  ;;  %8793 = vmatprep.mubr.msk.bf16.mxu0 %vm10737_vm0, %v10736_v21  ;;  %v1956_v44 = vrot.slane %v1954_v35, 4  ;;  %v11477_v31 = vld [vmem:[#allocation2 + $0x3c] sm:$0xf]  ;;  %v1478_v35 = vshll.u32 %v10069_v23, 16 }
 0x1c2   : > { %8869 = vmatprep.mubr.msk.bf16.mxu1 %vm10737_vm0, %v10736_v21  ;;  %v7889_v39 = vcombine.low %v11475_v28, %v11477_v31 }
 0x1c3   : > { %v1957_v51 = vor.u32 %v1956_v44, %v1953_v43  ;;  %v1480_v43 = vrot.slane %v1478_v35, 1  ;;  %v10072_v44 = vld [vmem:[#allocation2 + $0x30] sm:$0xff]  }
 0x1c4   : > { %v1987_v46 = vshrl.u32 %v7889_v39, 16  ;;  %v1990_v47 = vshll.u32 %v7889_v39, 16  ;;  %v1490_v12 = vshrl.u32 %v10072_v44, 16 }
 0x1c5   : > { %v1967_v11 = vsel %vm959_vm1, %v1957_v51, %v1966_v2 }
 0x1c6   : > { %v1989_v58 = vrot.slane %v1987_v46, 3  ;;  %v1992_v59 = vrot.slane %v1990_v47, 4  ;;  %v11535_v47 = vld [vmem:[#allocation2 + $0x58] sm:$0xf] }
 0x1c8   : > { %8794 = vmatmul.mubr.bf16.gmra.mrb[40].mxu0 %v7823_v50  ;;  %v1949_v50 = vor.u32 %v1948_v42, %v1945_v41  ;;  %v10101_v41 = vld [vmem:[#allocation10 + $0x160] sm:$0xff]   ;;  %v1476_v42 = vor.u32 %v1474_v34, %v1472_v22 }
 0x1c9   : > { %8870 = vmatmul.mubr.bf16.gmra.mrb[40].mxu1 %v1066_v54  ;;  %8797 = vmatprep.mubr.msk.bf16.mxu0 %vm10737_vm0, %v10736_v21  ;;  %v10061_v54 = vld [vmem:[#allocation10 + $0x100] sm:$0xff]  }
 0x1ca   : > { %8873 = vmatprep.mubr.msk.bf16.mxu1 %vm10737_vm0, %v10736_v21  ;;  %v1958_v57 = vsel %vm959_vm1, %v1949_v50, %v1957_v51  ;;  %v11491_v50 = vld [vmem:[#allocation2 + $0x40] sm:$0xf]  ;;  %v11493_v51 = vld [vmem:[#allocation2 + $0x44] sm:$0xf] }
 0x1cb   : > { %v7890_v60 = vcombine.low %v11491_v50, %v11493_v51 }
 0x1cd   : > { %v1996_v3 = vshrl.u32 %v7890_v60, 16  ;;  %v1999_v4 = vshll.u32 %v7890_v60, 16 }
 0x1d0   : > { %8798 = vmatmul.mubr.bf16.gmra.mrb[44].mxu0 %v7824_v61  ;;  %v10092_v61 = vld [vmem:[#allocation10 + $0x140] sm:$0xff]  }
 0x1d1   : > { %8874 = vmatmul.mubr.bf16.gmra.mrb[44].mxu1 %v1075_v63  ;;  %8801 = vmatprep.mubr.msk.bf16.mxu0 %vm10737_vm0, %v10736_v21  ;;  %v1464_v63 = vrot.slane %v1462_v56, 1  ;;  %v1486_v56 = vshll.u32 %v10072_v44, 16 }
 0x1d2   : > { %8877 = vmatprep.mubr.msk.bf16.mxu1 %vm10737_vm0, %v10736_v21 }
 0x1d3   : > { %v1468_v20 = vor.u32 %v1466_v9, %v1464_v63  ;;  %v1488_v0 = vrot.slane %v1486_v56, 1  ;;  %v11509_v9 = vld [vmem:[#allocation2 + $0x4c] sm:$0xf] }
 0x1d5   : > { %v1473_v33 = vsel %vm1445_vm2, %v1468_v20, %v1472_v22  ;;  %v1492_v22 = vor.u32 %v1490_v12, %v1488_v0 }
 0x1d8   : > { %8802 = vmatmul.mubr.bf16.gmra.mrb[48].mxu0 %v7825_v6  ;;  %v11462_v6 = vld [vmem:[#allocation2 + $0x34] sm:$0xf] }
 0x1d9   : > { %8878 = vmatmul.mubr.bf16.gmra.mrb[48].mxu1 %v1084_v8  ;;  %8805 = vmatprep.mubr.msk.bf16.mxu0 %vm10737_vm0, %v10736_v21  ;;  %v1465_v8 = vsel %vm1445_vm2, %v1460_v62, %v1464_v63  ;;  %v7888_v14 = vcombine.low %v11460_v5, %v11462_v6  ;;  %v10105_v62 = vld [vmem:[#allocation10 + $0x170] sm:$0xff]   ;;  %v1484_v63 = vor.u32 %v1482_v55, %v1480_v43 }
 0x1da   : > { %8881 = vmatprep.mubr.msk.bf16.mxu1 %vm10737_vm0, %v10736_v21 }
 0x1db   : > { %v1981_v26 = vshll.u32 %v7888_v14, 16 }
 0x1dd   : > { %v1983_v38 = vrot.slane %v1981_v26, 4 }
 0x1e0   : > { %8806 = vmatmul.mubr.bf16.gmra.mrb[52].mxu0 %v7826_v19  ;;  %v10096_v19 = vld [vmem:[#allocation10 + $0x150] sm:$0xff]  }
 0x1e1   : > { %8882 = vmatmul.mubr.bf16.gmra.mrb[52].mxu1 %v1093_v25  ;;  %8809 = vmatprep.mubr.msk.bf16.mxu0 %vm10737_vm0, %v10736_v21  ;;  %v1978_v25 = vshrl.u32 %v7888_v14, 16 }
 0x1e2   : > { %8885 = vmatprep.mubr.msk.bf16.mxu1 %vm10737_vm0, %v10736_v21 }
 0x1e3   : > { %v1980_v37 = vrot.slane %v1978_v25, 3 }
 0x1e5   : > { %v1984_v45 = vor.u32 %v1983_v38, %v1980_v37 }
 0x1e8   : > { %8810 = vmatmul.mubr.bf16.gmra.mrb[56].mxu0 %v7827_v36  ;;  %v1976_v36 = vsel %vm959_vm1, %v1966_v2, %v1975_v24  ;;  %v1993_v2 = vor.u32 %v1992_v59, %v1989_v58 }
 0x1e9   : > { %8886 = vmatmul.mubr.bf16.gmra.mrb[56].mxu1 %v1102_v40  ;;  %8905 = vmatprep.mubr.msk.bf16.mxu0 %vm10737_vm0, %v10736_v21  ;;  %v10081_v40 = vld [vmem:[#allocation10 + $0x120] sm:$0xff]  }
 0x1ea   : > { %8981 = vmatprep.mubr.msk.bf16.mxu1 %vm10737_vm0, %v10736_v21  ;;  %v1994_v14 = vsel %vm959_vm1, %v1984_v45, %v1993_v2 }
 0x1f0   : > { %8906 = vmatmul.mubr.bf16.vlgmr.msra.gmra.mrb[60].mxu0 %v1457_v53  ;;  %v10102_v53 = vld [vmem:[#allocation10 + $0x168] sm:$0xff]  }
 0x1f1   : > { %9042 = vmatpush3.bf16.msra.mxu0 %v10061_v54  ;;  %8982 = vmatmul.mubr.bf16.vlgmr.msra.gmra.mrb[60].mxu1 %v1958_v57  ;;  %v1481_v54 = vsel %vm1445_vm2, %v1476_v42, %v1480_v43  ;;  %v1985_v57 = vsel %vm959_vm1, %v1975_v24, %v1984_v45  ;;  %v10077_v24 = vld [vmem:[#allocation2 + $0x40] sm:$0xff]   ;;  %v10079_v43 = vld [vmem:[#allocation2 + $0x48] sm:$0xff]  }
 0x1f2   : > { %8909 = vmatprep.mubr.msk.bf16.mxu0 %vm10737_vm0, %v10736_v21  ;;  %8985 = vmatprep.mubr.msk.bf16.mxu1 %vm10737_vm0, %v10736_v21  ;;  %v1510_v55 = vshll.u32 %v10079_v43, 16 }
 0x1f3   : > { %9043 = vmatprep.subr.bf16.mxu0 %v10736_v21  ;;  %9118 = vmatpush3.bf16.msra.mxu1 %v10092_v61  ;;  %v10091_v61 = vld [vmem:[#allocation10 + $0x130] sm:$0xff]  }
 0x1f4   : > { %9119 = vmatprep.subr.bf16.mxu1 %v10736_v21 }
 0x1f5   : > { %9044 = vmatpush3.bf16.msra.mxu0 %v10067_v1  ;;  %v10074_v1 = vld [vmem:[#allocation2 + $0x38] sm:$0xff]  }
 0x1f6   : > { %9045 = vmatprep.subr.bf16.mxu0 %v10736_v21  ;;  %v1494_v13 = vshll.u32 %v10074_v1, 16  ;;  %v1498_v35 = vshrl.u32 %v10074_v1, 16 }
 0x1f7   : > { %9120 = vmatpush3.bf16.msra.mxu1 %v10093_v7  ;;  %v10100_v7 = vld [vmem:[#allocation10 + $0x138] sm:$0xff]  }
 0x1f8   : > { %8910 = vmatmul.mubr.bf16.gmra.mrb[64].mxu0 %v1465_v8  ;;  %9121 = vmatprep.subr.bf16.mxu1 %v10736_v21  ;;  %v11507_v8 = vld [vmem:[#allocation2 + $0x48] sm:$0xf]  ;;  %v1496_v23 = vrot.slane %v1494_v13, 1 }
 0x1f9   : > { %8986 = vmatmul.mubr.bf16.gmra.mrb[64].mxu1 %v1967_v11  ;;  %8913 = vmatprep.mubr.msk.bf16.mxu0 %vm10737_vm0, %v10736_v21  ;;  %v1489_v11 = vsel %vm1445_vm2, %v1484_v63, %v1488_v0  ;;  %v7891_v20 = vcombine.low %v11507_v8, %v11509_v9 }
 0x1fa   : > { %8989 = vmatprep.mubr.msk.bf16.mxu1 %vm10737_vm0, %v10736_v21  ;;  %9046 = vmatpush3.bf16.msra.mxu0 %v10071_v16  ;;  %v1998_v16 = vrot.slane %v1996_v3, 3  ;;  %v1497_v34 = vsel %vm1445_vm2, %v1492_v22, %v1496_v23  ;;  %v11549_v3 = vld [vmem:[#allocation2 + $0x64] sm:$0xf] }
 0x1fb   : > { %9047 = vmatprep.subr.bf16.mxu0 %v10736_v21  ;;  %9122 = vmatpush3.bf16.msra.mxu1 %v10096_v19  ;;  %v2001_v19 = vrot.slane %v1999_v4, 4  ;;  %v2005_v26 = vshrl.u32 %v7891_v20, 16 }
 0x1fc   : > { %9123 = vmatprep.subr.bf16.mxu1 %v10736_v21 }
 0x1fd   : > { %v2002_v25 = vor.u32 %v2001_v19, %v1998_v16  ;;  %v2007_v38 = vrot.slane %v2005_v26, 3  ;;  %v11561_v26 = vld [vmem:[#allocation2 + $0x6c] sm:$0xf] }
 0x1fe   : > { %9048 = vmatpush3.bf16.msra.mxu0 %v10076_v27  ;;  %v2008_v27 = vshll.u32 %v7891_v20, 16  ;;  %v10084_v20 = vld [vmem:[#allocation2 + $0x58] sm:$0xff]  }
 0x1ff   : > { %9049 = vmatprep.subr.bf16.mxu0 %v10736_v21  ;;  %9124 = vmatpush3.bf16.msra.mxu1 %v10097_v32  ;;  %v11523_v32 = vld [vmem:[#allocation2 + $0x50] sm:$0xf]  ;;  %v2003_v37 = vsel %vm959_vm1, %v1993_v2, %v2002_v25  ;;  %v11547_v2 = vld [vmem:[#allocation2 + $0x60] sm:$0xf] }
 0x200   : > { %8914 = vmatmul.mubr.bf16.gmra.mrb[68].mxu0 %v1473_v33  ;;  %9125 = vmatprep.subr.bf16.mxu1 %v10736_v21  ;;  %v11525_v33 = vld [vmem:[#allocation2 + $0x54] sm:$0xf]  ;;  %v2010_v39 = vrot.slane %v2008_v27, 4 }
 0x201   : > { %8990 = vmatmul.mubr.bf16.gmra.mrb[68].mxu1 %v1976_v36  ;;  %8917 = vmatprep.mubr.msk.bf16.mxu0 %vm10737_vm0, %v10736_v21  ;;  %v1502_v36 = vshll.u32 %v10077_v24, 16 }
 0x202   : > { %8993 = vmatprep.mubr.msk.bf16.mxu1 %vm10737_vm0, %v10736_v21  ;;  %9050 = vmatpush3.bf16.msra.mxu0 %v10081_v40  ;;  %v7892_v40 = vcombine.low %v11523_v32, %v11525_v33  ;;  %v2011_v44 = vor.u32 %v2010_v39, %v2007_v38 }
 0x203   : > { %9051 = vmatprep.subr.bf16.mxu0 %v10736_v21  ;;  %9126 = vmatpush3.bf16.msra.mxu1 %v10101_v41  ;;  %v1500_v41 = vor.u32 %v1498_v35, %v1496_v23  ;;  %v1504_v42 = vrot.slane %v1502_v36, 1  ;;  %v1526_v35 = vshll.u32 %v10084_v20, 16 }
 0x204   : > { %9127 = vmatprep.subr.bf16.mxu1 %v10736_v21  ;;  %v2014_v45 = vshrl.u32 %v7892_v40, 16  ;;  %v2017_v46 = vshll.u32 %v7892_v40, 16  ;;  %v2012_v56 = vsel %vm959_vm1, %v2002_v25, %v2011_v44  ;;  %v11559_v25 = vld [vmem:[#allocation2 + $0x68] sm:$0xf] }
 0x205   : > { %v7895_v39 = vcombine.low %v11559_v25, %v11561_v26 }
 0x206   : > { %9052 = vmatpush3.bf16.msra.mxu0 %v10086_v48  ;;  %v11537_v48 = vld [vmem:[#allocation2 + $0x5c] sm:$0xf]  ;;  %v2019_v58 = vrot.slane %v2017_v46, 4  ;;  %v11571_v46 = vld [vmem:[#allocation2 + $0x70] sm:$0xf] }
 0x207   : > { %9053 = vmatprep.subr.bf16.mxu0 %v10736_v21  ;;  %9128 = vmatpush3.bf16.msra.mxu1 %v10102_v53  ;;  %v1505_v53 = vsel %vm1445_vm2, %v1500_v41, %v1504_v42  ;;  %v7893_v59 = vcombine.low %v11535_v47, %v11537_v48  ;;  %v1528_v41 = vrot.slane %v1526_v35, 1 }
 0x208   : > { %8918 = vmatmul.mubr.bf16.gmra.mrb[72].mxu0 %v1481_v54  ;;  %9129 = vmatprep.subr.bf16.mxu1 %v10736_v21  ;;  %v1506_v54 = vshrl.u32 %v10077_v24, 16 }
 0x209   : > { %8994 = vmatmul.mubr.bf16.gmra.mrb[72].mxu1 %v1985_v57  ;;  %8921 = vmatprep.mubr.msk.bf16.mxu0 %vm10737_vm0, %v10736_v21  ;;  %v2016_v57 = vrot.slane %v2014_v45, 3  ;;  %v2023_v0 = vshrl.u32 %v7893_v59, 16  ;;  %v2026_v1 = vshll.u32 %v7893_v59, 16  ;;  %v2044_v45 = vshll.u32 %v7895_v39, 16 }
 0x20a   : > { %8997 = vmatprep.mubr.msk.bf16.mxu1 %vm10737_vm0, %v10736_v21  ;;  %9054 = vmatpush3.bf16.msra.mxu0 %v10091_v61  ;;  %v1508_v60 = vor.u32 %v1506_v54, %v1504_v42  ;;  %v1512_v61 = vrot.slane %v1510_v55, 1  ;;  %v10087_v42 = vld [vmem:[#allocation2 + $0x60] sm:$0xff]   ;;  %v1530_v55 = vshrl.u32 %v10084_v20, 16 }
 0x20b   : > { %9055 = vmatprep.subr.bf16.mxu0 %v10736_v21  ;;  %9130 = vmatpush3.bf16.msra.mxu1 %v10105_v62  ;;  %v10082_v62 = vld [vmem:[#allocation2 + $0x50] sm:$0xff]   ;;  %v2020_v63 = vor.u32 %v2019_v58, %v2016_v57  ;;  %v2025_v12 = vrot.slane %v2023_v0, 3  ;;  %v2028_v13 = vrot.slane %v2026_v1, 4  ;;  %v2046_v59 = vrot.slane %v2044_v45, 4 }
 0x20c   : > { %9131 = vmatprep.subr.bf16.mxu1 %v10736_v21  ;;  %v1513_v4 = vsel %vm1445_vm2, %v1508_v60, %v1512_v61 }
 0x20d   : > { %v2029_v22 = vor.u32 %v2028_v13, %v2025_v12  ;;  %v1538_v12 = vshrl.u32 %v10087_v42, 16 }
 0x20e   : > { %9056 = vmatpush3.bf16.msra.mxu0 %v10100_v7  ;;  %v1514_v7 = vshrl.u32 %v10079_v43, 16 }
 0x20f   : > { %9132 = vmatpush3.bf16.msra.mxu1 %v10106_v10  ;;  %9193 = vmatprep.subr.bf16.mxu0 %v10736_v21  ;;  %v1518_v10 = vshll.u32 %v10082_v62, 16  ;;  %v2030_v36 = vsel %vm959_vm1, %v2020_v63, %v2029_v22 }
 0x210   : > { %8922 = vmatmul.mubr.bf16.gmra.mrb[76].mxu0 %v1489_v11  ;;  %9269 = vmatprep.subr.bf16.mxu1 %v10736_v21  ;;  %v2021_v11 = vsel %vm959_vm1, %v2011_v44, %v2020_v63  ;;  %v1516_v16 = vor.u32 %v1514_v7, %v1512_v61  ;;  %v2041_v44 = vshrl.u32 %v7895_v39, 16  ;;  %v1532_v61 = vor.u32 %v1530_v55, %v1528_v41  ;;  %v10089_v63 = vld [vmem:[#allocation2 + $0x68] sm:$0xff]   ;;  %v11583_v7 = vld [vmem:[#allocation2 + $0x78] sm:$0xf] }
 0x211   : > { %8998 = vmatmul.mubr.bf16.gmra.mrb[76].mxu1 %v1994_v14  ;;  %8925 = vmatprep.mubr.msk.bf16.mxu0 %vm10737_vm0, %v10736_v21  ;;  %v7894_v14 = vcombine.low %v11547_v2, %v11549_v3  ;;  %v1520_v19 = vrot.slane %v1518_v10, 1  ;;  %v11585_v10 = vld [vmem:[#allocation2 + $0x7c] sm:$0xf]  ;;  %v1542_v13 = vshll.u32 %v10089_v63, 16  ;;  %v1546_v39 = vshrl.u32 %v10089_v63, 16 }
 0x212   : > { %9001 = vmatprep.mubr.msk.bf16.mxu1 %vm10737_vm0, %v10736_v21  ;;  %v2043_v58 = vrot.slane %v2041_v44, 3  ;;  %v7897_v20 = vcombine.low %v11583_v7, %v11585_v10  ;;  %v10098_v55 = vld [vmem:[#allocation2 + $0x78] sm:$0xff]  }
 0x213   : > { %v2032_v23 = vshrl.u32 %v7894_v14, 16  ;;  %v2035_v24 = vshll.u32 %v7894_v14, 16  ;;  %v1521_v27 = vsel %vm1445_vm2, %v1516_v16, %v1520_v19 }
 0x214   : > { %v2047_v0 = vor.u32 %v2046_v59, %v2043_v58  ;;  %v2062_v35 = vshll.u32 %v7897_v20, 16 }
 0x215   : > { %v2037_v38 = vrot.slane %v2035_v24, 4  ;;  %v10094_v24 = vld [vmem:[#allocation2 + $0x70] sm:$0xff]  }
 0x218   : > { %8926 = vmatmul.mubr.bf16.gmra.mrb[80].mxu0 %v1497_v34  ;;  %v1522_v34 = vshrl.u32 %v10082_v62, 16 }
 0x219   : > { %9002 = vmatmul.mubr.bf16.gmra.mrb[80].mxu1 %v2003_v37  ;;  %8929 = vmatprep.mubr.msk.bf16.mxu0 %vm10737_vm0, %v10736_v21  ;;  %v2034_v37 = vrot.slane %v2032_v23, 3  ;;  %v1544_v23 = vrot.slane %v1542_v13, 1 }
 0x21a   : > { %9005 = vmatprep.mubr.msk.bf16.mxu1 %vm10737_vm0, %v10736_v21  ;;  %v1524_v40 = vor.u32 %v1522_v34, %v1520_v19  ;;  %v2059_v34 = vshrl.u32 %v7897_v20, 16 }
 0x21b   : > { %v2038_v43 = vor.u32 %v2037_v38, %v2034_v37  ;;  %v11597_v37 = vld [vmem:[#allocation2 + $0x84] sm:$0xf]  ;;  %v1548_v45 = vor.u32 %v1546_v39, %v1544_v23 }
 0x21c   : > { %v1529_v54 = vsel %vm1445_vm2, %v1524_v40, %v1528_v41  ;;  %v1550_v40 = vshll.u32 %v10094_v24, 16 }
 0x21d   : > { %v2039_v57 = vsel %vm959_vm1, %v2029_v22, %v2038_v43  ;;  %v2048_v14 = vsel %vm959_vm1, %v2038_v43, %v2047_v0  ;;  %v2064_v43 = vrot.slane %v2062_v35, 4 }
 0x220   : > { %8930 = vmatmul.mubr.bf16.gmra.mrb[84].mxu0 %v1505_v53  ;;  %v11573_v53 = vld [vmem:[#allocation2 + $0x74] sm:$0xf] }
 0x221   : > { %9006 = vmatmul.mubr.bf16.gmra.mrb[84].mxu1 %v2012_v56  ;;  %8933 = vmatprep.mubr.msk.bf16.mxu0 %vm10737_vm0, %v10736_v21  ;;  %v1534_v56 = vshll.u32 %v10087_v42, 16  ;;  %v7896_v60 = vcombine.low %v11571_v46, %v11573_v53  ;;  %v2061_v42 = vrot.slane %v2059_v34, 3 }
 0x222   : > { %9009 = vmatprep.mubr.msk.bf16.mxu1 %vm10737_vm0, %v10736_v21 }
 0x223   : > { %v1536_v62 = vrot.slane %v1534_v56, 1  ;;  %v2050_v1 = vshrl.u32 %v7896_v60, 16  ;;  %v2065_v56 = vor.u32 %v2064_v43, %v2061_v42 }
 0x225   : > { %v2052_v16 = vrot.slane %v2050_v1, 3  ;;  %v1540_v22 = vor.u32 %v1538_v12, %v1536_v62  ;;  %v1558_v12 = vshll.u32 %v10098_v55, 16 }
 0x227   : > { %v1545_v38 = vsel %vm1445_vm2, %v1540_v22, %v1544_v23 }
 0x228   : > { %8934 = vmatmul.mubr.bf16.gmra.mrb[88].mxu0 %v1513_v4  ;;  %v2053_v4 = vshll.u32 %v7896_v60, 16  ;;  %v11607_v60 = vld [vmem:[#allocation2 + $0x88] sm:$0xf] }
 0x229   : > { %9010 = vmatmul.mubr.bf16.gmra.mrb[88].mxu1 %v2021_v11  ;;  %8937 = vmatprep.mubr.msk.bf16.mxu0 %vm10737_vm0, %v10736_v21  ;;  %v1537_v11 = vsel %vm1445_vm2, %v1532_v61, %v1536_v62  ;;  %v7899_v22 = vcombine.low %v11607_v60, %v11607_v60 }
 0x22a   : > { %9013 = vmatprep.mubr.msk.bf16.mxu1 %vm10737_vm0, %v10736_v21  ;;  %v2055_v19 = vrot.slane %v2053_v4, 4 }
 0x22b   : > { %v2077_v39 = vshrl.u32 %v7899_v22, 16 }
 0x230   : > { %8938 = vmatmul.mubr.bf16.gmra.mrb[92].mxu0 %v1521_v27  ;;  %v2056_v27 = vor.u32 %v2055_v19, %v2052_v16 }
 0x231   : > { %9014 = vmatmul.mubr.bf16.gmra.mrb[92].mxu1 %v2030_v36  ;;  %8941 = vmatprep.mubr.msk.bf16.mxu0 %vm10737_vm0, %v10736_v21  ;;  %v11595_v36 = vld [vmem:[#allocation2 + $0x80] sm:$0xf] }
 0x232   : > { %9017 = vmatprep.mubr.msk.bf16.mxu1 %vm10737_vm0, %v10736_v21  ;;  %v2057_v41 = vsel %vm959_vm1, %v2047_v0, %v2056_v27  ;;  %v7898_v44 = vcombine.low %v11595_v36, %v11597_v37  ;;  %v2066_v16 = vsel %vm959_vm1, %v2056_v27, %v2065_v56 }
 0x234   : > { %v2071_v58 = vshll.u32 %v7898_v44, 16 }
 0x236   : > { %v2073_v20 = vrot.slane %v2071_v58, 4 }
 0x238   : > { %8942 = vmatmul.mubr.bf16.gmra.mrb[96].mxu0 %v1529_v54  ;;  %v1552_v54 = vrot.slane %v1550_v40, 1  ;;  %v2080_v40 = vshll.u32 %v7899_v22, 16 }
 0x239   : > { %9018 = vmatmul.mubr.bf16.gmra.mrb[96].mxu1 %v2039_v57  ;;  %8945 = vmatprep.mubr.msk.bf16.mxu0 %vm10737_vm0, %v10736_v21  ;;  %v2068_v57 = vshrl.u32 %v7898_v44, 16 }
 0x23a   : > { %9021 = vmatprep.mubr.msk.bf16.mxu1 %vm10737_vm0, %v10736_v21  ;;  %v1553_v4 = vsel %vm1445_vm2, %v1548_v45, %v1552_v54 }
 0x23b   : > { %v2070_v19 = vrot.slane %v2068_v57, 3 }
 0x23d   : > { %v2074_v27 = vor.u32 %v2073_v20, %v2070_v19  ;;  %v10110_v19 = vld [vmem:[#allocation2 + $0x1c] sm:$0xff]  }
 0x240   : > { %8946 = vmatmul.mubr.bf16.gmra.mrb[100].mxu0 %v1537_v11  ;;  %v1554_v11 = vshrl.u32 %v10094_v24, 16  ;;  %v1560_v24 = vrot.slane %v1558_v12, 1 }
 0x241   : > { %9022 = vmatmul.mubr.bf16.gmra.mrb[100].mxu1 %v2048_v14  ;;  %8949 = vmatprep.mubr.msk.bf16.mxu0 %vm10737_vm0, %v10736_v21 }
 0x242   : > { %9025 = vmatprep.mubr.msk.bf16.mxu1 %vm10737_vm0, %v10736_v21  ;;  %v1556_v35 = vor.u32 %v1554_v11, %v1552_v54  ;;  %v10109_v11 = vld [vmem:[#allocation2 + $0x14] sm:$0xff]  }
 0x243   : > { %v2738_v20 = vshll.u32 %v10109_v11, 16 }
 0x244   : > { %v1561_v58 = vsel %vm1445_vm2, %v1556_v35, %v1560_v24 }
 0x248   : > { %8950 = vmatmul.mubr.bf16.gmra.mrb[104].mxu0 %v1545_v38  ;;  %v10103_v38 = vld [vmem:[#allocation2 + $0x80] ss:$0 sps:$4 sm:$0x11]  }
 0x249   : > { %9026 = vmatmul.mubr.bf16.gmra.mrb[104].mxu1 %v2057_v41  ;;  %8953 = vmatprep.mubr.msk.bf16.mxu0 %vm10737_vm0, %v10736_v21 }
 0x24a   : > { %9029 = vmatprep.mubr.msk.bf16.mxu1 %vm10737_vm0, %v10736_v21 }
 0x24b   : > { %v822_v59 = vpop.f32.mrb[0].mxu0 }
 0x24c   : > { %v1200_v61 = vpop.f32.mrb[0].mxu1  ;;  %v8755_v62 = vpop.f32.mrb[1].mxu0 }
 0x24d   : > { %v11609_v63 = vadd.f32 %v1200_v61, %v822_v59  ;;  %v8831_v0 = vpop.f32.mrb[1].mxu1  ;;  %v825_v1 = vpop.f32.mrb[2].mxu0  ;;  %v1562_v59 = vshrl.u32 %v10098_v55, 16  ;;  %v1566_v61 = vshll.u32 %v10103_v38, 16 }
 0x24e   : > { %v1203_v13 = vpop.f32.mrb[2].mxu1  ;;  %v8756_v14 = vpop.f32.mrb[3].mxu0  ;;  %v2075_v0 = vsel %vm959_vm1, %v2065_v56, %v2074_v27 }
 0x24f   : > { %v11615_v23 = vadd.f32 %v1203_v13, %v825_v1  ;;  %v8832_v34 = vpop.f32.mrb[3].mxu1  ;;  %v2079_v1 = vrot.slane %v2077_v39, 3  ;;  %v1564_v14 = vor.u32 %v1562_v59, %v1560_v24 }
 0x250   : > { %8954 = vmatmul.mubr.bf16.gmra.mrb[108].mxu0 %v1553_v4  ;;  %v2082_v4 = vrot.slane %v2080_v40, 4 }
 0x251   : > { %9030 = vmatmul.mubr.bf16.gmra.mrb[108].mxu1 %v2066_v16  ;;  %8957 = vmatprep.mubr.msk.bf16.mxu0 %vm10737_vm0, %v10736_v21  ;;  %v1568_v16 = vrot.slane %v1566_v61, 1 }
 0x252   : > { %9033 = vmatprep.mubr.msk.bf16.mxu1 %vm10737_vm0, %v10736_v21  ;;  %v2083_v55 = vor.u32 %v2082_v4, %v2079_v1  ;;  %v7908_v4 = vcombine.low %v11417_v15, %v11421_v17 }
 0x253   : > { %v830_v41 = vpop.f32.mrb[4].mxu0  ;;  %v1569_v40 = vsel %vm1445_vm2, %v1564_v14, %v1568_v16  ;;  %v10108_v16 = vld [vmem:[#allocation10 + $0x180] sm:$0xff]  }
 0x254   : > { %v1208_v42 = vpop.f32.mrb[4].mxu1  ;;  %v8759_v43 = vpop.f32.mrb[5].mxu0  ;;  %v2084_v24 = vsel %vm959_vm1, %v2074_v27, %v2083_v55 }
 0x255   : > { %v11621_v44 = vadd.f32 %v1208_v42, %v830_v41  ;;  %v8835_v45 = vpop.f32.mrb[5].mxu1  ;;  %v833_v57 = vpop.f32.mrb[6].mxu0  ;;  %v2736_v43 = vshrl.u32 %v10109_v11, 16 }
 0x256   : > { %v1211_v54 = vpop.f32.mrb[6].mxu1  ;;  %v8760_v62 = vpop.f32.mrb[7].mxu0  ;;  %v2740_v45 = vrot.slane %v2738_v20, 1 }
 0x257   : > { %v11625_v12 = vadd.f32 %v1211_v54, %v833_v57  ;;  %v8836_v13 = vpop.f32.mrb[7].mxu1  ;;  %v2743_v57 = vshll.u32 %v10110_v19, 16  ;;  %v10112_v62 = vld [vmem:[#allocation2 + $0x24] sm:$0xff]  }
 0x258   : > { %8958 = vmatmul.mubr.bf16.gmra.mrb[112].mxu0 %v1561_v58  ;;  %v2741_v61 = vor.u32 %v2740_v45, %v2736_v43 }
 0x259   : > { %9034 = vmatmul.mubr.bf16.gmra.mrb[112].mxu1 %v2075_v0  ;;  %8961 = vmatprep.mubr.msk.bf16.mxu0 %vm10737_vm0, %v10736_v21  ;;  %v2745_v54 = vrot.slane %v2743_v57, 1  ;;  %v7909_v57 = vcombine.low %v11423_v18, %v11430_v29  ;;  %v10143_v29 = vld [vmem:[#allocation10 + $0x1d0] sm:$0xff]  }
 0x25a   : > { %9037 = vmatprep.mubr.msk.bf16.mxu1 %vm10737_vm0, %v10736_v21 }
 0x25b   : > { %v838_v56 = vpop.f32.mrb[8].mxu0 }
 0x25c   : > { %v1216_v22 = vpop.f32.mrb[8].mxu1  ;;  %v8763_v34 = vpop.f32.mrb[9].mxu0 }
 0x25d   : > { %v11631_v35 = vadd.f32 %v1216_v22, %v838_v56  ;;  %v8839_v38 = vpop.f32.mrb[9].mxu1  ;;  %v841_v39 = vpop.f32.mrb[10].mxu0  ;;  %v2746_v56 = vsel %vm1445_vm2, %v2741_v61, %v2745_v54  ;;  %v2747_v22 = vshrl.u32 %v10110_v19, 16  ;;  %v2751_v34 = vshll.u32 %v10112_v62, 16 }
 0x25e   : > { %v1219_v41 = vpop.f32.mrb[10].mxu1  ;;  %v8764_v42 = vpop.f32.mrb[11].mxu0 }
 0x25f   : > { %v11635_v58 = vadd.f32 %v1219_v41, %v841_v39  ;;  %v8840_v59 = vpop.f32.mrb[11].mxu1  ;;  %v10114_v41 = vld [vmem:[#allocation10 + $0x188] sm:$0xff]   ;;  %v2749_v15 = vor.u32 %v2747_v22, %v2745_v54  ;;  %v2753_v17 = vrot.slane %v2751_v34, 1  ;;  %v10144_v34 = vld [vmem:[#allocation10 + $0x1d8] sm:$0xff]  }
 0x260   : > { %8962 = vmatmul.mubr.bf16.gmra.mrb[116].mxu0 %v1569_v40  ;;  %v10139_v40 = vld [vmem:[#allocation10 + $0x1c0] sm:$0xff]  }
 0x261   : > { %9038 = vmatmul.mubr.bf16.gmra.mrb[116].mxu1 %v2084_v24  ;;  %9057 = vmatprep.mubr.msk.bf16.mxu0 %vm10737_vm0, %v10736_v21  ;;  %v11652_v42 = vld [vmem:[#allocation2 + $0x2c] sm:$0xff]  }
 0x262   : > { %9133 = vmatprep.mubr.msk.bf16.mxu1 %vm10737_vm0, %v10736_v21  ;;  %v10140_v24 = vld [vmem:[#allocation10 + $0x1c8] sm:$0xff]  }
 0x263   : > { %v846_v0 = vpop.f32.mrb[12].mxu0 }
 0x264   : > { %v1224_v1 = vpop.f32.mrb[12].mxu1  ;;  %v8767_v27 = vpop.f32.mrb[13].mxu0 }
 0x265   : > { %v11643_v11 = vadd.f32 %v1224_v1, %v846_v0  ;;  %v8843_v13 = vpop.f32.mrb[13].mxu1  ;;  %v849_v14 = vpop.f32.mrb[14].mxu0  ;;  %v2754_v27 = vsel %vm1445_vm2, %v2749_v15, %v2753_v17 }
 0x266   : > { %v1227_v55 = vpop.f32.mrb[14].mxu1  ;;  %v8768_v20 = vpop.f32.mrb[15].mxu0  ;;  %v2759_v13 = vshll.u32 %v11652_v42, 16 }
 0x267   : > { %v11646_v38 = vadd.f32 %v1227_v55, %v849_v14  ;;  %v8844_v39 = vpop.f32.mrb[15].mxu1  ;;  %v10118_v14 = vld [vmem:[#allocation10 + $0x190] sm:$0xff]  }
 0x268   : > { %9058 = vmatmul.mubr.bf16.vlgmr.msra.gmra.mrb[120].mxu0 %v7908_v4  ;;  %v2755_v4 = vshrl.u32 %v10112_v62, 16  ;;  %v2761_v55 = vrot.slane %v2759_v13, 1  ;;  %v11670_v20 = vld [vmem:[#allocation2 + $0x34] sm:$0xff]  }
 0x269   : > { %9194 = vmatpush3.bf16.msra.mxu0 %v10108_v16  ;;  %9134 = vmatmul.mubr.bf16.vlgmr.msra.gmra.mrb[120].mxu1 %v2746_v56  ;;  %v10123_v56 = vld [vmem:[#allocation10 + $0x198] sm:$0xff]  }
 0x26a   : > { %9061 = vmatprep.mubr.msk.bf16.mxu0 %vm10737_vm0, %v10736_v21  ;;  %9137 = vmatprep.mubr.msk.bf16.mxu1 %vm10737_vm0, %v10736_v21  ;;  %v2757_v62 = vor.u32 %v2755_v4, %v2753_v17  ;;  %v10133_v4 = vld [vmem:[#allocation10 + $0x1a8] sm:$0xff]  }
 0x26b   : > { %v854_v19 = vpop.f32.mrb[16].mxu0  ;;  %9195 = vmatprep.subr.bf16.mxu0 %v10736_v21  ;;  %9270 = vmatpush3.bf16.msra.mxu1 %v10139_v40 }
 0x26c   : > { %v1232_v43 = vpop.f32.mrb[16].mxu1  ;;  %v8771_v45 = vpop.f32.mrb[17].mxu0  ;;  %9271 = vmatprep.subr.bf16.mxu1 %v10736_v21 }
 0x26d   : > { %v11658_v59 = vadd.f32 %v1232_v43, %v854_v19  ;;  %v8847_v61 = vpop.f32.mrb[17].mxu1  ;;  %v857_v0 = vpop.f32.mrb[18].mxu0  ;;  %9196 = vmatpush3.bf16.msra.mxu0 %v10114_v41  ;;  %v7910_v41 = vcombine.low %v11432_v30, %v11444_v49  ;;  %v2762_v45 = vsel %vm1445_vm2, %v2757_v62, %v2761_v55  ;;  %v10148_v30 = vld [vmem:[#allocation10 + $0x1e0] sm:$0xff]   ;;  %v7911_v62 = vcombine.low %v11448_v52, %v11460_v5  ;;  %v10152_v52 = vld [vmem:[#allocation10 + $0x1f0] sm:$0xff]  }
 0x26e   : > { %v1235_v54 = vpop.f32.mrb[18].mxu1  ;;  %v8772_v1 = vpop.f32.mrb[19].mxu0  ;;  %9197 = vmatprep.subr.bf16.mxu0 %v10736_v21  ;;  %v2767_v61 = vshll.u32 %v11670_v20, 16 }
 0x26f   : > { %v11663_v16 = vadd.f32 %v1235_v54, %v857_v0  ;;  %v8848_v18 = vpop.f32.mrb[19].mxu1  ;;  %9272 = vmatpush3.bf16.msra.mxu1 %v10140_v24  ;;  %v10128_v0 = vld [vmem:[#allocation10 + $0x1a0] sm:$0xff]  }
 0x270   : > { %9062 = vmatmul.mubr.bf16.gmra.mrb[124].mxu0 %v7909_v57  ;;  %9273 = vmatprep.subr.bf16.mxu1 %v10736_v21  ;;  %v2763_v57 = vshrl.u32 %v11652_v42, 16  ;;  %v2769_v42 = vrot.slane %v2767_v61, 1 }
 0x271   : > { %9138 = vmatmul.mubr.bf16.gmra.mrb[124].mxu1 %v2754_v27  ;;  %9065 = vmatprep.mubr.msk.bf16.mxu0 %vm10737_vm0, %v10736_v21  ;;  %v10120_v27 = vld [vmem:[#allocation2 + $0x3c] sm:$0xff]  }
 0x272   : > { %9141 = vmatprep.mubr.msk.bf16.mxu1 %vm10737_vm0, %v10736_v21  ;;  %9198 = vmatpush3.bf16.msra.mxu0 %v10118_v14  ;;  %v2765_v49 = vor.u32 %v2763_v57, %v2761_v55  ;;  %v10149_v14 = vld [vmem:[#allocation10 + $0x1e8] sm:$0xff]   ;;  %v10147_v57 = vld [vmem:[#allocation10 + $0x1b8] sm:$0xff]  }
 0x273   : > { %v862_v22 = vpop.f32.mrb[20].mxu0  ;;  %9199 = vmatprep.subr.bf16.mxu0 %v10736_v21  ;;  %9274 = vmatpush3.bf16.msra.mxu1 %v10143_v29 }
 0x274   : > { %v1240_v39 = vpop.f32.mrb[20].mxu1  ;;  %v8775_v40 = vpop.f32.mrb[21].mxu0  ;;  %9275 = vmatprep.subr.bf16.mxu1 %v10736_v21 }
 0x275   : > { %v11676_v15 = vadd.f32 %v1240_v39, %v862_v22  ;;  %v8851_v17 = vpop.f32.mrb[21].mxu1  ;;  %v865_v19 = vpop.f32.mrb[22].mxu0  ;;  %v2770_v40 = vsel %vm1445_vm2, %v2765_v49, %v2769_v42  ;;  %v7912_v49 = vcombine.low %v11462_v6, %v11475_v28 }
 0x276   : > { %v1243_v24 = vpop.f32.mrb[22].mxu1  ;;  %v8776_v43 = vpop.f32.mrb[23].mxu0  ;;  %9200 = vmatpush3.bf16.msra.mxu0 %v10123_v56  ;;  %v2775_v17 = vshll.u32 %v10120_v27, 16 }
 0x277   : > { %v11681_v54 = vadd.f32 %v1243_v24, %v865_v19  ;;  %v8852_v1 = vpop.f32.mrb[23].mxu1  ;;  %9201 = vmatprep.subr.bf16.mxu0 %v10736_v21  ;;  %9276 = vmatpush3.bf16.msra.mxu1 %v10144_v34  ;;  %v10138_v19 = vld [vmem:[#allocation10 + $0x1b0] sm:$0xff]  }
 0x278   : > { %9066 = vmatmul.mubr.bf16.gmra.mrb[128].mxu0 %v7910_v41  ;;  %9277 = vmatprep.subr.bf16.mxu1 %v10736_v21  ;;  %v2771_v41 = vshrl.u32 %v11670_v20, 16  ;;  %v2777_v20 = vrot.slane %v2775_v17, 1  ;;  %v7913_v17 = vcombine.low %v11477_v31, %v11491_v50 }
 0x279   : > { %9142 = vmatmul.mubr.bf16.gmra.mrb[128].mxu1 %v2762_v45  ;;  %9069 = vmatprep.mubr.msk.bf16.mxu0 %vm10737_vm0, %v10736_v21  ;;  %v10122_v45 = vld [vmem:[#allocation2 + $0x44] sm:$0xff]  }
 0x27a   : > { %9145 = vmatprep.mubr.msk.bf16.mxu1 %vm10737_vm0, %v10736_v21  ;;  %9202 = vmatpush3.bf16.msra.mxu0 %v10128_v0  ;;  %v2773_v5 = vor.u32 %v2771_v41, %v2769_v42  ;;  %v10153_v0 = vld [vmem:[#allocation10 + $0x1f8] sm:$0xff]  }
 0x27b   : > { %v870_v13 = vpop.f32.mrb[24].mxu0  ;;  %9203 = vmatprep.subr.bf16.mxu0 %v10736_v21  ;;  %9278 = vmatpush3.bf16.msra.mxu1 %v10148_v30 }
 0x27c   : > { %v1248_v18 = vpop.f32.mrb[24].mxu1  ;;  %v8779_v29 = vpop.f32.mrb[25].mxu0  ;;  %9279 = vmatprep.subr.bf16.mxu1 %v10736_v21 }
 0x27d   : > { %v11693_v56 = vadd.f32 %v1248_v18, %v870_v13  ;;  %v8855_v22 = vpop.f32.mrb[25].mxu1  ;;  %v873_v55 = vpop.f32.mrb[26].mxu0  ;;  %v2778_v29 = vsel %vm1445_vm2, %v2773_v5, %v2777_v20 }
 0x27e   : > { %v1251_v34 = vpop.f32.mrb[26].mxu1  ;;  %v8780_v39 = vpop.f32.mrb[27].mxu0  ;;  %9204 = vmatpush3.bf16.msra.mxu0 %v10133_v4  ;;  %v2783_v22 = vshll.u32 %v10122_v45, 16 }
 0x27f   : > { %v11697_v24 = vadd.f32 %v1251_v34, %v873_v55  ;;  %v8856_v43 = vpop.f32.mrb[27].mxu1  ;;  %9205 = vmatprep.subr.bf16.mxu0 %v10736_v21  ;;  %9280 = vmatpush3.bf16.msra.mxu1 %v10149_v14  ;;  %v10125_v39 = vld [vmem:[#allocation2 + $0x4c] sm:$0xff]  }
 0x280   : > { %9070 = vmatmul.mubr.bf16.gmra.mrb[132].mxu0 %v7911_v62  ;;  %9281 = vmatprep.subr.bf16.mxu1 %v10736_v21  ;;  %v2779_v62 = vshrl.u32 %v10120_v27, 16  ;;  %v2785_v28 = vrot.slane %v2783_v22, 1 }
 0x281   : > { %9146 = vmatmul.mubr.bf16.gmra.mrb[132].mxu1 %v2770_v40  ;;  %9073 = vmatprep.mubr.msk.bf16.mxu0 %vm10737_vm0, %v10736_v21 }
 0x282   : > { %9149 = vmatprep.mubr.msk.bf16.mxu1 %vm10737_vm0, %v10736_v21  ;;  %9206 = vmatpush3.bf16.msra.mxu0 %v10138_v19  ;;  %v2781_v6 = vor.u32 %v2779_v62, %v2777_v20 }
 0x283   : > { %v878_v61 = vpop.f32.mrb[28].mxu0  ;;  %9207 = vmatprep.subr.bf16.mxu0 %v10736_v21  ;;  %9282 = vmatpush3.bf16.msra.mxu1 %v10152_v52 }
 0x284   : > { %v1256_v1 = vpop.f32.mrb[28].mxu1  ;;  %v8783_v30 = vpop.f32.mrb[29].mxu0  ;;  %9283 = vmatprep.subr.bf16.mxu1 %v10736_v21 }
 0x285   : > { %v11709_v4 = vadd.f32 %v1256_v1, %v878_v61  ;;  %v8859_v13 = vpop.f32.mrb[29].mxu1  ;;  %v881_v42 = vpop.f32.mrb[30].mxu0  ;;  %v2786_v61 = vsel %vm1445_vm2, %v2781_v6, %v2785_v28  ;;  %v2791_v1 = vshll.u32 %v10125_v39, 16 }
 0x286   : > { %v1259_v14 = vpop.f32.mrb[30].mxu1  ;;  %v8784_v18 = vpop.f32.mrb[31].mxu0  ;;  %9208 = vmatpush3.bf16.msra.mxu0 %v10147_v57 }
 0x287   : > { %v11712_v55 = vadd.f32 %v1259_v14, %v881_v42  ;;  %v8860_v34 = vpop.f32.mrb[31].mxu1  ;;  %9284 = vmatpush3.bf16.msra.mxu1 %v10153_v0  ;;  %9345 = vmatprep.subr.bf16.mxu0 %v10736_v21  ;;  %v2787_v0 = vshrl.u32 %v10122_v45, 16  ;;  %v2793_v50 = vrot.slane %v2791_v1, 1  ;;  %v7914_v45 = vcombine.low %v11493_v51, %v11507_v8 }
 0x288   : > { %9074 = vmatmul.mubr.bf16.gmra.mrb[136].mxu0 %v7912_v49  ;;  %v10127_v49 = vld [vmem:[#allocation2 + $0x54] sm:$0xff]  }
 0x289   : > { %9150 = vmatmul.mubr.bf16.gmra.mrb[136].mxu1 %v2778_v29  ;;  %9077 = vmatprep.mubr.msk.bf16.mxu0 %vm10737_vm0, %v10736_v21  ;;  %v2789_v31 = vor.u32 %v2787_v0, %v2785_v28 }
 0x28a   : > { %9153 = vmatprep.mubr.msk.bf16.mxu1 %vm10737_vm0, %v10736_v21 }
 0x28b   : > { %v886_v27 = vpop.f32.mrb[32].mxu0  ;;  %v2794_v6 = vsel %vm1445_vm2, %v2789_v31, %v2793_v50 }
 0x28c   : > { %v1264_v40 = vpop.f32.mrb[32].mxu1  ;;  %v8787_v41 = vpop.f32.mrb[33].mxu0 }
 0x28d   : > { %v11721_v19 = vadd.f32 %v1264_v40, %v886_v27  ;;  %v8863_v43 = vpop.f32.mrb[33].mxu1  ;;  %v889_v52 = vpop.f32.mrb[34].mxu0  ;;  %v2795_v27 = vshrl.u32 %v10125_v39, 16  ;;  %v2799_v40 = vshll.u32 %v10127_v49, 16  ;;  %v7915_v39 = vcombine.low %v11509_v9, %v11523_v32 }
 0x28e   : > { %v1267_v5 = vpop.f32.mrb[34].mxu1  ;;  %v8788_v57 = vpop.f32.mrb[35].mxu0 }
 0x28f   : > { %v11724_v30 = vadd.f32 %v1267_v5, %v889_v52  ;;  %v8864_v20 = vpop.f32.mrb[35].mxu1  ;;  %v2797_v51 = vor.u32 %v2795_v27, %v2793_v50  ;;  %v2801_v8 = vrot.slane %v2799_v40, 1 }
 0x290   : > { %9078 = vmatmul.mubr.bf16.gmra.mrb[140].mxu0 %v7913_v17  ;;  %v10130_v17 = vld [vmem:[#allocation2 + $0x5c] sm:$0xff]  }
 0x291   : > { %9154 = vmatmul.mubr.bf16.gmra.mrb[140].mxu1 %v2786_v61  ;;  %9081 = vmatprep.mubr.msk.bf16.mxu0 %vm10737_vm0, %v10736_v21  ;;  %v2802_v31 = vsel %vm1445_vm2, %v2797_v51, %v2801_v8 }
 0x292   : > { %9157 = vmatprep.mubr.msk.bf16.mxu1 %vm10737_vm0, %v10736_v21 }
 0x293   : > { %v894_v13 = vpop.f32.mrb[36].mxu0 }
 0x294   : > { %v1272_v42 = vpop.f32.mrb[36].mxu1  ;;  %v8791_v14 = vpop.f32.mrb[37].mxu0 }
 0x295   : > { %v11732_v18 = vadd.f32 %v1272_v42, %v894_v13  ;;  %v8867_v29 = vpop.f32.mrb[37].mxu1  ;;  %v897_v62 = vpop.f32.mrb[38].mxu0  ;;  %v2803_v13 = vshrl.u32 %v10127_v49, 16  ;;  %v2807_v42 = vshll.u32 %v10130_v17, 16  ;;  %v7916_v49 = vcombine.low %v11525_v33, %v11535_v47 }
 0x296   : > { %v1275_v22 = vpop.f32.mrb[38].mxu1  ;;  %v8792_v34 = vpop.f32.mrb[39].mxu0 }
 0x297   : > { %v11735_v41 = vadd.f32 %v1275_v22, %v897_v62  ;;  %v8868_v28 = vpop.f32.mrb[39].mxu1  ;;  %v2805_v9 = vor.u32 %v2803_v13, %v2801_v8  ;;  %v2809_v32 = vrot.slane %v2807_v42, 1 }
 0x298   : > { %9082 = vmatmul.mubr.bf16.gmra.mrb[144].mxu0 %v7914_v45  ;;  %v10132_v45 = vld [vmem:[#allocation2 + $0x64] sm:$0xff]  }
 0x299   : > { %9158 = vmatmul.mubr.bf16.gmra.mrb[144].mxu1 %v2794_v6  ;;  %9085 = vmatprep.mubr.msk.bf16.mxu0 %vm10737_vm0, %v10736_v21  ;;  %v2810_v51 = vsel %vm1445_vm2, %v2805_v9, %v2809_v32 }
 0x29a   : > { %9161 = vmatprep.mubr.msk.bf16.mxu1 %vm10737_vm0, %v10736_v21 }
 0x29b   : > { %v902_v43 = vpop.f32.mrb[40].mxu0 }
 0x29c   : > { %v1280_v52 = vpop.f32.mrb[40].mxu1  ;;  %v8795_v5 = vpop.f32.mrb[41].mxu0 }
 0x29d   : > { %v11743_v57 = vadd.f32 %v1280_v52, %v902_v43  ;;  %v8871_v61 = vpop.f32.mrb[41].mxu1  ;;  %v905_v0 = vpop.f32.mrb[42].mxu0  ;;  %v2811_v43 = vshrl.u32 %v10130_v17, 16  ;;  %v2815_v52 = vshll.u32 %v10132_v45, 16  ;;  %v7917_v17 = vcombine.low %v11537_v48, %v11547_v2 }
 0x29e   : > { %v1283_v1 = vpop.f32.mrb[42].mxu1  ;;  %v8796_v20 = vpop.f32.mrb[43].mxu0 }
 0x29f   : > { %v11746_v14 = vadd.f32 %v1283_v1, %v905_v0  ;;  %v8872_v50 = vpop.f32.mrb[43].mxu1  ;;  %v2813_v33 = vor.u32 %v2811_v43, %v2809_v32  ;;  %v2817_v47 = vrot.slane %v2815_v52, 1 }
 0x2a0   : > { %9086 = vmatmul.mubr.bf16.gmra.mrb[148].mxu0 %v7915_v39  ;;  %v10135_v39 = vld [vmem:[#allocation2 + $0x6c] sm:$0xff]  }
 0x2a1   : > { %9162 = vmatmul.mubr.bf16.gmra.mrb[148].mxu1 %v2802_v31  ;;  %9089 = vmatprep.mubr.msk.bf16.mxu0 %vm10737_vm0, %v10736_v21  ;;  %v2818_v9 = vsel %vm1445_vm2, %v2813_v33, %v2817_v47 }
 0x2a2   : > { %9165 = vmatprep.mubr.msk.bf16.mxu1 %vm10737_vm0, %v10736_v21 }
 0x2a3   : > { %v910_v29 = vpop.f32.mrb[44].mxu0 }
 0x2a4   : > { %v1288_v62 = vpop.f32.mrb[44].mxu1  ;;  %v8799_v22 = vpop.f32.mrb[45].mxu0 }
 0x2a5   : > { %v11754_v34 = vadd.f32 %v1288_v62, %v910_v29  ;;  %v8875_v6 = vpop.f32.mrb[45].mxu1  ;;  %v913_v27 = vpop.f32.mrb[46].mxu0  ;;  %v2819_v29 = vshrl.u32 %v10132_v45, 16  ;;  %v2823_v62 = vshll.u32 %v10135_v39, 16  ;;  %v7918_v45 = vcombine.low %v11549_v3, %v11559_v25 }
 0x2a6   : > { %v1291_v40 = vpop.f32.mrb[46].mxu1  ;;  %v8800_v28 = vpop.f32.mrb[47].mxu0 }
 0x2a7   : > { %v11757_v5 = vadd.f32 %v1291_v40, %v913_v27  ;;  %v8876_v8 = vpop.f32.mrb[47].mxu1  ;;  %v2821_v48 = vor.u32 %v2819_v29, %v2817_v47  ;;  %v2825_v2 = vrot.slane %v2823_v62, 1 }
 0x2a8   : > { %9090 = vmatmul.mubr.bf16.gmra.mrb[152].mxu0 %v7916_v49  ;;  %v10137_v49 = vld [vmem:[#allocation2 + $0x74] sm:$0xff]  }
 0x2a9   : > { %9166 = vmatmul.mubr.bf16.gmra.mrb[152].mxu1 %v2810_v51  ;;  %9093 = vmatprep.mubr.msk.bf16.mxu0 %vm10737_vm0, %v10736_v21  ;;  %v2826_v33 = vsel %vm1445_vm2, %v2821_v48, %v2825_v2 }
 0x2aa   : > { %9169 = vmatprep.mubr.msk.bf16.mxu1 %vm10737_vm0, %v10736_v21 }
 0x2ab   : > { %v918_v61 = vpop.f32.mrb[48].mxu0 }
 0x2ac   : > { %v1296_v0 = vpop.f32.mrb[48].mxu1  ;;  %v8803_v1 = vpop.f32.mrb[49].mxu0 }
 0x2ad   : > { %v11765_v20 = vadd.f32 %v1296_v0, %v918_v61  ;;  %v8879_v31 = vpop.f32.mrb[49].mxu1  ;;  %v921_v13 = vpop.f32.mrb[50].mxu0  ;;  %v2827_v61 = vshrl.u32 %v10135_v39, 16  ;;  %v2831_v0 = vshll.u32 %v10137_v49, 16  ;;  %v7919_v39 = vcombine.low %v11561_v26, %v11571_v46 }
 0x2ae   : > { %v1299_v42 = vpop.f32.mrb[50].mxu1  ;;  %v8804_v50 = vpop.f32.mrb[51].mxu0 }
 0x2af   : > { %v11768_v22 = vadd.f32 %v1299_v42, %v921_v13  ;;  %v8880_v32 = vpop.f32.mrb[51].mxu1  ;;  %v2829_v3 = vor.u32 %v2827_v61, %v2825_v2  ;;  %v2833_v25 = vrot.slane %v2831_v0, 1 }
 0x2b0   : > { %9094 = vmatmul.mubr.bf16.gmra.mrb[156].mxu0 %v7917_v17  ;;  %v10142_v17 = vld [vmem:[#allocation2 + $0x7c] sm:$0xff]  }
 0x2b1   : > { %9170 = vmatmul.mubr.bf16.gmra.mrb[156].mxu1 %v2818_v9  ;;  %9097 = vmatprep.mubr.msk.bf16.mxu0 %vm10737_vm0, %v10736_v21  ;;  %v2834_v48 = vsel %vm1445_vm2, %v2829_v3, %v2833_v25  ;;  %v2843_v0 = vshrl.u32 %v10142_v17, 16 }
 0x2b2   : > { %9173 = vmatprep.mubr.msk.bf16.mxu1 %vm10737_vm0, %v10736_v21 }
 0x2b3   : > { %v926_v6 = vpop.f32.mrb[52].mxu0 }
 0x2b4   : > { %v1304_v27 = vpop.f32.mrb[52].mxu1  ;;  %v8807_v40 = vpop.f32.mrb[53].mxu0 }
 0x2b5   : > { %v11776_v28 = vadd.f32 %v1304_v27, %v926_v6  ;;  %v8883_v51 = vpop.f32.mrb[53].mxu1  ;;  %v929_v43 = vpop.f32.mrb[54].mxu0  ;;  %v2835_v6 = vshrl.u32 %v10137_v49, 16  ;;  %v2839_v27 = vshll.u32 %v10142_v17, 16  ;;  %v3105_v17 = vld [vmem:[#allocation2 + $0x1c] sm:$0x8] }
 0x2b6   : > { %v1307_v52 = vpop.f32.mrb[54].mxu1  ;;  %v8808_v8 = vpop.f32.mrb[55].mxu0 }
 0x2b7   : > { %v11779_v1 = vadd.f32 %v1307_v52, %v929_v43  ;;  %v8884_v47 = vpop.f32.mrb[55].mxu1  ;;  %v2837_v26 = vor.u32 %v2835_v6, %v2833_v25  ;;  %v2841_v46 = vrot.slane %v2839_v27, 1  ;;  %v7920_v8 = vcombine.low %v11573_v53, %v11583_v7 }
 0x2b8   : > { %9098 = vmatmul.mubr.bf16.gmra.mrb[160].mxu0 %v7918_v45  ;;  %v10146_v45 = vld [vmem:[#allocation2 + $0x84] sm:$0xff]  }
 0x2b9   : > { %9174 = vmatmul.mubr.bf16.gmra.mrb[160].mxu1 %v2826_v33  ;;  %9101 = vmatprep.mubr.msk.bf16.mxu0 %vm10737_vm0, %v10736_v21  ;;  %v2847_v47 = vshll.u32 %v10146_v45, 16  ;;  %v2842_v25 = vsel %vm1445_vm2, %v2837_v26, %v2841_v46  ;;  %v2845_v53 = vor.u32 %v2843_v0, %v2841_v46 }
 0x2ba   : > { %9177 = vmatprep.mubr.msk.bf16.mxu1 %vm10737_vm0, %v10736_v21 }
 0x2bb   : > { %v934_v31 = vpop.f32.mrb[56].mxu0  ;;  %v2849_v7 = vrot.slane %v2847_v47, 1 }
 0x2bc   : > { %v1312_v13 = vpop.f32.mrb[56].mxu1  ;;  %v8811_v42 = vpop.f32.mrb[57].mxu0 }
 0x2bd   : > { %v11787_v50 = vadd.f32 %v1312_v13, %v934_v31  ;;  %v8887_v9 = vpop.f32.mrb[57].mxu1  ;;  %v937_v29 = vpop.f32.mrb[58].mxu0 }
 0x2be   : > { %v1315_v62 = vpop.f32.mrb[58].mxu1  ;;  %v8812_v32 = vpop.f32.mrb[59].mxu0 }
 0x2bf   : > { %v11790_v40 = vadd.f32 %v1315_v62, %v937_v29  ;;  %v8888_v2 = vpop.f32.mrb[59].mxu1  ;;  %v11807_v29 = vld [vmem:[#allocation2 + $0x20] sm:$0xf]  ;;  %v11813_v62 = vld [vmem:[#allocation2 + $0x28] sm:$0xf] }
 0x2c0   : > { %9102 = vmatmul.mubr.bf16.gmra.mrb[164].mxu0 %v7919_v39  ;;  %v7921_v2 = vcombine.low %v11585_v10, %v11595_v36  ;;  %v7955_v26 = vcombine.low %v3105_v17, %v11807_v29 }
 0x2c1   : > { %9178 = vmatmul.mubr.bf16.gmra.mrb[164].mxu1 %v2834_v48  ;;  %9105 = vmatprep.mubr.msk.bf16.mxu0 %vm10737_vm0, %v10736_v21 }
 0x2c2   : > { %9181 = vmatprep.mubr.msk.bf16.mxu1 %vm10737_vm0, %v10736_v21  ;;  %v3232_v10 = vshrl.u32 %v7955_v26, 16  ;;  %v3235_v36 = vshll.u32 %v7955_v26, 16 }
 0x2c3   : > { %v1667_v51 = vpop.f32.mrb[60].mxu0 }
 0x2c4   : > { %v1786_v43 = vadd.f32 %v1667_v51, %v11609_v63  ;;  %v8907_v52 = vpop.f32.mrb[61].mxu0  ;;  %v2182_v49 = vpop.f32.mrb[60].mxu1  ;;  %v10151_v63 = vld [vmem:[#allocation2 + $0x8c] ss:$0 sps:$4 sm:$0x11]   ;;  %v3237_v26 = vrot.slane %v3235_v36, 4 }
 0x2c5   : > { %v1670_v33 = vpop.f32.mrb[62].mxu0  ;;  %v8983_v61 = vpop.f32.mrb[61].mxu1  ;;  %v2855_v0 = vshll.u32 %v10151_v63, 16 }
 0x2c6   : > { %v1787_v3 = vadd.f32 %v1670_v33, %v11615_v23  ;;  %v11800_v31 = vadd.f32 %v2182_v49, %v1786_v43  ;;  %v8908_v13 = vpop.f32.mrb[63].mxu0  ;;  %v2185_v42 = vpop.f32.mrb[62].mxu1  ;;  %v11811_v23 = vld [vmem:[#allocation2 + $0x24] sm:$0xf]  ;;  %v2850_v43 = vsel %vm1445_vm2, %v2845_v53, %v2849_v7  ;;  %v2851_v61 = vshrl.u32 %v10146_v45, 16 }
 0x2c7   : > { %v8984_v39 = vpop.f32.mrb[63].mxu1  ;;  %v7956_v52 = vcombine.low %v11811_v23, %v11813_v62  ;;  %v11833_v45 = vld [vmem:[#allocation2 + $0x30] sm:$0xf] }
 0x2c8   : > { %v11803_v9 = vadd.f32 %v2185_v42, %v1787_v3  ;;  %9106 = vmatmul.mubr.bf16.gmra.mrb[168].mxu0 %v7920_v8  ;;  %v11831_v39 = vld [vmem:[#allocation2 + $0x2c] sm:$0xf] }
 0x2c9   : > { %9182 = vmatmul.mubr.bf16.gmra.mrb[168].mxu1 %v2842_v25  ;;  %9109 = vmatprep.mubr.msk.bf16.mxu0 %vm10737_vm0, %v10736_v21  ;;  %v3240_v13 = vshrl.u32 %v7956_v52, 16  ;;  %v3243_v42 = vshll.u32 %v7956_v52, 16  ;;  %v2857_v25 = vrot.slane %v2855_v0, 1 }
 0x2ca   : > { %9185 = vmatprep.mubr.msk.bf16.mxu1 %vm10737_vm0, %v10736_v21 }
 0x2cb   : > { %v1675_v32 = vpop.f32.mrb[64].mxu0 }
 0x2cc   : > { %v1788_v48 = vadd.f32 %v1675_v32, %v11621_v44  ;;  %v8911_v6 = vpop.f32.mrb[65].mxu0  ;;  %v2190_v27 = vpop.f32.mrb[64].mxu1 }
 0x2cd   : > { %v1678_v46 = vpop.f32.mrb[66].mxu0  ;;  %v8987_v51 = vpop.f32.mrb[65].mxu1  ;;  %v3234_v6 = vrot.slane %v3232_v10, 3  ;;  %v11848_v10 = vld [vmem:[#allocation2 + $0x34] sm:$0xf] }
 0x2ce   : > { %v1789_v49 = vadd.f32 %v1678_v46, %v11625_v12  ;;  %v11823_v8 = vadd.f32 %v2190_v27, %v1788_v48  ;;  %v8912_v33 = vpop.f32.mrb[67].mxu0  ;;  %v2193_v44 = vpop.f32.mrb[66].mxu1  ;;  %v2853_v12 = vor.u32 %v2851_v61, %v2849_v7  ;;  %v7922_v48 = vcombine.low %v11597_v37, %v11607_v60 }
 0x2cf   : > { %v8988_v47 = vpop.f32.mrb[67].mxu1  ;;  %v3242_v46 = vrot.slane %v3240_v13, 3  ;;  %v3245_v51 = vrot.slane %v3243_v42, 4  ;;  %v7957_v7 = vcombine.low %v11831_v39, %v11833_v45  ;;  %v3238_v37 = vor.u32 %v3237_v26, %v3234_v6 }
 0x2d0   : > { %v11825_v3 = vadd.f32 %v2193_v44, %v1789_v49  ;;  %9110 = vmatmul.mubr.bf16.gmra.mrb[172].mxu0 %v7921_v2  ;;  %v2858_v33 = vsel %vm1445_vm2, %v2853_v12, %v2857_v25 }
 0x2d1   : > { %9186 = vmatmul.mubr.bf16.gmra.mrb[172].mxu1 %v2850_v43  ;;  %9113 = vmatprep.mubr.msk.bf16.mxu0 %vm10737_vm0, %v10736_v21  ;;  %v3246_v60 = vor.u32 %v3245_v51, %v3242_v46  ;;  %v3249_v0 = vshrl.u32 %v7957_v7, 16  ;;  %v3252_v47 = vshll.u32 %v7957_v7, 16 }
 0x2d2   : > { %9189 = vmatprep.mubr.msk.bf16.mxu1 %vm10737_vm0, %v10736_v21 }
 0x2d3   : > { %v1683_v63 = vpop.f32.mrb[68].mxu0  ;;  %v3251_v6 = vrot.slane %v3249_v0, 3 }
 0x2d4   : > { %v1790_v53 = vadd.f32 %v1683_v63, %v11631_v35  ;;  %v8915_v17 = vpop.f32.mrb[69].mxu0  ;;  %v2198_v32 = vpop.f32.mrb[68].mxu1 }
 0x2d5   : > { %v1686_v27 = vpop.f32.mrb[70].mxu0  ;;  %v8991_v2 = vpop.f32.mrb[69].mxu1  ;;  %v3247_v17 = vsel %vm959_vm1, %v3238_v37, %v3246_v60 }
 0x2d6   : > { %v1791_v43 = vadd.f32 %v1686_v27, %v11635_v58  ;;  %v11841_v52 = vadd.f32 %v2198_v32, %v1790_v53  ;;  %v8916_v49 = vpop.f32.mrb[71].mxu0  ;;  %v2201_v35 = vpop.f32.mrb[70].mxu1  ;;  %v11850_v58 = vld [vmem:[#allocation2 + $0x38] sm:$0xf]  ;;  %v10156_v32 = vld [vmem:[#allocation10 + $0x200] sm:$0xff]   ;;  %v3254_v27 = vrot.slane %v3252_v47, 4 }
 0x2d7   : > { %v8992_v44 = vpop.f32.mrb[71].mxu1  ;;  %v7958_v25 = vcombine.low %v11848_v10, %v11850_v58 }
 0x2d8   : > { %v11844_v61 = vadd.f32 %v2201_v35, %v1791_v43  ;;  %9114 = vmatmul.mubr.bf16.gmra.mrb[176].mxu0 %v7922_v48  ;;  %v7979_v48 = vcombine.low %v11807_v29, %v11811_v23  ;;  %v3255_v35 = vor.u32 %v3254_v27, %v3251_v6  ;;  %v11871_v29 = vld [vmem:[#allocation2 + $0x40] sm:$0xf] }
 0x2d9   : > { %9190 = vmatmul.mubr.bf16.gmra.mrb[176].mxu1 %v2858_v33  ;;  %9209 = vmatprep.mubr.msk.bf16.mxu0 %vm10737_vm0, %v10736_v21  ;;  %v3258_v43 = vshrl.u32 %v7958_v25, 16  ;;  %v3261_v49 = vshll.u32 %v7958_v25, 16  ;;  %v10161_v33 = vld [vmem:[#allocation10 + $0x208] sm:$0xff]   ;;  %v7980_v25 = vcombine.low %v11813_v62, %v11831_v39 }
 0x2da   : > { %9285 = vmatprep.mubr.msk.bf16.mxu1 %vm10737_vm0, %v10736_v21 }
 0x2db   : > { %v1691_v36 = vpop.f32.mrb[72].mxu0  ;;  %v3260_v47 = vrot.slane %v3258_v43, 3 }
 0x2dc   : > { %v1792_v13 = vadd.f32 %v1691_v36, %v11643_v11  ;;  %v8919_v42 = vpop.f32.mrb[73].mxu0  ;;  %v2206_v12 = vpop.f32.mrb[72].mxu1  ;;  %v3263_v36 = vrot.slane %v3261_v49, 4 }
 0x2dd   : > { %v1694_v63 = vpop.f32.mrb[74].mxu0  ;;  %v8995_v53 = vpop.f32.mrb[73].mxu1 }
 0x2de   : > { %v1793_v2 = vadd.f32 %v1694_v63, %v11646_v38  ;;  %v11861_v26 = vadd.f32 %v2206_v12, %v1792_v13  ;;  %v8920_v11 = vpop.f32.mrb[75].mxu0  ;;  %v2209_v46 = vpop.f32.mrb[74].mxu1  ;;  %v11869_v38 = vld [vmem:[#allocation2 + $0x3c] sm:$0xf]  ;;  %v3256_v12 = vsel %vm959_vm1, %v3246_v60, %v3255_v35  ;;  %v3264_v60 = vor.u32 %v3263_v36, %v3260_v47 }
 0x2df   : > { %v8996_v51 = vpop.f32.mrb[75].mxu1  ;;  %v7959_v63 = vcombine.low %v11869_v38, %v11871_v29  ;;  %v10170_v11 = vld [vmem:[#allocation10 + $0x218] sm:$0xff]  }
 0x2e0   : > { %v11863_v7 = vadd.f32 %v2209_v46, %v1793_v2  ;;  %9210 = vmatmul.mubr.bf16.vlgmr.msra.gmra.mrb[180].mxu0 %v3247_v17  ;;  %v11892_v2 = vld [vmem:[#allocation2 + $0x48] sm:$0xf] }
 0x2e1   : > { %9346 = vmatpush3.bf16.msra.mxu0 %v10156_v32  ;;  %9286 = vmatmul.mubr.bf16.vlgmr.msra.gmra.mrb[180].mxu1 %v7979_v48  ;;  %v10165_v48 = vld [vmem:[#allocation10 + $0x210] sm:$0xff]   ;;  %v3267_v62 = vshrl.u32 %v7959_v63, 16  ;;  %v3270_v39 = vshll.u32 %v7959_v63, 16 }
 0x2e2   : > { %9213 = vmatprep.mubr.msk.bf16.mxu0 %vm10737_vm0, %v10736_v21  ;;  %9289 = vmatprep.mubr.msk.bf16.mxu1 %vm10737_vm0, %v10736_v21 }
 0x2e3   : > { %v1699_v23 = vpop.f32.mrb[76].mxu0  ;;  %9347 = vmatprep.subr.bf16.mxu0 %v10736_v21  ;;  %v3272_v47 = vrot.slane %v3270_v39, 4 }
 0x2e4   : > { %v1794_v44 = vadd.f32 %v1699_v23, %v11658_v59  ;;  %v8923_v37 = vpop.f32.mrb[77].mxu0  ;;  %v2214_v0 = vpop.f32.mrb[76].mxu1 }
 0x2e5   : > { %v1702_v13 = vpop.f32.mrb[78].mxu0  ;;  %v8999_v42 = vpop.f32.mrb[77].mxu1  ;;  %9348 = vmatpush3.bf16.msra.mxu0 %v10161_v33  ;;  %v3265_v33 = vsel %vm959_vm1, %v3255_v35, %v3264_v60  ;;  %v7981_v37 = vcombine.low %v11833_v45, %v11848_v10 }
 0x2e6   : > { %v1795_v53 = vadd.f32 %v1702_v13, %v11663_v16  ;;  %v11881_v17 = vadd.f32 %v2214_v0, %v1794_v44  ;;  %v8924_v59 = vpop.f32.mrb[79].mxu0  ;;  %v2217_v32 = vpop.f32.mrb[78].mxu1  ;;  %9349 = vmatprep.subr.bf16.mxu0 %v10736_v21  ;;  %v11890_v16 = vld [vmem:[#allocation2 + $0x44] sm:$0xf]  ;;  %v3269_v0 = vrot.slane %v3267_v62, 3 }
 0x2e7   : > { %v9000_v6 = vpop.f32.mrb[79].mxu1  ;;  %v7960_v36 = vcombine.low %v11890_v16, %v11892_v2  ;;  %v11911_v59 = vld [vmem:[#allocation2 + $0x50] sm:$0xf] }
 0x2e8   : > { %v11884_v27 = vadd.f32 %v2217_v32, %v1795_v53  ;;  %9214 = vmatmul.mubr.bf16.gmra.mrb[184].mxu0 %v3256_v12  ;;  %v3273_v45 = vor.u32 %v3272_v47, %v3269_v0  ;;  %v10180_v32 = vld [vmem:[#allocation10 + $0x228] sm:$0xff]   ;;  %v10185_v47 = vld [vmem:[#allocation10 + $0x230] sm:$0xff]  }
 0x2e9   : > { %9290 = vmatmul.mubr.bf16.gmra.mrb[184].mxu1 %v7980_v25  ;;  %9217 = vmatprep.mubr.msk.bf16.mxu0 %vm10737_vm0, %v10736_v21  ;;  %v10175_v25 = vld [vmem:[#allocation10 + $0x220] sm:$0xff]   ;;  %v3276_v10 = vshrl.u32 %v7960_v36, 16  ;;  %v3279_v53 = vshll.u32 %v7960_v36, 16 }
 0x2ea   : > { %9293 = vmatprep.mubr.msk.bf16.mxu1 %vm10737_vm0, %v10736_v21  ;;  %9350 = vmatpush3.bf16.msra.mxu0 %v10165_v48 }
 0x2eb   : > { %v1707_v46 = vpop.f32.mrb[80].mxu0  ;;  %9351 = vmatprep.subr.bf16.mxu0 %v10736_v21 }
 0x2ec   : > { %v1796_v51 = vadd.f32 %v1707_v46, %v11676_v15  ;;  %v8927_v43 = vpop.f32.mrb[81].mxu0  ;;  %v2222_v49 = vpop.f32.mrb[80].mxu1 }
 0x2ed   : > { %v1710_v23 = vpop.f32.mrb[82].mxu0  ;;  %v9003_v44 = vpop.f32.mrb[81].mxu1  ;;  %v3274_v43 = vsel %vm959_vm1, %v3264_v60, %v3273_v45 }
 0x2ee   : > { %v1797_v13 = vadd.f32 %v1710_v23, %v11681_v54  ;;  %v11902_v42 = vadd.f32 %v2222_v49, %v1796_v51  ;;  %v8928_v12 = vpop.f32.mrb[83].mxu0  ;;  %v2225_v15 = vpop.f32.mrb[82].mxu1  ;;  %9352 = vmatpush3.bf16.msra.mxu0 %v10170_v11  ;;  %v11909_v54 = vld [vmem:[#allocation2 + $0x4c] sm:$0xf]  ;;  %v7982_v49 = vcombine.low %v11850_v58, %v11869_v38  ;;  %v3281_v23 = vrot.slane %v3279_v53, 4 }
 0x2ef   : > { %v9004_v63 = vpop.f32.mrb[83].mxu1  ;;  %9353 = vmatprep.subr.bf16.mxu0 %v10736_v21  ;;  %v7961_v11 = vcombine.low %v11909_v54, %v11911_v59  ;;  %v11934_v38 = vld [vmem:[#allocation2 + $0x58] sm:$0xf] }
 0x2f0   : > { %v11905_v35 = vadd.f32 %v2225_v15, %v1797_v13  ;;  %9218 = vmatmul.mubr.bf16.gmra.mrb[188].mxu0 %v3265_v33  ;;  %v3278_v33 = vrot.slane %v3276_v10, 3  ;;  %v10190_v15 = vld [vmem:[#allocation10 + $0x238] sm:$0xff]  }
 0x2f1   : > { %9294 = vmatmul.mubr.bf16.gmra.mrb[188].mxu1 %v7981_v37  ;;  %9221 = vmatprep.mubr.msk.bf16.mxu0 %vm10737_vm0, %v10736_v21  ;;  %v3285_v60 = vshrl.u32 %v7961_v11, 16  ;;  %v3288_v12 = vshll.u32 %v7961_v11, 16  ;;  %v7983_v11 = vcombine.low %v11871_v29, %v11890_v16 }
 0x2f2   : > { %9297 = vmatprep.mubr.msk.bf16.mxu1 %vm10737_vm0, %v10736_v21  ;;  %9354 = vmatpush3.bf16.msra.mxu0 %v10175_v25  ;;  %v3282_v58 = vor.u32 %v3281_v23, %v3278_v33 }
 0x2f3   : > { %v1715_v48 = vpop.f32.mrb[84].mxu0  ;;  %9355 = vmatprep.subr.bf16.mxu0 %v10736_v21 }
 0x2f4   : > { %v1798_v6 = vadd.f32 %v1715_v48, %v11693_v56  ;;  %v8931_v62 = vpop.f32.mrb[85].mxu0  ;;  %v2230_v39 = vpop.f32.mrb[84].mxu1  ;;  %v3290_v48 = vrot.slane %v3288_v12, 4 }
 0x2f5   : > { %v1718_v46 = vpop.f32.mrb[86].mxu0  ;;  %v9007_v51 = vpop.f32.mrb[85].mxu1 }
 0x2f6   : > { %v1799_v44 = vadd.f32 %v1718_v46, %v11697_v24  ;;  %v11923_v37 = vadd.f32 %v2230_v39, %v1798_v6  ;;  %v8932_v0 = vpop.f32.mrb[87].mxu0  ;;  %v2233_v56 = vpop.f32.mrb[86].mxu1  ;;  %9356 = vmatpush3.bf16.msra.mxu0 %v10180_v32  ;;  %v11932_v24 = vld [vmem:[#allocation2 + $0x54] sm:$0xf]  ;;  %v3287_v32 = vrot.slane %v3285_v60, 3  ;;  %v3283_v39 = vsel %vm959_vm1, %v3273_v45, %v3282_v58 }
 0x2f7   : > { %v9008_v36 = vpop.f32.mrb[87].mxu1  ;;  %9357 = vmatprep.subr.bf16.mxu0 %v10736_v21  ;;  %v7962_v46 = vcombine.low %v11932_v24, %v11934_v38  ;;  %v11954_v45 = vld [vmem:[#allocation2 + $0x60] sm:$0xf] }
 0x2f8   : > { %v11926_v13 = vadd.f32 %v2233_v56, %v1799_v44  ;;  %9222 = vmatmul.mubr.bf16.gmra.mrb[192].mxu0 %v3274_v43  ;;  %v3291_v44 = vor.u32 %v3290_v48, %v3287_v32 }
 0x2f9   : > { %9298 = vmatmul.mubr.bf16.gmra.mrb[192].mxu1 %v7982_v49  ;;  %9225 = vmatprep.mubr.msk.bf16.mxu0 %vm10737_vm0, %v10736_v21  ;;  %v3294_v29 = vshrl.u32 %v7962_v46, 16  ;;  %v3297_v16 = vshll.u32 %v7962_v46, 16  ;;  %v11971_v46 = vld [vmem:[#allocation2 + $0x68] sm:$0xf] }
 0x2fa   : > { %9301 = vmatprep.mubr.msk.bf16.mxu1 %vm10737_vm0, %v10736_v21  ;;  %9358 = vmatpush3.bf16.msra.mxu0 %v10185_v47  ;;  %v3292_v60 = vsel %vm959_vm1, %v3282_v58, %v3291_v44 }
 0x2fb   : > { %v1723_v25 = vpop.f32.mrb[88].mxu0  ;;  %9359 = vmatprep.subr.bf16.mxu0 %v10736_v21 }
 0x2fc   : > { %v1800_v63 = vadd.f32 %v1723_v25, %v11709_v4  ;;  %v8935_v10 = vpop.f32.mrb[89].mxu0  ;;  %v2238_v53 = vpop.f32.mrb[88].mxu1  ;;  %v7984_v25 = vcombine.low %v11892_v2, %v11909_v54 }
 0x2fd   : > { %v1726_v6 = vpop.f32.mrb[90].mxu0  ;;  %v9011_v62 = vpop.f32.mrb[89].mxu1  ;;  %v3299_v10 = vrot.slane %v3297_v16, 4 }
 0x2fe   : > { %v1801_v51 = vadd.f32 %v1726_v6, %v11712_v55  ;;  %v11944_v43 = vadd.f32 %v2238_v53, %v1800_v63  ;;  %v8936_v49 = vpop.f32.mrb[91].mxu0  ;;  %v2241_v4 = vpop.f32.mrb[90].mxu1  ;;  %9360 = vmatpush3.bf16.msra.mxu0 %v10190_v15  ;;  %v11952_v55 = vld [vmem:[#allocation2 + $0x5c] sm:$0xf]  ;;  %v3296_v63 = vrot.slane %v3294_v29, 3 }
 0x2ff   : > { %v9012_v33 = vpop.f32.mrb[91].mxu1  ;;  %v7963_v53 = vcombine.low %v11952_v55, %v11954_v45 }
 0x300   : > { %v11946_v23 = vadd.f32 %v2241_v4, %v1801_v51  ;;  %9226 = vmatmul.mubr.bf16.gmra.mrb[196].mxu0 %v3283_v39  ;;  %v3300_v2 = vor.u32 %v3299_v10, %v3296_v63 }
 0x301   : > { %9302 = vmatmul.mubr.bf16.gmra.mrb[196].mxu1 %v7983_v11  ;;  %9229 = vmatprep.mubr.msk.bf16.mxu0 %vm10737_vm0, %v10736_v21  ;;  %v3303_v54 = vshrl.u32 %v7963_v53, 16  ;;  %v3306_v58 = vshll.u32 %v7963_v53, 16  ;;  %v11969_v11 = vld [vmem:[#allocation2 + $0x64] sm:$0xf] }
 0x302   : > { %9305 = vmatprep.mubr.msk.bf16.mxu1 %vm10737_vm0, %v10736_v21  ;;  %v7964_v33 = vcombine.low %v11969_v11, %v11971_v46 }
 0x303   : > { %v1731_v0 = vpop.f32.mrb[92].mxu0 }
 0x304   : > { %v1802_v56 = vadd.f32 %v1731_v0, %v11721_v19  ;;  %v8939_v47 = vpop.f32.mrb[93].mxu0  ;;  %v2246_v36 = vpop.f32.mrb[92].mxu1  ;;  %v3301_v0 = vsel %vm959_vm1, %v3291_v44, %v3300_v2  ;;  %v3312_v10 = vshrl.u32 %v7964_v33, 16  ;;  %v3315_v53 = vshll.u32 %v7964_v33, 16 }
 0x305   : > { %v1734_v12 = vpop.f32.mrb[94].mxu0  ;;  %v9015_v15 = vpop.f32.mrb[93].mxu1  ;;  %v3305_v47 = vrot.slane %v3303_v54, 3 }
 0x306   : > { %v1803_v32 = vadd.f32 %v1734_v12, %v11724_v30  ;;  %v11963_v48 = vadd.f32 %v2246_v36, %v1802_v56  ;;  %v8940_v6 = vpop.f32.mrb[95].mxu0  ;;  %v2249_v19 = vpop.f32.mrb[94].mxu1  ;;  %v7985_v56 = vcombine.low %v11911_v59, %v11932_v24  ;;  %v3308_v36 = vrot.slane %v3306_v58, 4  ;;  %v11990_v59 = vld [vmem:[#allocation2 + $0x6c] sm:$0xf] }
 0x307   : > { %v9016_v62 = vpop.f32.mrb[95].mxu1  ;;  %v3317_v54 = vrot.slane %v3315_v53, 4 }
 0x308   : > { %v11965_v39 = vadd.f32 %v2249_v19, %v1803_v32  ;;  %9230 = vmatmul.mubr.bf16.gmra.mrb[200].mxu0 %v3292_v60  ;;  %v3309_v44 = vor.u32 %v3308_v36, %v3305_v47  ;;  %v3314_v62 = vrot.slane %v3312_v10, 3 }
 0x309   : > { %9306 = vmatmul.mubr.bf16.gmra.mrb[200].mxu1 %v7984_v25  ;;  %9233 = vmatprep.mubr.msk.bf16.mxu0 %vm10737_vm0, %v10736_v21 }
 0x30a   : > { %9309 = vmatprep.mubr.msk.bf16.mxu1 %vm10737_vm0, %v10736_v21  ;;  %v3318_v47 = vor.u32 %v3317_v54, %v3314_v62 }
 0x30b   : > { %v1739_v30 = vpop.f32.mrb[96].mxu0 }
 0x30c   : > { %v1804_v51 = vadd.f32 %v1739_v30, %v11732_v18  ;;  %v8943_v49 = vpop.f32.mrb[97].mxu0  ;;  %v2254_v4 = vpop.f32.mrb[96].mxu1 }
 0x30d   : > { %v1742_v29 = vpop.f32.mrb[98].mxu0  ;;  %v9019_v16 = vpop.f32.mrb[97].mxu1  ;;  %v7986_v49 = vcombine.low %v11934_v38, %v11952_v55  ;;  %v12009_v55 = vld [vmem:[#allocation2 + $0x74] sm:$0xf] }
 0x30e   : > { %v1805_v60 = vadd.f32 %v1742_v29, %v11735_v41  ;;  %v11982_v12 = vadd.f32 %v2254_v4, %v1804_v51  ;;  %v8944_v15 = vpop.f32.mrb[99].mxu0  ;;  %v2257_v18 = vpop.f32.mrb[98].mxu1  ;;  %v11992_v41 = vld [vmem:[#allocation2 + $0x70] sm:$0xf]  ;;  %v3310_v51 = vsel %vm959_vm1, %v3300_v2, %v3309_v44 }
 0x30f   : > { %v9020_v25 = vpop.f32.mrb[99].mxu1  ;;  %v7965_v4 = vcombine.low %v11990_v59, %v11992_v41 }
 0x310   : > { %v11984_v63 = vadd.f32 %v2257_v18, %v1805_v60  ;;  %9234 = vmatmul.mubr.bf16.gmra.mrb[204].mxu0 %v3301_v0  ;;  %v3319_v25 = vsel %vm959_vm1, %v3309_v44, %v3318_v47 }
 0x311   : > { %9310 = vmatmul.mubr.bf16.gmra.mrb[204].mxu1 %v7985_v56  ;;  %9237 = vmatprep.mubr.msk.bf16.mxu0 %vm10737_vm0, %v10736_v21  ;;  %v3321_v2 = vshrl.u32 %v7965_v4, 16  ;;  %v3324_v38 = vshll.u32 %v7965_v4, 16  ;;  %v12028_v4 = vld [vmem:[#allocation2 + $0x80] sm:$0xf] }
 0x312   : > { %9313 = vmatprep.mubr.msk.bf16.mxu1 %vm10737_vm0, %v10736_v21 }
 0x313   : > { %v1747_v24 = vpop.f32.mrb[100].mxu0 }
 0x314   : > { %v1806_v32 = vadd.f32 %v1747_v24, %v11743_v57  ;;  %v8947_v6 = vpop.f32.mrb[101].mxu0  ;;  %v2262_v19 = vpop.f32.mrb[100].mxu1  ;;  %v7987_v24 = vcombine.low %v11954_v45, %v11969_v11 }
 0x315   : > { %v1750_v58 = vpop.f32.mrb[102].mxu0  ;;  %v9023_v30 = vpop.f32.mrb[101].mxu1  ;;  %v3326_v6 = vrot.slane %v3324_v38, 4 }
 0x316   : > { %v1807_v33 = vadd.f32 %v1750_v58, %v11746_v14  ;;  %v12001_v29 = vadd.f32 %v2262_v19, %v1806_v32  ;;  %v8948_v16 = vpop.f32.mrb[103].mxu0  ;;  %v2265_v57 = vpop.f32.mrb[102].mxu1  ;;  %v12011_v14 = vld [vmem:[#allocation2 + $0x78] sm:$0xf]  ;;  %v3323_v32 = vrot.slane %v3321_v2, 3 }
 0x317   : > { %v9024_v0 = vpop.f32.mrb[103].mxu1  ;;  %v7966_v19 = vcombine.low %v12009_v55, %v12011_v14 }
 0x318   : > { %v12003_v56 = vadd.f32 %v2265_v57, %v1807_v33  ;;  %9238 = vmatmul.mubr.bf16.gmra.mrb[208].mxu0 %v3310_v51  ;;  %v3327_v45 = vor.u32 %v3326_v6, %v3323_v32 }
 0x319   : > { %9314 = vmatmul.mubr.bf16.gmra.mrb[208].mxu1 %v7986_v49  ;;  %9241 = vmatprep.mubr.msk.bf16.mxu0 %vm10737_vm0, %v10736_v21  ;;  %v3330_v11 = vshrl.u32 %v7966_v19, 16  ;;  %v3333_v44 = vshll.u32 %v7966_v19, 16  ;;  %v12026_v49 = vld [vmem:[#allocation2 + $0x7c] sm:$0xf] }
 0x31a   : > { %9317 = vmatprep.mubr.msk.bf16.mxu1 %vm10737_vm0, %v10736_v21  ;;  %v7967_v0 = vcombine.low %v12026_v49, %v12028_v4 }
 0x31b   : > { %v1755_v36 = vpop.f32.mrb[104].mxu0 }
 0x31c   : > { %v1808_v60 = vadd.f32 %v1755_v36, %v11754_v34  ;;  %v8951_v15 = vpop.f32.mrb[105].mxu0  ;;  %v2270_v18 = vpop.f32.mrb[104].mxu1  ;;  %v3328_v36 = vsel %vm959_vm1, %v3318_v47, %v3327_v45  ;;  %v3339_v6 = vshrl.u32 %v7967_v0, 16  ;;  %v3342_v19 = vshll.u32 %v7967_v0, 16 }
 0x31d   : > { %v1758_v10 = vpop.f32.mrb[106].mxu0  ;;  %v9027_v53 = vpop.f32.mrb[105].mxu1  ;;  %v3332_v15 = vrot.slane %v3330_v11, 3 }
 0x31e   : > { %v1809_v62 = vadd.f32 %v1758_v10, %v11757_v5  ;;  %v12020_v54 = vadd.f32 %v2270_v18, %v1808_v60  ;;  %v8952_v58 = vpop.f32.mrb[107].mxu0  ;;  %v2273_v34 = vpop.f32.mrb[106].mxu1  ;;  %v7988_v60 = vcombine.low %v11971_v46, %v11990_v59  ;;  %v3335_v18 = vrot.slane %v3333_v44, 4  ;;  %v12047_v46 = vld [vmem:[#allocation2 + $0x84] sm:$0xf] }
 0x31f   : > { %v9028_v30 = vpop.f32.mrb[107].mxu1  ;;  %v3344_v11 = vrot.slane %v3342_v19, 4 }
 0x320   : > { %v12022_v51 = vadd.f32 %v2273_v34, %v1809_v62  ;;  %9242 = vmatmul.mubr.bf16.gmra.mrb[212].mxu0 %v3319_v25  ;;  %v3336_v47 = vor.u32 %v3335_v18, %v3332_v15  ;;  %v3341_v30 = vrot.slane %v3339_v6, 3 }
 0x321   : > { %9318 = vmatmul.mubr.bf16.gmra.mrb[212].mxu1 %v7987_v24  ;;  %9245 = vmatprep.mubr.msk.bf16.mxu0 %vm10737_vm0, %v10736_v21 }
 0x322   : > { %9321 = vmatprep.mubr.msk.bf16.mxu1 %vm10737_vm0, %v10736_v21  ;;  %v3345_v15 = vor.u32 %v3344_v11, %v3341_v30 }
 0x323   : > { %v1763_v5 = vpop.f32.mrb[108].mxu0 }
 0x324   : > { %v1810_v33 = vadd.f32 %v1763_v5, %v11765_v20  ;;  %v8955_v16 = vpop.f32.mrb[109].mxu0  ;;  %v2278_v57 = vpop.f32.mrb[108].mxu1 }
 0x325   : > { %v1766_v2 = vpop.f32.mrb[110].mxu0  ;;  %v9031_v38 = vpop.f32.mrb[109].mxu1  ;;  %v7989_v16 = vcombine.low %v11992_v41, %v12009_v55  ;;  %v12066_v55 = vld [vmem:[#allocation2 + $0x8c] sm:$0xf] }
 0x326   : > { %v1811_v25 = vadd.f32 %v1766_v2, %v11768_v22  ;;  %v12039_v10 = vadd.f32 %v2278_v57, %v1810_v33  ;;  %v8956_v53 = vpop.f32.mrb[111].mxu0  ;;  %v2281_v20 = vpop.f32.mrb[110].mxu1  ;;  %v12049_v22 = vld [vmem:[#allocation2 + $0x88] sm:$0xf]  ;;  %v3337_v33 = vsel %vm959_vm1, %v3327_v45, %v3336_v47 }
 0x327   : > { %v9032_v24 = vpop.f32.mrb[111].mxu1  ;;  %v7968_v57 = vcombine.low %v12047_v46, %v12049_v22 }
 0x328   : > { %v12041_v32 = vadd.f32 %v2281_v20, %v1811_v25  ;;  %9246 = vmatmul.mubr.bf16.gmra.mrb[216].mxu0 %v3328_v36  ;;  %v3346_v24 = vsel %vm959_vm1, %v3336_v47, %v3345_v15 }
 0x329   : > { %9322 = vmatmul.mubr.bf16.gmra.mrb[216].mxu1 %v7988_v60  ;;  %9249 = vmatprep.mubr.msk.bf16.mxu0 %vm10737_vm0, %v10736_v21  ;;  %v3348_v45 = vshrl.u32 %v7968_v57, 16  ;;  %v3351_v41 = vshll.u32 %v7968_v57, 16 }
 0x32a   : > { %9325 = vmatprep.mubr.msk.bf16.mxu1 %vm10737_vm0, %v10736_v21 }
 0x32b   : > { %v1771_v59 = vpop.f32.mrb[112].mxu0 }
 0x32c   : > { %v1812_v62 = vadd.f32 %v1771_v59, %v11776_v28  ;;  %v8959_v58 = vpop.f32.mrb[113].mxu0  ;;  %v2286_v34 = vpop.f32.mrb[112].mxu1  ;;  %v7990_v59 = vcombine.low %v12011_v14, %v12026_v49 }
 0x32d   : > { %v1774_v44 = vpop.f32.mrb[114].mxu0  ;;  %v9035_v5 = vpop.f32.mrb[113].mxu1  ;;  %v3353_v58 = vrot.slane %v3351_v41, 4 }
 0x32e   : > { %v1813_v0 = vadd.f32 %v1774_v44, %v11779_v1  ;;  %v12058_v2 = vadd.f32 %v2286_v34, %v1812_v62  ;;  %v8960_v38 = vpop.f32.mrb[115].mxu0  ;;  %v2289_v28 = vpop.f32.mrb[114].mxu1  ;;  %v12068_v1 = vld [vmem:[#allocation2 + $0x90] sm:$0xf]  ;;  %v3350_v62 = vrot.slane %v3348_v45, 3 }
 0x32f   : > { %v9036_v36 = vpop.f32.mrb[115].mxu1  ;;  %v7969_v34 = vcombine.low %v12066_v55, %v12068_v1 }
 0x330   : > { %v12060_v60 = vadd.f32 %v2289_v28, %v1813_v0  ;;  %9250 = vmatmul.mubr.bf16.gmra.mrb[220].mxu0 %v3337_v33  ;;  %v3354_v14 = vor.u32 %v3353_v58, %v3350_v62 }
 0x331   : > { %9326 = vmatmul.mubr.bf16.gmra.mrb[220].mxu1 %v7989_v16  ;;  %9253 = vmatprep.mubr.msk.bf16.mxu0 %vm10737_vm0, %v10736_v21  ;;  %v3357_v49 = vshrl.u32 %v7969_v34, 16  ;;  %v3360_v47 = vshll.u32 %v7969_v34, 16  ;;  %v12083_v16 = vld [vmem:[#allocation2 + $0x94] sm:$0xf] }
 0x332   : > { %9329 = vmatprep.mubr.msk.bf16.mxu1 %vm10737_vm0, %v10736_v21  ;;  %v7970_v28 = vcombine.low %v12083_v16, %v12083_v16  ;;  %v3355_v41 = vsel %vm959_vm1, %v3345_v15, %v3354_v14 }
 0x333   : > { %v1779_v18 = vpop.f32.mrb[116].mxu0 }
 0x334   : > { %v1814_v25 = vadd.f32 %v1779_v18, %v11787_v50  ;;  %v8963_v53 = vpop.f32.mrb[117].mxu0  ;;  %v2294_v20 = vpop.f32.mrb[116].mxu1  ;;  %v7991_v18 = vcombine.low %v12028_v4, %v12047_v46  ;;  %v3366_v62 = vshrl.u32 %v7970_v28, 16  ;;  %v3369_v58 = vshll.u32 %v7970_v28, 16 }
 0x335   : > { %v1782_v6 = vpop.f32.mrb[118].mxu0  ;;  %v9039_v19 = vpop.f32.mrb[117].mxu1  ;;  %v3362_v53 = vrot.slane %v3360_v47, 4  ;;  %v7992_v47 = vcombine.low %v12049_v22, %v12066_v55 }
 0x336   : > { %v1815_v30 = vadd.f32 %v1782_v6, %v11790_v40  ;;  %v12077_v11 = vadd.f32 %v2294_v20, %v1814_v25  ;;  %v8964_v44 = vpop.f32.mrb[119].mxu0  ;;  %v2297_v50 = vpop.f32.mrb[118].mxu1  ;;  %v3359_v25 = vrot.slane %v3357_v49, 3 }
 0x337   : > { %v9040_v5 = vpop.f32.mrb[119].mxu1  ;;  %v3371_v44 = vrot.slane %v3369_v58, 4 }
 0x338   : > { %v12079_v33 = vadd.f32 %v2297_v50, %v1815_v30  ;;  %9254 = vmatmul.mubr.bf16.gmra.mrb[224].mxu0 %v3346_v24  ;;  %v3363_v15 = vor.u32 %v3362_v53, %v3359_v25  ;;  %v3368_v30 = vrot.slane %v3366_v62, 3 }
 0x339   : > { %9330 = vmatmul.mubr.bf16.gmra.mrb[224].mxu1 %v7990_v59  ;;  %9257 = vmatprep.mubr.msk.bf16.mxu0 %vm10737_vm0, %v10736_v21 }
 0x33a   : > { %9333 = vmatprep.mubr.msk.bf16.mxu1 %vm10737_vm0, %v10736_v21  ;;  %v3364_v49 = vsel %vm959_vm1, %v3354_v14, %v3363_v15  ;;  %v10194_v14 = vld [vmem:[#allocation2 + $0x28] sm:$0xff]  }
 0x33b   : > { %v2460_v40 = vpop.f32.mrb[120].mxu0  ;;  %v4032_v62 = vshll.u32 %v10194_v14, 16 }
 0x33c   : > { %v2579_v57 = vadd.f32 %v2460_v40, %v11800_v31  ;;  %v9059_v0 = vpop.f32.mrb[121].mxu0  ;;  %v2956_v38 = vpop.f32.mrb[120].mxu1  ;;  %v10193_v40 = vld [vmem:[#allocation2 + $0x20] sm:$0xff]  }
 0x33d   : > { %v2463_v36 = vpop.f32.mrb[122].mxu0  ;;  %v9135_v45 = vpop.f32.mrb[121].mxu1 }
 0x33e   : > { %v2580_v20 = vadd.f32 %v2463_v36, %v11803_v9  ;;  %v12094_v24 = vadd.f32 %v2956_v38, %v2579_v57  ;;  %v9060_v6 = vpop.f32.mrb[123].mxu0  ;;  %v2959_v31 = vpop.f32.mrb[122].mxu1  ;;  %v3372_v45 = vor.u32 %v3371_v44, %v3368_v30  ;;  %v4034_v30 = vrot.slane %v4032_v62, 1 }
 0x33f   : > { %v9136_v19 = vpop.f32.mrb[123].mxu1  ;;  %v7993_v6 = vcombine.low %v12068_v1, %v12083_v16  ;;  %v10195_v1 = vld [vmem:[#allocation2 + $0x30] sm:$0xff]  }
 0x340   : > { %v12096_v59 = vadd.f32 %v2959_v31, %v2580_v20  ;;  %9258 = vmatmul.mubr.bf16.gmra.mrb[228].mxu0 %v3355_v41  ;;  %v4027_v41 = vshll.u32 %v10193_v40, 16  ;;  %v3373_v25 = vsel %vm959_vm1, %v3363_v15, %v3372_v45  ;;  %v4025_v31 = vshrl.u32 %v10193_v40, 16 }
 0x341   : > { %9334 = vmatmul.mubr.bf16.gmra.mrb[228].mxu1 %v7991_v18  ;;  %9261 = vmatprep.mubr.msk.bf16.mxu0 %vm10737_vm0, %v10736_v21  ;;  %v4036_v40 = vshrl.u32 %v10194_v14, 16 }
 0x342   : > { %9337 = vmatprep.mubr.msk.bf16.mxu1 %vm10737_vm0, %v10736_v21  ;;  %v4029_v19 = vrot.slane %v4027_v41, 1 }
 0x343   : > { %v2468_v4 = vpop.f32.mrb[124].mxu0 }
 0x344   : > { %v2581_v9 = vadd.f32 %v2468_v4, %v11823_v8  ;;  %v9063_v46 = vpop.f32.mrb[125].mxu0  ;;  %v2964_v34 = vpop.f32.mrb[124].mxu1  ;;  %v4030_v15 = vor.u32 %v4029_v19, %v4025_v31  ;;  %v4044_v31 = vshrl.u32 %v10195_v1, 16 }
 0x345   : > { %v2471_v50 = vpop.f32.mrb[126].mxu0  ;;  %v9139_v5 = vpop.f32.mrb[125].mxu1 }
 0x346   : > { %v2582_v57 = vadd.f32 %v2471_v50, %v11825_v3  ;;  %v12107_v0 = vadd.f32 %v2964_v34, %v2581_v9  ;;  %v9064_v38 = vpop.f32.mrb[127].mxu0  ;;  %v2967_v28 = vpop.f32.mrb[126].mxu1 }
 0x347   : > { %v9140_v36 = vpop.f32.mrb[127].mxu1 }
 0x348   : > { %v12109_v8 = vadd.f32 %v2967_v28, %v2582_v57  ;;  %9262 = vmatmul.mubr.bf16.gmra.mrb[232].mxu0 %v3364_v49  ;;  %v4040_v57 = vshll.u32 %v10195_v1, 16 }
 0x349   : > { %9338 = vmatmul.mubr.bf16.gmra.mrb[232].mxu1 %v7992_v47  ;;  %9265 = vmatprep.mubr.msk.bf16.mxu0 %vm10737_vm0, %v10736_v21  ;;  %v4035_v47 = vsel %vm1445_vm2, %v4030_v15, %v4034_v30 }
 0x34a   : > { %9341 = vmatprep.mubr.msk.bf16.mxu1 %vm10737_vm0, %v10736_v21 }
 0x34b   : > { %v2476_v22 = vpop.f32.mrb[128].mxu0 }
 0x34c   : > { %v2583_v3 = vadd.f32 %v2476_v22, %v11841_v52  ;;  %v9067_v55 = vpop.f32.mrb[129].mxu0  ;;  %v2972_v18 = vpop.f32.mrb[128].mxu1 }
 0x34d   : > { %v2479_v53 = vpop.f32.mrb[130].mxu0  ;;  %v9143_v20 = vpop.f32.mrb[129].mxu1  ;;  %v10196_v55 = vld [vmem:[#allocation2 + $0x38] sm:$0xff]  }
 0x34e   : > { %v2584_v58 = vadd.f32 %v2479_v53, %v11844_v61  ;;  %v12120_v4 = vadd.f32 %v2972_v18, %v2583_v3  ;;  %v9068_v9 = vpop.f32.mrb[131].mxu0  ;;  %v2975_v46 = vpop.f32.mrb[130].mxu1  ;;  %v4042_v3 = vrot.slane %v4040_v57, 1  ;;  %v4048_v19 = vshll.u32 %v10196_v55, 16 }
 0x34f   : > { %v9144_v34 = vpop.f32.mrb[131].mxu1 }
 0x350   : > { %v12122_v52 = vadd.f32 %v2975_v46, %v2584_v58  ;;  %9266 = vmatmul.mubr.bf16.gmra.mrb[236].mxu0 %v3373_v25 }
 0x351   : > { %9342 = vmatmul.mubr.bf16.gmra.mrb[236].mxu1 %v7993_v6  ;;  %9361 = vmatprep.mubr.msk.bf16.mxu0 %vm10737_vm0, %v10736_v21 }
 0x353   : > { %v2484_v16 = vpop.f32.mrb[132].mxu0 }
 0x354   : > { %v2585_v44 = vadd.f32 %v2484_v16, %v11861_v26  ;;  %v9071_v50 = vpop.f32.mrb[133].mxu0  ;;  %v2980_v61 = vpop.f32.mrb[132].mxu1  ;;  %v4038_v26 = vor.u32 %v4036_v40, %v4034_v30  ;;  %v4050_v30 = vrot.slane %v4048_v19, 1  ;;  %v10197_v16 = vld [vmem:[#allocation2 + $0x40] sm:$0xff]  }
 0x355   : > { %v2487_v5 = vpop.f32.mrb[134].mxu0  ;;  %v9147_v49 = vpop.f32.mrb[133].mxu1  ;;  %v4056_v40 = vshll.u32 %v10197_v16, 16 }
 0x356   : > { %v2586_v38 = vadd.f32 %v2487_v5, %v11863_v7  ;;  %v12129_v28 = vadd.f32 %v2980_v61, %v2585_v44  ;;  %v9072_v36 = vpop.f32.mrb[135].mxu0  ;;  %v2983_v45 = vpop.f32.mrb[134].mxu1  ;;  %v4043_v6 = vsel %vm1445_vm2, %v4038_v26, %v4042_v3 }
 0x357   : > { %v9148_v41 = vpop.f32.mrb[135].mxu1 }
 0x358   : > { %v12131_v22 = vadd.f32 %v2983_v45, %v2586_v38  ;;  %9362 = vmatmul.mubr.bf16.vlgmr.msra.gmra.mrb[240].mxu0 %v4035_v47  ;;  %v4052_v47 = vshrl.u32 %v10196_v55, 16 }
 0x359   : > { %9365 = vmatprep.mubr.msk.bf16.mxu0 %vm10737_vm0, %v10736_v21 }
 0x35b   : > { %v2492_v18 = vpop.f32.mrb[136].mxu0 }
 0x35c   : > { %v2587_v14 = vadd.f32 %v2492_v18, %v11881_v17  ;;  %v9075_v25 = vpop.f32.mrb[137].mxu0  ;;  %v2988_v53 = vpop.f32.mrb[136].mxu1  ;;  %v4046_v17 = vor.u32 %v4044_v31, %v4042_v3  ;;  %v4058_v3 = vrot.slane %v4056_v40, 1  ;;  %v10198_v18 = vld [vmem:[#allocation2 + $0x48] sm:$0xff]  }
 0x35d   : > { %v2495_v7 = vpop.f32.mrb[138].mxu0  ;;  %v9151_v20 = vpop.f32.mrb[137].mxu1  ;;  %v4064_v31 = vshll.u32 %v10198_v18, 16 }
 0x35e   : > { %v2588_v62 = vadd.f32 %v2495_v7, %v11884_v27  ;;  %v12138_v58 = vadd.f32 %v2988_v53, %v2587_v14  ;;  %v9076_v9 = vpop.f32.mrb[139].mxu0  ;;  %v2991_v46 = vpop.f32.mrb[138].mxu1  ;;  %v4051_v49 = vsel %vm1445_vm2, %v4046_v17, %v4050_v30 }
 0x35f   : > { %v9152_v34 = vpop.f32.mrb[139].mxu1 }
 0x360   : > { %v12140_v15 = vadd.f32 %v2991_v46, %v2588_v62  ;;  %9366 = vmatmul.mubr.bf16.gmra.mrb[244].mxu0 %v4043_v6  ;;  %v4060_v6 = vshrl.u32 %v10197_v16, 16 }
 0x361   : > { %9369 = vmatprep.mubr.msk.bf16.mxu0 %vm10737_vm0, %v10736_v21 }
 0x363   : > { %v2500_v44 = vpop.f32.mrb[140].mxu0 }
 0x364   : > { %v2589_v1 = vadd.f32 %v2500_v44, %v11902_v42  ;;  %v9079_v50 = vpop.f32.mrb[141].mxu0  ;;  %v2996_v61 = vpop.f32.mrb[140].mxu1  ;;  %v4054_v42 = vor.u32 %v4052_v47, %v4050_v30  ;;  %v4062_v30 = vor.u32 %v4060_v6, %v4058_v3  ;;  %v10199_v44 = vld [vmem:[#allocation2 + $0x50] sm:$0xff]  }
 0x365   : > { %v2503_v27 = vpop.f32.mrb[142].mxu0  ;;  %v9155_v5 = vpop.f32.mrb[141].mxu1  ;;  %v4072_v47 = vshll.u32 %v10199_v44, 16 }
 0x366   : > { %v2590_v57 = vadd.f32 %v2503_v27, %v11905_v35  ;;  %v12147_v38 = vadd.f32 %v2996_v61, %v2589_v1  ;;  %v9080_v36 = vpop.f32.mrb[143].mxu0  ;;  %v2999_v45 = vpop.f32.mrb[142].mxu1  ;;  %v4059_v20 = vsel %vm1445_vm2, %v4054_v42, %v4058_v3 }
 0x367   : > { %v9156_v41 = vpop.f32.mrb[143].mxu1  ;;  %v4074_v3 = vrot.slane %v4072_v47, 1 }
 0x368   : > { %v12149_v26 = vadd.f32 %v2999_v45, %v2590_v57  ;;  %9370 = vmatmul.mubr.bf16.gmra.mrb[248].mxu0 %v4051_v49  ;;  %v4068_v49 = vshrl.u32 %v10198_v18, 16 }
 0x369   : > { %9373 = vmatprep.mubr.msk.bf16.mxu0 %vm10737_vm0, %v10736_v21 }
 0x36b   : > { %v2508_v14 = vpop.f32.mrb[144].mxu0 }
 0x36c   : > { %v2591_v55 = vadd.f32 %v2508_v14, %v11923_v37  ;;  %v9083_v25 = vpop.f32.mrb[145].mxu0  ;;  %v3004_v53 = vpop.f32.mrb[144].mxu1  ;;  %v4066_v37 = vrot.slane %v4064_v31, 1  ;;  %v10200_v14 = vld [vmem:[#allocation2 + $0x58] sm:$0xff]  }
 0x36d   : > { %v2511_v35 = vpop.f32.mrb[146].mxu0  ;;  %v9159_v7 = vpop.f32.mrb[145].mxu1  ;;  %v4080_v6 = vshll.u32 %v10200_v14, 16 }
 0x36e   : > { %v2592_v19 = vadd.f32 %v2511_v35, %v11926_v13  ;;  %v12156_v62 = vadd.f32 %v3004_v53, %v2591_v55  ;;  %v9084_v9 = vpop.f32.mrb[147].mxu0  ;;  %v3007_v46 = vpop.f32.mrb[146].mxu1  ;;  %v4067_v5 = vsel %vm1445_vm2, %v4062_v30, %v4066_v37 }
 0x36f   : > { %v9160_v34 = vpop.f32.mrb[147].mxu1 }
 0x370   : > { %v12158_v17 = vadd.f32 %v3007_v46, %v2592_v19  ;;  %9374 = vmatmul.mubr.bf16.gmra.mrb[252].mxu0 %v4059_v20  ;;  %v4076_v20 = vshrl.u32 %v10199_v44, 16 }
 0x371   : > { %9377 = vmatprep.mubr.msk.bf16.mxu0 %vm10737_vm0, %v10736_v21 }
 0x373   : > { %v2516_v1 = vpop.f32.mrb[148].mxu0 }
 0x374   : > { %v2593_v16 = vadd.f32 %v2516_v1, %v11944_v43  ;;  %v9087_v50 = vpop.f32.mrb[149].mxu0  ;;  %v3012_v61 = vpop.f32.mrb[148].mxu1  ;;  %v4070_v43 = vor.u32 %v4068_v49, %v4066_v37  ;;  %v4082_v37 = vrot.slane %v4080_v6, 1  ;;  %v10201_v1 = vld [vmem:[#allocation2 + $0x60] sm:$0xff]  }
 0x375   : > { %v2519_v13 = vpop.f32.mrb[150].mxu0  ;;  %v9163_v27 = vpop.f32.mrb[149].mxu1  ;;  %v4088_v49 = vshll.u32 %v10201_v1, 16 }
 0x376   : > { %v2594_v40 = vadd.f32 %v2519_v13, %v11946_v23  ;;  %v12165_v57 = vadd.f32 %v3012_v61, %v2593_v16  ;;  %v9088_v36 = vpop.f32.mrb[151].mxu0  ;;  %v3015_v45 = vpop.f32.mrb[150].mxu1  ;;  %v4075_v7 = vsel %vm1445_vm2, %v4070_v43, %v4074_v3 }
 0x377   : > { %v9164_v41 = vpop.f32.mrb[151].mxu1 }
 0x378   : > { %v12167_v42 = vadd.f32 %v3015_v45, %v2594_v40  ;;  %9378 = vmatmul.mubr.bf16.gmra.mrb[0].mxu0 %v4067_v5  ;;  %v4084_v5 = vshrl.u32 %v10200_v14, 16 }
 0x379   : > { %9381 = vmatprep.mubr.msk.bf16.mxu0 %vm10737_vm0, %v10736_v21 }
 0x37b   : > { %v2524_v55 = vpop.f32.mrb[152].mxu0 }
 0x37c   : > { %v2595_v18 = vadd.f32 %v2524_v55, %v11963_v48  ;;  %v9091_v25 = vpop.f32.mrb[153].mxu0  ;;  %v3020_v53 = vpop.f32.mrb[152].mxu1  ;;  %v4078_v48 = vor.u32 %v4076_v20, %v4074_v3  ;;  %v4090_v3 = vrot.slane %v4088_v49, 1  ;;  %v10202_v55 = vld [vmem:[#allocation2 + $0x68] sm:$0xff]  }
 0x37d   : > { %v2527_v23 = vpop.f32.mrb[154].mxu0  ;;  %v9167_v35 = vpop.f32.mrb[153].mxu1  ;;  %v4096_v20 = vshll.u32 %v10202_v55, 16 }
 0x37e   : > { %v2596_v31 = vadd.f32 %v2527_v23, %v11965_v39  ;;  %v12174_v19 = vadd.f32 %v3020_v53, %v2595_v18  ;;  %v9092_v9 = vpop.f32.mrb[155].mxu0  ;;  %v3023_v46 = vpop.f32.mrb[154].mxu1  ;;  %v4083_v27 = vsel %vm1445_vm2, %v4078_v48, %v4082_v37 }
 0x37f   : > { %v9168_v34 = vpop.f32.mrb[155].mxu1 }
 0x380   : > { %v12176_v30 = vadd.f32 %v3023_v46, %v2596_v31  ;;  %9382 = vmatmul.mubr.bf16.gmra.mrb[4].mxu0 %v4075_v7  ;;  %v4092_v7 = vshrl.u32 %v10201_v1, 16 }
 0x381   : > { %9385 = vmatprep.mubr.msk.bf16.mxu0 %vm10737_vm0, %v10736_v21 }
 0x383   : > { %v2532_v16 = vpop.f32.mrb[156].mxu0 }
 0x384   : > { %v2597_v44 = vadd.f32 %v2532_v16, %v11982_v12  ;;  %v9095_v50 = vpop.f32.mrb[157].mxu0  ;;  %v3028_v61 = vpop.f32.mrb[156].mxu1  ;;  %v4086_v12 = vor.u32 %v4084_v5, %v4082_v37  ;;  %v4098_v37 = vrot.slane %v4096_v20, 1  ;;  %v10203_v16 = vld [vmem:[#allocation2 + $0x70] sm:$0xff]  }
 0x385   : > { %v2535_v39 = vpop.f32.mrb[158].mxu0  ;;  %v9171_v13 = vpop.f32.mrb[157].mxu1  ;;  %v4104_v5 = vshll.u32 %v10203_v16, 16 }
 0x386   : > { %v2598_v47 = vadd.f32 %v2535_v39, %v11984_v63  ;;  %v12183_v40 = vadd.f32 %v3028_v61, %v2597_v44  ;;  %v9096_v36 = vpop.f32.mrb[159].mxu0  ;;  %v3031_v45 = vpop.f32.mrb[158].mxu1  ;;  %v4091_v35 = vsel %vm1445_vm2, %v4086_v12, %v4090_v3 }
 0x387   : > { %v9172_v41 = vpop.f32.mrb[159].mxu1 }
 0x388   : > { %v12185_v43 = vadd.f32 %v3031_v45, %v2598_v47  ;;  %9386 = vmatmul.mubr.bf16.gmra.mrb[8].mxu0 %v4083_v27  ;;  %v4100_v27 = vshrl.u32 %v10202_v55, 16 }
 0x389   : > { %9389 = vmatprep.mubr.msk.bf16.mxu0 %vm10737_vm0, %v10736_v21 }
 0x38b   : > { %v2540_v18 = vpop.f32.mrb[160].mxu0 }
 0x38c   : > { %v2599_v14 = vadd.f32 %v2540_v18, %v12001_v29  ;;  %v9099_v25 = vpop.f32.mrb[161].mxu0  ;;  %v3036_v53 = vpop.f32.mrb[160].mxu1  ;;  %v4094_v29 = vor.u32 %v4092_v7, %v4090_v3  ;;  %v4106_v3 = vrot.slane %v4104_v5, 1  ;;  %v10204_v18 = vld [vmem:[#allocation2 + $0x78] sm:$0xff]  }
 0x38d   : > { %v2543_v63 = vpop.f32.mrb[162].mxu0  ;;  %v9175_v23 = vpop.f32.mrb[161].mxu1  ;;  %v4112_v7 = vshll.u32 %v10204_v18, 16 }
 0x38e   : > { %v2600_v6 = vadd.f32 %v2543_v63, %v12003_v56  ;;  %v12192_v31 = vadd.f32 %v3036_v53, %v2599_v14  ;;  %v9100_v9 = vpop.f32.mrb[163].mxu0  ;;  %v3039_v46 = vpop.f32.mrb[162].mxu1  ;;  %v4099_v13 = vsel %vm1445_vm2, %v4094_v29, %v4098_v37 }
 0x38f   : > { %v9176_v34 = vpop.f32.mrb[163].mxu1 }
 0x390   : > { %v12194_v48 = vadd.f32 %v3039_v46, %v2600_v6  ;;  %9390 = vmatmul.mubr.bf16.gmra.mrb[12].mxu0 %v4091_v35  ;;  %v4108_v35 = vshrl.u32 %v10203_v16, 16 }
 0x391   : > { %9393 = vmatprep.mubr.msk.bf16.mxu0 %vm10737_vm0, %v10736_v21 }
 0x393   : > { %v2548_v44 = vpop.f32.mrb[164].mxu0 }
 0x394   : > { %v2601_v1 = vadd.f32 %v2548_v44, %v12020_v54  ;;  %v9103_v50 = vpop.f32.mrb[165].mxu0  ;;  %v3044_v61 = vpop.f32.mrb[164].mxu1  ;;  %v4102_v54 = vor.u32 %v4100_v27, %v4098_v37  ;;  %v4114_v37 = vrot.slane %v4112_v7, 1  ;;  %v10205_v44 = vld [vmem:[#allocation2 + $0x80] sm:$0xff]  }
 0x395   : > { %v2551_v56 = vpop.f32.mrb[166].mxu0  ;;  %v9179_v39 = vpop.f32.mrb[165].mxu1  ;;  %v4120_v27 = vshll.u32 %v10205_v44, 16 }
 0x396   : > { %v2602_v49 = vadd.f32 %v2551_v56, %v12022_v51  ;;  %v12201_v47 = vadd.f32 %v3044_v61, %v2601_v1  ;;  %v9104_v36 = vpop.f32.mrb[167].mxu0  ;;  %v3047_v45 = vpop.f32.mrb[166].mxu1  ;;  %v4107_v23 = vsel %vm1445_vm2, %v4102_v54, %v4106_v3 }
 0x397   : > { %v9180_v41 = vpop.f32.mrb[167].mxu1 }
 0x398   : > { %v12203_v12 = vadd.f32 %v3047_v45, %v2602_v49  ;;  %9394 = vmatmul.mubr.bf16.gmra.mrb[16].mxu0 %v4099_v13  ;;  %v4116_v13 = vshrl.u32 %v10204_v18, 16 }
 0x399   : > { %9397 = vmatprep.mubr.msk.bf16.mxu0 %vm10737_vm0, %v10736_v21 }
 0x39b   : > { %v2556_v14 = vpop.f32.mrb[168].mxu0 }
 0x39c   : > { %v2603_v55 = vadd.f32 %v2556_v14, %v12039_v10  ;;  %v9107_v25 = vpop.f32.mrb[169].mxu0  ;;  %v3052_v53 = vpop.f32.mrb[168].mxu1  ;;  %v4110_v10 = vor.u32 %v4108_v35, %v4106_v3  ;;  %v4122_v3 = vrot.slane %v4120_v27, 1  ;;  %v10206_v14 = vld [vmem:[#allocation2 + $0x88] sm:$0xff]  }
 0x39d   : > { %v2559_v51 = vpop.f32.mrb[170].mxu0  ;;  %v9183_v63 = vpop.f32.mrb[169].mxu1  ;;  %v4128_v35 = vshll.u32 %v10206_v14, 16 }
 0x39e   : > { %v2604_v20 = vadd.f32 %v2559_v51, %v12041_v32  ;;  %v12210_v6 = vadd.f32 %v3052_v53, %v2603_v55  ;;  %v9108_v9 = vpop.f32.mrb[171].mxu0  ;;  %v3055_v46 = vpop.f32.mrb[170].mxu1  ;;  %v4115_v39 = vsel %vm1445_vm2, %v4110_v10, %v4114_v37 }
 0x39f   : > { %v9184_v34 = vpop.f32.mrb[171].mxu1 }
 0x3a0   : > { %v12212_v29 = vadd.f32 %v3055_v46, %v2604_v20  ;;  %9398 = vmatmul.mubr.bf16.gmra.mrb[20].mxu0 %v4107_v23  ;;  %v4124_v23 = vshrl.u32 %v10205_v44, 16 }
 0x3a1   : > { %9401 = vmatprep.mubr.msk.bf16.mxu0 %vm10737_vm0, %v10736_v21 }
 0x3a3   : > { %v2564_v1 = vpop.f32.mrb[172].mxu0 }
 0x3a4   : > { %v2605_v16 = vadd.f32 %v2564_v1, %v12058_v2  ;;  %v9111_v50 = vpop.f32.mrb[173].mxu0  ;;  %v3060_v61 = vpop.f32.mrb[172].mxu1  ;;  %v4118_v2 = vor.u32 %v4116_v13, %v4114_v37  ;;  %v4130_v37 = vrot.slane %v4128_v35, 1  ;;  %v10207_v1 = vld [vmem:[#allocation2 + $0x90] sm:$0xff]  }
 0x3a5   : > { %v2567_v32 = vpop.f32.mrb[174].mxu0  ;;  %v9187_v56 = vpop.f32.mrb[173].mxu1  ;;  %v4136_v13 = vshll.u32 %v10207_v1, 16 }
 0x3a6   : > { %v2606_v5 = vadd.f32 %v2567_v32, %v12060_v60  ;;  %v12219_v49 = vadd.f32 %v3060_v61, %v2605_v16  ;;  %v9112_v36 = vpop.f32.mrb[175].mxu0  ;;  %v3063_v45 = vpop.f32.mrb[174].mxu1  ;;  %v4123_v63 = vsel %vm1445_vm2, %v4118_v2, %v4122_v3 }
 0x3a7   : > { %v9188_v41 = vpop.f32.mrb[175].mxu1 }
 0x3a8   : > { %v12221_v54 = vadd.f32 %v3063_v45, %v2606_v5  ;;  %9402 = vmatmul.mubr.bf16.gmra.mrb[24].mxu0 %v4115_v39  ;;  %v4132_v39 = vshrl.u32 %v10206_v14, 16 }
 0x3a9   : > { %9405 = vmatprep.mubr.msk.bf16.mxu0 %vm10737_vm0, %v10736_v21 }
 0x3ab   : > { %v2572_v55 = vpop.f32.mrb[176].mxu0 }
 0x3ac   : > { %v2607_v18 = vadd.f32 %v2572_v55, %v12077_v11  ;;  %v9115_v25 = vpop.f32.mrb[177].mxu0  ;;  %v3068_v53 = vpop.f32.mrb[176].mxu1  ;;  %v4126_v11 = vor.u32 %v4124_v23, %v4122_v3  ;;  %v4138_v3 = vrot.slane %v4136_v13, 1  ;;  %v10208_v55 = vld [vmem:[#allocation2 + $0x98] ss:$0 sps:$4 sm:$0x11]  }
 0x3ad   : > { %v2575_v60 = vpop.f32.mrb[178].mxu0  ;;  %v9191_v51 = vpop.f32.mrb[177].mxu1  ;;  %v4144_v23 = vshll.u32 %v10208_v55, 16 }
 0x3ae   : > { %v2608_v7 = vadd.f32 %v2575_v60, %v12079_v33  ;;  %v12228_v20 = vadd.f32 %v3068_v53, %v2607_v18  ;;  %v9116_v9 = vpop.f32.mrb[179].mxu0  ;;  %v3071_v46 = vpop.f32.mrb[178].mxu1  ;;  %v4131_v56 = vsel %vm1445_vm2, %v4126_v11, %v4130_v37 }
 0x3af   : > { %v9192_v34 = vpop.f32.mrb[179].mxu1 }
 0x3b0   : > { %v12230_v10 = vadd.f32 %v3071_v46, %v2608_v7  ;;  %9406 = vmatmul.mubr.bf16.gmra.mrb[28].mxu0 %v4123_v63  ;;  %v4140_v63 = vshrl.u32 %v10207_v1, 16 }
 0x3b1   : > { %9409 = vmatprep.mubr.msk.bf16.mxu0 %vm10737_vm0, %v10736_v21 }
 0x3b3   : > { %v3471_v16 = vpop.f32.mrb[180].mxu0 }
 0x3b4   : > { %v3590_v44 = vadd.f32 %v3471_v16, %v12094_v24  ;;  %v9211_v50 = vpop.f32.mrb[181].mxu0  ;;  %v3749_v61 = vpop.f32.mrb[180].mxu1  ;;  %v4134_v24 = vor.u32 %v4132_v39, %v4130_v37  ;;  %v4146_v37 = vrot.slane %v4144_v23, 1 }
 0x3b5   : > { %v3474_v33 = vpop.f32.mrb[182].mxu0  ;;  %v9287_v32 = vpop.f32.mrb[181].mxu1 }
 0x3b6   : > { %v3591_v27 = vadd.f32 %v3474_v33, %v12096_v59  ;;  %v12237_v5 = vadd.f32 %v3749_v61, %v3590_v44  ;;  %v9212_v36 = vpop.f32.mrb[183].mxu0  ;;  %v3752_v45 = vpop.f32.mrb[182].mxu1  ;;  %v4139_v51 = vsel %vm1445_vm2, %v4134_v24, %v4138_v3 }
 0x3b7   : > { %v9288_v41 = vpop.f32.mrb[183].mxu1 }
 0x3b8   : > { %v12239_v2 = vadd.f32 %v3752_v45, %v3591_v27  ;;  %9410 = vmatmul.mubr.bf16.gmra.mrb[32].mxu0 %v4131_v56 }
 0x3b9   : > { %9413 = vmatprep.mubr.msk.bf16.mxu0 %vm10737_vm0, %v10736_v21 }
 0x3bb   : > { %v3479_v18 = vpop.f32.mrb[184].mxu0 }
 0x3bc   : > { %v3592_v14 = vadd.f32 %v3479_v18, %v12107_v0  ;;  %v9215_v25 = vpop.f32.mrb[185].mxu0  ;;  %v3757_v53 = vpop.f32.mrb[184].mxu1  ;;  %v4142_v0 = vor.u32 %v4140_v63, %v4138_v3 }
 0x3bd   : > { %v3482_v59 = vpop.f32.mrb[186].mxu0  ;;  %v9291_v60 = vpop.f32.mrb[185].mxu1 }
 0x3be   : > { %v3593_v35 = vadd.f32 %v3482_v59, %v12109_v8  ;;  %v12246_v7 = vadd.f32 %v3757_v53, %v3592_v14  ;;  %v9216_v9 = vpop.f32.mrb[187].mxu0  ;;  %v3760_v46 = vpop.f32.mrb[186].mxu1  ;;  %v4147_v33 = vsel %vm1445_vm2, %v4142_v0, %v4146_v37 }
 0x3bf   : > { %v9292_v34 = vpop.f32.mrb[187].mxu1 }
 0x3c0   : > { %v12248_v11 = vadd.f32 %v3760_v46, %v3593_v35  ;;  %9414 = vmatmul.mubr.bf16.gmra.mrb[36].mxu0 %v4139_v51 }
 0x3c1   : > { %9417 = vmatprep.mubr.msk.bf16.mxu0 %vm10737_vm0, %v10736_v21 }
 0x3c3   : > { %v3487_v16 = vpop.f32.mrb[188].mxu0 }
 0x3c4   : > { %v3594_v44 = vadd.f32 %v3487_v16, %v12120_v4  ;;  %v9219_v1 = vpop.f32.mrb[189].mxu0  ;;  %v3765_v50 = vpop.f32.mrb[188].mxu1 }
 0x3c5   : > { %v3490_v61 = vpop.f32.mrb[190].mxu0  ;;  %v9295_v8 = vpop.f32.mrb[189].mxu1 }
 0x3c6   : > { %v3595_v32 = vadd.f32 %v3490_v61, %v12122_v52  ;;  %v12255_v56 = vadd.f32 %v3765_v50, %v3594_v44  ;;  %v9220_v39 = vpop.f32.mrb[191].mxu0  ;;  %v3768_v13 = vpop.f32.mrb[190].mxu1 }
 0x3c7   : > { %v9296_v27 = vpop.f32.mrb[191].mxu1 }
 0x3c8   : > { %v12257_v36 = vadd.f32 %v3768_v13, %v3595_v32  ;;  %9418 = vmatmul.mubr.bf16.gmra.mrb[40].mxu0 %v4147_v33 }
 0x3cb   : > { %v3495_v21 = vpop.f32.mrb[192].mxu0 }
 0x3cc   : > { %v3596_v45 = vadd.f32 %v3495_v21, %v12129_v28  ;;  %v9223_v4 = vpop.f32.mrb[193].mxu0  ;;  %v3773_v41 = vpop.f32.mrb[192].mxu1 }
 0x3cd   : > { %v3498_v24 = vpop.f32.mrb[194].mxu0  ;;  %v9299_v3 = vpop.f32.mrb[193].mxu1 }
 0x3ce   : > { %v3597_v55 = vadd.f32 %v3498_v24, %v12131_v22  ;;  %v12261_v18 = vadd.f32 %v3773_v41, %v3596_v45  ;;  %v9224_v52 = vpop.f32.mrb[195].mxu0  ;;  %v3776_v14 = vpop.f32.mrb[194].mxu1 }
 0x3cf   : > { %v9300_v25 = vpop.f32.mrb[195].mxu1 }
 0x3d0   : > { %v12263_v53 = vadd.f32 %v3776_v14, %v3597_v55 }
 0x3d3   : > { %v3503_v59 = vpop.f32.mrb[196].mxu0 }
 0x3d4   : > { %v3598_v60 = vadd.f32 %v3503_v59, %v12138_v58  ;;  %v9227_v51 = vpop.f32.mrb[197].mxu0  ;;  %v3781_v63 = vpop.f32.mrb[196].mxu1 }
 0x3d5   : > { %v3506_v23 = vpop.f32.mrb[198].mxu0  ;;  %v9303_v28 = vpop.f32.mrb[197].mxu1 }
 0x3d6   : > { %v3599_v35 = vadd.f32 %v3506_v23, %v12140_v15  ;;  %v12267_v9 = vadd.f32 %v3781_v63, %v3598_v60  ;;  %v9228_v46 = vpop.f32.mrb[199].mxu0  ;;  %v3784_v22 = vpop.f32.mrb[198].mxu1 }
 0x3d7   : > { %v9304_v34 = vpop.f32.mrb[199].mxu1 }
 0x3d8   : > { %v12269_v0 = vadd.f32 %v3784_v22, %v3599_v35 }
 0x3db   : > { %v3511_v37 = vpop.f32.mrb[200].mxu0 }
 0x3dc   : > { %v3600_v16 = vadd.f32 %v3511_v37, %v12147_v38  ;;  %v9231_v44 = vpop.f32.mrb[201].mxu0  ;;  %v3789_v1 = vpop.f32.mrb[200].mxu1 }
 0x3dd   : > { %v3514_v50 = vpop.f32.mrb[202].mxu0  ;;  %v9307_v58 = vpop.f32.mrb[201].mxu1 }
 0x3de   : > { %v3601_v61 = vadd.f32 %v3514_v50, %v12149_v26  ;;  %v12273_v8 = vadd.f32 %v3789_v1, %v3600_v16  ;;  %v9232_v33 = vpop.f32.mrb[203].mxu0  ;;  %v3792_v15 = vpop.f32.mrb[202].mxu1 }
 0x3df   : > { %v9308_v32 = vpop.f32.mrb[203].mxu1 }
 0x3e0   : > { %v12275_v39 = vadd.f32 %v3792_v15, %v3601_v61 }
 0x3e3   : > { %v3519_v13 = vpop.f32.mrb[204].mxu0 }
 0x3e4   : > { %v3602_v27 = vadd.f32 %v3519_v13, %v12156_v62  ;;  %v9235_v21 = vpop.f32.mrb[205].mxu0  ;;  %v3797_v45 = vpop.f32.mrb[204].mxu1 }
 0x3e5   : > { %v3522_v4 = vpop.f32.mrb[206].mxu0  ;;  %v9311_v38 = vpop.f32.mrb[205].mxu1 }
 0x3e6   : > { %v3603_v41 = vadd.f32 %v3522_v4, %v12158_v17  ;;  %v12279_v24 = vadd.f32 %v3797_v45, %v3602_v27  ;;  %v9236_v3 = vpop.f32.mrb[207].mxu0  ;;  %v3800_v26 = vpop.f32.mrb[206].mxu1 }
 0x3e7   : > { %v9312_v55 = vpop.f32.mrb[207].mxu1 }
 0x3e8   : > { %v12281_v52 = vadd.f32 %v3800_v26, %v3603_v41 }
 0x3eb   : > { %v3527_v14 = vpop.f32.mrb[208].mxu0 }
 0x3ec   : > { %v3604_v25 = vadd.f32 %v3527_v14, %v12165_v57  ;;  %v9239_v59 = vpop.f32.mrb[209].mxu0  ;;  %v3805_v60 = vpop.f32.mrb[208].mxu1 }
 0x3ed   : > { %v3530_v51 = vpop.f32.mrb[210].mxu0  ;;  %v9315_v62 = vpop.f32.mrb[209].mxu1 }
 0x3ee   : > { %v3605_v63 = vadd.f32 %v3530_v51, %v12167_v42  ;;  %v12285_v23 = vadd.f32 %v3805_v60, %v3604_v25  ;;  %v9240_v28 = vpop.f32.mrb[211].mxu0  ;;  %v3808_v17 = vpop.f32.mrb[210].mxu1 }
 0x3ef   : > { %v9316_v35 = vpop.f32.mrb[211].mxu1 }
 0x3f0   : > { %v12287_v46 = vadd.f32 %v3808_v17, %v3605_v63 }
 0x3f3   : > { %v3535_v22 = vpop.f32.mrb[212].mxu0 }
 0x3f4   : > { %v3606_v34 = vadd.f32 %v3535_v22, %v12174_v19  ;;  %v9243_v37 = vpop.f32.mrb[213].mxu0  ;;  %v3813_v16 = vpop.f32.mrb[212].mxu1 }
 0x3f5   : > { %v3538_v44 = vpop.f32.mrb[214].mxu0  ;;  %v9319_v57 = vpop.f32.mrb[213].mxu1 }
 0x3f6   : > { %v3607_v1 = vadd.f32 %v3538_v44, %v12176_v30  ;;  %v12291_v50 = vadd.f32 %v3813_v16, %v3606_v34  ;;  %v9244_v58 = vpop.f32.mrb[215].mxu0  ;;  %v3816_v42 = vpop.f32.mrb[214].mxu1 }
 0x3f7   : > { %v9320_v61 = vpop.f32.mrb[215].mxu1 }
 0x3f8   : > { %v12293_v33 = vadd.f32 %v3816_v42, %v3607_v1 }
 0x3fb   : > { %v3543_v15 = vpop.f32.mrb[216].mxu0 }
 0x3fc   : > { %v3608_v32 = vadd.f32 %v3543_v15, %v12183_v40  ;;  %v9247_v13 = vpop.f32.mrb[217].mxu0  ;;  %v3821_v27 = vpop.f32.mrb[216].mxu1 }
 0x3fd   : > { %v3546_v21 = vpop.f32.mrb[218].mxu0  ;;  %v9323_v19 = vpop.f32.mrb[217].mxu1 }
 0x3fe   : > { %v3609_v45 = vadd.f32 %v3546_v21, %v12185_v43  ;;  %v12297_v4 = vadd.f32 %v3821_v27, %v3608_v32  ;;  %v9248_v38 = vpop.f32.mrb[219].mxu0  ;;  %v3824_v30 = vpop.f32.mrb[218].mxu1 }
 0x3ff   : > { %v9324_v41 = vpop.f32.mrb[219].mxu1 }
 0x400   : > { %v12299_v3 = vadd.f32 %v3824_v30, %v3609_v45 }
 0x403   : > { %v3551_v26 = vpop.f32.mrb[220].mxu0 }
 0x404   : > { %v3610_v55 = vadd.f32 %v3551_v26, %v12192_v31  ;;  %v9251_v14 = vpop.f32.mrb[221].mxu0  ;;  %v3829_v25 = vpop.f32.mrb[220].mxu1 }
 0x405   : > { %v3554_v59 = vpop.f32.mrb[222].mxu0  ;;  %v9327_v40 = vpop.f32.mrb[221].mxu1 }
 0x406   : > { %v3611_v60 = vadd.f32 %v3554_v59, %v12194_v48  ;;  %v12303_v51 = vadd.f32 %v3829_v25, %v3610_v55  ;;  %v9252_v62 = vpop.f32.mrb[223].mxu0  ;;  %v3832_v43 = vpop.f32.mrb[222].mxu1 }
 0x407   : > { %v9328_v63 = vpop.f32.mrb[223].mxu1 }
 0x408   : > { %v12305_v28 = vadd.f32 %v3832_v43, %v3611_v60 }
 0x40b   : > { %v3559_v17 = vpop.f32.mrb[224].mxu0 }
 0x40c   : > { %v3612_v35 = vadd.f32 %v3559_v17, %v12201_v47  ;;  %v9255_v22 = vpop.f32.mrb[225].mxu0  ;;  %v3837_v34 = vpop.f32.mrb[224].mxu1 }
 0x40d   : > { %v3562_v37 = vpop.f32.mrb[226].mxu0  ;;  %v9331_v31 = vpop.f32.mrb[225].mxu1 }
 0x40e   : > { %v3613_v16 = vadd.f32 %v3562_v37, %v12203_v12  ;;  %v12309_v44 = vadd.f32 %v3837_v34, %v3612_v35  ;;  %v9256_v57 = vpop.f32.mrb[227].mxu0  ;;  %v3840_v48 = vpop.f32.mrb[226].mxu1 }
 0x40f   : > { %v9332_v1 = vpop.f32.mrb[227].mxu1 }
 0x410   : > { %v12311_v58 = vadd.f32 %v3840_v48, %v3613_v16  ;;  %v4461_v16 = vlaneseq }
 0x413   : > { %v3567_v42 = vpop.f32.mrb[228].mxu0 }
 0x414   : > { %v3614_v61 = vadd.f32 %v3567_v42, %v12210_v6  ;;  %v9259_v15 = vpop.f32.mrb[229].mxu0  ;;  %v3845_v32 = vpop.f32.mrb[228].mxu1  ;;  %v12331_v42 = vld [vmem:[#allocation12] ss:$0 sm:$0xff] }
 0x415   : > { %v3570_v13 = vpop.f32.mrb[230].mxu0  ;;  %v9335_v47 = vpop.f32.mrb[229].mxu1 }
 0x416   : > { %v3615_v27 = vadd.f32 %v3570_v13, %v12212_v29  ;;  %v12315_v21 = vadd.f32 %v3845_v32, %v3614_v61  ;;  %v9260_v19 = vpop.f32.mrb[231].mxu0  ;;  %v3848_v12 = vpop.f32.mrb[230].mxu1  ;;  %v12333_v61 = vshrl.u32 %v4461_v16, 7 }
 0x417   : > { %v9336_v45 = vpop.f32.mrb[231].mxu1 }
 0x418   : > { %v12317_v38 = vadd.f32 %v3848_v12, %v3615_v27  ;;  %vm4465_vm3 = vcmp.ge.s32.totalorder %v12333_v61, 1 }
 0x41b   : > { %v3575_v30 = vpop.f32.mrb[232].mxu0 }
 0x41c   : > { %v3616_v41 = vadd.f32 %v3575_v30, %v12219_v49  ;;  %v9263_v26 = vpop.f32.mrb[233].mxu0  ;;  %v3853_v55 = vpop.f32.mrb[232].mxu1 }
 0x41d   : > { %v3578_v14 = vpop.f32.mrb[234].mxu0  ;;  %v9339_v6 = vpop.f32.mrb[233].mxu1 }
 0x41e   : > { %v3617_v25 = vadd.f32 %v3578_v14, %v12221_v54  ;;  %v12321_v59 = vadd.f32 %v3853_v55, %v3616_v41  ;;  %v9264_v40 = vpop.f32.mrb[235].mxu0  ;;  %v3856_v29 = vpop.f32.mrb[234].mxu1  ;;  %v12344_v55 = vadd.s32 16, %v12333_v61 }
 0x41f   : > { %v9340_v60 = vpop.f32.mrb[235].mxu1 }
 0x420   : > { %v12323_v62 = vadd.f32 %v3856_v29, %v3617_v25  ;;  %vm4470_vm4 = vcmp.le.s32.totalorder %v12344_v55, 16 }
 0x423   : > { %v3583_v43 = vpop.f32.mrb[236].mxu0 }
 0x424   : > { %v3618_v63 = vadd.f32 %v3583_v43, %v12228_v20  ;;  %v9267_v17 = vpop.f32.mrb[237].mxu0  ;;  %v3861_v35 = vpop.f32.mrb[236].mxu1 }
 0x425   : > { %v3586_v22 = vpop.f32.mrb[238].mxu0  ;;  %v9343_v49 = vpop.f32.mrb[237].mxu1 }
 0x426   : > { %v3619_v34 = vadd.f32 %v3586_v22, %v12230_v10  ;;  %v12327_v37 = vadd.f32 %v3861_v35, %v3618_v63  ;;  %v9268_v31 = vpop.f32.mrb[239].mxu0  ;;  %v3864_v54 = vpop.f32.mrb[238].mxu1 }
 0x427   : > { %v9344_v57 = vpop.f32.mrb[239].mxu1 }
 0x428   : > { %v12329_v48 = vadd.f32 %v3864_v54, %v3619_v34 }
 0x42b   : > { %v4245_v1 = vpop.f32.mrb[240].mxu0 }
 0x42c   : > { %v4364_v20 = vadd.f32 %v4245_v1, %v12237_v5  ;;  %v9363_v15 = vpop.f32.mrb[241].mxu0 }
 0x42d   : > { %v4248_v32 = vpop.f32.mrb[242].mxu0 }
 0x42e   : > { %v4401_v13 = vadd.f32 %v12331_v42, %v4364_v20  ;;  %v4365_v10 = vadd.f32 %v4248_v32, %v12239_v2  ;;  %v9364_v47 = vpop.f32.mrb[243].mxu0 }
 0x430   : > { %v4431_v27 = vmax.f32 %v4401_v13, 0.0  ;;  %v4402_v19 = vadd.f32 %v12331_v42, %v4365_v10 }
 0x432   : > { %v4480_v12 = vsel %vm4465_vm3, %v4431_v27, 0.0  ;;  %v4432_v45 = vmax.f32 %v4402_v19, 0.0 }
 0x433   : > { %v4253_v30 = vpop.f32.mrb[244].mxu0 }
 0x434   : > { %v8245_v41 = vpack.c.bf16 %v4432_v45, %v4480_v12  ;;  %v4366_v5 = vadd.f32 %v4253_v30, %v12246_v7  ;;  %v9367_v26 = vpop.f32.mrb[245].mxu0 }
 0x435   : > { %v4256_v14 = vpop.f32.mrb[246].mxu0 }
 0x436   : > { %8246 = vst [vmem:[#allocation3] sm:$0xff] %v8245_v41   ;;  %v4403_v2 = vadd.f32 %v12331_v42, %v4366_v5  ;;  %v4367_v6 = vadd.f32 %v4256_v14, %v12248_v11  ;;  %v9368_v25 = vpop.f32.mrb[247].mxu0 }
 0x438   : > { %v4433_v40 = vmax.f32 %v4403_v2, 0.0  ;;  %v4404_v29 = vadd.f32 %v12331_v42, %v4367_v6 }
 0x43a   : > { %v4434_v60 = vmax.f32 %v4404_v29, 0.0  ;;  %v4482_v7 = vsel %vm4470_vm4, %v4433_v40, 0.0 }
 0x43b   : > { %v4261_v43 = vpop.f32.mrb[248].mxu0 }
 0x43c   : > { %v4483_v63 = vsel %vm4465_vm3, %v4434_v60, 0.0  ;;  %v4368_v17 = vadd.f32 %v4261_v43, %v12255_v56  ;;  %v9371_v35 = vpop.f32.mrb[249].mxu0 }
 0x43d   : > { %v8250_v22 = vpack.c.bf16 %v4483_v63, %v4482_v7  ;;  %v4264_v49 = vpop.f32.mrb[250].mxu0 }
 0x43e   : > { %v4369_v11 = vadd.f32 %v4264_v49, %v12257_v36  ;;  %v9372_v34 = vpop.f32.mrb[251].mxu0  ;;  %v4405_v31 = vadd.f32 %v12331_v42, %v4368_v17 }
 0x43f   : > { %8333 = vst [vmem:[#allocation3 + $0x8] sm:$0xff] %v8250_v22  }
 0x440   : > { %v4406_v54 = vadd.f32 %v12331_v42, %v4369_v11  ;;  %v4435_v57 = vmax.f32 %v4405_v31, 0.0 }
 0x442   : > { %v4436_v16 = vmax.f32 %v4406_v54, 0.0 }
 0x443   : > { %v4269_v1 = vpop.f32.mrb[252].mxu0 }
 0x444   : > { %v4485_v20 = vsel %vm4470_vm4, %v4436_v16, 0.0  ;;  %v4370_v15 = vadd.f32 %v4269_v1, %v12261_v18  ;;  %v9375_v56 = vpop.f32.mrb[253].mxu0 }
 0x445   : > { %v8255_v32 = vpack.c.bf16 %v4485_v20, %v4435_v57  ;;  %v4272_v13 = vpop.f32.mrb[254].mxu0 }
 0x446   : > { %v4407_v10 = vadd.f32 %v12331_v42, %v4370_v15  ;;  %v4371_v36 = vadd.f32 %v4272_v13, %v12263_v53  ;;  %v9376_v47 = vpop.f32.mrb[255].mxu0 }
 0x447   : > { %8334 = vst [vmem:[#allocation3 + $0x10] sm:$0xff] %v8255_v32  }
 0x448   : > { %v4437_v27 = vmax.f32 %v4407_v10, 0.0  ;;  %v4408_v19 = vadd.f32 %v12331_v42, %v4371_v36 }
 0x44a   : > { %v4486_v12 = vsel %vm4465_vm3, %v4437_v27, 0.0  ;;  %v4438_v45 = vmax.f32 %v4408_v19, 0.0 }
 0x44b   : > { %v4277_v30 = vpop.f32.mrb[0].mxu0 }
 0x44c   : > { %v8260_v41 = vpack.c.bf16 %v4438_v45, %v4486_v12  ;;  %v4372_v18 = vadd.f32 %v4277_v30, %v12267_v9  ;;  %v9379_v5 = vpop.f32.mrb[1].mxu0 }
 0x44d   : > { %v4280_v26 = vpop.f32.mrb[2].mxu0 }
 0x44e   : > { %8335 = vst [vmem:[#allocation3 + $0x18] sm:$0xff] %v8260_v41   ;;  %v4409_v14 = vadd.f32 %v12331_v42, %v4372_v18  ;;  %v4373_v53 = vadd.f32 %v4280_v26, %v12269_v0  ;;  %v9380_v2 = vpop.f32.mrb[3].mxu0 }
 0x450   : > { %v4439_v6 = vmax.f32 %v4409_v14, 0.0  ;;  %v4410_v25 = vadd.f32 %v12331_v42, %v4373_v53 }
 0x452   : > { %v4440_v40 = vmax.f32 %v4410_v25, 0.0  ;;  %v4488_v60 = vsel %vm4470_vm4, %v4439_v6, 0.0 }
 0x453   : > { %v4285_v29 = vpop.f32.mrb[4].mxu0 }
 0x454   : > { %v4489_v43 = vsel %vm4465_vm3, %v4440_v40, 0.0  ;;  %v4374_v9 = vadd.f32 %v4285_v29, %v12273_v8  ;;  %v9383_v7 = vpop.f32.mrb[5].mxu0 }
 0x455   : > { %v8265_v63 = vpack.c.bf16 %v4489_v43, %v4488_v60  ;;  %v4288_v17 = vpop.f32.mrb[6].mxu0 }
 0x456   : > { %v4375_v35 = vadd.f32 %v4288_v17, %v12275_v39  ;;  %v9384_v0 = vpop.f32.mrb[7].mxu0  ;;  %v4411_v22 = vadd.f32 %v12331_v42, %v4374_v9 }
 0x457   : > { %8336 = vst [vmem:[#allocation3 + $0x20] sm:$0xff] %v8265_v63  }
 0x458   : > { %v4412_v49 = vadd.f32 %v12331_v42, %v4375_v35  ;;  %v4441_v34 = vmax.f32 %v4411_v22, 0.0 }
 0x45a   : > { %v4442_v11 = vmax.f32 %v4412_v49, 0.0 }
 0x45b   : > { %v4293_v31 = vpop.f32.mrb[8].mxu0 }
 0x45c   : > { %v4491_v54 = vsel %vm4470_vm4, %v4442_v11, 0.0  ;;  %v4376_v16 = vadd.f32 %v4293_v31, %v12279_v24  ;;  %v9387_v8 = vpop.f32.mrb[9].mxu0 }
 0x45d   : > { %v8270_v57 = vpack.c.bf16 %v4491_v54, %v4441_v34  ;;  %v4296_v1 = vpop.f32.mrb[10].mxu0 }
 0x45e   : > { %v4413_v20 = vadd.f32 %v12331_v42, %v4376_v16  ;;  %v4377_v39 = vadd.f32 %v4296_v1, %v12281_v52  ;;  %v9388_v15 = vpop.f32.mrb[11].mxu0 }
 0x45f   : > { %8337 = vst [vmem:[#allocation3 + $0x28] sm:$0xff] %v8270_v57  }
 0x460   : > { %v4443_v56 = vmax.f32 %v4413_v20, 0.0  ;;  %v4414_v32 = vadd.f32 %v12331_v42, %v4377_v39 }
 0x462   : > { %v4492_v13 = vsel %vm4465_vm3, %v4443_v56, 0.0  ;;  %v4444_v10 = vmax.f32 %v4414_v32, 0.0 }
 0x463   : > { %v4301_v36 = vpop.f32.mrb[12].mxu0 }
 0x464   : > { %v8275_v47 = vpack.c.bf16 %v4444_v10, %v4492_v13  ;;  %v4378_v24 = vadd.f32 %v4301_v36, %v12285_v23  ;;  %v9391_v27 = vpop.f32.mrb[13].mxu0 }
 0x465   : > { %v4304_v19 = vpop.f32.mrb[14].mxu0 }
 0x466   : > { %8338 = vst [vmem:[#allocation3 + $0x30] sm:$0xff] %v8275_v47   ;;  %v4415_v12 = vadd.f32 %v12331_v42, %v4378_v24  ;;  %v4379_v52 = vadd.f32 %v4304_v19, %v12287_v46  ;;  %v9392_v45 = vpop.f32.mrb[15].mxu0 }
 0x468   : > { %v4445_v30 = vmax.f32 %v4415_v12, 0.0  ;;  %v4416_v41 = vadd.f32 %v12331_v42, %v4379_v52 }
 0x46a   : > { %v4446_v18 = vmax.f32 %v4416_v41, 0.0  ;;  %v4494_v26 = vsel %vm4470_vm4, %v4445_v30, 0.0 }
 0x46b   : > { %v4309_v5 = vpop.f32.mrb[16].mxu0 }
 0x46c   : > { %v4495_v14 = vsel %vm4465_vm3, %v4446_v18, 0.0  ;;  %v4380_v23 = vadd.f32 %v4309_v5, %v12291_v50  ;;  %v9395_v53 = vpop.f32.mrb[17].mxu0 }
 0x46d   : > { %v8280_v2 = vpack.c.bf16 %v4495_v14, %v4494_v26  ;;  %v4312_v6 = vpop.f32.mrb[18].mxu0 }
 0x46e   : > { %v4381_v25 = vadd.f32 %v4312_v6, %v12293_v33  ;;  %v9396_v46 = vpop.f32.mrb[19].mxu0  ;;  %v4417_v40 = vadd.f32 %v12331_v42, %v4380_v23 }
 0x46f   : > { %8339 = vst [vmem:[#allocation3 + $0x38] sm:$0xff] %v8280_v2  }
 0x470   : > { %v4418_v29 = vadd.f32 %v12331_v42, %v4381_v25  ;;  %v4447_v43 = vmax.f32 %v4417_v40, 0.0 }
 0x472   : > { %v4448_v60 = vmax.f32 %v4418_v29, 0.0 }
 0x473   : > { %v4317_v9 = vpop.f32.mrb[20].mxu0 }
 0x474   : > { %v4497_v7 = vsel %vm4470_vm4, %v4448_v60, 0.0  ;;  %v4382_v63 = vadd.f32 %v4317_v9, %v12297_v4  ;;  %v9399_v50 = vpop.f32.mrb[21].mxu0 }
 0x475   : > { %v8285_v17 = vpack.c.bf16 %v4497_v7, %v4447_v43  ;;  %v4320_v35 = vpop.f32.mrb[22].mxu0 }
 0x476   : > { %v4419_v0 = vadd.f32 %v12331_v42, %v4382_v63  ;;  %v4383_v33 = vadd.f32 %v4320_v35, %v12299_v3  ;;  %v9400_v22 = vpop.f32.mrb[23].mxu0 }
 0x477   : > { %8340 = vst [vmem:[#allocation3 + $0x40] sm:$0xff] %v8285_v17  }
 0x478   : > { %v4449_v49 = vmax.f32 %v4419_v0, 0.0  ;;  %v4420_v11 = vadd.f32 %v12331_v42, %v4383_v33 }
 0x47a   : > { %v4498_v34 = vsel %vm4465_vm3, %v4449_v49, 0.0  ;;  %v4450_v31 = vmax.f32 %v4420_v11, 0.0 }
 0x47b   : > { %v4325_v54 = vpop.f32.mrb[24].mxu0 }
 0x47c   : > { %v8290_v16 = vpack.c.bf16 %v4450_v31, %v4498_v34  ;;  %v4384_v4 = vadd.f32 %v4325_v54, %v12303_v51  ;;  %v9403_v8 = vpop.f32.mrb[25].mxu0 }
 0x47d   : > { %v4328_v57 = vpop.f32.mrb[26].mxu0 }
 0x47e   : > { %8341 = vst [vmem:[#allocation3 + $0x48] sm:$0xff] %v8290_v16   ;;  %v4421_v1 = vadd.f32 %v12331_v42, %v4384_v4  ;;  %v4385_v3 = vadd.f32 %v4328_v57, %v12305_v28  ;;  %v9404_v20 = vpop.f32.mrb[27].mxu0 }
 0x480   : > { %v4451_v39 = vmax.f32 %v4421_v1, 0.0  ;;  %v4422_v15 = vadd.f32 %v12331_v42, %v4385_v3 }
 0x482   : > { %v4452_v56 = vmax.f32 %v4422_v15, 0.0  ;;  %v4500_v13 = vsel %vm4470_vm4, %v4451_v39, 0.0 }
 0x483   : > { %v4333_v32 = vpop.f32.mrb[28].mxu0 }
 0x484   : > { %v4501_v10 = vsel %vm4465_vm3, %v4452_v56, 0.0  ;;  %v4386_v51 = vadd.f32 %v4333_v32, %v12309_v44  ;;  %v9407_v36 = vpop.f32.mrb[29].mxu0 }
 0x485   : > { %v8295_v47 = vpack.c.bf16 %v4501_v10, %v4500_v13  ;;  %v4336_v24 = vpop.f32.mrb[30].mxu0 }
 0x486   : > { %v4387_v27 = vadd.f32 %v4336_v24, %v12311_v58  ;;  %v9408_v28 = vpop.f32.mrb[31].mxu0  ;;  %v4423_v19 = vadd.f32 %v12331_v42, %v4386_v51 }
 0x487   : > { %8342 = vst [vmem:[#allocation3 + $0x50] sm:$0xff] %v8295_v47  }
 0x488   : > { %v4424_v12 = vadd.f32 %v12331_v42, %v4387_v27  ;;  %v4453_v45 = vmax.f32 %v4423_v19, 0.0 }
 0x48a   : > { %v4454_v52 = vmax.f32 %v4424_v12, 0.0 }
 0x48b   : > { %v4341_v30 = vpop.f32.mrb[32].mxu0 }
 0x48c   : > { %v4503_v41 = vsel %vm4470_vm4, %v4454_v52, 0.0  ;;  %v4388_v18 = vadd.f32 %v4341_v30, %v12315_v21  ;;  %v9411_v44 = vpop.f32.mrb[33].mxu0 }
 0x48d   : > { %v8300_v5 = vpack.c.bf16 %v4503_v41, %v4453_v45  ;;  %v4344_v26 = vpop.f32.mrb[34].mxu0 }
 0x48e   : > { %v4425_v14 = vadd.f32 %v12331_v42, %v4388_v18  ;;  %v4389_v58 = vadd.f32 %v4344_v26, %v12317_v38  ;;  %v9412_v23 = vpop.f32.mrb[35].mxu0 }
 0x48f   : > { %8343 = vst [vmem:[#allocation3 + $0x58] sm:$0xff] %v8300_v5  }
 0x490   : > { %v4455_v53 = vmax.f32 %v4425_v14, 0.0  ;;  %v4426_v2 = vadd.f32 %v12331_v42, %v4389_v58 }
 0x492   : > { %v4504_v6 = vsel %vm4465_vm3, %v4455_v53, 0.0  ;;  %v4456_v25 = vmax.f32 %v4426_v2, 0.0 }
 0x493   : > { %v4349_v46 = vpop.f32.mrb[36].mxu0 }
 0x494   : > { %v8305_v40 = vpack.c.bf16 %v4456_v25, %v4504_v6  ;;  %v4390_v21 = vadd.f32 %v4349_v46, %v12321_v59  ;;  %v9415_v29 = vpop.f32.mrb[37].mxu0 }
 0x495   : > { %v4352_v60 = vpop.f32.mrb[38].mxu0 }
 0x496   : > { %8344 = vst [vmem:[#allocation3 + $0x60] sm:$0xff] %v8305_v40   ;;  %v4427_v43 = vadd.f32 %v12331_v42, %v4390_v21  ;;  %v4391_v38 = vadd.f32 %v4352_v60, %v12323_v62  ;;  %v9416_v9 = vpop.f32.mrb[39].mxu0 }
 0x498   : > { %v4457_v7 = vmax.f32 %v4427_v43, 0.0  ;;  %v4428_v63 = vadd.f32 %v12331_v42, %v4391_v38 }
 0x49a   : > { %v4458_v50 = vmax.f32 %v4428_v63, 0.0  ;;  %v4506_v35 = vsel %vm4470_vm4, %v4457_v7, 0.0 }
 0x49b   : > { %v4357_v17 = vpop.f32.mrb[40].mxu0 }
 0x49c   : > { %v4507_v0 = vsel %vm4465_vm3, %v4458_v50, 0.0  ;;  %v4392_v59 = vadd.f32 %v4357_v17, %v12327_v37  ;;  %v9419_v33 = vpop.f32.mrb[41].mxu0  ;;  %v10738_v37 = vmov (!%p7811_p2), 0  }
 0x49d   : > { %v8310_v22 = vpack.c.bf16 %v4507_v0, %v4506_v35  ;;  %v4360_v49 = vpop.f32.mrb[42].mxu0  ;;  %4663 = vst [vmem:[#allocation3] sm:$0xf] (!%p7811_p2), %v10738_v37  ;;  %4664 = vst [vmem:[#allocation3 + $0x4] sm:$0xf] (!%p7811_p2), %v10738_v37 }
 0x49e   : > { %v4393_v11 = vadd.f32 %v4360_v49, %v12329_v48  ;;  %v9420_v62 = vpop.f32.mrb[43].mxu0  ;;  %v4429_v34 = vadd.f32 %v12331_v42, %v4392_v59  ;;  %4665 = vst [vmem:[#allocation3 + $0x8] sm:$0xf] (!%p7811_p2), %v10738_v37 }
 0x49f   : > { %8345 = vst [vmem:[#allocation3 + $0x68] sm:$0xff] %v8310_v22  }
 0x4a0   : > { %v4430_v31 = vadd.f32 %v12331_v42, %v4393_v11  ;;  %v4459_v16 = vmax.f32 %v4429_v34, 0.0 }
 0x4a1   : > { %4662 = sbr.rel (%p7811_p2) target bundleno = 1192 (0x4a8), region = 88 }
 0x4a2   : > { %v4460_v54 = vmax.f32 %v4430_v31, 0.0 }
 0x4a4   : > { %v4509_v4 = vsel %vm4470_vm4, %v4460_v54, 0.0 }
 0x4a5   : > { %v8315_v61 = vpack.c.bf16 %v4509_v4, %v4459_v16 }
 0x4a7   : > { %8346 = vst [vmem:[#allocation3 + $0x70] sm:$0xff] %v8315_v61  }
 0x4a8 PF: > { %4668 = sbr.rel (%p7812_p12) target bundleno = 1199 (0x4af), region = 92  ;;  %v10739_v48 = vmov (!%p7812_p12), 0  }
 0x4a9   : > { %4669 = vst [vmem:[#allocation3 + $0x6c] sm:$0xf] (!%p7812_p12), %v10739_v48  ;;  %4670 = vst [vmem:[#allocation3 + $0x70] sm:$0xf] (!%p7812_p12), %v10739_v48 }
 0x4aa   : > { %4671 = vst [vmem:[#allocation3 + $0x74] sm:$0xf] (!%p7812_p12), %v10739_v48 }
 0x4af PF: > { %v10209_v42 = vld [vmem:[#allocation13 + $0x40] sm:$0xff]   ;;  %v10210_v55 = vld [vmem:[#allocation13 + $0x48] sm:$0xff]   ;;  %v10211_v8 = vld [vmem:[#allocation13 + $0x50] sm:$0xff]   ;;  %vm5276_vm5 = vcmask 1046528   ;;  %s13417_s2 = sld [smem:[#allocation28_spill]]  ;;  %s13418_s18 = sld [smem:[#allocation29_spill]] }
 0x4b0   : > { %9421 = vmatprep.subr.bf16.mxu1 %v10209_v42  ;;  %v10212_v57 = vld [vmem:[#allocation13 + $0x58] sm:$0xff]   ;;  %v12449_v39 = vld [vmem:[#allocation3 + $0x8] sm:$0xff]   ;;  %v12455_v27 = vld [vmem:[#allocation3 + $0x10] sm:$0xff]   ;;  %s13419_s22 = sld [smem:[#allocation34_spill]]  ;;  %s7602_s21 = sshll.u32 %s11259_s15, 4  ;;  %s13234_s21 = int_to_ptr.vmem [resolvable:$true] %s7602_s21 }
 0x4b1   : > { %9422 = vmatpush3.bf16.msra.mxu1 %v10209_v42  ;;  %v4672_v1 = vld [vmem:[#allocation3] sm:$0xf]  ;;  %v12444_v3 = vld [vmem:[#allocation3 + $0x4] sm:$0xf]  ;;  %v4801_v32 = vshll.u32 %v12449_v39, 16  ;;  %v10214_v36 = vld [vmem:[#allocation13 + $0x68] sm:$0xff]  }
 0x4b2   : > { %9423 = vmatprep.subr.bf16.mxu1 %v10210_v55  ;;  %v12447_v20 = vcombine.low %v4672_v1, %v12444_v3  ;;  %v10213_v13 = vld [vmem:[#allocation13 + $0x60] sm:$0xff]   ;;  %v10215_v28 = vld [vmem:[#allocation13 + $0x70] sm:$0xff]   ;;  %v4805_v52 = vshrl.u32 %v12449_v39, 16  ;;  %v4809_v45 = vshll.u32 %v12455_v27, 16  ;;  %v10216_v30 = vld [vmem:[#allocation13 + $0x78] sm:$0xff]   ;;  %v4813_v41 = vshrl.u32 %v12455_v27, 16 }
 0x4b3   : > { %v4803_v51 = vrot.slane %v4801_v32, 1  ;;  %v12457_v19 = vld [vmem:[#allocation3 + $0x18] sm:$0xff]   ;;  %v10228_v12 = vld [vmem:[#allocation13 + $0xc0] sm:$0xff]   ;;  %v10232_v44 = vld [vmem:[#allocation13 + $0xc8] sm:$0xff]   ;;  %s7586_s30 = scalar_lea.sflag [#allocation6], %s11217_s17  ;;  %s10561_s24 = scalar_lea.vmem %s13234_s21, 2048 }
 0x4b4   : > { %v4794_v15 = vshrl.u32 %v12447_v20, 16  ;;  %v4796_v56 = vshll.u32 %v12447_v20, 16  ;;  %9541 = vmatprep.subr.bf16.mxu0 %v10228_v12  ;;  %v4817_v18 = vshll.u32 %v12457_v19, 16  ;;  %v4811_v5 = vrot.slane %v4809_v45, 1  ;;  %v10220_v26 = vld [vmem:[#allocation13] sm:$0xff]   ;;  %v10233_v58 = vld [vmem:[#allocation13 + $0xd0] sm:$0xff]   ;;  %p10562_p0 = scmp.ne.s32.totalorder %s13234_s21, %s10561_s24 }
 0x4b5   : > { %9424 = vmatpush3.bf16.msra.mxu1 %v10210_v55  ;;  %9542 = vmatpush3.bf16.msra.mxu0 %v10228_v12  ;;  %v12463_v14 = vld [vmem:[#allocation3 + $0x20] sm:$0xff]   ;;  %v4807_v23 = vor.u32 %v4805_v52, %v4803_v51  ;;  %v12465_v6 = vld [vmem:[#allocation3 + $0x28] sm:$0xff]   ;;  %v4821_v29 = vshrl.u32 %v12457_v19, 16  ;;  %v12473_v63 = vld [vmem:[#allocation3 + $0x30] sm:$0xff]   ;;  %s8241_s23 = sshll.u32 %s13417_s2, 4  ;;  %s8201_s5 = sshll.u32 %s13418_s18, 5 }
 0x4b6   : > { %9425 = vmatprep.subr.bf16.mxu1 %v10211_v8  ;;  %v4798_v10 = vrot.slane %v4796_v56, 1  ;;  %9543 = vmatprep.subr.bf16.mxu0 %v10232_v44  ;;  %v4815_v53 = vor.u32 %v4813_v41, %v4811_v5  ;;  %v4819_v2 = vrot.slane %v4817_v18, 1  ;;  %v4825_v25 = vshll.u32 %v12463_v14, 16  ;;  %v10237_v46 = vld [vmem:[#allocation13 + $0xd8] sm:$0xff]   ;;  %v10221_v21 = vld [vmem:[#allocation13 + $0x8] sm:$0xff]   ;;  %v10239_v9 = vld [vmem:[#allocation13 + $0xe0] sm:$0xff]   ;;  %s7599_s10 = sadd.s32 %s8241_s23, %s8201_s5 }
 0x4b7   : > { %v4812_v40 = vsel %vm1445_vm2, %v4807_v23, %v4811_v5  ;;  %v4829_v43 = vshrl.u32 %v12463_v14, 16  ;;  %v4833_v38 = vshll.u32 %v12465_v6, 16  ;;  %v10224_v17 = vld [vmem:[#allocation13 + $0x10] sm:$0xff]   ;;  %v10242_v33 = vld [vmem:[#allocation13 + $0xe8] sm:$0xff]   ;;  %v4841_v22 = vshll.u32 %v12473_v63, 16  ;;  %v10227_v49 = vld [vmem:[#allocation13 + $0x18] sm:$0xff]  }
 0x4b8   : > { %v4799_v47 = vor.u32 %v4798_v10, %v4794_v15  ;;  %v4820_v60 = vsel %vm1445_vm2, %v4815_v53, %v4819_v2  ;;  %v4827_v7 = vrot.slane %v4825_v25, 1  ;;  %v4823_v50 = vor.u32 %v4821_v29, %v4819_v2  ;;  %v12475_v59 = vld [vmem:[#allocation3 + $0x38] sm:$0xff]   ;;  %v10247_v4 = vld [vmem:[#allocation3 + $0xc] sm:$0xff]   ;;  %v12483_v37 = vld [vmem:[#allocation3 + $0x40] sm:$0xff]   ;;  %s8202_s4 = sshll.u32 %s7599_s10, 7  ;;  %p13422_p1 = scmp.ne.s32.totalorder %s13419_s22, 0 }
 0x4b9   : > { %9426 = vmatpush3.bf16.msra.mxu1 %v10211_v8  ;;  %9544 = vmatpush3.bf16.msra.mxu0 %v10232_v44  ;;  %v4835_v0 = vrot.slane %v4833_v38, 1  ;;  %v4837_v62 = vshrl.u32 %v12465_v6, 16  ;;  %v4845_v34 = vshrl.u32 %v12473_v63, 16  ;;  %v4849_v54 = vshll.u32 %v12475_v59, 16  ;;  %v10244_v16 = vld [vmem:[#allocation13 + $0xf0] sm:$0xff]   ;;  %v10231_v42 = vld [vmem:[#allocation13 + $0x20] sm:$0xff]  }
 0x4ba   : > { %9427 = vmatprep.subr.bf16.mxu1 %v10212_v57  ;;  %v4804_v24 = vsel %vm1445_vm2, %v4799_v47, %v4803_v51  ;;  %9545 = vmatprep.subr.bf16.mxu0 %v10233_v58  ;;  %v4831_v35 = vor.u32 %v4829_v43, %v4827_v7  ;;  %v4828_v11 = vsel %vm1445_vm2, %v4823_v50, %v4827_v7  ;;  %v4843_v61 = vrot.slane %v4841_v22, 1  ;;  %v10246_v1 = vld [vmem:[#allocation13 + $0xf8] sm:$0xff]   ;;  %v10234_v51 = vld [vmem:[#allocation13 + $0x28] sm:$0xff]   ;;  %v10256_v52 = vld [vmem:[#allocation13 + $0x140] sm:$0xff]   ;;  %p10563_p7 = pnand %p10562_p0, %p13422_p1  ;;  %s10740_s20 = smov [#allocation16]  }
 0x4bb   : > { %9437 = vmatprep.mubr.bf16.mxu1 %v4804_v24  ;;  %v4839_v48 = vor.u32 %v4837_v62, %v4835_v0  ;;  %v4851_v8 = vrot.slane %v4849_v54, 1  ;;  %9557 = vmatprep.mubr.bf16.mxu0 %v10247_v4  ;;  %v4857_v15 = vshll.u32 %v12483_v37, 16  ;;  %v4853_v32 = vshrl.u32 %v12475_v59, 16  ;;  %v12493_v47 = vld [vmem:[#allocation3 + $0x50] sm:$0xff]   ;;  %v12495_v12 = vld [vmem:[#allocation3 + $0x58] sm:$0xff]   ;;  %v12503_v29 = vld [vmem:[#allocation13 + $0x80] sm:$0xff]  }
 0x4bc   : > { %v4836_v31 = vsel %vm1445_vm2, %v4831_v35, %v4835_v0  ;;  %v4847_v55 = vor.u32 %v4845_v34, %v4843_v61  ;;  %v10250_v44 = vld [vmem:[#allocation3 + $0x1c] sm:$0xff]   ;;  %v4873_v5 = vshll.u32 %v12493_v47, 16  ;;  %v4877_v53 = vshrl.u32 %v12493_v47, 16  ;;  %v10252_v38 = vld [vmem:[#allocation3 + $0x24] sm:$0xff]   ;;  %v10254_v50 = vld [vmem:[#allocation3 + $0x2c] sm:$0xff]   ;;  %p10564_p3 = pneg %p10563_p7  ;;  %s10565_s16 = sshll.u32 %s10740_s20, 4  ;;  %s10566_s16 = int_to_ptr.vmem [resolvable:$false] %s10565_s16 }
 0x4bd   : > { %9428 = vmatpush3.bf16.msra.mxu1 %v10212_v57  ;;  %9546 = vmatpush3.bf16.msra.mxu0 %v10233_v58  ;;  %v12485_v57 = vld [vmem:[#allocation3 + $0x48] sm:$0xff]   ;;  %v4844_v56 = vsel %vm1445_vm2, %v4839_v48, %v4843_v61  ;;  %v4859_v24 = vrot.slane %v4857_v15, 1  ;;  %v4855_v45 = vor.u32 %v4853_v32, %v4851_v8  ;;  %v4881_v25 = vshll.u32 %v12495_v12, 16  ;;  %v10255_v34 = vld [vmem:[#allocation3 + $0x34] sm:$0xff]   ;;  %v10275_v15 = vld [vmem:[#allocation13 + $0x178] sm:$0xff]   ;;  %s10567_s6 = scalar_lea.vmem %s10566_s16, 4096  ;;  %p10568_p9 = scmp.lt.s32.totalorder %s13234_s21, %s10566_s16 }
 0x4be   : > { %9429 = vmatprep.subr.bf16.mxu1 %v10213_v13  ;;  %9547 = vmatprep.subr.bf16.mxu0 %v10237_v46  ;;  %v4852_v10 = vsel %vm1445_vm2, %v4847_v55, %v4851_v8  ;;  %v4869_v23 = vshrl.u32 %v12485_v57, 16  ;;  %v4885_v0 = vshrl.u32 %v12495_v12, 16  ;;  %v10268_v54 = vld [vmem:[#allocation13 + $0x168] sm:$0xff]   ;;  %v10272_v61 = vld [vmem:[#allocation13 + $0x170] sm:$0xff]   ;;  %p10569_p4 = scmp.lt.s32.totalorder %s10567_s6, %s10561_s24 }
 0x4bf   : > { %v4860_v58 = vsel %vm1445_vm2, %v4855_v45, %v4859_v24  ;;  %v4883_v7 = vrot.slane %v4881_v25, 1  ;;  %v12510_v4 = vld [vmem:[#allocation3 + $0x14] sm:$0xff]   ;;  %v10264_v55 = vld [vmem:[#allocation3 + $0x4c] sm:$0xff]   ;;  %v12517_v32 = vld [vmem:[#allocation3 + $0x1c] sm:$0xff]  }
 0x4c0   : > { %v5910_v48 = vshll.u32 %v12510_v4, 16  ;;  %v10270_v45 = vld [vmem:[#allocation3 + $0x5c] sm:$0xff]   ;;  %p10570_p5 = por %p10569_p4, %p10568_p9 }
 0x4c1   : > { %9430 = vmatpush3.bf16.msra.mxu1 %v10213_v13  ;;  %9548 = vmatpush3.bf16.msra.mxu0 %v10237_v46  ;;  %v4861_v13 = vshrl.u32 %v12483_v37, 16  ;;  %v10243_v46 = vld [vmem:[#allocation13 + $0x38] sm:$0xff]  }
 0x4c2   : > { %9431 = vmatprep.subr.bf16.mxu1 %v10214_v36  ;;  %9549 = vmatprep.subr.bf16.mxu0 %v10239_v9  ;;  %v12514_v8 = vrot.slane %v5910_v48, 1  ;;  %v10269_v48 = vld [vmem:[#allocation13 + $0xb8] sm:$0xff]   ;;  %p10571_p6 = pnand %p10570_p5, %p10564_p3 }
 0x4c3   : > { %v4863_v41 = vor.u32 %v4861_v13, %v4859_v24  ;;  %v5798_v13 = vld [vmem:[#allocation3 + $0x10] sm:$0xf]  ;;  %v10251_v24 = vld [vmem:[#allocation13 + $0x90] sm:$0xff]  }
 0x4c5   : > { %9432 = vmatpush3.bf16.msra.mxu1 %v10214_v36  ;;  %9550 = vmatpush3.bf16.msra.mxu0 %v10239_v9  ;;  %v4865_v36 = vshll.u32 %v12485_v57, 16 }
 0x4c6   : > { %9433 = vmatprep.subr.bf16.mxu1 %v10215_v28  ;;  %9551 = vmatprep.subr.bf16.mxu0 %v10242_v33 }
 0x4c7   : > { %v4867_v18 = vrot.slane %v4865_v36, 1  ;;  %v5918_v36 = vshll.u32 %v12517_v32, 16 }
 0x4c9   : > { %9434 = vmatpush3.bf16.msra.mxu1 %v10215_v28  ;;  %9552 = vmatpush3.bf16.msra.mxu0 %v10242_v33  ;;  %v10238_v28 = vld [vmem:[#allocation13 + $0x30] sm:$0xff]   ;;  %v4868_v2 = vsel %vm1445_vm2, %v4863_v41, %v4867_v18  ;;  %v4871_v43 = vor.u32 %v4869_v23, %v4867_v18  ;;  %v12527_v41 = vld [vmem:[#allocation3 + $0x24] sm:$0xff]  }
 0x4ca   : > { %9435 = vmatprep.subr.bf16.mxu1 %v10216_v30  ;;  %9553 = vmatprep.subr.bf16.mxu0 %v10244_v16 }
 0x4cd   : > { %9436 = vmatpush3.bf16.msra.mxu1 %v10216_v30  ;;  %9554 = vmatpush3.bf16.msra.mxu0 %v10244_v16  ;;  %v10248_v30 = vld [vmem:[#allocation3 + $0x14] sm:$0xff]  }
 0x4ce   : > { %9461 = vmatprep.subr.bf16.mxu1 %v10220_v26  ;;  %9555 = vmatprep.subr.bf16.mxu0 %v10246_v1 }
 0x4d0   : > { %9438 = vmatmul.mubr.bf16.vlgmr.msra.gmra.mrb[240].mxu1 %v4812_v40  ;;  %v10241_v40 = vld [vmem:[#allocation3 + $0x60] ss:$0 sps:$4 sm:$0x11]  }
 0x4d1   : > { %9462 = vmatpush3.bf16.msra.mxu1 %v10220_v26  ;;  %9441 = vmatprep.mubr.bf16.mxu1 %v4820_v60  ;;  %v10258_v26 = vld [vmem:[#allocation13 + $0x148] sm:$0xff]   ;;  %v10261_v60 = vld [vmem:[#allocation13 + $0x150] sm:$0xff]   ;;  %v4889_v33 = vshll.u32 %v10241_v40, 16 }
 0x4d2   : > { %9463 = vmatprep.subr.bf16.mxu1 %v10221_v21  ;;  %9556 = vmatpush3.bf16.msra.mxu0 %v10246_v1  ;;  %v10249_v1 = vld [vmem:[#allocation13 + $0x88] sm:$0xff]  }
 0x4d3   : > { %9621 = vmatprep.subr.bf16.mxu0 %v10256_v52  ;;  %v4891_v62 = vrot.slane %v4889_v33, 1 }
 0x4d5   : > { %9464 = vmatpush3.bf16.msra.mxu1 %v10221_v21  ;;  %9558 = vmatmul.mubr.bf16.vlgmr.msra.gmra.mrb[44].mxu0 %v10248_v30  ;;  %v4875_v21 = vrot.slane %v4873_v5, 1  ;;  %v5920_v30 = vrot.slane %v5918_v36, 1  ;;  %v5926_v5 = vshll.u32 %v12527_v41, 16  ;;  %v12575_v36 = vld [vmem:[#allocation3 + $0x44] sm:$0xff]  }
 0x4d6   : > { %9465 = vmatprep.subr.bf16.mxu1 %v10224_v17  ;;  %9561 = vmatprep.mubr.bf16.mxu0 %v10250_v44 }
 0x4d7   : > { %9622 = vmatpush3.bf16.msra.mxu0 %v10256_v52  ;;  %v4879_v9 = vor.u32 %v4877_v53, %v4875_v21  ;;  %v4876_v35 = vsel %vm1445_vm2, %v4871_v43, %v4875_v21  ;;  %v5922_v52 = vshrl.u32 %v12517_v32, 16  ;;  %v5928_v23 = vrot.slane %v5926_v5, 1  ;;  %v10271_v21 = vld [vmem:[#allocation3 + $0x64] sm:$0xff]  }
 0x4d8   : > { %9442 = vmatmul.mubr.bf16.gmra.mrb[244].mxu1 %v4828_v11  ;;  %9623 = vmatprep.subr.bf16.mxu0 %v10258_v26  ;;  %v4887_v11 = vor.u32 %v4885_v0, %v4883_v7  ;;  %v6225_v0 = vrot.slane %v12527_v41, 1  ;;  %v6233_v5 = vrot.slane %v12575_v36, 1 }
 0x4d9   : > { %9466 = vmatpush3.bf16.msra.mxu1 %v10224_v17  ;;  %9445 = vmatprep.mubr.bf16.mxu1 %v4836_v31  ;;  %v10263_v17 = vld [vmem:[#allocation13 + $0x158] sm:$0xff]   ;;  %v4884_v22 = vsel %vm1445_vm2, %v4879_v9, %v4883_v7  ;;  %v10262_v7 = vld [vmem:[#allocation13 + $0xa8] sm:$0xff]  }
 0x4da   : > { %9467 = vmatprep.subr.bf16.mxu1 %v10227_v49  ;;  %v10259_v31 = vld [vmem:[#allocation3 + $0x3c] sm:$0xff]   ;;  %v4892_v16 = vsel %vm1445_vm2, %v4887_v11, %v4891_v62 }
 0x4db   : > { %9624 = vmatpush3.bf16.msra.mxu0 %v10258_v26  ;;  %v10253_v26 = vld [vmem:[#allocation13 + $0x98] sm:$0xff]   ;;  %v10265_v62 = vld [vmem:[#allocation13 + $0xb0] sm:$0xff]  }
 0x4dc   : > { %9625 = vmatprep.subr.bf16.mxu0 %v10261_v60 }
 0x4dd   : > { %9468 = vmatpush3.bf16.msra.mxu1 %v10227_v49  ;;  %9562 = vmatmul.mubr.bf16.gmra.mrb[48].mxu0 %v10252_v38  ;;  %v10267_v49 = vld [vmem:[#allocation13 + $0x160] sm:$0xff]   ;;  %v12545_v38 = vld [vmem:[#allocation3 + $0x34] sm:$0xff]  }
 0x4de   : > { %9469 = vmatprep.subr.bf16.mxu1 %v10231_v42  ;;  %9565 = vmatprep.mubr.bf16.mxu0 %v10254_v50  ;;  %v5797_v50 = vld [vmem:[#allocation3 + $0xc] sm:$0xf] }
 0x4df   : > { %9626 = vmatpush3.bf16.msra.mxu0 %v10261_v60 }
 0x4e0   : > { %9446 = vmatmul.mubr.bf16.gmra.mrb[248].mxu1 %v4844_v56  ;;  %9627 = vmatprep.subr.bf16.mxu0 %v10263_v17  ;;  %v5914_v56 = vshrl.u32 %v12510_v4, 16 }
 0x4e1   : > { %9449 = vmatprep.mubr.bf16.mxu1 %v4852_v10  ;;  %9470 = vmatpush3.bf16.msra.mxu1 %v10231_v42  ;;  %v10260_v42 = vld [vmem:[#allocation3 + $0x44] sm:$0xff]   ;;  %v6199_v10 = vld [vmem:[#allocation3 + $0xc] sm:$0xe] }
 0x4e2   : > { %9471 = vmatprep.subr.bf16.mxu1 %v10234_v51  ;;  %v8138_v18 = vcombine.low %v6199_v10, %v5798_v13  ;;  %v12571_v10 = vld [vmem:[#allocation13 + $0x100] sm:$0xff]  }
 0x4e3   : > { %9628 = vmatpush3.bf16.msra.mxu0 %v10263_v17  ;;  %v8117_v17 = vcombine.low %v5797_v50, %v5798_v13  ;;  %v5255_v13 = vld [vmem:[#allocation3] sm:$0xe] }
 0x4e4   : > { %9629 = vmatprep.subr.bf16.mxu0 %v10267_v49  ;;  %v6220_v53 = vrot.slane %v8138_v18, 1 }
 0x4e5   : > { %9472 = vmatpush3.bf16.msra.mxu1 %v10234_v51  ;;  %9566 = vmatmul.mubr.bf16.gmra.mrb[52].mxu0 %v10255_v34  ;;  %v10266_v51 = vld [vmem:[#allocation3 + $0x54] sm:$0xff]   ;;  %v5903_v33 = vshrl.u32 %v8117_v17, 16 }
 0x4e6   : > { %9473 = vmatprep.subr.bf16.mxu1 %v10238_v28  ;;  %9569 = vmatprep.mubr.bf16.mxu0 %v10259_v31 }
 0x4e7   : > { %9630 = vmatpush3.bf16.msra.mxu0 %v10267_v49 }
 0x4e8   : > { %9450 = vmatmul.mubr.bf16.gmra.mrb[252].mxu1 %v4860_v58  ;;  %9631 = vmatprep.subr.bf16.mxu0 %v10268_v54  ;;  %v12535_v58 = vld [vmem:[#allocation3 + $0x2c] sm:$0xff]  }
 0x4e9   : > { %9453 = vmatprep.mubr.bf16.mxu1 %v4868_v2  ;;  %9474 = vmatpush3.bf16.msra.mxu1 %v10238_v28  ;;  %v12522_v28 = vld [vmem:[#allocation13 + $0x1c0] sm:$0xff]   ;;  %v6221_v2 = vrot.slane %v12510_v4, 1  ;;  %v5934_v40 = vshll.u32 %v12535_v58, 16  ;;  %v5938_v9 = vshrl.u32 %v12535_v58, 16 }
 0x4ea   : > { %9475 = vmatprep.subr.bf16.mxu1 %v10243_v46 }
 0x4eb   : > { %9632 = vmatpush3.bf16.msra.mxu0 %v10268_v54  ;;  %v5936_v60 = vrot.slane %v5934_v40, 1  ;;  %v6222_v43 = vsel %vm5276_vm5, %v6220_v53, %v6221_v2 }
 0x4ec   : > { %9633 = vmatprep.subr.bf16.mxu0 %v10272_v61 }
 0x4ed   : > { %9476 = vmatpush3.bf16.msra.mxu1 %v10243_v46  ;;  %9570 = vmatmul.mubr.bf16.gmra.mrb[56].mxu0 %v10260_v42  ;;  %v5940_v49 = vor.u32 %v5938_v9, %v5936_v60  ;;  %v10285_v42 = vld [vmem:[#allocation3 + $0x3c] sm:$0xff]  }
 0x4ee   : > { %9501 = vmatprep.subr.bf16.mxu1 %v12503_v29  ;;  %9573 = vmatprep.mubr.bf16.mxu0 %v10264_v55 }
 0x4ef   : > { %9634 = vmatpush3.bf16.msra.mxu0 %v10272_v61 }
 0x4f0   : > { %9454 = vmatmul.mubr.bf16.gmra.mrb[0].mxu1 %v4876_v35  ;;  %9635 = vmatprep.subr.bf16.mxu0 %v10275_v15  ;;  %v5942_v35 = vshll.u32 %v12545_v38, 16 }
 0x4f1   : > { %9457 = vmatprep.mubr.bf16.mxu1 %v4884_v22  ;;  %v5905_v22 = vshll.u32 %v8117_v17, 16 }
 0x4f2   : > { %v5944_v11 = vrot.slane %v5942_v35, 1 }
 0x4f3   : > { %9636 = vmatpush3.bf16.msra.mxu0 %v10275_v15  ;;  %v5907_v31 = vrot.slane %v5905_v22, 1  ;;  %v10291_v15 = vld [vmem:[#allocation13 + $0x1d0] sm:$0xff]  }
 0x4f4   : > { %9701 = vmatprep.subr.bf16.mxu0 %v12522_v28  ;;  %v12559_v61 = vsel %vm1445_vm2, %v5940_v49, %v5944_v11 }
 0x4f5   : > { %9574 = vmatmul.mubr.bf16.gmra.mrb[60].mxu0 %v10266_v51  ;;  %v5908_v4 = vor.u32 %v5907_v31, %v5903_v33  ;;  %v10302_v33 = vld [vmem:[#allocation13 + $0x1f0] sm:$0xff]  }
 0x4f6   : > { %9577 = vmatprep.mubr.bf16.mxu0 %v10270_v45  ;;  %v5958_v45 = vshll.u32 %v12575_v36, 16 }
 0x4f7   : > { %v12565_v55 = vsel %vm1445_vm2, %v5908_v4, %v12514_v8 }
 0x4f8   : > { %9458 = vmatmul.mubr.bf16.gmra.mrb[4].mxu1 %v4892_v16  ;;  %v10288_v16 = vld [vmem:[#allocation13 + $0x1c8] sm:$0xff]  }
 0x4f9   : > { %9477 = vmatprep.mubr.bf16.mxu1 %v12447_v20  ;;  %v5916_v20 = vor.u32 %v5914_v56, %v12514_v8 }
 0x4fb   : > { %v12530_v44 = vsel %vm1445_vm2, %v5916_v20, %v5920_v30 }
 0x4fd   : > { %9578 = vmatmul.mubr.bf16.gmra.mrb[64].mxu0 %v10271_v21 }
 0x4fe   : > { %9637 = vmatprep.mubr.bf16.mxu0 %v6222_v43  ;;  %v10298_v43 = vld [vmem:[#allocation13 + $0x1e8] sm:$0xff]  }
 0x500   : > { %9478 = vmatmul.mubr.bf16.vlgmr.msra.gmra.mrb[8].mxu1 %v12449_v39  ;;  %v5924_v39 = vor.u32 %v5922_v52, %v5920_v30  ;;  %v8088_v52 = vcombine.low %v5255_v13, %v12444_v3  ;;  %v5962_v30 = vshrl.u32 %v12575_v36, 16  ;;  %v10297_v3 = vld [vmem:[#allocation13 + $0x1e0] sm:$0xff]  }
 0x501   : > { %9502 = vmatpush3.bf16.msra.mxu1 %v12503_v29  ;;  %9481 = vmatprep.mubr.bf16.mxu1 %v12455_v27  ;;  %v5930_v27 = vshrl.u32 %v12527_v41, 16  ;;  %v10257_v29 = vld [vmem:[#allocation13 + $0xa0] sm:$0xff]   ;;  %v6231_v41 = vrot.slane %v10285_v42, 1 }
 0x502   : > { %9503 = vmatprep.subr.bf16.mxu1 %v10249_v1  ;;  %v12540_v25 = vsel %vm1445_vm2, %v5924_v39, %v5928_v23 }
 0x503   : > { %v5932_v46 = vor.u32 %v5930_v27, %v5928_v23  ;;  %v10347_v23 = vld [vmem:[#allocation3 + $0x8] sm:$0xff]  }
 0x504   : > { %v5278_v53 = vrot.slane %v10347_v23, 1  ;;  %v10351_v23 = vld [vmem:[#allocation3 + $0x28] sm:$0xff]  }
 0x505   : > { %9504 = vmatpush3.bf16.msra.mxu1 %v10249_v1  ;;  %v6229_v1 = vrot.slane %v12545_v38, 1 }
 0x506   : > { %9505 = vmatprep.subr.bf16.mxu1 %v10251_v24 }
 0x508   : > { %9482 = vmatmul.mubr.bf16.gmra.mrb[12].mxu1 %v12457_v19  ;;  %v12548_v19 = vsel %vm1445_vm2, %v5932_v46, %v5936_v60  ;;  %v12592_v46 = vld [vmem:[#allocation3 + $0x5c] sm:$0xff]  }
 0x509   : > { %9506 = vmatpush3.bf16.msra.mxu1 %v10251_v24  ;;  %9485 = vmatprep.mubr.bf16.mxu1 %v12463_v14  ;;  %v6223_v14 = vrot.slane %v12517_v32, 1  ;;  %v5950_v32 = vshll.u32 %v10285_v42, 16  ;;  %v10293_v24 = vld [vmem:[#allocation13 + $0x1d8] sm:$0xff]  }
 0x50a   : > { %9507 = vmatprep.subr.bf16.mxu1 %v10253_v26 }
 0x50b   : > { %v6224_v34 = vsel %vm5276_vm5, %v6221_v2, %v6223_v14  ;;  %v6226_v54 = vsel %vm5276_vm5, %v6223_v14, %v6225_v0  ;;  %v5952_v51 = vrot.slane %v5950_v32, 1  ;;  %v12590_v2 = vld [vmem:[#allocation3 + $0x54] sm:$0xff]  }
 0x50c   : > { %9638 = vmatmul.mubr.bf16.vlgmr.msra.gmra.mrb[68].mxu0 %v6224_v34  ;;  %v5978_v9 = vshrl.u32 %v12590_v2, 16  ;;  %v6237_v14 = vrot.slane %v12590_v2, 1  ;;  %v12614_v34 = vld [vmem:[#allocation3 + $0x1c] sm:$0xf] }
 0x50d   : > { %9508 = vmatpush3.bf16.msra.mxu1 %v10253_v26  ;;  %9641 = vmatprep.mubr.bf16.mxu0 %v6226_v54  ;;  %v5960_v26 = vrot.slane %v5958_v45, 1 }
 0x50e   : > { %9509 = vmatprep.subr.bf16.mxu1 %v10257_v29  ;;  %9702 = vmatpush3.bf16.msra.mxu0 %v12522_v28 }
 0x50f   : > { %9703 = vmatprep.subr.bf16.mxu0 %v10288_v16  ;;  %v5964_v21 = vor.u32 %v5962_v30, %v5960_v26 }
 0x510   : > { %9486 = vmatmul.mubr.bf16.gmra.mrb[16].mxu1 %v12465_v6  ;;  %v5946_v6 = vshrl.u32 %v12545_v38, 16  ;;  %v5974_v38 = vshll.u32 %v12590_v2, 16 }
 0x511   : > { %9489 = vmatprep.mubr.bf16.mxu1 %v12473_v63  ;;  %9510 = vmatpush3.bf16.msra.mxu1 %v10257_v29  ;;  %v6227_v63 = vrot.slane %v12535_v58, 1  ;;  %v5277_v58 = vrot.slane %v8088_v52, 1  ;;  %v6232_v29 = vsel %vm5276_vm5, %v6229_v1, %v6231_v41  ;;  %v6239_v52 = vrot.slane %v12592_v46, 1 }
 0x512   : > { %9511 = vmatprep.subr.bf16.mxu1 %v10262_v7  ;;  %v5948_v56 = vor.u32 %v5946_v6, %v5944_v11  ;;  %9704 = vmatpush3.bf16.msra.mxu0 %v10288_v16  ;;  %v5976_v22 = vrot.slane %v5974_v38, 1  ;;  %v12611_v11 = vld [vmem:[#allocation3 + $0x6c] ss:$0 sps:$4 sm:$0x11]   ;;  %v10348_v16 = vld [vmem:[#allocation3 + $0x10] sm:$0xff]   ;;  %v10349_v6 = vld [vmem:[#allocation3 + $0x18] sm:$0xff]  }
 0x513   : > { %v6228_v8 = vsel %vm5276_vm5, %v6225_v0, %v6227_v63  ;;  %v6230_v20 = vsel %vm5276_vm5, %v6227_v63, %v6229_v1  ;;  %9705 = vmatprep.subr.bf16.mxu0 %v10291_v15  ;;  %v5279_v35 = vsel %vm5276_vm5, %v5277_v58, %v5278_v53  ;;  %v12609_v0 = vld [vmem:[#allocation3 + $0x64] sm:$0xff]   ;;  %v5280_v4 = vrot.slane %v10348_v16, 1  ;;  %v10281_v58 = vld [vmem:[#allocation13 + $0x110] sm:$0xff]  }
 0x514   : > { %v12580_v28 = vsel %vm1445_vm2, %v5948_v56, %v5952_v51  ;;  %9642 = vmatmul.mubr.bf16.gmra.mrb[72].mxu0 %v6228_v8  ;;  %v5980_v54 = vor.u32 %v5978_v9, %v5976_v22  ;;  %v5986_v1 = vshrl.u32 %v12592_v46, 16  ;;  %v5998_v13 = vshll.u32 %v12611_v11, 16  ;;  %v10305_v8 = vld [vmem:[#allocation13 + $0x1f8] sm:$0xff]  }
 0x515   : > { %9512 = vmatpush3.bf16.msra.mxu1 %v10262_v7  ;;  %9645 = vmatprep.mubr.bf16.mxu0 %v6230_v20  ;;  %v5982_v7 = vshll.u32 %v12592_v46, 16  ;;  %v5281_v36 = vsel %vm5276_vm5, %v5278_v53, %v5280_v4  ;;  %v6241_v45 = vrot.slane %v12609_v0, 1  ;;  %v5286_v53 = vrot.slane %v10351_v23, 1  ;;  %v10283_v38 = vld [vmem:[#allocation13 + $0x118] sm:$0xff]  }
 0x516   : > { %9513 = vmatprep.subr.bf16.mxu1 %v10265_v62  ;;  %9706 = vmatpush3.bf16.msra.mxu0 %v10291_v15  ;;  %v5994_v15 = vshrl.u32 %v12609_v0, 16  ;;  %v6240_v2 = vsel %vm5276_vm5, %v6237_v14, %v6239_v52  ;;  %v6243_v9 = vrot.slane %v12611_v11, 1 }
 0x517   : > { %9707 = vmatprep.subr.bf16.mxu0 %v10293_v24  ;;  %v5984_v49 = vrot.slane %v5982_v7, 1  ;;  %v6242_v46 = vsel %vm5276_vm5, %v6239_v52, %v6241_v45 }
 0x518   : > { %9490 = vmatmul.mubr.bf16.gmra.mrb[20].mxu1 %v12475_v59  ;;  %v12577_v59 = vld [vmem:[#allocation3 + $0x4c] sm:$0xff]  }
 0x519   : > { %9493 = vmatprep.mubr.bf16.mxu1 %v12483_v37  ;;  %9514 = vmatpush3.bf16.msra.mxu1 %v10265_v62  ;;  %v5954_v37 = vshrl.u32 %v10285_v42, 16  ;;  %v5966_v39 = vshll.u32 %v12577_v59, 16  ;;  %v6235_v50 = vrot.slane %v12577_v59, 1  ;;  %v6740_v62 = vld [vmem:[#allocation3 + $0x18] sm:$0xf]  ;;  %v12621_v42 = vsel %vm1445_vm2, %v5980_v54, %v5984_v49 }
 0x51a   : > { %9515 = vmatprep.subr.bf16.mxu1 %v10269_v48  ;;  %9708 = vmatpush3.bf16.msra.mxu0 %v10293_v24  ;;  %v8167_v32 = vcombine.low %v6740_v62, %v12614_v34  ;;  %v6000_v24 = vrot.slane %v5998_v13, 1  ;;  %v6244_v62 = vsel %vm5276_vm5, %v6241_v45, %v6243_v9  ;;  %v10355_v45 = vld [vmem:[#allocation3 + $0x48] sm:$0xff]  }
 0x51b   : > { %v5956_v18 = vor.u32 %v5954_v37, %v5952_v51  ;;  %v5968_v27 = vrot.slane %v5966_v39, 1  ;;  %9709 = vmatprep.subr.bf16.mxu0 %v10297_v3  ;;  %v6236_v63 = vsel %vm5276_vm5, %v6233_v5, %v6235_v50  ;;  %v6238_v56 = vsel %vm5276_vm5, %v6235_v50, %v6237_v14  ;;  %v10279_v37 = vld [vmem:[#allocation13 + $0x108] sm:$0xff]  }
 0x51c   : > { %9646 = vmatmul.mubr.bf16.gmra.mrb[76].mxu0 %v6232_v29  ;;  %v5988_v51 = vor.u32 %v5986_v1, %v5984_v49  ;;  %v6848_v39 = vshll.u32 %v8167_v32, 16  ;;  %v10310_v14 = vld [vmem:[#allocation3 + $0x30] sm:$0xff]  }
 0x51d   : > { %9516 = vmatpush3.bf16.msra.mxu1 %v10269_v48  ;;  %v12595_v40 = vsel %vm1445_vm2, %v5956_v18, %v5960_v26  ;;  %v12600_v60 = vsel %vm1445_vm2, %v5964_v21, %v5968_v27  ;;  %v5282_v48 = vrot.slane %v10349_v6, 1  ;;  %v12636_v18 = vld [vmem:[#allocation3 + $0x20] sm:$0xff]   ;;  %v6846_v21 = vshrl.u32 %v8167_v32, 16  ;;  %v10312_v6 = vld [vmem:[#allocation3 + $0x38] sm:$0xff]   ;;  %v10292_v32 = vld [vmem:[#allocation13 + $0x128] sm:$0xff]  }
 0x51e   : > { %9581 = vmatprep.subr.bf16.mxu1 %v12571_v10  ;;  %9710 = vmatpush3.bf16.msra.mxu0 %v10297_v3  ;;  %v10350_v3 = vld [vmem:[#allocation3 + $0x20] sm:$0xff]   ;;  %v6850_v29 = vrot.slane %v6848_v39, 1  ;;  %v6857_v54 = vshrl.u32 %v12636_v18, 16  ;;  %v6877_v52 = vshll.u32 %v10312_v6, 16  ;;  %v10295_v39 = vld [vmem:[#allocation13 + $0x130] sm:$0xff]   ;;  %v6881_v23 = vshrl.u32 %v10312_v6, 16 }
 0x51f   : > { %9711 = vmatprep.subr.bf16.mxu0 %v10298_v43 }
 0x520   : > { %9494 = vmatmul.mubr.bf16.gmra.mrb[24].mxu1 %v12485_v57  ;;  %v6234_v57 = vsel %vm5276_vm5, %v6231_v41, %v6233_v5  ;;  %v12638_v5 = vld [vmem:[#allocation13 + $0x200] sm:$0xff]   ;;  %v6851_v7 = vor.u32 %v6850_v29, %v6846_v21 }
 0x521   : > { %9497 = vmatprep.mubr.bf16.mxu1 %v12493_v47  ;;  %v5970_v47 = vshrl.u32 %v12577_v59, 16  ;;  %9649 = vmatprep.mubr.bf16.mxu0 %v6234_v57  ;;  %v5283_v59 = vsel %vm5276_vm5, %v5280_v4, %v5282_v48  ;;  %v6853_v57 = vshll.u32 %v12636_v18, 16  ;;  %v6869_v4 = vshll.u32 %v10310_v14, 16 }
 0x522   : > { %9712 = vmatpush3.bf16.msra.mxu0 %v10298_v43 }
 0x523   : > { %v5972_v17 = vor.u32 %v5970_v47, %v5968_v27  ;;  %9713 = vmatprep.subr.bf16.mxu0 %v10302_v33  ;;  %v5284_v27 = vrot.slane %v10350_v3, 1  ;;  %v12649_v47 = vld [vmem:[#allocation3 + $0x28] sm:$0xff]   ;;  %v6855_v50 = vrot.slane %v6853_v57, 1  ;;  %v6879_v57 = vrot.slane %v6877_v52, 1 }
 0x524   : > { %9650 = vmatmul.mubr.bf16.gmra.mrb[80].mxu0 %v6236_v63  ;;  %v6861_v49 = vshll.u32 %v12649_v47, 16  ;;  %v6865_v11 = vshrl.u32 %v12649_v47, 16  ;;  %v7168_v63 = vrot.slane %v10310_v14, 1 }
 0x525   : > { %v12617_v31 = vsel %vm1445_vm2, %v5972_v17, %v5976_v22  ;;  %9653 = vmatprep.mubr.bf16.mxu0 %v6238_v56  ;;  %v5287_v43 = vsel %vm5276_vm5, %v5284_v27, %v5286_v53  ;;  %v10352_v17 = vld [vmem:[#allocation3 + $0x30] sm:$0xff]   ;;  %v10287_v22 = vld [vmem:[#allocation13 + $0x120] sm:$0xff]   ;;  %v6856_v16 = vsel %vm1445_vm2, %v6851_v7, %v6855_v50  ;;  %v6859_v13 = vor.u32 %v6857_v54, %v6855_v50 }
 0x526   : > { %9714 = vmatpush3.bf16.msra.mxu0 %v10302_v33  ;;  %v6883_v50 = vor.u32 %v6881_v23, %v6879_v57 }
 0x527   : > { %9715 = vmatprep.subr.bf16.mxu0 %v10305_v8 }
 0x528   : > { %9498 = vmatmul.mubr.bf16.gmra.mrb[28].mxu1 %v12495_v12  ;;  %v5990_v12 = vshll.u32 %v12609_v0, 16  ;;  %v10353_v0 = vld [vmem:[#allocation3 + $0x38] sm:$0xff]  }
 0x529   : > { %9517 = vmatprep.mubr.bf16.mxu1 %v5279_v35  ;;  %v5288_v35 = vrot.slane %v10352_v17, 1  ;;  %v5290_v33 = vrot.slane %v10353_v0, 1  ;;  %v10319_v17 = vld [vmem:[#allocation3 + $0x50] sm:$0xff]  }
 0x52a   : > { %v5992_v20 = vrot.slane %v5990_v12, 1  ;;  %9716 = vmatpush3.bf16.msra.mxu0 %v10305_v8  ;;  %v6863_v12 = vrot.slane %v6861_v49, 1  ;;  %v12687_v0 = vld [vmem:[#allocation13 + $0x210] sm:$0xff]  }
 0x52b   : > { %9741 = vmatprep.subr.bf16.mxu0 %v12638_v5  ;;  %v5289_v1 = vsel %vm5276_vm5, %v5286_v53, %v5288_v35  ;;  %v5291_v56 = vsel %vm5276_vm5, %v5288_v35, %v5290_v33 }
 0x52c   : > { %v12634_v30 = vsel %vm1445_vm2, %v5988_v51, %v5992_v20  ;;  %v5996_v41 = vor.u32 %v5994_v15, %v5992_v20  ;;  %9654 = vmatmul.mubr.bf16.gmra.mrb[84].mxu0 %v6240_v2  ;;  %v7170_v15 = vrot.slane %v10312_v6, 1  ;;  %v6867_v51 = vor.u32 %v6865_v11, %v6863_v12  ;;  %v10315_v2 = vld [vmem:[#allocation3 + $0x48] sm:$0xff]  }
 0x52d   : > { %9657 = vmatprep.mubr.bf16.mxu0 %v6242_v46  ;;  %v6871_v20 = vrot.slane %v6869_v4, 1  ;;  %v6864_v3 = vsel %vm1445_vm2, %v6859_v13, %v6863_v12  ;;  %v12674_v46 = vld [vmem:[#allocation13 + $0x208] sm:$0xff]   ;;  %v6893_v49 = vshll.u32 %v10315_v2, 16  ;;  %v12689_v11 = vld [vmem:[#allocation13 + $0x180] sm:$0xff]   ;;  %v10320_v12 = vld [vmem:[#allocation3 + $0x58] sm:$0xff]  }
 0x52e   : > { %v12641_v26 = vsel %vm1445_vm2, %v5996_v41, %v6000_v24  ;;  %v10354_v24 = vld [vmem:[#allocation3 + $0x40] sm:$0xff]   ;;  %v5294_v41 = vrot.slane %v10355_v45, 1 }
 0x52f   : > { %v6895_v13 = vrot.slane %v6893_v49, 1  ;;  %v10324_v45 = vld [vmem:[#allocation3 + $0x60] sm:$0xff]   ;;  %v10330_v49 = vld [vmem:[#allocation3 + $0x70] sm:$0xff]  }
 0x530   : > { %9518 = vmatmul.mubr.bf16.vlgmr.msra.gmra.mrb[32].mxu1 %v5281_v36  ;;  %v12666_v36 = vld [vmem:[#allocation3 + $0x40] sm:$0xff]  }
 0x531   : > { %9582 = vmatpush3.bf16.msra.mxu1 %v12571_v10  ;;  %9521 = vmatprep.mubr.bf16.mxu1 %v5283_v59  ;;  %v5285_v10 = vsel %vm5276_vm5, %v5282_v48, %v5284_v27  ;;  %v7166_v48 = vrot.slane %v12649_v47, 1  ;;  %v12669_v59 = vsel %vm5276_vm5, %v7168_v63, %v7170_v15  ;;  %v6873_v27 = vshrl.u32 %v10310_v14, 16  ;;  %v10337_v47 = vld [vmem:[#allocation3 + $0x28] sm:$0xff]  }
 0x532   : > { %9583 = vmatprep.subr.bf16.mxu1 %v10279_v37  ;;  %v6885_v53 = vshll.u32 %v12666_v36, 16  ;;  %v7172_v21 = vrot.slane %v12666_v36, 1  ;;  %v6889_v4 = vshrl.u32 %v12666_v36, 16 }
 0x533   : > { %v12664_v8 = vsel %vm5276_vm5, %v7166_v48, %v7168_v63  ;;  %v6875_v9 = vor.u32 %v6873_v27, %v6871_v20  ;;  %v6897_v63 = vshrl.u32 %v10315_v2, 16 }
 0x534   : > { %9658 = vmatmul.mubr.bf16.gmra.mrb[88].mxu0 %v6244_v62  ;;  %v12680_v7 = vsel %vm5276_vm5, %v7170_v15, %v7172_v21  ;;  %v6887_v14 = vrot.slane %v6885_v53, 1  ;;  %v10357_v62 = vld [vmem:[#allocation3 + $0x58] sm:$0xff]   ;;  %v6905_v53 = vshrl.u32 %v10319_v17, 16 }
 0x535   : > { %9584 = vmatpush3.bf16.msra.mxu1 %v10279_v37  ;;  %9717 = vmatprep.mubr.bf16.mxu0 %v6856_v16  ;;  %v5292_v37 = vrot.slane %v10354_v24, 1  ;;  %v5298_v54 = vrot.slane %v10357_v62, 1  ;;  %v6880_v16 = vsel %vm1445_vm2, %v6875_v9, %v6879_v57  ;;  %v12696_v15 = vld [vmem:[#allocation13 + $0x218] sm:$0xff]   ;;  %v10326_v57 = vld [vmem:[#allocation3 + $0x68] sm:$0xff]  }
 0x536   : > { %9585 = vmatprep.subr.bf16.mxu1 %v10281_v58  ;;  %v6888_v6 = vsel %vm1445_vm2, %v6883_v50, %v6887_v14  ;;  %v6891_v36 = vor.u32 %v6889_v4, %v6887_v14  ;;  %v7182_v50 = vrot.slane %v10326_v57, 1 }
 0x537   : > { %v5293_v29 = vsel %vm5276_vm5, %v5290_v33, %v5292_v37  ;;  %v10356_v33 = vld [vmem:[#allocation3 + $0x50] sm:$0xff]  }
 0x538   : > { %9522 = vmatmul.mubr.bf16.gmra.mrb[36].mxu1 %v5285_v10  ;;  %v7174_v10 = vrot.slane %v10315_v2, 1  ;;  %v6896_v23 = vsel %vm1445_vm2, %v6891_v36, %v6895_v13 }
 0x539   : > { %9586 = vmatpush3.bf16.msra.mxu1 %v10281_v58  ;;  %9525 = vmatprep.mubr.bf16.mxu1 %v5287_v43  ;;  %v6872_v58 = vsel %vm1445_vm2, %v6867_v51, %v6871_v20  ;;  %v5295_v43 = vsel %vm5276_vm5, %v5292_v37, %v5294_v41  ;;  %v7178_v51 = vrot.slane %v10320_v12, 1  ;;  %v6899_v37 = vor.u32 %v6897_v63, %v6895_v13 }
 0x53a   : > { %9587 = vmatprep.subr.bf16.mxu1 %v10283_v38  ;;  %v12684_v35 = vsel %vm5276_vm5, %v7172_v21, %v7174_v10  ;;  %v6913_v21 = vshrl.u32 %v10320_v12, 16  ;;  %v7184_v13 = vrot.slane %v10330_v49, 1 }
 0x53c   : > { %9718 = vmatmul.mubr.bf16.vlgmr.msra.gmra.mrb[92].mxu0 %v6864_v3  ;;  %v10358_v3 = vld [vmem:[#allocation3 + $0x60] ss:$0 sps:$4 sm:$0x11]  }
 0x53d   : > { %9588 = vmatpush3.bf16.msra.mxu1 %v10283_v38  ;;  %v10299_v38 = vld [vmem:[#allocation13 + $0x138] sm:$0xff]   ;;  %9721 = vmatprep.mubr.bf16.mxu0 %v6872_v58  ;;  %v5300_v27 = vrot.slane %v10358_v3, 1  ;;  %v6909_v58 = vshll.u32 %v10320_v12, 16  ;;  %v6933_v12 = vshll.u32 %v10330_v49, 16 }
 0x53e   : > { %9589 = vmatprep.subr.bf16.mxu1 %v10287_v22  ;;  %9742 = vmatpush3.bf16.msra.mxu0 %v12638_v5 }
 0x53f   : > { %9743 = vmatprep.subr.bf16.mxu0 %v12674_v46  ;;  %v6911_v9 = vrot.slane %v6909_v58, 1  ;;  %v10311_v58 = vld [vmem:[#allocation13 + $0x190] sm:$0xff]  }
 0x540   : > { %9526 = vmatmul.mubr.bf16.gmra.mrb[40].mxu1 %v5289_v1  ;;  %v6901_v1 = vshll.u32 %v10319_v17, 16 }
 0x541   : > { %9529 = vmatprep.mubr.bf16.mxu1 %v5291_v56  ;;  %9590 = vmatpush3.bf16.msra.mxu1 %v10287_v22  ;;  %v5296_v22 = vrot.slane %v10356_v33, 1  ;;  %v7176_v56 = vrot.slane %v10319_v17, 1  ;;  %v6915_v33 = vor.u32 %v6913_v21, %v6911_v9 }
 0x542   : > { %9591 = vmatprep.subr.bf16.mxu1 %v10292_v32  ;;  %9744 = vmatpush3.bf16.msra.mxu0 %v12674_v46  ;;  %v6903_v52 = vrot.slane %v6901_v1, 1  ;;  %v6929_v1 = vshrl.u32 %v10326_v57, 16 }
 0x543   : > { %9745 = vmatprep.subr.bf16.mxu0 %v12687_v0  ;;  %v5299_v20 = vsel %vm5276_vm5, %v5296_v22, %v5298_v54  ;;  %v12702_v24 = vsel %vm5276_vm5, %v7174_v10, %v7176_v56  ;;  %v12715_v10 = vld [vmem:[#allocation13 + $0x228] sm:$0xff]  }
 0x544   : > { %9722 = vmatmul.mubr.bf16.gmra.mrb[96].mxu0 %v6880_v16  ;;  %v6904_v2 = vsel %vm1445_vm2, %v6899_v37, %v6903_v52  ;;  %v6907_v14 = vor.u32 %v6905_v53, %v6903_v52  ;;  %v6925_v16 = vshll.u32 %v10326_v57, 16  ;;  %v12736_v37 = vsel %vm5276_vm5, %v7182_v50, %v7184_v13 }
 0x545   : > { %9592 = vmatpush3.bf16.msra.mxu1 %v10292_v32  ;;  %v5297_v32 = vsel %vm5276_vm5, %v5294_v41, %v5296_v22  ;;  %9725 = vmatprep.mubr.bf16.mxu0 %v6888_v6  ;;  %v12706_v41 = vsel %vm5276_vm5, %v7176_v56, %v7178_v51  ;;  %v6921_v6 = vshrl.u32 %v10324_v45, 16  ;;  %v10331_v56 = vld [vmem:[#allocation3 + $0x78] ss:$0 sps:$4 sm:$0x11]   ;;  %v6937_v53 = vshrl.u32 %v10330_v49, 16  ;;  %v10345_v49 = vld [vmem:[#allocation3 + $0x68] sm:$0xff]  }
 0x546   : > { %9593 = vmatprep.subr.bf16.mxu1 %v10295_v39  ;;  %9746 = vmatpush3.bf16.msra.mxu0 %v12687_v0  ;;  %v6912_v4 = vsel %vm1445_vm2, %v6907_v14, %v6911_v9 }
 0x547   : > { %9747 = vmatprep.subr.bf16.mxu0 %v12696_v15 }
 0x548   : > { %9530 = vmatmul.mubr.bf16.gmra.mrb[44].mxu1 %v5293_v29  ;;  %v6917_v29 = vshll.u32 %v10324_v45, 16 }
 0x549   : > { %9533 = vmatprep.mubr.bf16.mxu1 %v5295_v43  ;;  %9594 = vmatpush3.bf16.msra.mxu1 %v10295_v39  ;;  %v12709_v39 = vld [vmem:[#allocation13 + $0x220] sm:$0xff]   ;;  %v7180_v43 = vrot.slane %v10324_v45, 1  ;;  %v6935_v45 = vrot.slane %v6933_v12, 1 }
 0x54a   : > { %9595 = vmatprep.subr.bf16.mxu1 %v10299_v38  ;;  %9748 = vmatpush3.bf16.msra.mxu0 %v12696_v15  ;;  %v6919_v22 = vrot.slane %v6917_v29, 1 }
 0x54b   : > { %9749 = vmatprep.subr.bf16.mxu0 %v12709_v39  ;;  %v12719_v17 = vsel %vm5276_vm5, %v7178_v51, %v7180_v43  ;;  %v12723_v62 = vsel %vm5276_vm5, %v7180_v43, %v7182_v50  ;;  %v6927_v51 = vrot.slane %v6925_v16, 1  ;;  %v7164_v43 = vrot.slane %v12636_v18, 1  ;;  %v10322_v50 = vld [vmem:[#allocation13 + $0x1a8] sm:$0xff]   ;;  %v10329_v18 = vld [vmem:[#allocation13 + $0x1b8] sm:$0xff]  }
 0x54c   : > { %9726 = vmatmul.mubr.bf16.gmra.mrb[100].mxu0 %v6896_v23  ;;  %v6920_v63 = vsel %vm1445_vm2, %v6915_v33, %v6919_v22  ;;  %v6923_v36 = vor.u32 %v6921_v6, %v6919_v22  ;;  %v10344_v33 = vld [vmem:[#allocation3 + $0x60] sm:$0xff]   ;;  %v10346_v6 = vld [vmem:[#allocation3 + $0x70] sm:$0xff]  }
 0x54d   : > { %9596 = vmatpush3.bf16.msra.mxu1 %v10299_v38  ;;  %v5301_v38 = vsel %vm5276_vm5, %v5298_v54, %v5300_v27  ;;  %9729 = vmatprep.mubr.bf16.mxu0 %v6904_v2  ;;  %v12726_v54 = vld [vmem:[#allocation13 + $0x230] sm:$0xff]   ;;  %v6931_v52 = vor.u32 %v6929_v1, %v6927_v51  ;;  %v6941_v2 = vshll.u32 %v10331_v56, 16 }
 0x54e   : > { %9661 = vmatprep.subr.bf16.mxu1 %v12689_v11  ;;  %9750 = vmatpush3.bf16.msra.mxu0 %v12709_v39  ;;  %v7142_v27 = vld [vmem:[#allocation3 + $0x18] sm:$0xe]  ;;  %v6928_v23 = vsel %vm1445_vm2, %v6923_v36, %v6927_v51 }
 0x54f   : > { %9751 = vmatprep.subr.bf16.mxu0 %v12715_v10  ;;  %v6936_v21 = vsel %vm1445_vm2, %v6931_v52, %v6935_v45  ;;  %v8188_v29 = vcombine.low %v7142_v27, %v12614_v34  ;;  %v6943_v57 = vrot.slane %v6941_v2, 1 }
 0x550   : > { %9534 = vmatmul.mubr.bf16.gmra.mrb[48].mxu1 %v5297_v32  ;;  %v12733_v32 = vld [vmem:[#allocation13 + $0x238] sm:$0xff]  }
 0x551   : > { %9537 = vmatprep.mubr.bf16.mxu1 %v5299_v20  ;;  %v7186_v20 = vrot.slane %v10331_v56, 1 }
 0x552   : > { %9752 = vmatpush3.bf16.msra.mxu0 %v12715_v10 }
 0x553   : > { %9753 = vmatprep.subr.bf16.mxu0 %v12726_v54  ;;  %v12740_v3 = vsel %vm5276_vm5, %v7184_v13, %v7186_v20 }
 0x554   : > { %9730 = vmatmul.mubr.bf16.gmra.mrb[104].mxu0 %v6912_v4 }
 0x555   : > { %9733 = vmatprep.mubr.bf16.mxu0 %v6920_v63 }
 0x556   : > { %9754 = vmatpush3.bf16.msra.mxu0 %v12726_v54 }
 0x557   : > { %9755 = vmatprep.subr.bf16.mxu0 %v12733_v32 }
 0x558   : > { %9538 = vmatmul.mubr.bf16.gmra.mrb[52].mxu1 %v5301_v38  ;;  %v10317_v38 = vld [vmem:[#allocation13 + $0x1a0] sm:$0xff]  }
 0x559   : > { %9597 = vmatprep.mubr.bf16.mxu1 %v12565_v55  ;;  %v10309_v55 = vld [vmem:[#allocation13 + $0x188] sm:$0xff]  }
 0x55a   : > { %9756 = vmatpush3.bf16.msra.mxu0 %v12733_v32 }
 0x55c   : > { %9734 = vmatmul.mubr.bf16.gmra.mrb[108].mxu0 %v6928_v23 }
 0x55d   : > { %9737 = vmatprep.mubr.bf16.mxu0 %v6936_v21 }
 0x560   : > { %9598 = vmatmul.mubr.bf16.vlgmr.msra.gmra.mrb[56].mxu1 %v12530_v44  ;;  %v10313_v44 = vld [vmem:[#allocation13 + $0x198] sm:$0xff]  }
 0x561   : > { %9662 = vmatpush3.bf16.msra.mxu1 %v12689_v11  ;;  %9601 = vmatprep.mubr.bf16.mxu1 %v12540_v25  ;;  %v6939_v11 = vor.u32 %v6937_v53, %v6935_v45  ;;  %v7163_v25 = vrot.slane %v8188_v29, 1 }
 0x562   : > { %9663 = vmatprep.subr.bf16.mxu1 %v10309_v55 }
 0x563   : > { %v6944_v9 = vsel %vm1445_vm2, %v6939_v11, %v6943_v57  ;;  %v7165_v34 = vsel %vm5276_vm5, %v7163_v25, %v7164_v43 }
 0x564   : > { %9738 = vmatmul.mubr.bf16.gmra.mrb[112].mxu0 %v6944_v9 }
 0x565   : > { %9664 = vmatpush3.bf16.msra.mxu1 %v10309_v55  ;;  %9757 = vmatprep.mubr.bf16.mxu0 %v7165_v34 }
 0x566   : > { %9665 = vmatprep.subr.bf16.mxu1 %v10311_v58 }
 0x568   : > { %9602 = vmatmul.mubr.bf16.gmra.mrb[60].mxu1 %v12548_v19  ;;  %v10325_v19 = vld [vmem:[#allocation13 + $0x1b0] sm:$0xff]  }
 0x569   : > { %9666 = vmatpush3.bf16.msra.mxu1 %v10311_v58  ;;  %9605 = vmatprep.mubr.bf16.mxu1 %v12559_v61  ;;  %v7167_v61 = vsel %vm5276_vm5, %v7164_v43, %v7166_v48  ;;  %v10342_v48 = vld [vmem:[#allocation3 + $0x50] sm:$0xff]  }
 0x56a   : > { %9667 = vmatprep.subr.bf16.mxu1 %v10313_v44 }
 0x56c   : > { %9758 = vmatmul.mubr.bf16.vlgmr.msra.gmra.mrb[116].mxu0 %v7167_v61 }
 0x56d   : > { %9668 = vmatpush3.bf16.msra.mxu1 %v10313_v44 }
 0x56e   : > { %9669 = vmatprep.subr.bf16.mxu1 %v10317_v38 }
 0x570   : > { %9606 = vmatmul.mubr.bf16.gmra.mrb[64].mxu1 %v12580_v28  ;;  %v10333_v28 = vld [vmem:[#allocation3 + $0x18] sm:$0xff]  }
 0x571   : > { %9609 = vmatprep.mubr.bf16.mxu1 %v12595_v40  ;;  %9670 = vmatpush3.bf16.msra.mxu1 %v10317_v38  ;;  %v10334_v40 = vld [vmem:[#allocation3 + $0x20] sm:$0xff]  }
 0x572   : > { %9671 = vmatprep.subr.bf16.mxu1 %v10322_v50 }
 0x575   : > { %9672 = vmatpush3.bf16.msra.mxu1 %v10322_v50 }
 0x576   : > { %9673 = vmatprep.subr.bf16.mxu1 %v10325_v19 }
 0x578   : > { %9610 = vmatmul.mubr.bf16.gmra.mrb[68].mxu1 %v12600_v60  ;;  %v10338_v60 = vld [vmem:[#allocation3 + $0x30] sm:$0xff]  }
 0x579   : > { %9613 = vmatprep.mubr.bf16.mxu1 %v12617_v31  ;;  %9674 = vmatpush3.bf16.msra.mxu1 %v10325_v19  ;;  %v10339_v31 = vld [vmem:[#allocation3 + $0x38] sm:$0xff]  }
 0x57a   : > { %9675 = vmatprep.subr.bf16.mxu1 %v10329_v18 }
 0x57d   : > { %9676 = vmatpush3.bf16.msra.mxu1 %v10329_v18 }
 0x57e   : > { %9781 = vmatprep.subr.bf16.mxu1 %v12638_v5 }
 0x580   : > { %9614 = vmatmul.mubr.bf16.gmra.mrb[72].mxu1 %v12621_v42  ;;  %v10340_v42 = vld [vmem:[#allocation3 + $0x40] sm:$0xff]  }
 0x581   : > { %9617 = vmatprep.mubr.bf16.mxu1 %v12634_v30  ;;  %v10341_v30 = vld [vmem:[#allocation3 + $0x48] sm:$0xff]  }
 0x588   : > { %9618 = vmatmul.mubr.bf16.gmra.mrb[76].mxu1 %v12641_v26 }
 0x589   : > { %9677 = vmatprep.mubr.bf16.mxu1 %v10333_v28 }
 0x590   : > { %9678 = vmatmul.mubr.bf16.vlgmr.msra.gmra.mrb[80].mxu1 %v10334_v40 }
 0x591   : > { %9789 = vmatpush3.bf16.msra.mxu1 %v12638_v5  ;;  %9681 = vmatprep.mubr.bf16.mxu1 %v10337_v47 }
 0x592   : > { %9782 = vmatprep.subr.bf16.mxu1 %v12674_v46 }
 0x595   : > { %9790 = vmatpush3.bf16.msra.mxu1 %v12674_v46 }
 0x596   : > { %9783 = vmatprep.subr.bf16.mxu1 %v12687_v0 }
 0x598   : > { %9682 = vmatmul.mubr.bf16.gmra.mrb[84].mxu1 %v10338_v60 }
 0x599   : > { %9791 = vmatpush3.bf16.msra.mxu1 %v12687_v0  ;;  %9685 = vmatprep.mubr.bf16.mxu1 %v10339_v31  ;;  %v10343_v0 = vld [vmem:[#allocation3 + $0x58] sm:$0xff]  }
 0x59a   : > { %9784 = vmatprep.subr.bf16.mxu1 %v12696_v15 }
 0x59d   : > { %9792 = vmatpush3.bf16.msra.mxu1 %v12696_v15 }
 0x59e   : > { %9785 = vmatprep.subr.bf16.mxu1 %v12709_v39 }
 0x5a0   : > { %9686 = vmatmul.mubr.bf16.gmra.mrb[88].mxu1 %v10340_v42 }
 0x5a1   : > { %9689 = vmatprep.mubr.bf16.mxu1 %v10341_v30  ;;  %9793 = vmatpush3.bf16.msra.mxu1 %v12709_v39 }
 0x5a2   : > { %9786 = vmatprep.subr.bf16.mxu1 %v12715_v10 }
 0x5a3   : > { %v9439_v5 = vpop.f32.mrb[240].mxu1 }
 0x5a4   : > { %v12776_v26 = vpop.f32.mrb[241].mxu1 }
 0x5a5   : > { %v12778_v46 = vpop.f32.mrb[242].mxu1  ;;  %9794 = vmatpush3.bf16.msra.mxu1 %v12715_v10 }
 0x5a6   : > { %v4990_v14 = vpop.f32.mrb[243].mxu1  ;;  %9787 = vmatprep.subr.bf16.mxu1 %v12726_v54 }
 0x5a8   : > { %9690 = vmatmul.mubr.bf16.gmra.mrb[92].mxu1 %v10342_v48  ;;  %v9559_v1 = vpop.f32.mrb[44].mxu0 }
 0x5a9   : > { %9693 = vmatprep.mubr.bf16.mxu1 %v10343_v0  ;;  %9795 = vmatpush3.bf16.msra.mxu1 %v12726_v54  ;;  %v12796_v12 = vpop.f32.mrb[45].mxu0 }
 0x5aa   : > { %9788 = vmatprep.subr.bf16.mxu1 %v12733_v32  ;;  %v12798_v56 = vpop.f32.mrb[46].mxu0 }
 0x5ab   : > { %v12784_v15 = vpop.f32.mrb[244].mxu1 }
 0x5ac   : > { %v12786_v39 = vpop.f32.mrb[245].mxu1 }
 0x5ad   : > { %v12788_v22 = vpop.f32.mrb[246].mxu1  ;;  %9796 = vmatpush3.bf16.msra.mxu1 %v12733_v32  ;;  %v12800_v32 = vpop.f32.mrb[47].mxu0 }
 0x5ae   : > { %v5005_v10 = vpop.f32.mrb[247].mxu1 }
 0x5b0   : > { %9694 = vmatmul.mubr.bf16.gmra.mrb[96].mxu1 %v10344_v33  ;;  %v12809_v36 = vpop.f32.mrb[48].mxu0 }
 0x5b1   : > { %9697 = vmatprep.mubr.bf16.mxu1 %v10345_v49 }
 0x5b3   : > { %v12791_v16 = vpop.f32.mrb[248].mxu1 }
 0x5b4   : > { %v5017_v4 = vpop.f32.mrb[249].mxu1 }
 0x5b5   : > { %v9448_v54 = vpop.f32.mrb[250].mxu1 }
 0x5b6   : > { %v12793_v63 = vpop.f32.mrb[251].mxu1 }
 0x5b8   : > { %9698 = vmatmul.mubr.bf16.gmra.mrb[100].mxu1 %v10346_v6 }
 0x5b9   : > { %9761 = vmatprep.mubr.bf16.mxu1 %v12664_v8  ;;  %v12812_v8 = vpop.f32.mrb[49].mxu0 }
 0x5ba   : > { %v12814_v52 = vpop.f32.mrb[50].mxu0 }
 0x5bb   : > { %v9451_v13 = vpop.f32.mrb[252].mxu1  ;;  %v5712_v27 = vpop.f32.mrb[51].mxu0 }
 0x5bc   : > { %v12802_v51 = vpop.f32.mrb[253].mxu1  ;;  %v12823_v2 = vpop.f32.mrb[52].mxu0 }
 0x5bd   : > { %v12804_v20 = vpop.f32.mrb[254].mxu1 }
 0x5be   : > { %v12806_v55 = vpop.f32.mrb[255].mxu1 }
 0x5c0   : > { %9762 = vmatmul.mubr.bf16.vlgmr.msra.gmra.mrb[104].mxu1 %v12669_v59  ;;  %v5724_v59 = vpop.f32.mrb[53].mxu0 }
 0x5c1   : > { %9765 = vmatprep.mubr.bf16.mxu1 %v12680_v7  ;;  %v9568_v7 = vpop.f32.mrb[54].mxu0 }
 0x5c2   : > { %v12828_v29 = vpop.f32.mrb[55].mxu0 }
 0x5c3   : > { %v12816_v45 = vpop.f32.mrb[0].mxu1  ;;  %v9571_v25 = vpop.f32.mrb[56].mxu0 }
 0x5c4   : > { %v12818_v58 = vpop.f32.mrb[1].mxu1 }
 0x5c5   : > { %v12820_v23 = vpop.f32.mrb[2].mxu1 }
 0x5c6   : > { %v5049_v53 = vpop.f32.mrb[3].mxu1 }
 0x5c8   : > { %9766 = vmatmul.mubr.bf16.gmra.mrb[108].mxu1 %v12684_v35  ;;  %v12834_v35 = vpop.f32.mrb[57].mxu0 }
 0x5c9   : > { %9769 = vmatprep.mubr.bf16.mxu1 %v12702_v24  ;;  %v12836_v43 = vpop.f32.mrb[58].mxu0 }
 0x5ca   : > { %v12838_v38 = vpop.f32.mrb[59].mxu0 }
 0x5cb   : > { %v12826_v21 = vpop.f32.mrb[4].mxu1 }
 0x5cc   : > { %v5061_v44 = vpop.f32.mrb[5].mxu1 }
 0x5cd   : > { %v9460_v11 = vpop.f32.mrb[6].mxu1 }
 0x5ce   : > { %v12830_v57 = vpop.f32.mrb[7].mxu1 }
 0x5d0   : > { %9770 = vmatmul.mubr.bf16.gmra.mrb[112].mxu1 %v12706_v41 }
 0x5d1   : > { %9773 = vmatprep.mubr.bf16.mxu1 %v12719_v17  ;;  %v12849_v17 = vpop.f32.mrb[60].mxu0 }
 0x5d2   : > { %v12852_v18 = vpop.f32.mrb[61].mxu0 }
 0x5d3   : > { %v9479_v24 = vpop.f32.mrb[8].mxu1  ;;  %v12854_v28 = vpop.f32.mrb[62].mxu0 }
 0x5d4   : > { %v5168_v9 = vpop.f32.mrb[9].mxu1  ;;  %v5756_v47 = vpop.f32.mrb[63].mxu0 }
 0x5d5   : > { %v12841_v34 = vadd.f32 %v5168_v9, %v12776_v26  ;;  %v9480_v50 = vpop.f32.mrb[10].mxu1 }
 0x5d6   : > { %v12844_v19 = vadd.f32 %v9480_v50, %v12778_v46  ;;  %v5171_v61 = vpop.f32.mrb[11].mxu1 }
 0x5d7   : > { %v12846_v41 = vadd.f32 %v5171_v61, %v4990_v14 }
 0x5d8   : > { %9774 = vmatmul.mubr.bf16.gmra.mrb[116].mxu1 %v12723_v62 }
 0x5d9   : > { %9777 = vmatprep.mubr.bf16.mxu1 %v12736_v37  ;;  %v12866_v37 = vpop.f32.mrb[64].mxu0 }
 0x5da   : > { %v5768_v26 = vpop.f32.mrb[65].mxu0 }
 0x5db   : > { %v9483_v40 = vpop.f32.mrb[12].mxu1  ;;  %v9580_v48 = vpop.f32.mrb[66].mxu0 }
 0x5dc   : > { %v12857_v60 = vadd.f32 %v9483_v40, %v12784_v15  ;;  %v5183_v31 = vpop.f32.mrb[13].mxu1  ;;  %v12868_v0 = vpop.f32.mrb[67].mxu0 }
 0x5dd   : > { %v12860_v42 = vadd.f32 %v5183_v31, %v12786_v39  ;;  %v9484_v30 = vpop.f32.mrb[14].mxu1 }
 0x5de   : > { %v12863_v62 = vadd.f32 %v9484_v30, %v12788_v22  ;;  %v5186_v5 = vpop.f32.mrb[15].mxu1 }
 0x5df   : > { %v9639_v22 = vpop.f32.mrb[68].mxu0 }
 0x5e0   : > { %9778 = vmatmul.mubr.bf16.gmra.mrb[120].mxu1 %v12740_v3  ;;  %v12876_v10 = vpop.f32.mrb[69].mxu0 }
 0x5e1   : > { %v12878_v3 = vpop.f32.mrb[70].mxu0 }
 0x5e2   : > { %v12880_v6 = vpop.f32.mrb[71].mxu0 }
 0x5e3   : > { %v9487_v46 = vpop.f32.mrb[16].mxu1 }
 0x5e4   : > { %v12871_v14 = vadd.f32 %v9487_v46, %v12791_v16  ;;  %v5198_v15 = vpop.f32.mrb[17].mxu1 }
 0x5e5   : > { %v9488_v39 = vpop.f32.mrb[18].mxu1 }
 0x5e6   : > { %v5200_v33 = vpop.f32.mrb[19].mxu1 }
 0x5e7   : > { %v12874_v49 = vadd.f32 %v5200_v33, %v12793_v63  ;;  %v12891_v53 = vpop.f32.mrb[72].mxu0 }
 0x5e8   : > { %v12893_v59 = vpop.f32.mrb[73].mxu0 }
 0x5e9   : > { %v12895_v7 = vpop.f32.mrb[74].mxu0 }
 0x5ea   : > { %v6357_v11 = vpop.f32.mrb[75].mxu0 }
 0x5eb   : > { %v9491_v4 = vpop.f32.mrb[20].mxu1 }
 0x5ec   : > { %v5212_v54 = vpop.f32.mrb[21].mxu1 }
 0x5ed   : > { %v12883_v1 = vadd.f32 %v5212_v54, %v12802_v51  ;;  %v9492_v16 = vpop.f32.mrb[22].mxu1 }
 0x5ee   : > { %v12886_v13 = vadd.f32 %v9492_v16, %v12804_v20  ;;  %v5215_v27 = vpop.f32.mrb[23].mxu1 }
 0x5ef   : > { %v12889_v63 = vadd.f32 %v5215_v27, %v12806_v55  ;;  %v12906_v50 = vpop.f32.mrb[76].mxu0 }
 0x5f0   : > { %v6369_v61 = vpop.f32.mrb[77].mxu0 }
 0x5f1   : > { %v9648_v40 = vpop.f32.mrb[78].mxu0 }
 0x5f2   : > { %v12908_v31 = vpop.f32.mrb[79].mxu0 }
 0x5f3   : > { %v9495_v44 = vpop.f32.mrb[24].mxu1 }
 0x5f4   : > { %v12898_v25 = vadd.f32 %v9495_v44, %v12816_v45  ;;  %v5227_v51 = vpop.f32.mrb[25].mxu1 }
 0x5f5   : > { %v12901_v24 = vadd.f32 %v5227_v51, %v12818_v58  ;;  %v9496_v20 = vpop.f32.mrb[26].mxu1 }
 0x5f6   : > { %v12904_v9 = vadd.f32 %v9496_v20, %v12820_v23  ;;  %v5230_v55 = vpop.f32.mrb[27].mxu1 }
 0x5f7   : > { %v9651_v48 = vpop.f32.mrb[80].mxu0 }
 0x5f8   : > { %v12916_v23 = vpop.f32.mrb[81].mxu0 }
 0x5f9   : > { %v12918_v46 = vpop.f32.mrb[82].mxu0 }
 0x5fa   : > { %v12920_v39 = vpop.f32.mrb[83].mxu0 }
 0x5fb   : > { %v9499_v47 = vpop.f32.mrb[28].mxu1 }
 0x5fc   : > { %v12911_v30 = vadd.f32 %v9499_v47, %v12826_v21  ;;  %v5242_v45 = vpop.f32.mrb[29].mxu1 }
 0x5fd   : > { %v9500_v5 = vpop.f32.mrb[30].mxu1 }
 0x5fe   : > { %v5244_v26 = vpop.f32.mrb[31].mxu1 }
 0x5ff   : > { %v12914_v58 = vadd.f32 %v5244_v26, %v12830_v57  ;;  %v12931_v44 = vpop.f32.mrb[84].mxu0 }
 0x600   : > { %v12936_v51 = vpop.f32.mrb[85].mxu0 }
 0x603   : > { %v9519_v15 = vpop.f32.mrb[32].mxu1 }
 0x604   : > { %v5396_v33 = vpop.f32.mrb[33].mxu1 }
 0x605   : > { %v5483_v22 = vadd.f32 %v5396_v33, %v12841_v34  ;;  %v9520_v4 = vpop.f32.mrb[34].mxu1  ;;  %v12938_v34 = vpop.f32.mrb[86].mxu0 }
 0x606   : > { %v5485_v21 = vadd.f32 %v9520_v4, %v12844_v19  ;;  %v5399_v54 = vpop.f32.mrb[35].mxu1  ;;  %v6401_v19 = vpop.f32.mrb[87].mxu0 }
 0x607   : > { %v5484_v16 = vadd.f32 %v5399_v54, %v12846_v41  ;;  %v12926_v57 = vadd.f32 %v12796_v12, %v5483_v22  ;;  %v12952_v5 = vpop.f32.mrb[88].mxu0 }
 0x608   : > { %v12929_v27 = vadd.f32 %v12798_v56, %v5485_v21  ;;  %v6413_v26 = vpop.f32.mrb[89].mxu0 }
 0x609   : > { %v12934_v11 = vadd.f32 %v12800_v32, %v5484_v16 }
 0x60b   : > { %v9523_v20 = vpop.f32.mrb[36].mxu1 }
 0x60c   : > { %v5487_v55 = vadd.f32 %v9523_v20, %v12857_v60  ;;  %v5411_v41 = vpop.f32.mrb[37].mxu1  ;;  %v9660_v60 = vpop.f32.mrb[90].mxu0 }
 0x60d   : > { %v5486_v12 = vadd.f32 %v5411_v41, %v12860_v42  ;;  %v9524_v61 = vpop.f32.mrb[38].mxu1  ;;  %v12954_v15 = vpop.f32.mrb[91].mxu0 }
 0x60e   : > { %v5488_v56 = vadd.f32 %v9524_v61, %v12863_v62  ;;  %v12944_v40 = vadd.f32 %v12809_v36, %v5487_v55  ;;  %v5414_v47 = vpop.f32.mrb[39].mxu1 }
 0x60f   : > { %v12947_v32 = vadd.f32 %v12812_v8, %v5486_v12  ;;  %v9719_v4 = vpop.f32.mrb[92].mxu0 }
 0x610   : > { %v12950_v45 = vadd.f32 %v12814_v52, %v5488_v56  ;;  %v12964_v21 = vpop.f32.mrb[93].mxu0 }
 0x611   : > { %v12966_v54 = vpop.f32.mrb[94].mxu0 }
 0x612   : > { %v12968_v20 = vpop.f32.mrb[95].mxu0 }
 0x613   : > { %v9527_v48 = vpop.f32.mrb[40].mxu1 }
 0x614   : > { %v5490_v42 = vadd.f32 %v9527_v48, %v12871_v14  ;;  %v5426_v62 = vpop.f32.mrb[41].mxu1 }
 0x615   : > { %v9528_v33 = vpop.f32.mrb[42].mxu1 }
 0x616   : > { %v12958_v36 = vadd.f32 %v12823_v2, %v5490_v42  ;;  %v5428_v22 = vpop.f32.mrb[43].mxu1 }
 0x617   : > { %v5489_v8 = vadd.f32 %v5428_v22, %v12874_v49  ;;  %v12979_v61 = vpop.f32.mrb[96].mxu0 }
 0x618   : > { %v12984_v47 = vpop.f32.mrb[97].mxu0 }
 0x619   : > { %v12962_v52 = vadd.f32 %v12828_v29, %v5489_v8 }
 0x61b   : > { %v9531_v16 = vpop.f32.mrb[44].mxu1 }
 0x61c   : > { %v5440_v14 = vpop.f32.mrb[45].mxu1 }
 0x61d   : > { %v5491_v19 = vadd.f32 %v5440_v14, %v12883_v1  ;;  %v9532_v55 = vpop.f32.mrb[46].mxu1  ;;  %v12986_v1 = vpop.f32.mrb[98].mxu0 }
 0x61e   : > { %v5493_v2 = vadd.f32 %v9532_v55, %v12886_v13  ;;  %v5443_v41 = vpop.f32.mrb[47].mxu1  ;;  %v7057_v13 = vpop.f32.mrb[99].mxu0 }
 0x61f   : > { %v5492_v49 = vadd.f32 %v5443_v41, %v12889_v63  ;;  %v12974_v12 = vadd.f32 %v12834_v35, %v5491_v19  ;;  %v13000_v22 = vpop.f32.mrb[100].mxu0 }
 0x620   : > { %v12977_v29 = vadd.f32 %v12836_v43, %v5493_v2  ;;  %v7069_v8 = vpop.f32.mrb[101].mxu0 }
 0x621   : > { %v12982_v56 = vadd.f32 %v12838_v38, %v5492_v49 }
 0x623   : > { %v9535_v26 = vpop.f32.mrb[48].mxu1 }
 0x624   : > { %v5495_v60 = vadd.f32 %v9535_v26, %v12898_v25  ;;  %v5455_v63 = vpop.f32.mrb[49].mxu1  ;;  %v9728_v25 = vpop.f32.mrb[102].mxu0 }
 0x625   : > { %v5494_v35 = vadd.f32 %v5455_v63, %v12901_v24  ;;  %v9536_v48 = vpop.f32.mrb[50].mxu1  ;;  %v13002_v16 = vpop.f32.mrb[103].mxu0 }
 0x626   : > { %v5496_v43 = vadd.f32 %v9536_v48, %v12904_v9  ;;  %v12992_v42 = vadd.f32 %v12849_v17, %v5495_v60  ;;  %v5458_v62 = vpop.f32.mrb[51].mxu1 }
 0x627   : > { %v12995_v38 = vadd.f32 %v12852_v18, %v5494_v35  ;;  %v9731_v55 = vpop.f32.mrb[104].mxu0 }
 0x628   : > { %v12998_v33 = vadd.f32 %v12854_v28, %v5496_v43  ;;  %v13012_v2 = vpop.f32.mrb[105].mxu0 }
 0x629   : > { %v13014_v41 = vpop.f32.mrb[106].mxu0 }
 0x62a   : > { %v13016_v26 = vpop.f32.mrb[107].mxu0 }
 0x62b   : > { %v9539_v4 = vpop.f32.mrb[52].mxu1 }
 0x62c   : > { %v5498_v24 = vadd.f32 %v9539_v4, %v12911_v30  ;;  %v5470_v9 = vpop.f32.mrb[53].mxu1 }
 0x62d   : > { %v9540_v14 = vpop.f32.mrb[54].mxu1 }
 0x62e   : > { %v13006_v17 = vadd.f32 %v12866_v37, %v5498_v24  ;;  %v5472_v19 = vpop.f32.mrb[55].mxu1 }
 0x62f   : > { %v5497_v18 = vadd.f32 %v5472_v19, %v12914_v58  ;;  %v13027_v48 = vpop.f32.mrb[108].mxu0 }
 0x630   : > { %v13032_v62 = vpop.f32.mrb[109].mxu0 }
 0x631   : > { %v13010_v28 = vadd.f32 %v12868_v0, %v5497_v18 }
 0x633   : > { %v9599_v49 = vpop.f32.mrb[56].mxu1 }
 0x634   : > { %v6096_v30 = vpop.f32.mrb[57].mxu1 }
 0x635   : > { %v6183_v13 = vadd.f32 %v6096_v30, %v12926_v57  ;;  %v9600_v60 = vpop.f32.mrb[58].mxu1  ;;  %v13034_v57 = vpop.f32.mrb[110].mxu0 }
 0x636   : > { %v6185_v37 = vadd.f32 %v9600_v60, %v12929_v27  ;;  %v6099_v63 = vpop.f32.mrb[59].mxu1  ;;  %v7101_v27 = vpop.f32.mrb[111].mxu0 }
 0x637   : > { %v6184_v58 = vadd.f32 %v6099_v63, %v12934_v11  ;;  %v13022_v35 = vadd.f32 %v12876_v10, %v6183_v13  ;;  %v13048_v19 = vpop.f32.mrb[112].mxu0 }
 0x638   : > { %v13025_v0 = vadd.f32 %v12878_v3, %v6185_v37  ;;  %v7113_v18 = vpop.f32.mrb[113].mxu0 }
 0x639   : > { %v13030_v43 = vadd.f32 %v12880_v6, %v6184_v58 }
 0x63b   : > { %v9603_v8 = vpop.f32.mrb[60].mxu1 }
 0x63c   : > { %v6187_v25 = vadd.f32 %v9603_v8, %v12944_v40  ;;  %v6111_v11 = vpop.f32.mrb[61].mxu1  ;;  %v9740_v40 = vpop.f32.mrb[114].mxu0 }
 0x63d   : > { %v6186_v10 = vadd.f32 %v6111_v11, %v12947_v32  ;;  %v9604_v4 = vpop.f32.mrb[62].mxu1  ;;  %v13050_v49 = vpop.f32.mrb[115].mxu0 }
 0x63e   : > { %v13039_v3 = vadd.f32 %v12891_v53, %v6187_v25  ;;  %v6188_v24 = vadd.f32 %v9604_v4, %v12950_v45  ;;  %v6114_v9 = vpop.f32.mrb[63].mxu1 }
 0x63f   : > { %v13043_v6 = vadd.f32 %v12893_v59, %v6186_v10  ;;  %v9759_v60 = vpop.f32.mrb[116].mxu0 }
 0x640   : > { %v13046_v14 = vadd.f32 %v12895_v7, %v6188_v24  ;;  %v7282_v7 = vpop.f32.mrb[117].mxu0 }
 0x641   : > { %v9760_v63 = vpop.f32.mrb[118].mxu0 }
 0x642   : > { %v7285_v8 = vpop.f32.mrb[119].mxu0 }
 0x643   : > { %v9607_v55 = vpop.f32.mrb[64].mxu1 }
 0x644   : > { %v6190_v32 = vadd.f32 %v9607_v55, %v12958_v36  ;;  %v6126_v53 = vpop.f32.mrb[65].mxu1 }
 0x645   : > { %v9608_v30 = vpop.f32.mrb[66].mxu1 }
 0x646   : > { %v6128_v13 = vpop.f32.mrb[67].mxu1  ;;  %v13054_v45 = vadd.f32 %v12906_v50, %v6190_v32 }
 0x647   : > { %v6189_v59 = vadd.f32 %v6128_v13, %v12962_v52  ;;  %v8318_v13 = vld [vmem:[%s11220_s13] sm:$0xff]  }
 0x648   : > { %v8319_v60 = vunpack.c.l.bf16 %v8318_v13 }
 0x649   : > { %v13058_v37 = vadd.f32 %v12908_v31, %v6189_v59  ;;  %v7410_v59 = vld [vmem:[%s11220_s13 + $0x8] sm:$0x1] }
 0x64b   : > { %v9611_v58 = vpop.f32.mrb[68].mxu1 }
 0x64c   : > { %v6140_v27 = vpop.f32.mrb[69].mxu1 }
 0x64d   : > { %v6191_v25 = vadd.f32 %v6140_v27, %v12974_v12  ;;  %v9612_v36 = vpop.f32.mrb[70].mxu1 }
 0x64e   : > { %v6193_v11 = vadd.f32 %v9612_v36, %v12977_v29  ;;  %v6143_v10 = vpop.f32.mrb[71].mxu1  ;;  %v7434_v36 = vunpack.c.l.bf16 %v7410_v59 }
 0x64f   : > { %v6192_v50 = vadd.f32 %v6143_v10, %v12982_v56  ;;  %v13064_v4 = vadd.f32 %v12916_v23, %v6191_v25 }
 0x650   : > { %v13067_v52 = vadd.f32 %v12918_v46, %v6193_v11 }
 0x651   : > { %v13070_v31 = vadd.f32 %v12920_v39, %v6192_v50 }
 0x653   : > { %v9615_v24 = vpop.f32.mrb[72].mxu1 }
 0x654   : > { %v6195_v9 = vadd.f32 %v9615_v24, %v12992_v42  ;;  %v6155_v12 = vpop.f32.mrb[73].mxu1 }
 0x655   : > { %v6194_v29 = vadd.f32 %v6155_v12, %v12995_v38  ;;  %v9616_v18 = vpop.f32.mrb[74].mxu1 }
 0x656   : > { %v6196_v56 = vadd.f32 %v9616_v18, %v12998_v33  ;;  %v6158_v23 = vpop.f32.mrb[75].mxu1  ;;  %v13076_v40 = vadd.f32 %v12931_v44, %v6195_v9  ;;  %v7411_v44 = vld [vmem:[%s11220_s13 + $0xc] sm:$0xff]  }
 0x657   : > { %v13079_v46 = vadd.f32 %v12936_v51, %v6194_v29  ;;  %v7435_v27 = vunpack.c.l.bf16 %v7411_v44  ;;  %v7436_v25 = vunpack.c.h.bf16 %v7411_v44  ;;  %v13101_v18 = vld [vmem:[#allocation15] ss:$0 sm:$0xff]  ;;  %v7484_v23 = vrot.slane %v7434_v36, 1 }
 0x658   : > { %v13082_v39 = vadd.f32 %v12938_v34, %v6196_v56  ;;  %v8320_v34 = vunpack.c.h.bf16 %v8318_v13 }
 0x659   : > { %v7486_v12 = vrot.slane %v7435_v27, 1  ;;  %v13099_v29 = vrot.slane %v7436_v25, 1 }
 0x65a   : > { %v7482_v24 = vrot.slane %v8320_v34, 1 }
 0x65b   : > { %v9619_v42 = vpop.f32.mrb[76].mxu1 }
 0x65c   : > { %v6198_v55 = vadd.f32 %v9619_v42, %v13006_v17  ;;  %v6170_v32 = vpop.f32.mrb[77].mxu1 }
 0x65d   : > { %v9620_v53 = vpop.f32.mrb[78].mxu1 }
 0x65e   : > { %v6172_v38 = vpop.f32.mrb[79].mxu1  ;;  %v13086_v30 = vadd.f32 %v12952_v5, %v6198_v55 }
 0x65f   : > { %v6197_v33 = vadd.f32 %v6172_v38, %v13010_v28  ;;  %v7481_v28 = vrot.slane %v8319_v60, 1 }
 0x661   : > { %v13093_v51 = vadd.f32 %v12954_v15, %v6197_v33  ;;  %v7485_v33 = vsel %vm5276_vm5, %v7482_v24, %v7484_v23 }
 0x663   : > { %v9679_v58 = vpop.f32.mrb[80].mxu1 }
 0x664   : > { %v6637_v17 = vpop.f32.mrb[81].mxu1 }
 0x665   : > { %v6724_v11 = vadd.f32 %v6637_v17, %v13022_v35  ;;  %v9680_v10 = vpop.f32.mrb[82].mxu1 }
 0x666   : > { %v6726_v5 = vadd.f32 %v9680_v10, %v13025_v0  ;;  %v6640_v50 = vpop.f32.mrb[83].mxu1  ;;  %v7483_v0 = vsel %vm5276_vm5, %v7481_v28, %v7482_v24 }
 0x667   : > { %v6725_v9 = vadd.f32 %v6640_v50, %v13030_v43  ;;  %v7126_v15 = vadd.f32 %v12964_v21, %v6724_v11  ;;  %v7488_v43 = vsel %vm5276_vm5, %v7486_v12, %v13099_v29 }
 0x668   : > { %v7128_v56 = vadd.f32 %v12966_v54, %v6726_v5 }
 0x669   : > { %v7369_v42 = vadd.f32 %v7282_v7, %v7126_v15  ;;  %v7127_v35 = vadd.f32 %v12968_v20, %v6725_v9 }
 0x66a   : > { %v7371_v55 = vadd.f32 %v9760_v63, %v7128_v56 }
 0x66b   : > { %v7392_v32 = vadd.f32 %v13101_v18, %v7369_v42  ;;  %v7370_v21 = vadd.f32 %v7285_v8, %v7127_v35  ;;  %v9683_v53 = vpop.f32.mrb[84].mxu1 }
 0x66c   : > { %v7394_v38 = vadd.f32 %v13101_v18, %v7371_v55  ;;  %v6728_v54 = vadd.f32 %v9683_v53, %v13039_v3  ;;  %v6652_v7 = vpop.f32.mrb[85].mxu1 }
 0x66d   : > { %v7537_v20 = vadd.f32 %v7483_v0, %v7392_v32  ;;  %v7393_v63 = vadd.f32 %v13101_v18, %v7370_v21  ;;  %v6727_v13 = vadd.f32 %v6652_v7, %v13043_v6  ;;  %v9684_v44 = vpop.f32.mrb[86].mxu1  ;;  %v8347_v0 = vld [vmem:[%s11220_s13 + $0x18] sm:$0xff]   ;;  %v7413_v32 = vld [vmem:[%s11220_s13 + $0x14] sm:$0x1] }
 0x66e   : > { %v7539_v59 = vadd.f32 %v7488_v43, %v7394_v38  ;;  %v6729_v8 = vadd.f32 %v9684_v44, %v13046_v14  ;;  %v6655_v60 = vpop.f32.mrb[87].mxu1  ;;  %v7130_v34 = vadd.f32 %v12979_v61, %v6728_v54  ;;  %v7416_v43 = vld [vmem:[%s11220_s13 + $0x20] sm:$0x1]  ;;  %v8323_v21 = vunpack.c.l.bf16 %v8347_v0 }
 0x66f   : > { %v7553_v58 = vmax.f32 %v7537_v20, 0.0  ;;  %v7538_v27 = vadd.f32 %v7485_v33, %v7393_v63  ;;  %v7129_v25 = vadd.f32 %v12984_v47, %v6727_v13  ;;  %v8324_v53 = vunpack.c.h.bf16 %v8347_v0  ;;  %v7418_v63 = vld [vmem:[%s11220_s13 + $0x24] sm:$0xff]   ;;  %v7419_v13 = vld [vmem:[%s11220_s13 + $0x2c] sm:$0x1] }
 0x670   : > { %v7555_v3 = vmax.f32 %v7539_v59, 0.0  ;;  %v13118_v17 = vadd.f32 %v12986_v1, %v6729_v8  ;;  %v7437_v38 = vunpack.c.l.bf16 %v7413_v32  ;;  %v7440_v33 = vunpack.c.l.bf16 %v7416_v43 }
 0x671   : > { %7569 = vst [vmem:[%s11259_s15] sm:$0xff] %v7553_v58  ;;  %v7554_v36 = vmax.f32 %v7538_v27, 0.0  ;;  %v7491_v54 = vrot.slane %v8323_v21, 1  ;;  %v7492_v7 = vrot.slane %v8324_v53, 1 }
 0x672   : > { %7571 = vst [vmem:[%s11259_s15 + $0x10] sm:$0xff] %v7555_v3  ;;  %v7494_v59 = vrot.slane %v7440_v33, 1  ;;  %v7442_v3 = vunpack.c.h.bf16 %v7418_v63 }
 0x673   : > { %7570 = vst [vmem:[%s11259_s15 + $0x8] sm:$0xff] %v7554_v36  ;;  %v9687_v6 = vpop.f32.mrb[88].mxu1  ;;  %v7493_v58 = vsel %vm5276_vm5, %v7491_v54, %v7492_v7  ;;  %v7443_v36 = vunpack.c.l.bf16 %v7419_v13 }
 0x674   : > { %v6731_v11 = vadd.f32 %v9687_v6, %v13054_v45  ;;  %v6667_v10 = vpop.f32.mrb[89].mxu1 }
 0x675   : > { %v9688_v14 = vpop.f32.mrb[90].mxu1 }
 0x676   : > { %v6669_v5 = vpop.f32.mrb[91].mxu1  ;;  %v13125_v61 = vadd.f32 %v13000_v22, %v6731_v11 }
 0x677   : > { %v6730_v50 = vadd.f32 %v6669_v5, %v13058_v37  ;;  %v7441_v5 = vunpack.c.l.bf16 %v7418_v63 }
 0x679   : > { %v13129_v47 = vadd.f32 %v13002_v16, %v6730_v50 }
 0x67b   : > { %v9691_v1 = vpop.f32.mrb[92].mxu1 }
 0x67c   : > { %v6681_v28 = vpop.f32.mrb[93].mxu1  ;;  %v7497_v1 = vrot.slane %v7442_v3, 1 }
 0x67d   : > { %v6732_v24 = vadd.f32 %v6681_v28, %v13064_v4  ;;  %v9692_v9 = vpop.f32.mrb[94].mxu1  ;;  %v7499_v28 = vrot.slane %v7443_v36, 1 }
 0x67e   : > { %v6734_v15 = vadd.f32 %v9692_v9, %v13067_v52  ;;  %v6684_v45 = vpop.f32.mrb[95].mxu1 }
 0x67f   : > { %v6733_v12 = vadd.f32 %v6684_v45, %v13070_v31  ;;  %v13135_v22 = vadd.f32 %v13012_v2, %v6732_v24 }
 0x680   : > { %v13138_v37 = vadd.f32 %v13014_v41, %v6734_v15  ;;  %v8348_v15 = vld [vmem:[%s11220_s13 + $0x30] sm:$0xff]  }
 0x681   : > { %v13141_v16 = vadd.f32 %v13016_v26, %v6733_v12  ;;  %v8328_v32 = vunpack.c.h.bf16 %v8348_v15 }
 0x683   : > { %v9695_v56 = vpop.f32.mrb[96].mxu1  ;;  %v7502_v33 = vrot.slane %v8328_v32, 1 }
 0x684   : > { %v6736_v4 = vadd.f32 %v9695_v56, %v13076_v40  ;;  %v6696_v23 = vpop.f32.mrb[97].mxu1 }
 0x685   : > { %v6735_v52 = vadd.f32 %v6696_v23, %v13079_v46  ;;  %v9696_v42 = vpop.f32.mrb[98].mxu1  ;;  %v7423_v23 = vld [vmem:[%s11220_s13 + $0x3c] sm:$0xff]  }
 0x686   : > { %v6737_v31 = vadd.f32 %v9696_v42, %v13082_v39  ;;  %v6699_v35 = vpop.f32.mrb[99].mxu1  ;;  %v13147_v2 = vadd.f32 %v13027_v48, %v6736_v4  ;;  %v7496_v4 = vrot.slane %v7441_v5, 1 }
 0x687   : > { %v13150_v41 = vadd.f32 %v13032_v62, %v6735_v52  ;;  %v7500_v52 = vsel %vm5276_vm5, %v7497_v1, %v7499_v28 }
 0x688   : > { %v13153_v26 = vadd.f32 %v13034_v57, %v6737_v31  ;;  %v7422_v31 = vld [vmem:[%s11220_s13 + $0x38] sm:$0x1] }
 0x689   : > { %v7446_v21 = vunpack.c.l.bf16 %v7422_v31 }
 0x68b   : > { %v9699_v55 = vpop.f32.mrb[100].mxu1 }
 0x68c   : > { %v6739_v40 = vadd.f32 %v9699_v55, %v13086_v30  ;;  %v6711_v46 = vpop.f32.mrb[101].mxu1  ;;  %v7489_v30 = vrot.slane %v7437_v38, 1  ;;  %v8327_v55 = vunpack.c.l.bf16 %v8348_v15 }
 0x68d   : > { %v9700_v39 = vpop.f32.mrb[102].mxu1  ;;  %v7448_v46 = vunpack.c.h.bf16 %v7423_v23 }
 0x68e   : > { %v6713_v48 = vpop.f32.mrb[103].mxu1  ;;  %v13160_v62 = vadd.f32 %v13048_v19, %v6739_v40  ;;  %v7498_v39 = vsel %vm5276_vm5, %v7496_v4, %v7497_v1 }
 0x68f   : > { %v6738_v57 = vadd.f32 %v6713_v48, %v13093_v51  ;;  %v8349_v48 = vld [vmem:[%s11220_s13 + $0x48] sm:$0xff]   ;;  %v7507_v63 = vrot.slane %v7448_v46, 1 }
 0x691   : > { %v13164_v20 = vadd.f32 %v13050_v49, %v6738_v57  ;;  %v7490_v49 = vsel %vm5276_vm5, %v13099_v29, %v7489_v30  ;;  %v7501_v57 = vrot.slane %v8327_v55, 1 }
 0x693   : > { %v9763_v44 = vpop.f32.mrb[104].mxu1  ;;  %v7503_v3 = vsel %vm5276_vm5, %v7501_v57, %v7502_v33 }
 0x694   : > { %v7373_v8 = vadd.f32 %v9763_v44, %v7130_v34  ;;  %v7297_v60 = vpop.f32.mrb[105].mxu1  ;;  %v7495_v34 = vsel %vm5276_vm5, %v7492_v7, %v7494_v59  ;;  %v7504_v44 = vrot.slane %v7446_v21, 1  ;;  %v8331_v59 = vunpack.c.l.bf16 %v8349_v48 }
 0x695   : > { %v7372_v27 = vadd.f32 %v7297_v60, %v7129_v25  ;;  %v9764_v19 = vpop.f32.mrb[106].mxu1  ;;  %v7428_v60 = vld [vmem:[%s11220_s13 + $0x50] sm:$0x1] }
 0x696   : > { %v7396_v51 = vadd.f32 %v13101_v18, %v7373_v8  ;;  %v7374_v6 = vadd.f32 %v9764_v19, %v13118_v17  ;;  %v7300_v11 = vpop.f32.mrb[107].mxu1  ;;  %v8332_v8 = vunpack.c.h.bf16 %v8349_v48 }
 0x697   : > { %v7395_v10 = vadd.f32 %v13101_v18, %v7372_v27 }
 0x698   : > { %v7541_v14 = vadd.f32 %v7493_v58, %v7396_v51  ;;  %v7397_v25 = vadd.f32 %v13101_v18, %v7374_v6  ;;  %v7512_v5 = vrot.slane %v8332_v8, 1 }
 0x699   : > { %v7540_v50 = vadd.f32 %v7490_v49, %v7395_v10 }
 0x69a   : > { %v7557_v29 = vmax.f32 %v7541_v14, 0.0  ;;  %v7542_v24 = vadd.f32 %v7495_v34, %v7397_v25  ;;  %v7452_v34 = vunpack.c.l.bf16 %v7428_v60  ;;  %v7511_v25 = vrot.slane %v8331_v59, 1 }
 0x69b   : > { %v7556_v9 = vmax.f32 %v7540_v50, 0.0  ;;  %v9767_v17 = vpop.f32.mrb[108].mxu1 }
 0x69c   : > { %7573 = vst [vmem:[%s11259_s15 + $0x20] sm:$0xff] %v7557_v29  ;;  %v7558_v45 = vmax.f32 %v7542_v24, 0.0  ;;  %v7376_v12 = vadd.f32 %v9767_v17, %v13125_v61  ;;  %v7312_v56 = vpop.f32.mrb[109].mxu1  ;;  %v7447_v61 = vunpack.c.l.bf16 %v7423_v23  ;;  %v7430_v29 = vld [vmem:[%s11220_s13 + $0x54] sm:$0xff]   ;;  %v7431_v24 = vld [vmem:[%s11220_s13 + $0x5c] sm:$0x1] }
 0x69d   : > { %7572 = vst [vmem:[%s11259_s15 + $0x18] sm:$0xff] %v7556_v9  ;;  %v9768_v42 = vpop.f32.mrb[110].mxu1  ;;  %v7513_v56 = vsel %vm5276_vm5, %v7511_v25, %v7512_v5  ;;  %v7454_v31 = vunpack.c.h.bf16 %v7430_v29 }
 0x69e   : > { %7574 = vst [vmem:[%s11259_s15 + $0x28] sm:$0xff] %v7558_v45  ;;  %v7399_v35 = vadd.f32 %v13101_v18, %v7376_v12  ;;  %v7314_v0 = vpop.f32.mrb[111].mxu1  ;;  %v7506_v30 = vrot.slane %v7447_v61, 1 }
 0x69f   : > { %v7375_v40 = vadd.f32 %v7314_v0, %v13129_v47  ;;  %v7425_v47 = vld [vmem:[%s11220_s13 + $0x44] sm:$0x1]  ;;  %v7517_v21 = vrot.slane %v7454_v31, 1  ;;  %s13420_s13 = sld [smem:[#allocation43_spill]] }
 0x6a0   : > { %v7544_v43 = vadd.f32 %v7500_v52, %v7399_v35  ;;  %v7449_v49 = vunpack.c.l.bf16 %v7425_v47  ;;  %v7508_v11 = vsel %vm5276_vm5, %v7506_v30, %v7507_v63  ;;  %v7455_v35 = vunpack.c.l.bf16 %v7431_v24 }
 0x6a1   : > { %v7398_v53 = vadd.f32 %v13101_v18, %v7375_v40 }
 0x6a2   : > { %v7560_v38 = vmax.f32 %v7544_v43, 0.0  ;;  %v7509_v28 = vrot.slane %v7449_v49, 1  ;;  %v7453_v43 = vunpack.c.l.bf16 %v7430_v29 }
 0x6a3   : > { %v7543_v54 = vadd.f32 %v7498_v39, %v7398_v53  ;;  %v9771_v7 = vpop.f32.mrb[112].mxu1  ;;  %v7519_v53 = vrot.slane %v7455_v35, 1 }
 0x6a4   : > { %7576 = vst [vmem:[%s11259_s15 + $0x38] sm:$0xff] %v7560_v38  ;;  %v7326_v13 = vpop.f32.mrb[113].mxu1  ;;  %v7510_v55 = vsel %vm5276_vm5, %v7507_v63, %v7509_v28  ;;  %v7516_v30 = vrot.slane %v7453_v43, 1 }
 0x6a5   : > { %v7559_v58 = vmax.f32 %v7543_v54, 0.0  ;;  %v7377_v27 = vadd.f32 %v7326_v13, %v13135_v22  ;;  %v9772_v19 = vpop.f32.mrb[114].mxu1  ;;  %v7505_v22 = vsel %vm5276_vm5, %v7502_v33, %v7504_v44  ;;  %v7520_v63 = vsel %vm5276_vm5, %v7517_v21, %v7519_v53  ;;  %s13421_s3 = smov %s13420_s13  ;;  %s13232_s11 = scalar_lea.hbm %s13420_s13, %s8202_s4 }
 0x6a6   : > { %v7379_v36 = vadd.f32 %v9772_v19, %v13138_v37  ;;  %v7329_v51 = vpop.f32.mrb[115].mxu1 }
 0x6a7   : > { %7575 = vst [vmem:[%s11259_s15 + $0x30] sm:$0xff] %v7559_v58  ;;  %v7400_v6 = vadd.f32 %v13101_v18, %v7377_v27  ;;  %v7378_v10 = vadd.f32 %v7329_v51, %v13141_v16  ;;  %v7514_v16 = vrot.slane %v7452_v34, 1 }
 0x6a8   : > { %v7402_v14 = vadd.f32 %v13101_v18, %v7379_v36 }
 0x6a9   : > { %v7545_v37 = vadd.f32 %v7503_v3, %v7400_v6  ;;  %v7401_v50 = vadd.f32 %v13101_v18, %v7378_v10  ;;  %v7515_v61 = vsel %vm5276_vm5, %v7512_v5, %v7514_v16 }
 0x6aa   : > { %v7547_v1 = vadd.f32 %v7508_v11, %v7402_v14 }
 0x6ab   : > { %v7561_v9 = vmax.f32 %v7545_v37, 0.0  ;;  %v7546_v17 = vadd.f32 %v7505_v22, %v7401_v50  ;;  %v9775_v15 = vpop.f32.mrb[116].mxu1 }
 0x6ac   : > { %v7563_v45 = vmax.f32 %v7547_v1, 0.0  ;;  %v7381_v12 = vadd.f32 %v9775_v15, %v13147_v2  ;;  %v7341_v4 = vpop.f32.mrb[117].mxu1 }
 0x6ad   : > { %7577 = vst [vmem:[%s11259_s15 + $0x40] sm:$0xff] %v7561_v9  ;;  %v7562_v23 = vmax.f32 %v7546_v17, 0.0  ;;  %v7380_v52 = vadd.f32 %v7341_v4, %v13150_v41  ;;  %v9776_v42 = vpop.f32.mrb[118].mxu1 }
 0x6ae   : > { %7579 = vst [vmem:[%s11259_s15 + $0x50] sm:$0xff] %v7563_v45  ;;  %v7404_v0 = vadd.f32 %v13101_v18, %v7381_v12  ;;  %v7382_v32 = vadd.f32 %v9776_v42, %v13153_v26  ;;  %v7344_v2 = vpop.f32.mrb[119].mxu1 }
 0x6af   : > { %7578 = vst [vmem:[%s11259_s15 + $0x48] sm:$0xff] %v7562_v23  ;;  %v7403_v40 = vadd.f32 %v13101_v18, %v7380_v52 }
 0x6b0   : > { %v7549_v41 = vadd.f32 %v7513_v56, %v7404_v0  ;;  %v7405_v46 = vadd.f32 %v13101_v18, %v7382_v32 }
 0x6b1   : > { %v7548_v39 = vadd.f32 %v7510_v55, %v7403_v40 }
 0x6b2   : > { %v7565_v48 = vmax.f32 %v7549_v41, 0.0  ;;  %v7550_v38 = vadd.f32 %v7515_v61, %v7405_v46 }
 0x6b3   : > { %v7564_v26 = vmax.f32 %v7548_v39, 0.0  ;;  %v9779_v57 = vpop.f32.mrb[120].mxu1 }
 0x6b4   : > { %7581 = vst [vmem:[%s11259_s15 + $0x60] sm:$0xff] %v7565_v48  ;;  %v7566_v33 = vmax.f32 %v7550_v38, 0.0  ;;  %v7384_v54 = vadd.f32 %v9779_v57, %v13160_v62  ;;  %v7356_v7 = vpop.f32.mrb[121].mxu1  ;;  %v7518_v62 = vsel %vm5276_vm5, %v7516_v30, %v7517_v21 }
 0x6b5   : > { %7580 = vst [vmem:[%s11259_s15 + $0x58] sm:$0xff] %v7564_v26  ;;  %v9780_v47 = vpop.f32.mrb[122].mxu1 }
 0x6b6   : > { %7582 = vst [vmem:[%s11259_s15 + $0x68] sm:$0xff] %v7566_v33  ;;  %v7407_v13 = vadd.f32 %v13101_v18, %v7384_v54  ;;  %v7358_v44 = vpop.f32.mrb[123].mxu1 }
 0x6b7   : > { %v7383_v59 = vadd.f32 %v7358_v44, %v13164_v20 }
 0x6b8   : > { %v7552_v8 = vadd.f32 %v7520_v63, %v7407_v13 }
 0x6b9   : > { %v7406_v60 = vadd.f32 %v13101_v18, %v7383_v59 }
 0x6ba   : > { %v7568_v58 = vmax.f32 %v7552_v8, 0.0 }
 0x6bb   : > { %v7551_v27 = vadd.f32 %v7518_v62, %v7406_v60 }
 0x6bc   : > { %7584 = vst [vmem:[%s11259_s15 + $0x78] sm:$0xff] %v7568_v58 }
 0x6bd   : > { %v7567_v20 = vmax.f32 %v7551_v27, 0.0 }
 0x6bf   : > { %7583 = vst [vmem:[%s11259_s15 + $0x70] sm:$0xff] %v7567_v20 }
 0x6c0   : > { %10574 = shalt.err (!%p10571_p6)
}
 0x6c1   : > { %s10575_s15 = scalar_lea.hbm %s13232_s11, 2048  ;;  %s10579_s2 = scalar_lea.hbm %s13421_s3, 8192 }
 0x6c2   : > { %p10576_p13 = scmp.ne.s32.totalorder %s13232_s11, %s10575_s15  ;;  %p10580_p10 = scmp.lt.u32.totalorder %s13232_s11, %s13421_s3 }
 0x6c3   : > { %p10581_p2 = scmp.lt.u32.totalorder %s10579_s2, %s10575_s15  ;;  %p10583_p0 = scmp.lt.u32.totalorder %s10575_s15, %s13232_s11 }
 0x6c4   : > { %p10577_p8 = pnand %p10576_p13, %p13422_p1 }
 0x6c5   : > { %p10582_p12 = por %p10581_p2, %p10580_p10 }
 0x6c6   : > { %p10578_p11 = pneg %p10577_p8 }
 0x6c7   : > { %p10584_p7 = por %p10583_p0, %p10582_p12 }
 0x6c9   : > { %p10585_p3 = pnand %p10584_p7, %p10578_p11 }
 0x6cb   : > { %10588 = shalt.err (!%p10585_p3)
}
 0x6cc   : > { %s10741_s5 = smov 128   ;;  %s10742_s10 = smov 8  }
 0x6cd   : > { %9831 = dma.vmem_to_hbm [thread:$0]  (%p13422_p1), %s13234_s21, 2048, %s13232_s11, %s7586_s30, %s10741_s5, %s10741_s5, %s10742_s10  }
 0x6ce PF: > { %s13423_s4 = sld [smem:[#allocation26_spill]]  ;;  %s13424_s29 = sld [smem:[#allocation35_spill]] }
 0x6cf   : > { %p9869_p9 = scmp.ge.s32.totalorder %s10723_s14, 2 }
 0x6d4   : > { %s7617_s25 = sand.u32 1, %s13423_s4   ;;  %p13425_p4 = scmp.ne.s32.totalorder %s13424_s29, 0 }
 0x6d5   : > { %s7618_s13 = scalar_lea.sflag [#allocation6], %s7617_s25 }
 0x6d6   : > { %p9857_p5 = pnand %p9869_p9, %p13425_p4 }
 0x6d8   : > { %10666 = dma.done.wait (!%p9857_p5), %s7618_s13, 2048  }
 0x6d9   : > { %10668 = vsyncadd (!%p9857_p5), %s7618_s13, 4294965248  ;;  %s28_s14 = sadd.s32 1, %s10723_s14   ;;  %s13427_s22 = sld [smem:[#allocation24_spill]] }
 0x6da   : > { %p13266_p6 = scmp.ge.s32.totalorder %s28_s14, 6   ;;  %s13428_s25 = sld [smem:[#allocation25_spill]] }
 0x6db   : > { %s13429_s17 = sld [smem:[#allocation27_spill]]  ;;  %s13430_s29 = sld [smem:[#allocation36_spill]] }
 0x6dc   : > { %s13431_s11 = sld [smem:[#allocation30_spill]]  ;;  %s13432_s21 = sld [smem:[#allocation32_spill]] }
 0x6dd   : > { %s13433_s13 = sld [smem:[#allocation33_spill]]  ;;  %s13436_s27 = smov %s10687_s28 }
 0x6de   : > { %s13438_s30 = smov %s10699_s8  ;;  %s13439_s8 = smov %s10703_s9 }
 0x6df   : > { %s13435_s24 = smov %s13427_s22  ;;  %s13440_s9 = smov %s11091_s1 }
 0x6e0   : > { %s13441_s10 = smov %s10715_s12  ;;  %27 = sbr.rel (!%p13266_p6) target bundleno = 22 (0x16), region = 165 }
 0x6e1   : > { %s13437_s28 = smov %s13429_s17 }
 0x6e2   : > { %s13442_s12 = smov %s13432_s21 }
 0x6e7   :  { %7623 = vsyncpa [#allocation5], 1 }
 0x6e8   :  { %7625 = vsyncpa [#allocation5 + $0x1], 1 }
 0x6e9   :  { %7626 = vsyncpa [#allocation8], 1 }
 0x6ea   :  { %7628 = vsyncpa [#allocation8 + $0x1], 1 }
 0x6eb   :  { %7629 = vsyncpa [#allocation11], 1 }
 0x6ec   :  { %7630 = vsyncpa [#allocation14], 1 }
 0x6ed   :  { %7631 = vsyncpa [#allocation6], 1 }
 0x6ee   :  { %7633 = vsyncpa [#allocation6 + $0x1], 1 }

</bundles_post_ra>
